<compile_context>
chip_gen: v6e
topology: v6e:2x2x1
jax: 0.10.0
libtpu: 0.0.40
codegen_flags: <defaults>
</compile_context>

<pallas_src>
import functools

import jax
import jax.numpy as jnp
from jax import lax
from jax.experimental import pallas as pl
from jax.experimental.pallas import tpu as pltpu


# -----------------------------------------------------------------------------
# In-kernel helpers
# -----------------------------------------------------------------------------
def _fill_padded(xp_ref, xval):
    """Write xval into xp_ref[1:1+h, 1:1+w, :] and zero only the pad border."""
    Hp, Wp, C = xp_ref.shape
    h, w = xval.shape[0], xval.shape[1]
    dt = xp_ref.dtype
    xp_ref[pl.ds(0, 1), :, :] = jnp.zeros((1, Wp, C), dt)
    xp_ref[:, pl.ds(0, 1), :] = jnp.zeros((Hp, 1, C), dt)
    if Hp == h + 2:                      # 3x3 taps also need bottom/right pad rows
        xp_ref[pl.ds(Hp - 1, 1), :, :] = jnp.zeros((1, Wp, C), dt)
        xp_ref[:, pl.ds(Wp - 1, 1), :] = jnp.zeros((Hp, 1, C), dt)
    xp_ref[pl.ds(1, h), pl.ds(1, w), :] = xval


def _conv_matmul(xp_ref, taps, h, w, w_ref):
    """im2col built as a value (no scratch round-trip) + one MXU contraction."""
    c = xp_ref.shape[-1]
    cols = []
    for dy in range(taps):
        for dx in range(taps):
            sl = xp_ref[pl.ds(dy, h), pl.ds(dx, w), :]          # (h, w, c) bf16
            cols.append(sl.reshape(h * w, c))
    lhs = jnp.concatenate(cols, axis=-1)                        # (h*w, taps*taps*c)
    return jnp.dot(lhs, w_ref[...], preferred_element_type=jnp.float32)


# -----------------------------------------------------------------------------
# Fused ResidualBlock kernel (one sample per grid step, everything in VMEM)
# -----------------------------------------------------------------------------
def _residual_block_kernel(x_ref, w1_ref, s1_ref, b1_ref, w2_ref, s2_ref, b2_ref,
                           o_ref, xp1_ref, xp2_ref,
                           *, taps1, H1, W1, Cout, has_proj):
    # conv1 (+ fused 1x1 projection shortcut as extra output columns)
    _fill_padded(xp1_ref, x_ref[...])
    y = _conv_matmul(xp1_ref, taps1, H1, W1, w1_ref)            # (H1*W1, C1) f32
    y = y * s1_ref[...] + b1_ref[...]                           # BN1 (+ shortcut BN)

    # ReLU on the conv1 branch only, then conv2 -> BN2
    y1 = jnp.maximum(y[:, :Cout], 0.0)
    _fill_padded(xp2_ref, y1.reshape(H1, W1, Cout).astype(xp2_ref.dtype))
    left = _conv_matmul(xp2_ref, 3, H1, W1, w2_ref)             # (H1*W1, Cout) f32
    left = left * s2_ref[...] + b2_ref[...]

    # shortcut: fused projection columns, or identity
    if has_proj:
        sc = y[:, Cout:2 * Cout]
    else:
        sc = x_ref[...].reshape(H1 * W1, Cout).astype(jnp.float32)

    res = jnp.maximum(left + sc, 0.0)                           # (H1*W1, Cout)
    o_ref[...] = res.T.astype(o_ref.dtype)                      # lane-dense (Cout, H1*W1)


# -----------------------------------------------------------------------------
# Host-side weight packing (conv1 RHS, with shortcut fused as extra columns)
# -----------------------------------------------------------------------------
def _pack_conv1_rhs(p):
    cin, cout, stride = int(p["cin"]), int(p["cout"]), int(p["stride"])
    has_proj = bool(p["has_proj"])
    c1 = 2 * cout if has_proj else cout
    w1 = p["w1"]                                   # (3, 3, cin, cout) HWIO
    if stride == 1:
        rhs = jnp.zeros((3, 3, cin, c1), jnp.float32)
        rhs = rhs.at[:, :, :, :cout].set(w1)
        if has_proj:
            rhs = rhs.at[1, 1, :, cout:].set(p["ws"])       # 1x1 shortcut = center tap
        rhs = rhs.reshape(9 * cin, c1)
    else:  # stride == 2: space-to-depth -> 2x2 taps, (sy, sx, cin) sub-channels
        rhs = jnp.zeros((2, 2, 2, 2, cin, c1), jnp.float32)  # (dy', dx', sy, sx, cin, out)
        for dy in range(3):
            dyp, sy = ((0, 1) if dy == 0 else (1, dy - 1))
            for dx in range(3):
                dxp, sx = ((0, 1) if dx == 0 else (1, dx - 1))
                rhs = rhs.at[dyp, dxp, sy, sx, :, :cout].set(w1[dy, dx])
        if has_proj:
            rhs = rhs.at[1, 1, 0, 0, :, cout:].set(p["ws"])  # shortcut reads pixel (2i, 2j)
        rhs = rhs.reshape(16 * cin, c1)
    return rhs.astype(jnp.bfloat16)


# -----------------------------------------------------------------------------
# Wrapper: NCHW in/out (PyTorch semantics), one fused pallas_call
# -----------------------------------------------------------------------------
def residual_block(x_nchw, p):
    N, Cin, H, W = x_nchw.shape
    Cout, stride = int(p["cout"]), int(p["stride"])
    has_proj = bool(p["has_proj"])
    assert stride in (1, 2)
    if stride == 2:
        assert H % 2 == 0 and W % 2 == 0
    H1 = (H - 1) // stride + 1
    W1 = (W - 1) // stride + 1
    c1 = 2 * Cout if has_proj else Cout

    x = jnp.transpose(x_nchw.astype(jnp.float32), (0, 2, 3, 1))          # NHWC
    if stride == 1:
        taps1, ceff = 3, Cin
    else:
        taps1, ceff = 2, 4 * Cin
        x = (x.reshape(N, H1, 2, W1, 2, Cin)                             # space-to-depth
               .transpose(0, 1, 3, 2, 4, 5)
               .reshape(N, H1, W1, ceff))
    x = x.astype(jnp.bfloat16)

    w1p = _pack_conv1_rhs(p)
    w2p = p["w2"].reshape(9 * Cout, Cout).astype(jnp.bfloat16)
    if has_proj:
        s1p = jnp.concatenate([p["s1"], p["ss"]], axis=-1)
        b1p = jnp.concatenate([p["b1"], p["bs"]], axis=-1)
    else:
        s1p, b1p = p["s1"], p["b1"]

    kernel = functools.partial(
        _residual_block_kernel,
        taps1=taps1, H1=H1, W1=W1, Cout=Cout, has_proj=has_proj)

    out = pl.pallas_call(
        kernel,
        out_shape=jax.ShapeDtypeStruct((N, Cout, H1 * W1), jnp.float32),
        grid=(N,),
        in_specs=[
            pl.BlockSpec((None, H1, W1, ceff), lambda n: (n, 0, 0, 0)),
            pl.BlockSpec((taps1 * taps1 * ceff, c1), lambda n: (0, 0)),
            pl.BlockSpec((1, c1), lambda n: (0, 0)),
            pl.BlockSpec((1, c1), lambda n: (0, 0)),
            pl.BlockSpec((9 * Cout, Cout), lambda n: (0, 0)),
            pl.BlockSpec((1, Cout), lambda n: (0, 0)),
            pl.BlockSpec((1, Cout), lambda n: (0, 0)),
        ],
        out_specs=pl.BlockSpec((None, Cout, H1 * W1), lambda n: (n, 0, 0)),
        scratch_shapes=[
            pltpu.VMEM((H1 + taps1 - 1, W1 + taps1 - 1, ceff), jnp.bfloat16),  # padded conv1 in
            pltpu.VMEM((H1 + 2, W1 + 2, Cout), jnp.bfloat16),                  # padded conv2 in
        ],
        compiler_params=pltpu.CompilerParams(
            dimension_semantics=("parallel",)),     # 2 samples -> 2 TCs on v7x
    )(x, w1p, s1p, b1p, w2p, p["s2"], p["b2"])

    return out.reshape(N, Cout, H1, W1)             # free reshape, no transpose


# -----------------------------------------------------------------------------
# Deterministic parameter construction (inference-mode BN folded to affine)
# -----------------------------------------------------------------------------
def init_residual_block(key, cin, cout, stride, bn_eps=1e-5):
    ks = iter(jax.random.split(key, 16))

    def bn(c):
        gamma = 1.0 + 0.1 * jax.random.normal(next(ks), (c,), jnp.float32)
        beta = 0.1 * jax.random.normal(next(ks), (c,), jnp.float32)
        rmean = 0.05 * jax.random.normal(next(ks), (c,), jnp.float32)
        rvar = 0.9 + 0.2 * jax.random.uniform(next(ks), (c,), jnp.float32)
        scale = gamma / jnp.sqrt(rvar + bn_eps)
        shift = beta - scale * rmean
        return scale.reshape(1, c), shift.reshape(1, c)

    w1 = jax.random.normal(next(ks), (3, 3, cin, cout), jnp.float32) / jnp.sqrt(9.0 * cin)
    s1, b1 = bn(cout)
    w2 = jax.random.normal(next(ks), (3, 3, cout, cout), jnp.float32) / jnp.sqrt(9.0 * cout)
    s2, b2 = bn(cout)

    p = {"cin": cin, "cout": cout, "stride": stride,
         "has_proj": (stride != 1 or cin != cout),
         "w1": w1, "w2": w2, "s1": s1, "b1": b1, "s2": s2, "b2": b2}
    if p["has_proj"]:
        p["ws"] = jax.random.normal(next(ks), (cin, cout), jnp.float32) / jnp.sqrt(float(cin))
        p["ss"], p["bs"] = bn(cout)
    return p


# -----------------------------------------------------------------------------
# Pure-JAX reference (inference-mode BN, f32 HIGHEST precision)
# -----------------------------------------------------------------------------
def residual_block_ref(x_nchw, p):
    x = jnp.transpose(x_nchw.astype(jnp.float32), (0, 2, 3, 1))
    s = int(p["stride"])

    def conv(xin, w, stride, pad):
        return lax.conv_general_dilated(
            xin, w, (stride, stride), [(pad, pad), (pad, pad)],
            dimension_numbers=("NHWC", "HWIO", "NHWC"),
            precision=lax.Precision.HIGHEST)

    def affine(y, scale, shift):
        return y * scale.reshape(1, 1, 1, -1) + shift.reshape(1, 1, 1, -1)

    y = jnp.maximum(affine(conv(x, p["w1"], s, 1), p["s1"], p["b1"]), 0.0)
    y = affine(conv(y, p["w2"], 1, 1), p["s2"], p["b2"])
    if p["has_proj"]:
        cin, cout = p["w1"].shape[2], p["w1"].shape[3]
        sc = affine(conv(x, p["ws"].reshape(1, 1, cin, cout), s, 0), p["ss"], p["bs"])
    else:
        sc = x
    out = jnp.maximum(y + sc, 0.0)
    return jnp.transpose(out, (0, 3, 1, 2))


if __name__ == "__main__":
    N, Cin, H = 2, 8, 16
    root = jax.random.PRNGKey(0)
    kx, ka, kb = jax.random.split(root, 3)
    x = jax.random.normal(kx, (N, Cin, H, H), jnp.float32)

    # identity-shortcut block (stride=1, inchannel == outchannel)
    pa = init_residual_block(ka, Cin, Cin, stride=1)
    out_a = residual_block(x, pa)

    # projection-shortcut block (stride=2, channel expansion)
    pb = init_residual_block(kb, Cin, 2 * Cin, stride=2)
    out_b = residual_block(x, pb)

    jax.block_until_ready((out_a, out_b))

    assert out_a.shape == (N, Cin, H, H)
    assert out_b.shape == (N, 2 * Cin, H // 2, H // 2)

    # bf16 operands -> compare against f32 HIGHEST reference at bf16-level tolerance
    ref_a = residual_block_ref(x, pa)
    ref_b = residual_block_ref(x, pb)
    assert jnp.allclose(out_a, ref_a, atol=5e-2, rtol=5e-2), \
        float(jnp.max(jnp.abs(out_a - ref_a)))
    assert jnp.allclose(out_b, ref_b, atol=5e-2, rtol=5e-2), \
        float(jnp.max(jnp.abs(out_b - ref_b)))

    print("KERNEL_OK")
</pallas_src>

<mosaic_0001>
module attributes {stable_mosaic.version = 11 : i64} {
  func.func @_residual_block_kernel(%arg0: i32, %arg1: memref<1x16x16x8xbf16, #tpu.memory_space<vmem>>, %arg2: memref<72x8xbf16, #tpu.memory_space<vmem>>, %arg3: memref<1x8xf32, #tpu.memory_space<vmem>>, %arg4: memref<1x8xf32, #tpu.memory_space<vmem>>, %arg5: memref<72x8xbf16, #tpu.memory_space<vmem>>, %arg6: memref<1x8xf32, #tpu.memory_space<vmem>>, %arg7: memref<1x8xf32, #tpu.memory_space<vmem>>, %arg8: memref<1x8x256xf32, #tpu.memory_space<vmem>>, %arg9: memref<18x18x8xbf16, #tpu.memory_space<vmem>>, %arg10: memref<18x18x8xbf16, #tpu.memory_space<vmem>>) attributes {dimension_semantics = [#tpu.dimension_semantics<parallel>], iteration_bounds = array<i64: 2>, scalar_prefetch = 0 : i64, scratch_operands = 2 : i64, tpu.core_type = #tpu.core_type<tc>, window_params = [{transform_indices = @transform_0, window_bounds = array<i64: 1, 16, 16, 8>}, {pipeline_mode = #tpu.pipeline_mode<synchronous>, transform_indices = @transform_1, window_bounds = array<i64: 72, 8>}, {pipeline_mode = #tpu.pipeline_mode<synchronous>, transform_indices = @transform_2, window_bounds = array<i64: 1, 8>}, {pipeline_mode = #tpu.pipeline_mode<synchronous>, transform_indices = @transform_3, window_bounds = array<i64: 1, 8>}, {pipeline_mode = #tpu.pipeline_mode<synchronous>, transform_indices = @transform_4, window_bounds = array<i64: 72, 8>}, {pipeline_mode = #tpu.pipeline_mode<synchronous>, transform_indices = @transform_5, window_bounds = array<i64: 1, 8>}, {pipeline_mode = #tpu.pipeline_mode<synchronous>, transform_indices = @transform_6, window_bounds = array<i64: 1, 8>}, {transform_indices = @transform_7, window_bounds = array<i64: 1, 8, 256>}]} {
    %c0 = arith.constant 0 : index
    %c0_0 = arith.constant 0 : index
    %c0_1 = arith.constant 0 : index
    %c0_2 = arith.constant 0 : index
    %0 = vector.load %arg1[%c0, %c0_0, %c0_1, %c0_2] : memref<1x16x16x8xbf16, #tpu.memory_space<vmem>>, vector<1x16x16x8xbf16>
    %1 = vector.shape_cast %0 : vector<1x16x16x8xbf16> to vector<16x16x8xbf16>
    %cst = arith.constant 0.000000e+00 : bf16
    %2 = vector.broadcast %cst : bf16 to vector<1x18x8xbf16>
    %c0_3 = arith.constant 0 : index
    %c0_4 = arith.constant 0 : index
    %c0_5 = arith.constant 0 : index
    %3 = vector.load %arg9[%c0_3, %c0_4, %c0_5] : memref<18x18x8xbf16, #tpu.memory_space<vmem>>, vector<1x18x8xbf16>
    tpu.vector_store %arg9[%c0_3, %c0_4, %c0_5], %2 {strides = array<i32>} : memref<18x18x8xbf16, #tpu.memory_space<vmem>>, vector<1x18x8xbf16>,
    %cst_6 = arith.constant 0.000000e+00 : bf16
    %4 = vector.broadcast %cst_6 : bf16 to vector<18x1x8xbf16>
    %c0_7 = arith.constant 0 : index
    %c0_8 = arith.constant 0 : index
    %c0_9 = arith.constant 0 : index
    %5 = vector.load %arg9[%c0_7, %c0_8, %c0_9] : memref<18x18x8xbf16, #tpu.memory_space<vmem>>, vector<18x1x8xbf16>
    tpu.vector_store %arg9[%c0_7, %c0_8, %c0_9], %4 {strides = array<i32>} : memref<18x18x8xbf16, #tpu.memory_space<vmem>>, vector<18x1x8xbf16>,
    %cst_10 = arith.constant 0.000000e+00 : bf16
    %6 = vector.broadcast %cst_10 : bf16 to vector<1x18x8xbf16>
    %c17 = arith.constant 17 : index
    %c0_11 = arith.constant 0 : index
    %c0_12 = arith.constant 0 : index
    %7 = vector.load %arg9[%c17, %c0_11, %c0_12] : memref<18x18x8xbf16, #tpu.memory_space<vmem>>, vector<1x18x8xbf16>
    tpu.vector_store %arg9[%c17, %c0_11, %c0_12], %6 {strides = array<i32>} : memref<18x18x8xbf16, #tpu.memory_space<vmem>>, vector<1x18x8xbf16>,
    %cst_13 = arith.constant 0.000000e+00 : bf16
    %8 = vector.broadcast %cst_13 : bf16 to vector<18x1x8xbf16>
    %c0_14 = arith.constant 0 : index
    %c17_15 = arith.constant 17 : index
    %c0_16 = arith.constant 0 : index
    %9 = vector.load %arg9[%c0_14, %c17_15, %c0_16] : memref<18x18x8xbf16, #tpu.memory_space<vmem>>, vector<18x1x8xbf16>
    tpu.vector_store %arg9[%c0_14, %c17_15, %c0_16], %8 {strides = array<i32>} : memref<18x18x8xbf16, #tpu.memory_space<vmem>>, vector<18x1x8xbf16>,
    %c1 = arith.constant 1 : index
    %c1_17 = arith.constant 1 : index
    %c0_18 = arith.constant 0 : index
    %10 = vector.load %arg9[%c1, %c1_17, %c0_18] : memref<18x18x8xbf16, #tpu.memory_space<vmem>>, vector<16x16x8xbf16>
    tpu.vector_store %arg9[%c1, %c1_17, %c0_18], %1 {strides = array<i32>} : memref<18x18x8xbf16, #tpu.memory_space<vmem>>, vector<16x16x8xbf16>,
    %c0_19 = arith.constant 0 : index
    %c0_20 = arith.constant 0 : index
    %c0_21 = arith.constant 0 : index
    %11 = vector.load %arg9[%c0_19, %c0_20, %c0_21] : memref<18x18x8xbf16, #tpu.memory_space<vmem>>, vector<16x16x8xbf16>
    %12 = vector.shape_cast %11 : vector<16x16x8xbf16> to vector<256x8xbf16>
    %c0_22 = arith.constant 0 : index
    %c1_23 = arith.constant 1 : index
    %c0_24 = arith.constant 0 : index
    %13 = vector.load %arg9[%c0_22, %c1_23, %c0_24] : memref<18x18x8xbf16, #tpu.memory_space<vmem>>, vector<16x16x8xbf16>
    %14 = vector.shape_cast %13 : vector<16x16x8xbf16> to vector<256x8xbf16>
    %c0_25 = arith.constant 0 : index
    %c2 = arith.constant 2 : index
    %c0_26 = arith.constant 0 : index
    %15 = vector.load %arg9[%c0_25, %c2, %c0_26] : memref<18x18x8xbf16, #tpu.memory_space<vmem>>, vector<16x16x8xbf16>
    %16 = vector.shape_cast %15 : vector<16x16x8xbf16> to vector<256x8xbf16>
    %c1_27 = arith.constant 1 : index
    %c0_28 = arith.constant 0 : index
    %c0_29 = arith.constant 0 : index
    %17 = vector.load %arg9[%c1_27, %c0_28, %c0_29] : memref<18x18x8xbf16, #tpu.memory_space<vmem>>, vector<16x16x8xbf16>
    %18 = vector.shape_cast %17 : vector<16x16x8xbf16> to vector<256x8xbf16>
    %c1_30 = arith.constant 1 : index
    %c1_31 = arith.constant 1 : index
    %c0_32 = arith.constant 0 : index
    %19 = vector.load %arg9[%c1_30, %c1_31, %c0_32] : memref<18x18x8xbf16, #tpu.memory_space<vmem>>, vector<16x16x8xbf16>
    %20 = vector.shape_cast %19 : vector<16x16x8xbf16> to vector<256x8xbf16>
    %c1_33 = arith.constant 1 : index
    %c2_34 = arith.constant 2 : index
    %c0_35 = arith.constant 0 : index
    %21 = vector.load %arg9[%c1_33, %c2_34, %c0_35] : memref<18x18x8xbf16, #tpu.memory_space<vmem>>, vector<16x16x8xbf16>
    %22 = vector.shape_cast %21 : vector<16x16x8xbf16> to vector<256x8xbf16>
    %c2_36 = arith.constant 2 : index
    %c0_37 = arith.constant 0 : index
    %c0_38 = arith.constant 0 : index
    %23 = vector.load %arg9[%c2_36, %c0_37, %c0_38] : memref<18x18x8xbf16, #tpu.memory_space<vmem>>, vector<16x16x8xbf16>
    %24 = vector.shape_cast %23 : vector<16x16x8xbf16> to vector<256x8xbf16>
    %c2_39 = arith.constant 2 : index
    %c1_40 = arith.constant 1 : index
    %c0_41 = arith.constant 0 : index
    %25 = vector.load %arg9[%c2_39, %c1_40, %c0_41] : memref<18x18x8xbf16, #tpu.memory_space<vmem>>, vector<16x16x8xbf16>
    %26 = vector.shape_cast %25 : vector<16x16x8xbf16> to vector<256x8xbf16>
    %c2_42 = arith.constant 2 : index
    %c2_43 = arith.constant 2 : index
    %c0_44 = arith.constant 0 : index
    %27 = vector.load %arg9[%c2_42, %c2_43, %c0_44] : memref<18x18x8xbf16, #tpu.memory_space<vmem>>, vector<16x16x8xbf16>
    %28 = vector.shape_cast %27 : vector<16x16x8xbf16> to vector<256x8xbf16>
    %29 = tpu.concatenate %12, %14, %16, %18, %20, %22, %24, %26, %28 in 1 : vector<256x8xbf16>, vector<256x8xbf16>, vector<256x8xbf16>, vector<256x8xbf16>, vector<256x8xbf16>, vector<256x8xbf16>, vector<256x8xbf16>, vector<256x8xbf16>, vector<256x8xbf16> -> vector<256x72xbf16>
    %c0_45 = arith.constant 0 : index
    %c0_46 = arith.constant 0 : index
    %30 = vector.load %arg2[%c0_45, %c0_46] : memref<72x8xbf16, #tpu.memory_space<vmem>>, vector<72x8xbf16>
    %cst_47 = arith.constant dense<0.000000e+00> : vector<256x8xf32>
    %31 = tpu.matmul %29, %30, %cst_47 {dimension_numbers = #tpu.dot_dimension_numbers<[1], [0], [0], [1], [0, 0, 1, 1], [], []>} : vector<256x72xbf16>, vector<72x8xbf16>, vector<256x8xf32> -> vector<256x8xf32>
    %c0_48 = arith.constant 0 : index
    %c0_49 = arith.constant 0 : index
    %32 = vector.load %arg3[%c0_48, %c0_49] : memref<1x8xf32, #tpu.memory_space<vmem>>, vector<1x8xf32>
    %33 = vector.broadcast %32 : vector<1x8xf32> to vector<256x8xf32>
    %34 = arith.mulf %31, %33 : vector<256x8xf32>
    %c0_50 = arith.constant 0 : index
    %c0_51 = arith.constant 0 : index
    %35 = vector.load %arg4[%c0_50, %c0_51] : memref<1x8xf32, #tpu.memory_space<vmem>>, vector<1x8xf32>
    %36 = vector.broadcast %35 : vector<1x8xf32> to vector<256x8xf32>
    %37 = arith.addf %34, %36 : vector<256x8xf32>
    %cst_52 = arith.constant 0.000000e+00 : f32
    %38 = vector.broadcast %cst_52 : f32 to vector<256x8xf32>
    %39 = arith.maximumf %37, %38 : vector<256x8xf32>
    %40 = vector.shape_cast %39 : vector<256x8xf32> to vector<16x16x8xf32>
    %41 = arith.truncf %40 : vector<16x16x8xf32> to vector<16x16x8xbf16>
    %cst_53 = arith.constant 0.000000e+00 : bf16
    %42 = vector.broadcast %cst_53 : bf16 to vector<1x18x8xbf16>
    %c0_54 = arith.constant 0 : index
    %c0_55 = arith.constant 0 : index
    %c0_56 = arith.constant 0 : index
    %43 = vector.load %arg10[%c0_54, %c0_55, %c0_56] : memref<18x18x8xbf16, #tpu.memory_space<vmem>>, vector<1x18x8xbf16>
    tpu.vector_store %arg10[%c0_54, %c0_55, %c0_56], %42 {strides = array<i32>} : memref<18x18x8xbf16, #tpu.memory_space<vmem>>, vector<1x18x8xbf16>,
    %cst_57 = arith.constant 0.000000e+00 : bf16
    %44 = vector.broadcast %cst_57 : bf16 to vector<18x1x8xbf16>
    %c0_58 = arith.constant 0 : index
    %c0_59 = arith.constant 0 : index
    %c0_60 = arith.constant 0 : index
    %45 = vector.load %arg10[%c0_58, %c0_59, %c0_60] : memref<18x18x8xbf16, #tpu.memory_space<vmem>>, vector<18x1x8xbf16>
    tpu.vector_store %arg10[%c0_58, %c0_59, %c0_60], %44 {strides = array<i32>} : memref<18x18x8xbf16, #tpu.memory_space<vmem>>, vector<18x1x8xbf16>,
    %cst_61 = arith.constant 0.000000e+00 : bf16
    %46 = vector.broadcast %cst_61 : bf16 to vector<1x18x8xbf16>
    %c17_62 = arith.constant 17 : index
    %c0_63 = arith.constant 0 : index
    %c0_64 = arith.constant 0 : index
    %47 = vector.load %arg10[%c17_62, %c0_63, %c0_64] : memref<18x18x8xbf16, #tpu.memory_space<vmem>>, vector<1x18x8xbf16>
    tpu.vector_store %arg10[%c17_62, %c0_63, %c0_64], %46 {strides = array<i32>} : memref<18x18x8xbf16, #tpu.memory_space<vmem>>, vector<1x18x8xbf16>,
    %cst_65 = arith.constant 0.000000e+00 : bf16
    %48 = vector.broadcast %cst_65 : bf16 to vector<18x1x8xbf16>
    %c0_66 = arith.constant 0 : index
    %c17_67 = arith.constant 17 : index
    %c0_68 = arith.constant 0 : index
    %49 = vector.load %arg10[%c0_66, %c17_67, %c0_68] : memref<18x18x8xbf16, #tpu.memory_space<vmem>>, vector<18x1x8xbf16>
    tpu.vector_store %arg10[%c0_66, %c17_67, %c0_68], %48 {strides = array<i32>} : memref<18x18x8xbf16, #tpu.memory_space<vmem>>, vector<18x1x8xbf16>,
    %c1_69 = arith.constant 1 : index
    %c1_70 = arith.constant 1 : index
    %c0_71 = arith.constant 0 : index
    %50 = vector.load %arg10[%c1_69, %c1_70, %c0_71] : memref<18x18x8xbf16, #tpu.memory_space<vmem>>, vector<16x16x8xbf16>
    tpu.vector_store %arg10[%c1_69, %c1_70, %c0_71], %41 {strides = array<i32>} : memref<18x18x8xbf16, #tpu.memory_space<vmem>>, vector<16x16x8xbf16>,
    %c0_72 = arith.constant 0 : index
    %c0_73 = arith.constant 0 : index
    %c0_74 = arith.constant 0 : index
    %51 = vector.load %arg10[%c0_72, %c0_73, %c0_74] : memref<18x18x8xbf16, #tpu.memory_space<vmem>>, vector<16x16x8xbf16>
    %52 = vector.shape_cast %51 : vector<16x16x8xbf16> to vector<256x8xbf16>
    %c0_75 = arith.constant 0 : index
    %c1_76 = arith.constant 1 : index
    %c0_77 = arith.constant 0 : index
    %53 = vector.load %arg10[%c0_75, %c1_76, %c0_77] : memref<18x18x8xbf16, #tpu.memory_space<vmem>>, vector<16x16x8xbf16>
    %54 = vector.shape_cast %53 : vector<16x16x8xbf16> to vector<256x8xbf16>
    %c0_78 = arith.constant 0 : index
    %c2_79 = arith.constant 2 : index
    %c0_80 = arith.constant 0 : index
    %55 = vector.load %arg10[%c0_78, %c2_79, %c0_80] : memref<18x18x8xbf16, #tpu.memory_space<vmem>>, vector<16x16x8xbf16>
    %56 = vector.shape_cast %55 : vector<16x16x8xbf16> to vector<256x8xbf16>
    %c1_81 = arith.constant 1 : index
    %c0_82 = arith.constant 0 : index
    %c0_83 = arith.constant 0 : index
    %57 = vector.load %arg10[%c1_81, %c0_82, %c0_83] : memref<18x18x8xbf16, #tpu.memory_space<vmem>>, vector<16x16x8xbf16>
    %58 = vector.shape_cast %57 : vector<16x16x8xbf16> to vector<256x8xbf16>
    %c1_84 = arith.constant 1 : index
    %c1_85 = arith.constant 1 : index
    %c0_86 = arith.constant 0 : index
    %59 = vector.load %arg10[%c1_84, %c1_85, %c0_86] : memref<18x18x8xbf16, #tpu.memory_space<vmem>>, vector<16x16x8xbf16>
    %60 = vector.shape_cast %59 : vector<16x16x8xbf16> to vector<256x8xbf16>
    %c1_87 = arith.constant 1 : index
    %c2_88 = arith.constant 2 : index
    %c0_89 = arith.constant 0 : index
    %61 = vector.load %arg10[%c1_87, %c2_88, %c0_89] : memref<18x18x8xbf16, #tpu.memory_space<vmem>>, vector<16x16x8xbf16>
    %62 = vector.shape_cast %61 : vector<16x16x8xbf16> to vector<256x8xbf16>
    %c2_90 = arith.constant 2 : index
    %c0_91 = arith.constant 0 : index
    %c0_92 = arith.constant 0 : index
    %63 = vector.load %arg10[%c2_90, %c0_91, %c0_92] : memref<18x18x8xbf16, #tpu.memory_space<vmem>>, vector<16x16x8xbf16>
    %64 = vector.shape_cast %63 : vector<16x16x8xbf16> to vector<256x8xbf16>
    %c2_93 = arith.constant 2 : index
    %c1_94 = arith.constant 1 : index
    %c0_95 = arith.constant 0 : index
    %65 = vector.load %arg10[%c2_93, %c1_94, %c0_95] : memref<18x18x8xbf16, #tpu.memory_space<vmem>>, vector<16x16x8xbf16>
    %66 = vector.shape_cast %65 : vector<16x16x8xbf16> to vector<256x8xbf16>
    %c2_96 = arith.constant 2 : index
    %c2_97 = arith.constant 2 : index
    %c0_98 = arith.constant 0 : index
    %67 = vector.load %arg10[%c2_96, %c2_97, %c0_98] : memref<18x18x8xbf16, #tpu.memory_space<vmem>>, vector<16x16x8xbf16>
    %68 = vector.shape_cast %67 : vector<16x16x8xbf16> to vector<256x8xbf16>
    %69 = tpu.concatenate %52, %54, %56, %58, %60, %62, %64, %66, %68 in 1 : vector<256x8xbf16>, vector<256x8xbf16>, vector<256x8xbf16>, vector<256x8xbf16>, vector<256x8xbf16>, vector<256x8xbf16>, vector<256x8xbf16>, vector<256x8xbf16>, vector<256x8xbf16> -> vector<256x72xbf16>
    %c0_99 = arith.constant 0 : index
    %c0_100 = arith.constant 0 : index
    %70 = vector.load %arg5[%c0_99, %c0_100] : memref<72x8xbf16, #tpu.memory_space<vmem>>, vector<72x8xbf16>
    %cst_101 = arith.constant dense<0.000000e+00> : vector<256x8xf32>
    %71 = tpu.matmul %69, %70, %cst_101 {dimension_numbers = #tpu.dot_dimension_numbers<[1], [0], [0], [1], [0, 0, 1, 1], [], []>} : vector<256x72xbf16>, vector<72x8xbf16>, vector<256x8xf32> -> vector<256x8xf32>
    %c0_102 = arith.constant 0 : index
    %c0_103 = arith.constant 0 : index
    %72 = vector.load %arg6[%c0_102, %c0_103] : memref<1x8xf32, #tpu.memory_space<vmem>>, vector<1x8xf32>
    %73 = vector.broadcast %72 : vector<1x8xf32> to vector<256x8xf32>
    %74 = arith.mulf %71, %73 : vector<256x8xf32>
    %c0_104 = arith.constant 0 : index
    %c0_105 = arith.constant 0 : index
    %75 = vector.load %arg7[%c0_104, %c0_105] : memref<1x8xf32, #tpu.memory_space<vmem>>, vector<1x8xf32>
    %76 = vector.broadcast %75 : vector<1x8xf32> to vector<256x8xf32>
    %77 = arith.addf %74, %76 : vector<256x8xf32>
    %c0_106 = arith.constant 0 : index
    %c0_107 = arith.constant 0 : index
    %c0_108 = arith.constant 0 : index
    %c0_109 = arith.constant 0 : index
    %78 = vector.load %arg1[%c0_106, %c0_107, %c0_108, %c0_109] : memref<1x16x16x8xbf16, #tpu.memory_space<vmem>>, vector<1x16x16x8xbf16>
    %79 = vector.shape_cast %78 : vector<1x16x16x8xbf16> to vector<16x16x8xbf16>
    %80 = vector.shape_cast %79 : vector<16x16x8xbf16> to vector<256x8xbf16>
    %81 = arith.extf %80 : vector<256x8xbf16> to vector<256x8xf32>
    %82 = arith.addf %77, %81 : vector<256x8xf32>
    %cst_110 = arith.constant 0.000000e+00 : f32
    %83 = vector.broadcast %cst_110 : f32 to vector<256x8xf32>
    %84 = arith.maximumf %82, %83 : vector<256x8xf32>
    %85 = tpu.transpose %84, [1, 0] : vector<256x8xf32> -> vector<8x256xf32>
    %c0_111 = arith.constant 0 : index
    %c0_112 = arith.constant 0 : index
    %c0_113 = arith.constant 0 : index
    %86 = vector.load %arg8[%c0_111, %c0_112, %c0_113] : memref<1x8x256xf32, #tpu.memory_space<vmem>>, vector<1x8x256xf32>
    %87 = vector.shape_cast %86 : vector<1x8x256xf32> to vector<8x256xf32>
    %88 = vector.shape_cast %85 : vector<8x256xf32> to vector<1x8x256xf32>
    tpu.vector_store %arg8[%c0_111, %c0_112, %c0_113], %88 {strides = array<i32>} : memref<1x8x256xf32, #tpu.memory_space<vmem>>, vector<1x8x256xf32>,
    return
  }
  func.func @transform_0(%arg0: i32) -> (i32, i32, i32, i32) {
    %c0_i32 = arith.constant 0 : i32
    %c0_i32_0 = arith.constant 0 : i32
    %c0_i32_1 = arith.constant 0 : i32
    %c0_i32_2 = arith.constant 0 : i32
    return %arg0, %c0_i32, %c0_i32_0, %c0_i32_1 : i32, i32, i32, i32
  }
  func.func @transform_1(%arg0: i32) -> (i32, i32) {
    %c0_i32 = arith.constant 0 : i32
    %c0_i32_0 = arith.constant 0 : i32
    %c0_i32_1 = arith.constant 0 : i32
    return %c0_i32, %c0_i32_0 : i32, i32
  }
  func.func @transform_2(%arg0: i32) -> (i32, i32) {
    %c0_i32 = arith.constant 0 : i32
    %c0_i32_0 = arith.constant 0 : i32
    %c0_i32_1 = arith.constant 0 : i32
    return %c0_i32, %c0_i32_0 : i32, i32
  }
  func.func @transform_3(%arg0: i32) -> (i32, i32) {
    %c0_i32 = arith.constant 0 : i32
    %c0_i32_0 = arith.constant 0 : i32
    %c0_i32_1 = arith.constant 0 : i32
    return %c0_i32, %c0_i32_0 : i32, i32
  }
  func.func @transform_4(%arg0: i32) -> (i32, i32) {
    %c0_i32 = arith.constant 0 : i32
    %c0_i32_0 = arith.constant 0 : i32
    %c0_i32_1 = arith.constant 0 : i32
    return %c0_i32, %c0_i32_0 : i32, i32
  }
  func.func @transform_5(%arg0: i32) -> (i32, i32) {
    %c0_i32 = arith.constant 0 : i32
    %c0_i32_0 = arith.constant 0 : i32
    %c0_i32_1 = arith.constant 0 : i32
    return %c0_i32, %c0_i32_0 : i32, i32
  }
  func.func @transform_6(%arg0: i32) -> (i32, i32) {
    %c0_i32 = arith.constant 0 : i32
    %c0_i32_0 = arith.constant 0 : i32
    %c0_i32_1 = arith.constant 0 : i32
    return %c0_i32, %c0_i32_0 : i32, i32
  }
  func.func @transform_7(%arg0: i32) -> (i32, i32, i32) {
    %c0_i32 = arith.constant 0 : i32
    %c0_i32_0 = arith.constant 0 : i32
    %c0_i32_1 = arith.constant 0 : i32
    return %arg0, %c0_i32, %c0_i32_0 : i32, i32, i32
  }
}

</mosaic_0001>

<bundles_post_ra>
// kernel: tpu_custom_call.1
= control target key start
LH: loop header
LB: loop body
LE: loop exit
PB: predicated region body
PF: predicated region fallthrough
CT: control target
= control target key end

     0   :  { %12 = vsyncpa [#allocation5], 0  ;;  %s13195_s0 = inlined_call_operand.vmem [shape: bf16[2,16,16,8], index: 0, kind: input, shape index: {}]   ;;  %s13196_s1 = inlined_call_operand.vmem [shape: bf16[72,8], index: 1, kind: input, shape index: {}]   ;;  %s13197_s2 = inlined_call_operand.vmem [shape: f32[1,8], index: 2, kind: input, shape index: {}]   ;;  %s13198_s3 = inlined_call_operand.vmem [shape: f32[1,8], index: 3, kind: input, shape index: {}]   ;;  %s13199_s4 = inlined_call_operand.vmem [shape: bf16[72,8], index: 4, kind: input, shape index: {}]   ;;  %s13200_s5 = inlined_call_operand.vmem [shape: f32[1,8], index: 5, kind: input, shape index: {}]   ;;  %s13201_s6 = inlined_call_operand.vmem [shape: f32[1,8], index: 6, kind: input, shape index: {}]   ;;  %s13202_s7 = inlined_call_operand.hbm [shape: f32[2,8,256], index: 7, kind: output, shape index: {}]  }
   0x1   :  { %14 = vsyncpa [#allocation5 + $0x1], 0  ;;  %s9116_s24 = smov 0   ;;  %s9118_s25 = smov 0  }
   0x2   :  { %s9120_s26 = smov 0   ;;  %s9122_s27 = smov 0  }
   0x3 LB: > { %s9137_s28 = sadd.s32 4294967295, %s9064_s27   ;;  %s8115_s29 = sadd.s32 4294967294, %s9064_s27   ;;  %s9064_s27 = sphi %s9122_s27, %s13300_s27   ;;  %s9060_s26 = sphi %s9120_s26, %s13299_s26   ;;  %s9056_s25 = sphi %s9118_s25, %s13298_s25   ;;  %s9052_s24 = sphi %s9116_s24, %s13297_s24  }
   0x4   : > { %s9141_s30 = sadd.s32 1, %s9064_s27   ;;  %s179_s8 = sadd.s32 1, %s9060_s26 }
   0x5   : > { %s176_s9 = ssub.s32 %s9064_s27, %s9141_s30  ;;  %p189_p0 = scmp.ne.s32.totalorder %s9060_s26, %s9056_s25 }
   0x6   : > { %p177_p1 = scmp.eq.s32.totalorder %s176_s9, 0  ;;  %p190_p2 = scmp.eq.s32.totalorder %s9137_s28, 1 }
   0x7   : > { %p195_p3 = scmp.ne.s32.totalorder %s9056_s25, %s9052_s24  ;;  %p196_p4 = scmp.eq.s32.totalorder %s8115_s29, 1 }
   0x8   : > { %s9152_s10 = scalar_select %p177_p1, %s9060_s26, %s179_s8  }
   0x9   : > { %p9154_p5 = por %p190_p2, %p189_p0  ;;  %p9158_p6 = por %p196_p4, %p195_p3 }
   0xa   : > { %p8118_p7 = scmp.ge.s32.totalorder %s9064_s27, 1  ;;  %p240_p8 = scmp.lt.s32.totalorder %s9064_s27, 3 }
   0xc   : > { %p241_p9 = pnand %p8118_p7, %p240_p8 }
   0xe   : > { %244 = sbr.rel (%p241_p9) target bundleno = 1298 (0x512), region = 48 }
  0x13   : > { %vm310_vm0 = vcmask 60416   ;;  %vm313_vm1 = vcmask 57344   ;;  %vm316_vm2 = vsmask.f32 256  ;;  %v13203_v0 = vmov 0   ;;  %p272_p10 = scmp.lt.s32.totalorder %s9137_s28, 1 }
  0x14   : > { %311 = vst.msk [vmem:[#allocation2] sm:$0xf] %vm310_vm0, %v13203_v0  ;;  %312 = vst.msk [vmem:[#allocation2 + $0x4] sm:$0xf] %vm310_vm0, %v13203_v0  ;;  %vm376_vm4 = vsmask.f32 7938 }
  0x15   : > { %314 = vst.msk [vmem:[#allocation2 + $0x8] sm:$0x1] %vm313_vm1, %v13203_v0  ;;  %vm9172_vm3 = vmand %vm313_vm1, %vm316_vm2  ;;  %v321_v2 = vld [vmem:[#allocation2 + $0xc] sm:$0x1]  ;;  %v324_v3 = vld [vmem:[#allocation2 + $0x18] sm:$0x1] }
  0x16   : > { %374 = vst.msk [vmem:[#allocation2 + $0xd0] sm:$0xf] %vm310_vm0, %v13203_v0  ;;  %4076 = vst.msk [vmem:[#allocation3] sm:$0xf] %vm310_vm0, %v13203_v0  ;;  %s273_s13 = scalar_select %p272_p10, %s9137_s28, 1  ;;  %v322_v4 = vsel %vm9172_vm3, 0, %v321_v2 }
  0x17   : > { %375 = vst.msk [vmem:[#allocation2 + $0xd4] sm:$0x1] %vm313_vm1, %v13203_v0  ;;  %4078 = vst.msk [vmem:[#allocation3 + $0x8] sm:$0x1] %vm313_vm1, %v13203_v0  ;;  %v325_v5 = vsel %vm9172_vm3, 0, %v324_v3  ;;  %vm1368_vm6 = vcmask 1042432  }
  0x18   : > { %4077 = vst.msk [vmem:[#allocation3 + $0x4] sm:$0xf] %vm310_vm0, %v13203_v0  ;;  %4135 = vst.msk [vmem:[#allocation3 + $0xd0] sm:$0xf] %vm310_vm0, %v13203_v0  ;;  %v327_v6 = vld [vmem:[#allocation2 + $0x24] sm:$0x1] }
  0x19   : > { %4136 = vst.msk [vmem:[#allocation3 + $0xd4] sm:$0x1] %vm313_vm1, %v13203_v0  ;;  %323 = vst [vmem:[#allocation2 + $0xc] sm:$0x1] %v322_v4  ;;  %v328_v7 = vsel %vm9172_vm3, 0, %v327_v6  ;;  %s8589_s14 = sshll.u32 %s273_s13, 7 }
  0x1a   : > { %326 = vst [vmem:[#allocation2 + $0x18] sm:$0x1] %v325_v5  ;;  %vm9200_vm5 = vmand %vm313_vm1, %vm376_vm4  ;;  %v381_v9 = vld [vmem:[#allocation2 + $0x14] sm:$0x1]  ;;  %v384_v10 = vld [vmem:[#allocation2 + $0x20] sm:$0x1]  ;;  %s9207_s17 = scalar_lea.vmem %s13195_s0, %s8589_s14 }
  0x1b   : > { %329 = vst [vmem:[#allocation2 + $0x24] sm:$0x1] %v328_v7  ;;  %vm1369_vm7 = vcmask 1046532   ;;  %vm432_vm8 = vsmask.f32 4368  ;;  %v382_v11 = vsel %vm9200_vm5, 0, %v381_v9  ;;  %vm9232_vm10 = vmand %vm310_vm0, %vm376_vm4 }
  0x1c   : > { %v385_v12 = vsel %vm9200_vm5, 0, %v384_v10  ;;  %v278_v13 = vld [vmem:[%s9207_s17] sm:$0xf]  ;;  %v279_v14 = vld [vmem:[%s9207_s17 + $0x4] sm:$0xf]  ;;  %vm9226_vm9 = vmor %vm1368_vm6, %vm1369_vm7  ;;  %s9067_s18 = smov 16  }
  0x1d   : > { %v280_v15 = vld [vmem:[%s9207_s17 + $0x8] sm:$0xf]  ;;  %383 = vst [vmem:[#allocation2 + $0x14] sm:$0x1] %v382_v11  ;;  %386 = vst [vmem:[#allocation2 + $0x20] sm:$0x1] %v385_v12 }
  0x1e   : > { %v378_v16 = vld [vmem:[#allocation2 + $0x8] sm:$0x1]  ;;  %v9216_v17 = vld [vmem:[#allocation2 + $0x4] sm:$0xf]  ;;  %v1304_v18 = vld [vmem:[#allocation2] sm:$0xe] }
  0x1f   : > { %v379_v19 = vsel %vm9200_vm5, 0, %v378_v16  ;;  %v8122_v20 = vrot.slane %v1304_v18, 9  ;;  %v1373_v21 = vrot.slane %v9216_v17, 5  ;;  %v318_v22 = vld [vmem:[#allocation2] sm:$0x1]  ;;  %v435_v23 = vshrl.u32 %v278_v13, 16  ;;  %vm9238_vm11 = vmor %vm316_vm2, %vm432_vm8 }
  0x20   : > { %380 = vst [vmem:[#allocation2 + $0x8] sm:$0x1] %v379_v19  ;;  %v319_v24 = vsel %vm9172_vm3, 0, %v318_v22  ;;  %v438_v25 = vshll.u32 %v278_v13, 16  ;;  %v443_v26 = vshrl.u32 %v279_v14, 16  ;;  %v446_v27 = vshll.u32 %v279_v14, 16 }
  0x21   : > { %v281_v28 = vld [vmem:[%s9207_s17 + $0xc] sm:$0xf]  ;;  %320 = vst [vmem:[#allocation2] sm:$0x1] %v319_v24  ;;  %v437_v30 = vrot.slane %v435_v23, 7  ;;  %v452_v31 = vshrl.u32 %v280_v15, 16  ;;  %v1374_v44 = vsel %vm9226_vm9, %v8122_v20, %v1373_v21 }
  0x22   : > { %v445_v32 = vrot.slane %v443_v26, 7  ;;  %v757_v34 = vld [vmem:[#allocation2 + $0xc] sm:$0xf]  ;;  %v455_v35 = vshll.u32 %v280_v15, 16  ;;  %v460_v36 = vshrl.u32 %v281_v28, 16  ;;  %v463_v37 = vshll.u32 %v281_v28, 16 }
  0x23   : > { %v1375_v38 = vrot.slane %v1373_v21, 4  ;;  %v440_v40 = vor.u32 %v438_v25, %v437_v30  ;;  %v441_v41 = vrot.slane %v437_v30, 4  ;;  %v454_v42 = vrot.slane %v452_v31, 7  ;;  %v282_v43 = vld [vmem:[%s9207_s17 + $0x10] sm:$0xf]  ;;  %s9068_s19 = smov 24  }
  0x24   : > { %v448_v45 = vor.u32 %v446_v27, %v445_v32  ;;  %v462_v46 = vrot.slane %v460_v36, 7  ;;  %v764_v47 = vld [vmem:[#allocation2 + $0x18] sm:$0xf]  ;;  %v283_v48 = vld [vmem:[%s9207_s17 + $0x14] sm:$0xf]  ;;  %v469_v49 = vshrl.u32 %v282_v43, 16 }
  0x25   : > { %v758_v50 = vsel %vm9232_vm10, %v440_v40, %v757_v34  ;;  %v457_v51 = vor.u32 %v455_v35, %v454_v42  ;;  %v458_v52 = vrot.slane %v454_v42, 4  ;;  %v472_v53 = vshll.u32 %v282_v43, 16  ;;  %v771_v58 = vld [vmem:[#allocation2 + $0x24] sm:$0xf]  ;;  %v761_v12 = vld [vmem:[#allocation2 + $0x14] sm:$0x1] }
  0x26   : > { %v449_v54 = vsel %vm9238_vm11, %v441_v41, %v448_v45  ;;  %v450_v55 = vrot.slane %v445_v32, 4  ;;  %759 = vst [vmem:[#allocation2 + $0xc] sm:$0xf] %v758_v50  ;;  %v465_v56 = vor.u32 %v463_v37, %v462_v46  ;;  %v471_v57 = vrot.slane %v469_v49, 7  ;;  %v768_v18 = vld [vmem:[#allocation2 + $0x20] sm:$0x1] }
  0x27   : > { %v901_v59 = vld [vmem:[#allocation2 + $0x8] sm:$0x1]  ;;  %760 = vst.msk [vmem:[#allocation2 + $0x10] sm:$0xf] %vm310_vm0, %v449_v54  ;;  %v765_v60 = vsel %vm9232_vm10, %v457_v51, %v764_v47  ;;  %v477_v61 = vshrl.u32 %v283_v48, 16  ;;  %v480_v62 = vshll.u32 %v283_v48, 16 }
  0x28   : > { %v930_v63 = vshll.u32 %v9216_v17, 16  ;;  %v1376_v2 = vrot.slane %v901_v59, 5  ;;  %v466_v3 = vsel %vm9238_vm11, %v458_v52, %v465_v56  ;;  %v467_v4 = vrot.slane %v462_v46, 4  ;;  %766 = vst [vmem:[#allocation2 + $0x18] sm:$0xf] %v765_v60  ;;  %s9069_s20 = smov 48  }
  0x29   : > { %v474_v5 = vor.u32 %v472_v53, %v471_v57  ;;  %v869_v6 = vld [vmem:[#allocation2] sm:$0xf]  ;;  %767 = vst.msk [vmem:[#allocation2 + $0x1c] sm:$0xf] %vm310_vm0, %v466_v3  ;;  %v475_v7 = vrot.slane %v471_v57, 4  ;;  %v9257_v9 = vrot.slane %v477_v61, 7  ;;  %v762_v25 = vsel %vm9172_vm3, %v450_v55, %v761_v12 }
  0x2a   : > { %v921_v10 = vshrl.u32 %v869_v6, 16  ;;  %v924_v11 = vshll.u32 %v869_v6, 16  ;;  %v940_v13 = vshll.u32 %v901_v59, 16  ;;  %v1377_v14 = vsel %vm9226_vm9, %v1375_v38, %v1376_v2  ;;  %763 = vst [vmem:[#allocation2 + $0x14] sm:$0x1] %v762_v25  ;;  %s9070_s21 = smov 8  }
  0x2b   : > { %v772_v15 = vsel %vm9232_vm10, %v474_v5, %v771_v58  ;;  %v934_v16 = vshrl.u32 %v9216_v17, 16  ;;  %v8202_v19 = vcombine.low %v1374_v44, %v1377_v14  ;;  %v482_v20 = vor.u32 %v480_v62, %v9257_v9  ;;  %s9071_s22 = smov 40   ;;  %s9072_s23 = smov 64  }
  0x2c   : > { %773 = vst [vmem:[#allocation2 + $0x24] sm:$0xf] %v772_v15  ;;  %v923_v21 = vrot.slane %v921_v10, 4  ;;  %v9265_v22 = vrot.slane %v930_v63, 5  ;;  %v926_v23 = vrot.slane %v924_v11, 5  ;;  %v769_v27 = vsel %vm9172_vm3, %v467_v4, %v768_v18  ;;  %s9073_s29 = smov 32  }
  0x2d   : > { %v936_v24 = vrot.slane %v934_v16, 4  ;;  %2892 = vrot.lane.b32.xlu1 %v8202_v19, %s9067_s18  ;;  %v1483_v26 = vld [vmem:[#allocation2 + $0xc] sm:$0xf]  ;;  %v483_v17 = vsel %vm9238_vm11, %v475_v7, %v482_v20  ;;  %vm917_vm12 = vsmask.f32 3328  ;;  %v484_v32 = vrot.slane %v9257_v9, 4 }
  0x2e   : > { %vm918_vm13 = vsmask.f32 7440  ;;  %v9274_v28 = vld [vmem:[#allocation2 + $0x10] sm:$0xf]  ;;  %v1532_v30 = vshrl.u32 %v1483_v26, 16  ;;  %v1535_v31 = vshll.u32 %v1483_v26, 16  ;;  %v927_v40 = vor.u32 %v926_v23, %v923_v21 }
  0x2f   : > { %774 = vst.msk [vmem:[#allocation2 + $0x28] sm:$0xf] %vm310_vm0, %v483_v17  ;;  %v942_v34 = vrot.slane %v940_v13, 5  ;;  %770 = vst [vmem:[#allocation2 + $0x20] sm:$0x1] %v769_v27  ;;  %v1545_v35 = vshrl.u32 %v9274_v28, 16  ;;  %v8218_v36 = vcombine.low %v1483_v26, %v9274_v28  ;;  %v937_v41 = vor.u32 %v936_v24, %v9265_v22 }
  0x30   : > { %v1485_v37 = vld [vmem:[#allocation2 + $0x18] sm:$0xf]  ;;  %v9283_v42 = vrot.slane %v1532_v30, 4  ;;  %v9285_v43 = vrot.slane %v1535_v31, 5  ;;  %v9287_v44 = vld [vmem:[#allocation2 + $0x1c] sm:$0xf]  ;;  %vm9313_vm14 = vmor %vm917_vm12, %vm918_vm13 }
  0x31   : > { %v9280_v38 = vld [vmem:[#allocation2 + $0x18] sm:$0xf]  ;;  %v1556_v45 = vshrl.u32 %v1485_v37, 16  ;;  %v1559_v46 = vshll.u32 %v1485_v37, 16  ;;  %v9289_v47 = vld [vmem:[#allocation2 + $0x10] sm:$0xf]  ;;  %2988 = vrot.lane.b32.xlu0 %v8218_v36, %s9068_s19  ;;  %v8219_v51 = vcombine.low %v1485_v37, %v9287_v44 }
  0x32   : > { %v1305_v48 = vld [vmem:[#allocation2 + $0xc] sm:$0xe]  ;;  %v1541_v49 = vshll.u32 %v9274_v28, 16  ;;  %v9292_v50 = vrot.slane %v1545_v35, 4  ;;  %v9296_v52 = vld [vmem:[#allocation2 + $0x1c] sm:$0xf]  ;;  %v1538_v3 = vor.u32 %v9285_v43, %v9283_v42 }
  0x33   : > { %v2141_v53 = vshrl.u32 %v9280_v38, 16  ;;  %v1569_v54 = vshrl.u32 %v9287_v44, 16  ;;  %v9300_v55 = vrot.slane %v1556_v45, 4  ;;  %v9302_v56 = vrot.slane %v1559_v46, 5  ;;  %v2094_v58 = vld [vmem:[#allocation2 + $0x24] sm:$0xf]  ;;  %2990 = vrot.lane.b32.xlu1 %v8219_v51, %s9068_s19 }
  0x34   : > { %v2144_v57 = vshll.u32 %v9280_v38, 16  ;;  %v2154_v60 = vshrl.u32 %v9296_v52, 16  ;;  %v8266_v61 = vcombine.low %v9280_v38, %v9296_v52  ;;  %v2165_v62 = vshrl.u32 %v2094_v58, 16  ;;  %v1915_v2 = vld [vmem:[#allocation2 + $0xc] sm:$0xe]  ;;  %s9074_s8 = smov 56  }
  0x35   : > { %v9306_v59 = vrot.slane %v2141_v53, 4  ;;  %v2168_v4 = vshll.u32 %v2094_v58, 16  ;;  %v928_v5 = vrot.slane %v927_v40, 4  ;;  %v9319_v6 = vld [vmem:[#allocation2 + $0x14] sm:$0x1]  ;;  %v938_v12 = vrot.slane %v937_v41, 4 }
  0x36   : > { %v1916_v7 = vld [vmem:[#allocation2 + $0x18] sm:$0xe]  ;;  %3244 = vrot.lane.b32.xlu0 %v8266_v61, %s9069_s20  ;;  %v9322_v10 = vld [vmem:[#allocation2 + $0x28] sm:$0xf]  ;;  %v9324_v11 = vrot.slane %v2165_v62, 4  ;;  %v8123_v13 = vrot.slane %v1305_v48, 9  ;;  %v1562_v61 = vor.u32 %v9302_v56, %v9300_v55 }
  0x37   : > { %v1380_v14 = vrot.slane %v9289_v47, 5  ;;  %v9327_v15 = vrot.slane %v2168_v4, 5  ;;  %v2178_v16 = vshrl.u32 %v9322_v10, 16  ;;  %v8267_v18 = vcombine.low %v2094_v58, %v9322_v10  ;;  %v9334_v20 = vld [vmem:[#allocation2 + $0x14] sm:$0x1] }
  0x38   : > { %v933_v19 = vsel %vm9313_vm14, %v928_v5, %v9265_v22  ;;  %v1516_v21 = vld [vmem:[#allocation2 + $0x20] sm:$0x1]  ;;  %v943_v23 = vsel %vm9313_vm14, %v938_v12, %v942_v34  ;;  %v1383_v26 = vrot.slane %v9319_v6, 5  ;;  %v2524_v17 = vld [vmem:[#allocation2 + $0x18] sm:$0xe]  ;;  %v8138_v30 = vrot.slane %v1915_v2, 9 }
  0x39   : > { %v1381_v24 = vsel %vm9226_vm9, %v8123_v13, %v1380_v14  ;;  %v1382_v25 = vrot.slane %v1380_v14, 4  ;;  %3246 = vrot.lane.b32.xlu1 %v8267_v18, %s9069_s20  ;;  %v8186_v27 = vcombine.low %v933_v19, %v943_v23  ;;  %v1981_v31 = vrot.slane %v9274_v28, 5  ;;  %v9344_v35 = vld [vmem:[#allocation2 + $0x20] sm:$0x1]  ;;  %v387_v4 = vld [vmem:[#allocation2 + $0x2c] sm:$0x1] }
  0x3a   : > { %v1984_v22 = vrot.slane %v9334_v20, 5  ;;  %v8139_v36 = vrot.slane %v1916_v7, 9  ;;  %v1988_v37 = vrot.slane %v9287_v44, 5  ;;  %v1991_v40 = vrot.slane %v1516_v21, 5  ;;  %v2525_v5 = vld [vmem:[#allocation2 + $0x24] sm:$0xe] }
  0x3b   : > { %v1384_v34 = vsel %vm9226_vm9, %v1382_v25, %v1383_v26  ;;  %2812 = vrot.lane.b32.xlu0 %v8186_v27, %s9070_s21  ;;  %v1982_v42 = vsel %vm9226_vm9, %v8138_v30, %v1981_v31  ;;  %v1983_v43 = vrot.slane %v1981_v31, 4  ;;  %v8154_v45 = vrot.slane %v2524_v17, 9  ;;  %v9373_v56 = vld [vmem:[#allocation2 + $0xc] sm:$0xf] }
  0x3c   : > { %v8203_v41 = vcombine.low %v1381_v24, %v1384_v34  ;;  %v1989_v46 = vsel %vm9226_vm9, %v8139_v36, %v1988_v37  ;;  %v1990_v48 = vrot.slane %v1988_v37, 4  ;;  %v2590_v51 = vrot.slane %v9296_v52, 5 }
  0x3d   : > { %v2593_v53 = vrot.slane %v9344_v35, 5  ;;  %v1985_v58 = vsel %vm9226_vm9, %v1983_v43, %v1984_v22  ;;  %v1565_v62 = vshll.u32 %v9287_v44, 16  ;;  %v1571_v2 = vrot.slane %v1569_v54, 4 }
  0x3e   : > { %2894 = vrot.lane.b32.xlu1 %v8203_v41, %s9067_s18  ;;  %v8250_v7 = vcombine.low %v1982_v42, %v1985_v58  ;;  %v1992_v12 = vsel %vm9226_vm9, %v1990_v48, %v1991_v40  ;;  %v2591_v13 = vsel %vm9226_vm9, %v8154_v45, %v2590_v51  ;;  %v2592_v14 = vrot.slane %v2590_v51, 4  ;;  %v9402_v45 = vld [vmem:[#allocation2 + $0x1c] sm:$0xf] }
  0x3f   : > { %v8251_v18 = vcombine.low %v1989_v46, %v1992_v12  ;;  %v1563_v19 = vrot.slane %v1562_v61, 4  ;;  %v1567_v23 = vrot.slane %v1565_v62, 5  ;;  %v1575_v24 = vshll.u32 %v1516_v21, 16  ;;  %v9409_v62 = vld [vmem:[#allocation2 + $0x20] sm:$0x1] }
  0x40   : > { %v9366_v25 = vrot.slane %v1538_v3, 4  ;;  %3148 = vrot.lane.b32.xlu0 %v8250_v7, %s9071_s22  ;;  %v2594_v44 = vsel %vm9226_vm9, %v2592_v14, %v2593_v53  ;;  %v388_v54 = vsel %vm9200_vm5, 0, %v387_v4  ;;  %v8155_v55 = vrot.slane %v2525_v5, 9 }
  0x41   : > { %v9377_v26 = vrot.slane %v2144_v57, 5  ;;  %v8298_v3 = vcombine.low %v2591_v13, %v2594_v44  ;;  %v1572_v21 = vor.u32 %v1571_v2, %v1567_v23  ;;  %v1577_v17 = vrot.slane %v1575_v24, 5  ;;  %389 = vst [vmem:[#allocation2 + $0x2c] sm:$0x1] %v388_v54 }
  0x42   : > { %3150 = vrot.lane.b32.xlu1 %v8251_v18, %s9071_s22  ;;  %v1568_v27 = vsel %vm9313_vm14, %v1563_v19, %v1567_v23  ;;  %v2597_v30 = vrot.slane %v9322_v10, 5  ;;  %v2171_v31 = vor.u32 %v9327_v15, %v9324_v11  ;;  %v2174_v22 = vshll.u32 %v9322_v10, 16  ;;  %v9397_v10 = vld [vmem:[#allocation2 + $0x18] sm:$0xf]  ;;  %v9420_v23 = vld [vmem:[#allocation2 + $0x24] sm:$0xf] }
  0x43   : > { %v1573_v34 = vrot.slane %v1572_v21, 4  ;;  %v2180_v38 = vrot.slane %v2178_v16, 4  ;;  %v945_v57 = vshrl.u32 %v9373_v56, 16  ;;  %v948_v36 = vshll.u32 %v9373_v56, 16 }
  0x44   : > { %3404 = vrot.lane.b32.xlu0 %v8298_v3, %s9072_s23  ;;  %v9391_v37 = vsel %vm9226_vm9, %v8155_v55, %v2597_v30  ;;  %v9393_v40 = vrot.slane %v2174_v22, 5  ;;  %v954_v41 = vshll.u32 %v9289_v47, 16  ;;  %v958_v11 = vshrl.u32 %v9289_v47, 16 }
  0x45   : > { %v1578_v15 = vsel %vm9313_vm14, %v1573_v34, %v1577_v17  ;;  %v947_v16 = vrot.slane %v945_v57, 4  ;;  %v950_v42 = vrot.slane %v948_v36, 5  ;;  %v964_v43 = vshll.u32 %v9319_v6, 16 }
  0x46   : > { %v8235_v46 = vcombine.low %v1568_v27, %v1578_v15  ;;  %v9404_v48 = vrot.slane %v2597_v30, 4  ;;  %v9406_v51 = vrot.slane %v2171_v31, 4  ;;  %v956_v53 = vrot.slane %v954_v41, 5  ;;  %v9432_v31 = vld [vmem:[#allocation2 + $0x28] sm:$0xf] }
  0x47   : > { %v2181_v58 = vor.u32 %v2180_v38, %v9393_v40  ;;  %v951_v47 = vor.u32 %v950_v42, %v947_v16  ;;  %v960_v61 = vrot.slane %v958_v11, 4  ;;  %v969_v2 = vshrl.u32 %v9397_v10, 16 }
  0x48   : > { %3070 = vrot.lane.b32.xlu1 %v8235_v46, %s9073_s29  ;;  %v775_v6 = vld [vmem:[#allocation2 + $0x2c] sm:$0x1]  ;;  %v966_v4 = vrot.slane %v964_v43, 5  ;;  %v972_v5 = vshll.u32 %v9397_v10, 16  ;;  %v978_v7 = vshll.u32 %v9402_v45, 16  ;;  %v982_v12 = vshrl.u32 %v9402_v45, 16 }
  0x49   : > { %v776_v13 = vsel %vm9172_vm3, %v484_v32, %v775_v6  ;;  %v952_v14 = vrot.slane %v951_v47, 4  ;;  %v961_v18 = vor.u32 %v960_v61, %v956_v53  ;;  %v971_v19 = vrot.slane %v969_v2, 4 }
  0x4a   : > { %777 = vst [vmem:[#allocation2 + $0x2c] sm:$0x1] %v776_v13  ;;  %v974_v24 = vrot.slane %v972_v5, 5  ;;  %v980_v44 = vrot.slane %v978_v7, 5  ;;  %v984_v54 = vrot.slane %v982_v12, 4  ;;  %v988_v55 = vshll.u32 %v9409_v62, 16 }
  0x4b   : > { %v2177_v3 = vsel %vm9313_vm14, %v9406_v51, %v9393_v40  ;;  %v962_v9 = vrot.slane %v961_v18, 4  ;;  %v9429_v32 = vrot.slane %v1541_v49, 5  ;;  %v1551_v21 = vshll.u32 %v9334_v20, 16  ;;  %v1307_v12 = vld [vmem:[#allocation2 + $0x24] sm:$0xe] }
  0x4c   : > { %v975_v17 = vor.u32 %v974_v24, %v971_v19  ;;  %v985_v27 = vor.u32 %v984_v54, %v980_v44  ;;  %v990_v30 = vrot.slane %v988_v55, 5  ;;  %v993_v22 = vshrl.u32 %v9420_v23, 16 }
  0x4d   : > { %v2182_v34 = vrot.slane %v2181_v58, 4  ;;  %v957_v38 = vsel %vm9313_vm14, %v952_v14, %v956_v53  ;;  %v967_v57 = vsel %vm9313_vm14, %v962_v9, %v966_v4  ;;  %v1548_v28 = vor.u32 %v9292_v50, %v9429_v32 }
  0x4e   : > { %v976_v49 = vrot.slane %v975_v17, 4  ;;  %v986_v36 = vrot.slane %v985_v27, 4  ;;  %v1553_v20 = vrot.slane %v1551_v21, 5  ;;  %v995_v40 = vrot.slane %v993_v22, 4 }
  0x4f   : > { %v1549_v41 = vrot.slane %v1548_v28, 4  ;;  %v996_v11 = vshll.u32 %v9420_v23, 16  ;;  %v1002_v15 = vshll.u32 %v9432_v31, 16  ;;  %v1006_v16 = vshrl.u32 %v9432_v31, 16 }
  0x50   : > { %v981_v42 = vsel %vm9313_vm14, %v976_v49, %v980_v44  ;;  %v991_v43 = vsel %vm9313_vm14, %v986_v36, %v990_v30  ;;  %v2147_v50 = vor.u32 %v9377_v26, %v9306_v59  ;;  %v2150_v46 = vshll.u32 %v9296_v52, 16  ;;  %v1306_v44 = vld [vmem:[#allocation2 + $0x18] sm:$0xe] }
  0x51   : > { %v2125_v51 = vld [vmem:[#allocation2 + $0x2c] sm:$0x1]  ;;  %v8187_v53 = vcombine.low %v957_v38, %v967_v57  ;;  %v1544_v58 = vsel %vm9313_vm14, %v9366_v25, %v9429_v32  ;;  %v998_v61 = vrot.slane %v996_v11, 5  ;;  %v1004_v2 = vrot.slane %v1002_v15, 5  ;;  %v284_v30 = vld [vmem:[%s9207_s17 + $0x18] sm:$0xf] }
  0x52   : > { %v904_v47 = vld [vmem:[#allocation2 + $0x2c] sm:$0x1]  ;;  %v2600_v6 = vrot.slane %v2125_v51, 5  ;;  %v2184_v4 = vshll.u32 %v2125_v51, 16  ;;  %v8188_v5 = vcombine.low %v981_v42, %v991_v43  ;;  %v1008_v7 = vrot.slane %v1006_v16, 4 }
  0x53   : > { %v999_v13 = vor.u32 %v998_v61, %v995_v40  ;;  %v1012_v14 = vshll.u32 %v904_v47, 16  ;;  %v2148_v59 = vrot.slane %v2147_v50, 4  ;;  %v2152_v26 = vrot.slane %v2150_v46, 5  ;;  %v285_v38 = vld [vmem:[%s9207_s17 + $0x1c] sm:$0xf] }
  0x54   : > { %v2601_v18 = vsel %vm9226_vm9, %v9404_v48, %v2600_v6  ;;  %v2186_v19 = vrot.slane %v2184_v4, 5  ;;  %v1009_v24 = vor.u32 %v1008_v7, %v1004_v2  ;;  %v2156_v25 = vrot.slane %v2154_v60, 4  ;;  %v330_v57 = vld [vmem:[#allocation2 + $0x30] sm:$0x1]  ;;  %v9481_v42 = vld [vmem:[#allocation2 + $0x24] sm:$0xf] }
  0x55   : > { %v8299_v54 = vcombine.low %v9391_v37, %v2601_v18  ;;  %v1554_v55 = vsel %vm9313_vm14, %v1549_v41, %v1553_v20  ;;  %v1000_v9 = vrot.slane %v999_v13, 4  ;;  %v1014_v32 = vrot.slane %v1012_v14, 5  ;;  %v1517_v18 = vld [vmem:[#allocation2 + $0x2c] sm:$0x1] }
  0x56   : > { %v2187_v21 = vsel %vm9313_vm14, %v2182_v34, %v2186_v19  ;;  %v1010_v17 = vrot.slane %v1009_v24, 4  ;;  %v2157_v27 = vor.u32 %v2156_v25, %v2152_v26  ;;  %v2160_v48 = vshll.u32 %v9344_v35, 16 }
  0x57   : > { %3406 = vrot.lane.b32.xlu0 %v8299_v54, %s9072_s23  ;;  %v8283_v52 = vcombine.low %v2177_v3, %v2187_v21  ;;  %v1005_v60 = vsel %vm9313_vm14, %v1000_v9, %v1004_v2  ;;  %v8125_v37 = vrot.slane %v1307_v12, 9  ;;  %v1394_v22 = vrot.slane %v9432_v31, 5  ;;  %v390_v12 = vld [vmem:[#allocation2 + $0x38] sm:$0x1]  ;;  %v333_v21 = vld [vmem:[#allocation2 + $0x3c] sm:$0x1] }
  0x58   : > { %v1015_v28 = vsel %vm9313_vm14, %v1010_v17, %v1014_v32  ;;  %v2158_v34 = vrot.slane %v2157_v27, 4  ;;  %v2162_v49 = vrot.slane %v2160_v48, 5  ;;  %v1397_v36 = vrot.slane %v904_v47, 5 }
  0x59   : > { %3326 = vrot.lane.b32.xlu1 %v8283_v52, %s9074_s8  ;;  %v8234_v35 = vcombine.low %v1544_v58, %v1554_v55  ;;  %v2153_v3 = vsel %vm9313_vm14, %v2148_v59, %v2152_v26  ;;  %v1396_v20 = vrot.slane %v1394_v22, 4  ;;  %v8124_v40 = vrot.slane %v1306_v44, 9  ;;  %v9488_v58 = vld [vmem:[#allocation2 + $0x28] sm:$0xf]  ;;  %v1917_v44 = vld [vmem:[#allocation2 + $0x24] sm:$0xe] }
  0x5a   : > { %v8189_v41 = vcombine.low %v1005_v60, %v1015_v28  ;;  %v1387_v11 = vrot.slane %v9402_v45, 5  ;;  %v1390_v15 = vrot.slane %v9409_v62, 5  ;;  %v331_v16 = vsel %vm9172_vm3, 0, %v330_v57  ;;  %v286_v52 = vld [vmem:[%s9207_s17 + $0x20] sm:$0xf] }
  0x5b   : > { %2814 = vrot.lane.b32.xlu0 %v8187_v53, %s9070_s21  ;;  %v2163_v43 = vsel %vm9313_vm14, %v2158_v34, %v2162_v49  ;;  %v1395_v50 = vsel %vm9226_vm9, %v8125_v37, %v1394_v22  ;;  %332 = vst [vmem:[#allocation2 + $0x30] sm:$0x1] %v331_v16  ;;  %v486_v46 = vshrl.u32 %v284_v30, 16  ;;  %v489_v51 = vshll.u32 %v284_v30, 16  ;;  %v287_v28 = vld [vmem:[%s9207_s17 + $0x24] sm:$0xf] }
  0x5c   : > { %v1398_v62 = vsel %vm9226_vm9, %v1396_v20, %v1397_v36  ;;  %v1388_v47 = vsel %vm9226_vm9, %v8124_v40, %v1387_v11  ;;  %v1389_v61 = vrot.slane %v1387_v11, 4  ;;  %v494_v2 = vshrl.u32 %v285_v38, 16 }
  0x5d   : > { %2816 = vrot.lane.b32.xlu1 %v8188_v5, %s9070_s21  ;;  %v488_v53 = vrot.slane %v486_v46, 7  ;;  %v497_v6 = vshll.u32 %v285_v38, 16  ;;  %v1580_v4 = vshrl.u32 %v9481_v42, 16  ;;  %v1583_v7 = vshll.u32 %v9481_v42, 16 }
  0x5e   : > { %v8282_v13 = vcombine.low %v2153_v3, %v2163_v43  ;;  %v1391_v14 = vsel %vm9226_vm9, %v1389_v61, %v1390_v15  ;;  %v9499_v59 = vrot.slane %v494_v2, 7  ;;  %v1593_v26 = vshrl.u32 %v9488_v58, 16  ;;  %v393_v3 = vld [vmem:[#allocation2 + $0x44] sm:$0x1]  ;;  %v336_v15 = vld [vmem:[#allocation2 + $0x48] sm:$0x1] }
  0x5f   : > { %3068 = vrot.lane.b32.xlu0 %v8234_v35, %s9073_s29  ;;  %v8205_v19 = vcombine.low %v1395_v50, %v1398_v62  ;;  %v491_v5 = vor.u32 %v489_v51, %v488_v53  ;;  %v492_v24 = vrot.slane %v488_v53, 4  ;;  %v1582_v25 = vrot.slane %v1580_v4, 4  ;;  %v9535_v4 = vld [vmem:[%s9207_s17 + $0x28] sm:$0xf] }
  0x60   : > { %v8204_v54 = vcombine.low %v1388_v47, %v1391_v14  ;;  %v499_v55 = vor.u32 %v497_v6, %v9499_v59  ;;  %v1585_v9 = vrot.slane %v1583_v7, 5  ;;  %v391_v32 = vsel %vm9200_vm5, 0, %v390_v12 }
  0x61   : > { %2818 = vrot.lane.b32.xlu1 %v8189_v41, %s9070_s21  ;;  %v501_v17 = vrot.slane %v9499_v59, 4  ;;  %392 = vst [vmem:[#allocation2 + $0x38] sm:$0x1] %v391_v32  ;;  %v1589_v27 = vshll.u32 %v9488_v58, 16  ;;  %v1595_v48 = vrot.slane %v1593_v26, 4  ;;  %v1599_v30 = vshll.u32 %v1517_v18, 16 }
  0x62   : > { %v500_v60 = vsel %vm9238_vm11, %v492_v24, %v499_v55  ;;  %v778_v37 = vld [vmem:[#allocation2 + $0x30] sm:$0xf]  ;;  %v1586_v22 = vor.u32 %v1585_v9, %v1582_v25  ;;  %v8140_v38 = vrot.slane %v1917_v44, 9  ;;  %v1995_v57 = vrot.slane %v9488_v58, 5 }
  0x63   : > { %3324 = vrot.lane.b32.xlu0 %v8282_v13, %s9074_s8  ;;  %v779_v34 = vsel %vm9232_vm10, %v491_v5, %v778_v37  ;;  %781 = vst.msk [vmem:[#allocation2 + $0x34] sm:$0xf] %vm310_vm0, %v500_v60  ;;  %v1591_v49 = vrot.slane %v1589_v27, 5  ;;  %v1998_v36 = vrot.slane %v1517_v18, 5  ;;  %v334_v35 = vsel %vm9172_vm3, 0, %v333_v21 }
  0x64   : > { %780 = vst [vmem:[#allocation2 + $0x30] sm:$0xf] %v779_v34  ;;  %v1587_v20 = vrot.slane %v1586_v22, 4  ;;  %v1601_v40 = vrot.slane %v1599_v30, 5  ;;  %v1997_v41 = vrot.slane %v1995_v57, 4  ;;  %v503_v11 = vshrl.u32 %v286_v52, 16 }
  0x65   : > { %335 = vst [vmem:[#allocation2 + $0x3c] sm:$0x1] %v334_v35  ;;  %2898 = vrot.lane.b32.xlu1 %v8205_v19, %s9067_s18  ;;  %v1596_v16 = vor.u32 %v1595_v48, %v1591_v49  ;;  %v506_v43 = vshll.u32 %v286_v52, 16  ;;  %v511_v50 = vshrl.u32 %v287_v28, 16  ;;  %v514_v46 = vshll.u32 %v287_v28, 16 }
  0x66   : > { %v8220_v51 = vcombine.low %v9481_v42, %v9488_v58  ;;  %v9525_v62 = vsel %vm9226_vm9, %v8140_v38, %v1995_v57  ;;  %v505_v47 = vrot.slane %v503_v11, 7  ;;  %v394_v61 = vsel %vm9200_vm5, 0, %v393_v3 }
  0x67   : > { %2896 = vrot.lane.b32.xlu0 %v8204_v54, %s9067_s18  ;;  %v1597_v2 = vrot.slane %v1596_v16, 4  ;;  %v9532_v53 = vsel %vm9226_vm9, %v1997_v41, %v1998_v36  ;;  %v513_v6 = vrot.slane %v511_v50, 7  ;;  %395 = vst [vmem:[#allocation2 + $0x44] sm:$0x1] %v394_v61  ;;  %v337_v42 = vsel %vm9172_vm3, 0, %v336_v15 }
  0x68   : > { %v782_v58 = vld [vmem:[#allocation2 + $0x38] sm:$0x1]  ;;  %v1592_v7 = vsel %vm9313_vm14, %v1587_v20, %v1591_v49  ;;  %v509_v12 = vrot.slane %v505_v47, 4  ;;  %338 = vst [vmem:[#allocation2 + $0x48] sm:$0x1] %v337_v42  ;;  %v508_v59 = vor.u32 %v506_v43, %v505_v47  ;;  %v8252_v19 = vcombine.low %v9525_v62, %v9532_v53 }
  0x69   : > { %v783_v13 = vsel %vm9172_vm3, %v501_v17, %v782_v58  ;;  %v1602_v14 = vsel %vm9313_vm14, %v1597_v2, %v1601_v40  ;;  %v516_v26 = vor.u32 %v514_v46, %v513_v6  ;;  %v518_v5 = vrot.slane %v513_v6, 4 }
  0x6a   : > { %v1490_v18 = vld [vmem:[#allocation2 + $0x34] sm:$0xf]  ;;  %784 = vst [vmem:[#allocation2 + $0x38] sm:$0x1] %v783_v13  ;;  %v520_v25 = vshrl.u32 %v9535_v4, 16  ;;  %v8236_v9 = vcombine.low %v1592_v7, %v1602_v14  ;;  %v523_v41 = vshll.u32 %v9535_v4, 16 }
  0x6b   : > { %v9547_v24 = vld [vmem:[#allocation2 + $0x34] sm:$0xf]  ;;  %v1489_v44 = vld [vmem:[#allocation2 + $0x30] sm:$0xf]  ;;  %v1617_v54 = vshrl.u32 %v1490_v18, 16  ;;  %2992 = vrot.lane.b32.xlu0 %v8220_v51, %s9068_s19  ;;  %v1613_v55 = vshll.u32 %v1490_v18, 16  ;;  %v517_v21 = vsel %vm9238_vm11, %v509_v12, %v516_v26 }
  0x6c   : > { %v1918_v32 = vld [vmem:[#allocation2 + $0x30] sm:$0xe]  ;;  %v1604_v17 = vshrl.u32 %v1489_v44, 16  ;;  %v1607_v27 = vshll.u32 %v1489_v44, 16  ;;  %v8221_v48 = vcombine.low %v1489_v44, %v1490_v18  ;;  %v785_v52 = vld [vmem:[#allocation2 + $0x3c] sm:$0xf] }
  0x6d   : > { %v8141_v30 = vrot.slane %v1918_v32, 9  ;;  %788 = vst.msk [vmem:[#allocation2 + $0x40] sm:$0xf] %vm310_vm0, %v517_v21  ;;  %v1615_v60 = vrot.slane %v1613_v55, 5  ;;  %v1619_v37 = vrot.slane %v1617_v54, 4  ;;  %v2002_v22 = vrot.slane %v1490_v18, 5 }
  0x6e   : > { %v786_v38 = vsel %vm9232_vm10, %v508_v59, %v785_v52  ;;  %v2096_v57 = vld [vmem:[#allocation2 + $0x30] sm:$0xf]  ;;  %v1606_v28 = vrot.slane %v1604_v17, 4  ;;  %v1609_v34 = vrot.slane %v1607_v27, 5  ;;  %2994 = vrot.lane.b32.xlu1 %v8221_v48, %s9068_s19  ;;  %v789_v35 = vld [vmem:[#allocation2 + $0x44] sm:$0x1] }
  0x6f   : > { %787 = vst [vmem:[#allocation2 + $0x3c] sm:$0xf] %v786_v38  ;;  %v2189_v49 = vshrl.u32 %v2096_v57, 16  ;;  %v2192_v36 = vshll.u32 %v2096_v57, 16  ;;  %v1620_v3 = vor.u32 %v1619_v37, %v1615_v60  ;;  %3072 = vrot.lane.b32.xlu0 %v8236_v9, %s9073_s29  ;;  %v9560_v20 = vsel %vm9226_vm9, %v8141_v30, %v2002_v22  ;;  %v877_v50 = vld [vmem:[#allocation2 + $0x30] sm:$0xf] }
  0x70   : > { %v2202_v40 = vshrl.u32 %v9547_v24, 16  ;;  %v1610_v11 = vor.u32 %v1609_v34, %v1606_v28  ;;  %v2004_v15 = vrot.slane %v2002_v22, 4  ;;  %v8268_v62 = vcombine.low %v2096_v57, %v9547_v24  ;;  %v9584_v30 = vld [vmem:[#allocation2 + $0x34] sm:$0xf] }
  0x71   : > { %v2191_v16 = vrot.slane %v2189_v49, 4  ;;  %v2194_v43 = vrot.slane %v2192_v36, 5  ;;  %v1518_v46 = vld [vmem:[#allocation2 + $0x38] sm:$0x1]  ;;  %v1621_v51 = vrot.slane %v1620_v3, 4  ;;  %v790_v47 = vsel %vm9172_vm3, %v518_v5, %v789_v35 }
  0x72   : > { %v9567_v61 = vld [vmem:[#allocation2 + $0x38] sm:$0x1]  ;;  %v2198_v2 = vshll.u32 %v9547_v24, 16  ;;  %v1611_v53 = vrot.slane %v1610_v11, 4  ;;  %v1623_v6 = vshll.u32 %v1518_v46, 16  ;;  %v2005_v42 = vrot.slane %v1518_v46, 5 }
  0x73   : > { %791 = vst [vmem:[#allocation2 + $0x44] sm:$0x1] %v790_v47  ;;  %v2195_v58 = vor.u32 %v2194_v43, %v2191_v16  ;;  %3152 = vrot.lane.b32.xlu0 %v8252_v19, %s9071_s22  ;;  %v2204_v13 = vrot.slane %v2202_v40, 4  ;;  %v2208_v14 = vshll.u32 %v9567_v61, 16  ;;  %v1017_v59 = vshrl.u32 %v877_v50, 16 }
  0x74   : > { %v9571_v7 = vld [vmem:[#allocation2 + $0x40] sm:$0xf]  ;;  %v2200_v12 = vrot.slane %v2198_v2, 5  ;;  %v1616_v26 = vsel %vm9313_vm14, %v1611_v53, %v1615_v60  ;;  %v1625_v18 = vrot.slane %v1623_v6, 5  ;;  %v2006_v5 = vsel %vm9226_vm9, %v2004_v15, %v2005_v42  ;;  %v9589_v49 = vld [vmem:[#allocation2 + $0x38] sm:$0x1] }
  0x75   : > { %v2226_v44 = vshrl.u32 %v9571_v7, 16  ;;  %v8253_v54 = vcombine.low %v9560_v20, %v2006_v5  ;;  %v2222_v19 = vshll.u32 %v9571_v7, 16  ;;  %v2196_v9 = vrot.slane %v2195_v58, 4  ;;  %v2526_v46 = vld [vmem:[#allocation2 + $0x30] sm:$0xe] }
  0x76   : > { %v2098_v55 = vld [vmem:[#allocation2 + $0x3c] sm:$0xf]  ;;  %v2205_v32 = vor.u32 %v2204_v13, %v2200_v12  ;;  %v1626_v21 = vsel %vm9313_vm14, %v1621_v51, %v1625_v18  ;;  %v2210_v34 = vrot.slane %v2208_v14, 5  ;;  %v1019_v3 = vrot.slane %v1017_v59, 4  ;;  %v880_v58 = vld [vmem:[#allocation2 + $0x40] sm:$0xf] }
  0x77   : > { %v2213_v17 = vshrl.u32 %v2098_v55, 16  ;;  %v2216_v27 = vshll.u32 %v2098_v55, 16  ;;  %v8269_v48 = vcombine.low %v2098_v55, %v9571_v7  ;;  %v8237_v52 = vcombine.low %v1616_v26, %v1626_v21  ;;  %3248 = vrot.lane.b32.xlu0 %v8268_v62, %s9069_s20  ;;  %v879_v26 = vld [vmem:[#allocation2 + $0x3c] sm:$0xf] }
  0x78   : > { %v2224_v60 = vrot.slane %v2222_v19, 5  ;;  %v2228_v37 = vrot.slane %v2226_v44, 4  ;;  %v2201_v22 = vsel %vm9313_vm14, %v2196_v9, %v2200_v12  ;;  %v2206_v28 = vrot.slane %v2205_v32, 4 }
  0x79   : > { %v2215_v38 = vrot.slane %v2213_v17, 4  ;;  %v2218_v57 = vrot.slane %v2216_v27, 5  ;;  %3074 = vrot.lane.b32.xlu1 %v8237_v52, %s9073_s29  ;;  %v1020_v20 = vshll.u32 %v877_v50, 16  ;;  %v1026_v40 = vshll.u32 %v9584_v30, 16 }
  0x7a   : > { %v9592_v36 = vld [vmem:[#allocation2 + $0x44] sm:$0x1]  ;;  %v2229_v35 = vor.u32 %v2228_v37, %v2224_v60  ;;  %v2211_v16 = vsel %vm9313_vm14, %v2206_v28, %v2210_v34  ;;  %v1030_v43 = vshrl.u32 %v9584_v30, 16  ;;  %v1036_v50 = vshll.u32 %v9589_v49, 16 }
  0x7b   : > { %v2219_v11 = vor.u32 %v2218_v57, %v2215_v38  ;;  %v2232_v15 = vshll.u32 %v9592_v36, 16  ;;  %v8284_v62 = vcombine.low %v2201_v22, %v2211_v16  ;;  %v1022_v47 = vrot.slane %v1020_v20, 5  ;;  %v906_v19 = vld [vmem:[#allocation2 + $0x44] sm:$0x1]  ;;  %v2527_v38 = vld [vmem:[#allocation2 + $0x3c] sm:$0xe] }
  0x7c   : > { %v2230_v51 = vrot.slane %v2229_v35, 4  ;;  %v1028_v2 = vrot.slane %v1026_v40, 5  ;;  %v1032_v42 = vrot.slane %v1030_v43, 4  ;;  %v8156_v13 = vrot.slane %v2526_v46, 9 }
  0x7d   : > { %v2220_v53 = vrot.slane %v2219_v11, 4  ;;  %v2234_v6 = vrot.slane %v2232_v15, 5  ;;  %3154 = vrot.lane.b32.xlu1 %v8253_v54, %s9071_s22  ;;  %3328 = vrot.lane.b32.xlu0 %v8284_v62, %s9074_s8  ;;  %v1023_v12 = vor.u32 %v1022_v47, %v1019_v3  ;;  %v2604_v14 = vrot.slane %v9547_v24, 5  ;;  %v1309_v3 = vld [vmem:[#allocation2 + $0x3c] sm:$0xe] }
  0x7e   : > { %v2607_v59 = vrot.slane %v9567_v61, 5  ;;  %v1033_v44 = vor.u32 %v1032_v42, %v1028_v2  ;;  %v1038_v55 = vrot.slane %v1036_v50, 5  ;;  %v1041_v24 = vshrl.u32 %v879_v26, 16  ;;  %v1308_v15 = vld [vmem:[#allocation2 + $0x30] sm:$0xe] }
  0x7f   : > { %v2225_v18 = vsel %vm9313_vm14, %v2220_v53, %v2224_v60  ;;  %v2235_v5 = vsel %vm9313_vm14, %v2230_v51, %v2234_v6  ;;  %v1024_v54 = vrot.slane %v1023_v12, 4  ;;  %v2605_v32 = vsel %vm9226_vm9, %v8156_v13, %v2604_v14 }
  0x80   : > { %v8285_v9 = vcombine.low %v2225_v18, %v2235_v5  ;;  %v2606_v21 = vrot.slane %v2604_v14, 4  ;;  %v1034_v17 = vrot.slane %v1033_v44, 4  ;;  %v1044_v27 = vshll.u32 %v879_v26, 16  ;;  %v289_v18 = vld [vmem:[%s9207_s17 + $0x2c] sm:$0xf] }
  0x81   : > { %v1050_v61 = vshll.u32 %v880_v58, 16  ;;  %3250 = vrot.lane.b32.xlu1 %v8269_v48, %s9069_s20  ;;  %v1029_v52 = vsel %vm9313_vm14, %v1024_v54, %v1028_v2  ;;  %v1054_v37 = vshrl.u32 %v880_v58, 16  ;;  %v1060_v22 = vshll.u32 %v906_v19, 16  ;;  %v1491_v44 = vld [vmem:[#allocation2 + $0x3c] sm:$0xf] }
  0x82   : > { %v2608_v60 = vsel %vm9226_vm9, %v2606_v21, %v2607_v59  ;;  %v1039_v57 = vsel %vm9313_vm14, %v1034_v17, %v1038_v55  ;;  %v1043_v34 = vrot.slane %v1041_v24, 4  ;;  %v1046_v35 = vrot.slane %v1044_v27, 5  ;;  %v792_v54 = vld [vmem:[#allocation2 + $0x48] sm:$0xf]  ;;  %v9641_v21 = vld [vmem:[#allocation2 + $0x4] sm:$0xf] }
  0x83   : > { %v8300_v28 = vcombine.low %v2605_v32, %v2608_v60  ;;  %v8190_v20 = vcombine.low %v1029_v52, %v1039_v57  ;;  %v1052_v40 = vrot.slane %v1050_v61, 5  ;;  %v1056_v11 = vrot.slane %v1054_v37, 4  ;;  %v9639_v32 = vld [vmem:[#allocation2 + $0x40] sm:$0xf] }
  0x84   : > { %v1062_v48 = vrot.slane %v1060_v22, 5  ;;  %v1047_v16 = vor.u32 %v1046_v35, %v1043_v34  ;;  %v8157_v43 = vrot.slane %v2527_v38, 9  ;;  %v2611_v46 = vrot.slane %v9571_v7, 5  ;;  %v396_v38 = vld [vmem:[#allocation2 + $0x50] sm:$0x1] }
  0x85   : > { %3408 = vrot.lane.b32.xlu0 %v8300_v28, %s9072_s23  ;;  %v2614_v51 = vrot.slane %v9592_v36, 5  ;;  %3330 = vrot.lane.b32.xlu1 %v8285_v9, %s9074_s8  ;;  %v1057_v62 = vor.u32 %v1056_v11, %v1052_v40  ;;  %v8127_v47 = vrot.slane %v1309_v3, 9  ;;  %v1408_v2 = vrot.slane %v880_v58, 5  ;;  %v1519_v3 = vld [vmem:[#allocation2 + $0x44] sm:$0x1] }
  0x86   : > { %v1411_v53 = vrot.slane %v906_v19, 5  ;;  %v1048_v6 = vrot.slane %v1047_v16, 4  ;;  %v2612_v42 = vsel %vm9226_vm9, %v8157_v43, %v2611_v46  ;;  %v2613_v50 = vrot.slane %v2611_v46, 4 }
  0x87   : > { %v8126_v12 = vrot.slane %v1308_v15, 9  ;;  %v1058_v13 = vrot.slane %v1057_v62, 4  ;;  %v1409_v14 = vsel %vm9226_vm9, %v8127_v47, %v1408_v2  ;;  %v1410_v7 = vrot.slane %v1408_v2, 4 }
  0x88   : > { %v1401_v36 = vrot.slane %v9584_v30, 5  ;;  %v1053_v59 = vsel %vm9313_vm14, %v1048_v6, %v1052_v40  ;;  %v2615_v58 = vsel %vm9226_vm9, %v2613_v50, %v2614_v51  ;;  %v1404_v26 = vrot.slane %v9589_v49, 5  ;;  %v9643_v49 = vld [vmem:[#allocation2] sm:$0xf]  ;;  %v339_v51 = vld [vmem:[#allocation2 + $0x54] sm:$0x1] }
  0x89   : > { %v522_v5 = vrot.slane %v520_v25, 7  ;;  %2820 = vrot.lane.b32.xlu1 %v8190_v20, %s9070_s21  ;;  %v1063_v55 = vsel %vm9313_vm14, %v1058_v13, %v1062_v48  ;;  %v8301_v19 = vcombine.low %v2612_v42, %v2615_v58  ;;  %v1412_v9 = vsel %vm9226_vm9, %v1410_v7, %v1411_v53  ;;  %v290_v20 = vld [vmem:[%s9207_s17 + $0x30] sm:$0xf]  ;;  %v1919_v48 = vld [vmem:[#allocation2 + $0x3c] sm:$0xe] }
  0x8a   : > { %v8170_v25 = vcombine.low %v9643_v49, %v9641_v21  ;;  %v8191_v17 = vcombine.low %v1053_v59, %v1063_v55  ;;  %v1402_v24 = vsel %vm9226_vm9, %v8126_v12, %v1401_v36  ;;  %v1403_v27 = vrot.slane %v1401_v36, 4  ;;  %v291_v13 = vld [vmem:[%s9207_s17 + $0x34] sm:$0xf]  ;;  %v399_v58 = vld [vmem:[#allocation2 + $0x5c] sm:$0x1] }
  0x8b   : > { %v525_v61 = vor.u32 %v523_v41, %v522_v5  ;;  %3410 = vrot.lane.b32.xlu0 %v8301_v19, %s9072_s23  ;;  %v8207_v52 = vcombine.low %v1409_v14, %v1412_v9  ;;  %v528_v60 = vshrl.u32 %v289_v18, 16  ;;  %v531_v37 = vshll.u32 %v289_v18, 16 }
  0x8c   : > { %v1628_v22 = vshrl.u32 %v1491_v44, 16  ;;  %v1405_v57 = vsel %vm9226_vm9, %v1403_v27, %v1404_v26  ;;  %v1631_v34 = vshll.u32 %v1491_v44, 16  ;;  %v1641_v35 = vshrl.u32 %v9639_v32, 16 }
  0x8d   : > { %v793_v28 = vsel %vm9232_vm10, %v525_v61, %v792_v54  ;;  %2822 = vrot.lane.b32.xlu1 %v8191_v17, %s9070_s21  ;;  %v8206_v4 = vcombine.low %v1402_v24, %v1405_v57  ;;  %v526_v41 = vrot.slane %v522_v5, 4  ;;  %v530_v40 = vrot.slane %v528_v60, 7 }
  0x8e   : > { %794 = vst [vmem:[#allocation2 + $0x48] sm:$0xf] %v793_v28  ;;  %v1630_v11 = vrot.slane %v1628_v22, 4  ;;  %v1633_v15 = vrot.slane %v1631_v34, 5  ;;  %v397_v16 = vsel %vm9200_vm5, 0, %v396_v38  ;;  %v1637_v43 = vshll.u32 %v9639_v32, 16 }
  0x8f   : > { %v1643_v46 = vrot.slane %v1641_v35, 4  ;;  %2900 = vrot.lane.b32.xlu0 %v8206_v4, %s9067_s18  ;;  %v533_v62 = vor.u32 %v531_v37, %v530_v40  ;;  %v535_v47 = vrot.slane %v530_v40, 4  ;;  %v8222_v2 = vcombine.low %v1491_v44, %v9639_v32  ;;  %398 = vst [vmem:[#allocation2 + $0x50] sm:$0x1] %v397_v16 }
  0x90   : > { %v1647_v53 = vshll.u32 %v1519_v3, 16  ;;  %v1634_v6 = vor.u32 %v1633_v15, %v1630_v11  ;;  %v1639_v42 = vrot.slane %v1637_v43, 5  ;;  %v8142_v50 = vrot.slane %v1919_v48, 9 }
  0x91   : > { %v2009_v12 = vrot.slane %v9639_v32, 5  ;;  %2902 = vrot.lane.b32.xlu1 %v8207_v52, %s9067_s18  ;;  %v534_v14 = vsel %vm9238_vm11, %v526_v41, %v533_v62  ;;  %v2012_v7 = vrot.slane %v1519_v3, 5  ;;  %v340_v36 = vsel %vm9172_vm3, 0, %v339_v51 }
  0x92   : > { %v537_v59 = vshrl.u32 %v290_v20, 16  ;;  %795 = vst.msk [vmem:[#allocation2 + $0x4c] sm:$0xf] %vm310_vm0, %v534_v14  ;;  %v1635_v26 = vrot.slane %v1634_v6, 4  ;;  %v1644_v18 = vor.u32 %v1643_v46, %v1639_v42  ;;  %v1649_v5 = vrot.slane %v1647_v53, 5 }
  0x93   : > { %v2011_v44 = vrot.slane %v2009_v12, 4  ;;  %341 = vst [vmem:[#allocation2 + $0x54] sm:$0x1] %v340_v36  ;;  %2996 = vrot.lane.b32.xlu0 %v8222_v2, %s9068_s19  ;;  %v540_v19 = vshll.u32 %v290_v20, 16  ;;  %v545_v9 = vshrl.u32 %v291_v13, 16  ;;  %v548_v54 = vshll.u32 %v291_v13, 16 }
  0x94   : > { %v539_v55 = vrot.slane %v537_v59, 7  ;;  %v1640_v17 = vsel %vm9313_vm14, %v1635_v26, %v1639_v42  ;;  %v1645_v24 = vrot.slane %v1644_v18, 4  ;;  %v2010_v61 = vsel %vm9226_vm9, %v8142_v50, %v2009_v12  ;;  %v9690_v53 = vld [vmem:[#allocation2 + $0x10] sm:$0xf] }
  0x95   : > { %v1493_v32 = vld [vmem:[#allocation2 + $0x48] sm:$0xf]  ;;  %v400_v52 = vsel %vm9200_vm5, 0, %v399_v58  ;;  %v2013_v38 = vsel %vm9226_vm9, %v2011_v44, %v2012_v7  ;;  %v547_v20 = vrot.slane %v545_v9, 7  ;;  %vm3436_vm15 = vcmask 64512  }
  0x96   : > { %v1920_v27 = vld [vmem:[#allocation2 + $0x48] sm:$0xe]  ;;  %v1652_v60 = vshrl.u32 %v1493_v32, 16  ;;  %v1655_v37 = vshll.u32 %v1493_v32, 16  ;;  %401 = vst [vmem:[#allocation2 + $0x5c] sm:$0x1] %v400_v52  ;;  %v1650_v34 = vsel %vm9313_vm14, %v1645_v24, %v1649_v5  ;;  %v542_v35 = vor.u32 %v540_v19, %v539_v55 }
  0x97   : > { %v8143_v22 = vrot.slane %v1920_v27, 9  ;;  %v9681_v57 = vld [vmem:[#allocation2 + $0x48] sm:$0xf]  ;;  %v796_v28 = vld [vmem:[#allocation2 + $0x50] sm:$0x1]  ;;  %v543_v3 = vrot.slane %v539_v55, 4  ;;  %v8238_v11 = vcombine.low %v1640_v17, %v1650_v34  ;;  %v8254_v48 = vcombine.low %v2010_v61, %v2013_v38 }
  0x98   : > { %v1654_v4 = vrot.slane %v1652_v60, 4  ;;  %v1657_v41 = vrot.slane %v1655_v37, 5  ;;  %v797_v40 = vsel %vm9172_vm3, %v535_v47, %v796_v28  ;;  %v550_v15 = vor.u32 %v548_v54, %v547_v20  ;;  %v881_v26 = vld [vmem:[#allocation2 + $0x48] sm:$0xf] }
  0x99   : > { %798 = vst [vmem:[#allocation2 + $0x50] sm:$0x1] %v797_v40  ;;  %v552_v16 = vrot.slane %v547_v20, 4  ;;  %v2237_v43 = vshrl.u32 %v9681_v57, 16  ;;  %v1494_v46 = vld [vmem:[#allocation2 + $0x4c] sm:$0xf]  ;;  %3076 = vrot.lane.b32.xlu0 %v8238_v11, %s9073_s29 }
  0x9a   : > { %v1658_v51 = vor.u32 %v1657_v41, %v1654_v4  ;;  %v799_v62 = vld [vmem:[#allocation2 + $0x54] sm:$0xf]  ;;  %v2240_v2 = vshll.u32 %v9681_v57, 16  ;;  %v1665_v42 = vshrl.u32 %v1494_v46, 16  ;;  %v8223_v50 = vcombine.low %v1493_v32, %v1494_v46  ;;  %v9696_v14 = vld [vmem:[#allocation2 + $0x4c] sm:$0xf] }
  0x9b   : > { %v1661_v12 = vshll.u32 %v1494_v46, 16  ;;  %v2016_v13 = vrot.slane %v1494_v46, 5  ;;  %v551_v36 = vsel %vm9238_vm11, %v543_v3, %v550_v15  ;;  %v800_v59 = vsel %vm9232_vm10, %v542_v35, %v799_v62  ;;  %v9717_v52 = vld [vmem:[#allocation2 + $0x4c] sm:$0xf] }
  0x9c   : > { %v1659_v7 = vrot.slane %v1658_v51, 4  ;;  %v2239_v58 = vrot.slane %v2237_v43, 4  ;;  %2998 = vrot.lane.b32.xlu1 %v8223_v50, %s9068_s19  ;;  %v1667_v5 = vrot.slane %v1665_v42, 4  ;;  %801 = vst [vmem:[#allocation2 + $0x54] sm:$0xf] %v800_v59  ;;  %v2242_v9 = vrot.slane %v2240_v2, 5 }
  0x9d   : > { %v1663_v18 = vrot.slane %v1661_v12, 5  ;;  %v9705_v44 = vsel %vm9226_vm9, %v8143_v22, %v2016_v13  ;;  %802 = vst.msk [vmem:[#allocation2 + $0x58] sm:$0xf] %vm310_vm0, %v551_v36  ;;  %v803_v55 = vld [vmem:[#allocation2 + $0x5c] sm:$0x1]  ;;  %3156 = vrot.lane.b32.xlu0 %v8254_v48, %s9071_s22  ;;  %v2250_v54 = vshrl.u32 %v9696_v14, 16  ;;  %v8270_v32 = vcombine.low %v9681_v57, %v9696_v14 }
  0x9e   : > { %v804_v17 = vsel %vm9172_vm3, %v552_v16, %v803_v55  ;;  %v2018_v27 = vrot.slane %v2016_v13, 4  ;;  %v2246_v61 = vshll.u32 %v9696_v14, 16  ;;  %v1065_v60 = vshrl.u32 %v881_v26, 16  ;;  %v2528_v55 = vld [vmem:[#allocation2 + $0x48] sm:$0xe] }
  0x9f   : > { %v1668_v24 = vor.u32 %v1667_v5, %v1663_v18  ;;  %805 = vst [vmem:[#allocation2 + $0x5c] sm:$0x1] %v804_v17  ;;  %v1664_v22 = vsel %vm9313_vm14, %v1659_v7, %v1663_v18  ;;  %v2243_v28 = vor.u32 %v2242_v9, %v2239_v58  ;;  %v2252_v34 = vrot.slane %v2250_v54, 4 }
  0xa0   : > { %v1520_v37 = vld [vmem:[#allocation2 + $0x50] sm:$0x1]  ;;  %v1068_v57 = vshll.u32 %v881_v26, 16  ;;  %v2248_v4 = vrot.slane %v2246_v61, 5  ;;  %v1067_v11 = vrot.slane %v1065_v60, 4  ;;  %v1074_v46 = vshll.u32 %v9717_v52, 16 }
  0xa1   : > { %v9721_v38 = vld [vmem:[#allocation2 + $0x50] sm:$0x1]  ;;  %v1669_v35 = vrot.slane %v1668_v24, 4  ;;  %v1671_v3 = vshll.u32 %v1520_v37, 16  ;;  %v2019_v20 = vrot.slane %v1520_v37, 5  ;;  %3252 = vrot.lane.b32.xlu0 %v8270_v32, %s9069_s20  ;;  %v2244_v41 = vrot.slane %v2243_v28, 4 }
  0xa2   : > { %v2256_v40 = vshll.u32 %v9721_v38, 16  ;;  %v1070_v48 = vrot.slane %v1068_v57, 5  ;;  %v2253_v43 = vor.u32 %v2252_v34, %v2248_v4  ;;  %v9741_v24 = vld [vmem:[#allocation2 + $0x50] sm:$0x1]  ;;  %v1076_v37 = vrot.slane %v1074_v46, 5 }
  0xa3   : > { %v1673_v15 = vrot.slane %v1671_v3, 5  ;;  %v2020_v16 = vsel %vm9226_vm9, %v2018_v27, %v2019_v20  ;;  %v2102_v62 = vld [vmem:[#allocation2 + $0x54] sm:$0xf]  ;;  %v2249_v42 = vsel %vm9313_vm14, %v2244_v41, %v2248_v4  ;;  %v1078_v57 = vshrl.u32 %v9717_v52, 16 }
  0xa4   : > { %v8255_v51 = vcombine.low %v9705_v44, %v2020_v16  ;;  %v9729_v2 = vld [vmem:[#allocation2 + $0x58] sm:$0xf]  ;;  %v2258_v50 = vrot.slane %v2256_v40, 5  ;;  %v1071_v12 = vor.u32 %v1070_v48, %v1067_v11  ;;  %v2261_v7 = vshrl.u32 %v2102_v62, 16  ;;  %v9750_v40 = vpop.permute.xlu1 %2892 }
  0xa5   : > { %v1674_v13 = vsel %vm9313_vm14, %v1669_v35, %v1673_v15  ;;  %v2264_v36 = vshll.u32 %v2102_v62, 16  ;;  %v2274_v59 = vshrl.u32 %v9729_v2, 16  ;;  %v8271_v26 = vcombine.low %v2102_v62, %v9729_v2  ;;  %v883_v35 = vld [vmem:[#allocation2 + $0x54] sm:$0xf] }
  0xa6   : > { %v8239_v58 = vcombine.low %v1664_v22, %v1674_v13  ;;  %v9737_v18 = vld [vmem:[#allocation2 + $0x5c] sm:$0x1]  ;;  %v2270_v5 = vshll.u32 %v9729_v2, 16  ;;  %v2254_v44 = vrot.slane %v2253_v43, 4  ;;  %v2263_v9 = vrot.slane %v2261_v7, 4 }
  0xa7   : > { %v2266_v54 = vrot.slane %v2264_v36, 5  ;;  %v2276_v32 = vrot.slane %v2274_v59, 4  ;;  %v2280_v17 = vshll.u32 %v9737_v18, 16  ;;  %v1072_v60 = vrot.slane %v1071_v12, 4  ;;  %v884_v43 = vld [vmem:[#allocation2 + $0x58] sm:$0xf]  ;;  %v9756_v12 = vpop.permute.xlu0 %2988 }
  0xa8   : > { %3078 = vrot.lane.b32.xlu1 %v8239_v58, %s9073_s29  ;;  %v2272_v27 = vrot.slane %v2270_v5, 5  ;;  %v2259_v61 = vsel %vm9313_vm14, %v2254_v44, %v2258_v50  ;;  %v1084_v4 = vshll.u32 %v9741_v24, 16  ;;  %v8158_v41 = vrot.slane %v2528_v55, 9  ;;  %v2529_v44 = vld [vmem:[#allocation2 + $0x54] sm:$0xe] }
  0xa9   : > { %v2267_v22 = vor.u32 %v2266_v54, %v2263_v9  ;;  %v2282_v28 = vrot.slane %v2280_v17, 5  ;;  %v8286_v34 = vcombine.low %v2249_v42, %v2259_v61  ;;  %v1077_v20 = vsel %vm9313_vm14, %v1072_v60, %v1076_v37 }
  0xaa   : > { %v2277_v3 = vor.u32 %v2276_v32, %v2272_v27  ;;  %v1080_v48 = vrot.slane %v1078_v57, 4  ;;  %v2618_v15 = vrot.slane %v9696_v14, 5  ;;  %v2621_v16 = vrot.slane %v9721_v38, 5  ;;  %v908_v14 = vld [vmem:[#allocation2 + $0x5c] sm:$0x1] }
  0xab   : > { %v2268_v11 = vrot.slane %v2267_v22, 4  ;;  %3332 = vrot.lane.b32.xlu0 %v8286_v34, %s9074_s8  ;;  %v1086_v62 = vrot.slane %v1084_v4, 5  ;;  %v1089_v42 = vshrl.u32 %v883_v35, 16  ;;  %v1092_v50 = vshll.u32 %v883_v35, 16  ;;  %v9767_v22 = vpop.permute.xlu1 %2990 }
  0xac   : > { %3158 = vrot.lane.b32.xlu1 %v8255_v51, %s9071_s22  ;;  %v2278_v46 = vrot.slane %v2277_v3, 4  ;;  %v1081_v7 = vor.u32 %v1080_v48, %v1076_v37  ;;  %v2619_v36 = vsel %vm9226_vm9, %v8158_v41, %v2618_v15  ;;  %v2620_v59 = vrot.slane %v2618_v15, 4  ;;  %v1311_v37 = vld [vmem:[#allocation2 + $0x54] sm:$0xe]  ;;  %v1310_v3 = vld [vmem:[#allocation2 + $0x48] sm:$0xe]  ;;  %v9774_v48 = vpop.permute.xlu0 %3244 }
  0xad   : > { %v2273_v13 = vsel %vm9313_vm14, %v2268_v11, %v2272_v27  ;;  %v1091_v58 = vrot.slane %v1089_v42, 4  ;;  %v1094_v51 = vrot.slane %v1092_v50, 5  ;;  %v1098_v5 = vshll.u32 %v884_v43, 16  ;;  %v342_v42 = vld [vmem:[#allocation2 + $0x60] sm:$0x1] }
  0xae   : > { %v2283_v38 = vsel %vm9313_vm14, %v2278_v46, %v2282_v28  ;;  %v1082_v9 = vrot.slane %v1081_v7, 4  ;;  %v2622_v54 = vsel %vm9226_vm9, %v2620_v59, %v2621_v16  ;;  %v1102_v32 = vshrl.u32 %v884_v43, 16  ;;  %v292_v7 = vld [vmem:[%s9207_s17 + $0x38] sm:$0xf] }
  0xaf   : > { %v8287_v55 = vcombine.low %v2273_v13, %v2283_v38  ;;  %v8302_v17 = vcombine.low %v2619_v36, %v2622_v54  ;;  %v1095_v27 = vor.u32 %v1094_v51, %v1091_v58  ;;  %v1100_v61 = vrot.slane %v1098_v5, 5  ;;  %v293_v58 = vld [vmem:[%s9207_s17 + $0x3c] sm:$0xf]  ;;  %v1495_v54 = vld [vmem:[#allocation2 + $0x54] sm:$0xf] }
  0xb0   : > { %3254 = vrot.lane.b32.xlu1 %v8271_v26, %s9069_s20  ;;  %v1108_v60 = vshll.u32 %v908_v14, 16  ;;  %v1087_v28 = vsel %vm9313_vm14, %v1082_v9, %v1086_v62  ;;  %v1104_v34 = vrot.slane %v1102_v32, 4  ;;  %v8159_v57 = vrot.slane %v2529_v44, 9 }
  0xb1   : > { %v2625_v35 = vrot.slane %v9729_v2, 5  ;;  %v8192_v4 = vcombine.low %v1077_v20, %v1087_v28  ;;  %3412 = vrot.lane.b32.xlu0 %v8302_v17, %s9072_s23  ;;  %v1096_v26 = vrot.slane %v1095_v27, 4  ;;  %v2628_v11 = vrot.slane %v9737_v18, 5 }
  0xb2   : > { %v1110_v41 = vrot.slane %v1108_v60, 5  ;;  %v1105_v15 = vor.u32 %v1104_v34, %v1100_v61  ;;  %v8129_v62 = vrot.slane %v1311_v37, 9  ;;  %v1422_v20 = vrot.slane %v884_v43, 5  ;;  %v1496_v60 = vld [vmem:[#allocation2 + $0x58] sm:$0xf]  ;;  %v9801_v37 = vpop.permute.xlu0 %2812 }
  0xb3   : > { %v2626_v16 = vsel %vm9226_vm9, %v8159_v57, %v2625_v35  ;;  %v2627_v46 = vrot.slane %v2625_v35, 4  ;;  %v1101_v2 = vsel %vm9313_vm14, %v1096_v26, %v1100_v61  ;;  %v1425_v50 = vrot.slane %v908_v14, 5  ;;  %v9791_v14 = vpop.permute.xlu1 %3246 }
  0xb4   : > { %3334 = vrot.lane.b32.xlu1 %v8287_v55, %s9074_s8  ;;  %v8128_v13 = vrot.slane %v1310_v3, 9  ;;  %v1106_v18 = vrot.slane %v1105_v15, 4  ;;  %v1415_v59 = vrot.slane %v9717_v52, 5  ;;  %v1418_v38 = vrot.slane %v9741_v24, 5  ;;  %v402_v3 = vld [vmem:[#allocation2 + $0x68] sm:$0x1] }
  0xb5   : > { %v2629_v36 = vsel %vm9226_vm9, %v2627_v46, %v2628_v11  ;;  %v1423_v5 = vsel %vm9226_vm9, %v8129_v62, %v1422_v20  ;;  %v1424_v44 = vrot.slane %v1422_v20, 4  ;;  %v343_v43 = vsel %vm9172_vm3, 0, %v342_v42  ;;  %v1521_v15 = vld [vmem:[#allocation2 + $0x5c] sm:$0x1] }
  0xb6   : > { %v8303_v51 = vcombine.low %v2626_v16, %v2629_v36  ;;  %v1111_v55 = vsel %vm9313_vm14, %v1106_v18, %v1110_v41  ;;  %v1416_v9 = vsel %vm9226_vm9, %v8128_v13, %v1415_v59  ;;  %v1417_v52 = vrot.slane %v1415_v59, 4  ;;  %344 = vst [vmem:[#allocation2 + $0x60] sm:$0x1] %v343_v43  ;;  %v294_v18 = vld [vmem:[%s9207_s17 + $0x40] sm:$0xf] }
  0xb7   : > { %v554_v24 = vshrl.u32 %v292_v7, 16  ;;  %v8193_v32 = vcombine.low %v1101_v2, %v1111_v55  ;;  %v1426_v17 = vsel %vm9226_vm9, %v1424_v44, %v1425_v50  ;;  %v557_v27 = vshll.u32 %v292_v7, 16  ;;  %v1921_v2 = vld [vmem:[#allocation2 + $0x54] sm:$0xe]  ;;  %v9812_v36 = vpop.permute.xlu1 %2894 }
  0xb8   : > { %2824 = vrot.lane.b32.xlu1 %v8192_v4, %s9070_s21  ;;  %3414 = vrot.lane.b32.xlu0 %v8303_v51, %s9072_s23  ;;  %v562_v61 = vshrl.u32 %v293_v58, 16  ;;  %v8209_v28 = vcombine.low %v1423_v5, %v1426_v17  ;;  %v1419_v34 = vsel %vm9226_vm9, %v1417_v52, %v1418_v38  ;;  %v565_v35 = vshll.u32 %v293_v58, 16  ;;  %v345_v5 = vld [vmem:[#allocation2 + $0x6c] sm:$0x1] }
  0xb9   : > { %v556_v57 = vrot.slane %v554_v24, 7  ;;  %v8208_v26 = vcombine.low %v1416_v9, %v1419_v34  ;;  %v1676_v41 = vshrl.u32 %v1495_v54, 16  ;;  %v1679_v11 = vshll.u32 %v1495_v54, 16  ;;  %v295_v24 = vld [vmem:[%s9207_s17 + $0x44] sm:$0xf] }
  0xba   : > { %v9805_v4 = vrot.slane %v562_v61, 7  ;;  %v1689_v62 = vshrl.u32 %v1496_v60, 16  ;;  %v8224_v42 = vcombine.low %v1495_v54, %v1496_v60  ;;  %v403_v59 = vsel %vm9200_vm5, 0, %v402_v3  ;;  %v9819_v54 = vpop.permute.xlu0 %3148  ;;  %v405_v34 = vld [vmem:[#allocation2 + $0x74] sm:$0x1] }
  0xbb   : > { %v559_v16 = vor.u32 %v557_v27, %v556_v57  ;;  %v560_v46 = vrot.slane %v556_v57, 4  ;;  %v1678_v13 = vrot.slane %v1676_v41, 4  ;;  %v1681_v7 = vrot.slane %v1679_v11, 5  ;;  %404 = vst [vmem:[#allocation2 + $0x68] sm:$0x1] %v403_v59 }
  0xbc   : > { %2826 = vrot.lane.b32.xlu1 %v8193_v32, %s9070_s21  ;;  %2904 = vrot.lane.b32.xlu0 %v8208_v26, %s9067_s18  ;;  %v567_v20 = vor.u32 %v565_v35, %v9805_v4  ;;  %v569_v50 = vrot.slane %v9805_v4, 4  ;;  %v1685_v38 = vshll.u32 %v1496_v60, 16  ;;  %v1691_v58 = vrot.slane %v1689_v62, 4  ;;  %v348_v26 = vld [vmem:[#allocation2 + $0x78] sm:$0x1] }
  0xbd   : > { %v1695_v51 = vshll.u32 %v1521_v15, 16  ;;  %v806_v43 = vld [vmem:[#allocation2 + $0x60] sm:$0xf]  ;;  %v1682_v55 = vor.u32 %v1681_v7, %v1678_v13  ;;  %v8144_v9 = vrot.slane %v1921_v2, 9  ;;  %v2023_v52 = vrot.slane %v1496_v60, 5  ;;  %v9843_v2 = vpop.permute.xlu1 %3150 }
  0xbe   : > { %v568_v44 = vsel %vm9238_vm11, %v560_v46, %v567_v20  ;;  %v807_v32 = vsel %vm9232_vm10, %v559_v16, %v806_v43  ;;  %v1687_v17 = vrot.slane %v1685_v38, 5  ;;  %v2026_v61 = vrot.slane %v1521_v15, 5  ;;  %v9846_v59 = vpop.permute.xlu0 %3404 }
  0xbf   : > { %809 = vst.msk [vmem:[#allocation2 + $0x64] sm:$0xf] %vm310_vm0, %v568_v44  ;;  %v1697_v27 = vrot.slane %v1695_v51, 5  ;;  %808 = vst [vmem:[#allocation2 + $0x60] sm:$0xf] %v807_v32  ;;  %v1683_v57 = vrot.slane %v1682_v55, 4  ;;  %v9828_v60 = vsel %vm9226_vm9, %v8144_v9, %v2023_v52 }
  0xc0   : > { %2906 = vrot.lane.b32.xlu1 %v8209_v28, %s9067_s18  ;;  %3000 = vrot.lane.b32.xlu0 %v8224_v42, %s9068_s19  ;;  %v2025_v35 = vrot.slane %v2023_v52, 4  ;;  %v346_v3 = vsel %vm9172_vm3, 0, %v345_v5  ;;  %v1692_v4 = vor.u32 %v1691_v58, %v1687_v17  ;;  %v571_v41 = vshrl.u32 %v294_v18, 16  ;;  %v9835_v28 = vld [vmem:[%s13196_s1 + $0x20] ss:$0 sps:$4 sm:$0xff]  }
  0xc1   : > { %347 = vst [vmem:[#allocation2 + $0x6c] sm:$0x1] %v346_v3  ;;  %v574_v11 = vshll.u32 %v294_v18, 16  ;;  %v579_v15 = vshrl.u32 %v295_v24, 16  ;;  %v1688_v16 = vsel %vm9313_vm14, %v1683_v57, %v1687_v17  ;;  %v582_v62 = vshll.u32 %v295_v24, 16 }
  0xc2   : > { %v2027_v46 = vsel %vm9226_vm9, %v2025_v35, %v2026_v61  ;;  %v406_v42 = vsel %vm9200_vm5, 0, %v405_v34  ;;  %v1693_v20 = vrot.slane %v1692_v4, 4  ;;  %v573_v7 = vrot.slane %v571_v41, 7  ;;  %v810_v58 = vld [vmem:[#allocation2 + $0x68] sm:$0x1] }
  0xc3   : > { %v8256_v13 = vcombine.low %v9828_v60, %v2027_v46  ;;  %v581_v18 = vrot.slane %v579_v15, 7  ;;  %407 = vst [vmem:[#allocation2 + $0x74] sm:$0x1] %v406_v42  ;;  %vm3485_vm1 = vcmask 130048   ;;  %vm13205_vm2 = vcmask 1043456  }
  0xc4   : > { %v349_v38 = vsel %vm9172_vm3, 0, %v348_v26  ;;  %v1698_v51 = vsel %vm9313_vm14, %v1693_v20, %v1697_v27  ;;  %v576_v5 = vor.u32 %v574_v11, %v573_v7  ;;  %v577_v44 = vrot.slane %v573_v7, 4  ;;  %8828 = vmatprep.subr.msk.bf16.mxu0 %vm13205_vm2, %v9835_v28 }
  0xc5   : > { %v584_v43 = vor.u32 %v582_v62, %v581_v18  ;;  %350 = vst [vmem:[#allocation2 + $0x78] sm:$0x1] %v349_v38  ;;  %v811_v9 = vsel %vm9172_vm3, %v569_v50, %v810_v58  ;;  %v8240_v52 = vcombine.low %v1688_v16, %v1698_v51  ;;  %v586_v24 = vrot.slane %v581_v18, 4 }
  0xc6   : > { %v1498_v55 = vld [vmem:[#allocation2 + $0x64] sm:$0xf]  ;;  %v3439_v17 = vsel %vm3436_vm15, %v8170_v25, %v9801_v37  ;;  %v1497_v27 = vld [vmem:[#allocation2 + $0x60] sm:$0xf]  ;;  %812 = vst [vmem:[#allocation2 + $0x68] sm:$0x1] %v811_v9  ;;  %v9871_v25 = vpop.permute.xlu1 %3070 }
  0xc7   : > { %v9856_v32 = vld [vmem:[#allocation2 + $0x64] sm:$0xf]  ;;  %v1713_v61 = vshrl.u32 %v1498_v55, 16  ;;  %v1709_v34 = vshll.u32 %v1498_v55, 16  ;;  %v1922_v57 = vld [vmem:[#allocation2 + $0x60] sm:$0xe]  ;;  %v585_v60 = vsel %vm9238_vm11, %v577_v44, %v584_v43  ;;  %v9867_v50 = vsel %vm3485_vm1, %v3439_v17, %v9750_v40  ;;  %3080 = vrot.lane.b32.xlu0 %v8240_v52, %s9073_s29 }
  0xc8   : > { %v1700_v35 = vshrl.u32 %v1497_v27, 16  ;;  %v1703_v3 = vshll.u32 %v1497_v27, 16  ;;  %v8225_v26 = vcombine.low %v1497_v27, %v1498_v55  ;;  %v8145_v21 = vrot.slane %v1922_v57, 9  ;;  %v813_v49 = vld [vmem:[#allocation2 + $0x6c] sm:$0xf] }
  0xc9   : > { %816 = vst.msk [vmem:[#allocation2 + $0x70] sm:$0xf] %vm310_vm0, %v585_v60  ;;  %v9873_v37 = vrot.slane %v1709_v34, 5  ;;  %v1715_v4 = vrot.slane %v1713_v61, 4  ;;  %v2030_v41 = vrot.slane %v1498_v55, 5  ;;  %v814_v11 = vsel %vm9232_vm10, %v576_v5, %v813_v49  ;;  %v9878_v20 = vpop.permute.xlu0 %3406 }
  0xca   : > { %v2104_v40 = vld [vmem:[#allocation2 + $0x60] sm:$0xf]  ;;  %v1702_v15 = vrot.slane %v1700_v35, 4  ;;  %v1705_v16 = vrot.slane %v1703_v3, 5  ;;  %3002 = vrot.lane.b32.xlu1 %v8225_v26, %s9068_s19  ;;  %815 = vst [vmem:[#allocation2 + $0x6c] sm:$0xf] %v814_v11 }
  0xcb   : > { %v2285_v46 = vshrl.u32 %v2104_v40, 16  ;;  %v2288_v62 = vshll.u32 %v2104_v40, 16  ;;  %v817_v42 = vld [vmem:[#allocation2 + $0x74] sm:$0x1]  ;;  %v1716_v7 = vor.u32 %v1715_v4, %v9873_v37  ;;  %v9883_v18 = vsel %vm9226_vm9, %v8145_v21, %v2030_v41  ;;  %v9886_v51 = vld [vmem:[#allocation2 + $0x60] sm:$0xf]  ;;  %3160 = vrot.lane.b32.xlu0 %v8256_v13, %s9071_s22  ;;  %v9896_v13 = vpop.permute.xlu1 %3326 }
  0xcc   : > { %v2032_v38 = vrot.slane %v2030_v41, 4  ;;  %v2298_v58 = vshrl.u32 %v9856_v32, 16  ;;  %v1706_v5 = vor.u32 %v1705_v16, %v1702_v15  ;;  %v8272_v55 = vcombine.low %v2104_v40, %v9856_v32  ;;  %v9900_v26 = vld [vmem:[#allocation2 + $0x30] sm:$0xf] }
  0xcd   : > { %v2287_v44 = vrot.slane %v2285_v46, 4  ;;  %v2290_v43 = vrot.slane %v2288_v62, 5  ;;  %v1717_v9 = vrot.slane %v1716_v7, 4  ;;  %v818_v52 = vsel %vm9172_vm3, %v586_v24, %v817_v42  ;;  %v1522_v61 = vld [vmem:[#allocation2 + $0x68] sm:$0x1]  ;;  %v9898_v3 = vpop.permute.xlu0 %2814 }
  0xce   : > { %v2294_v17 = vshll.u32 %v9856_v32, 16  ;;  %v2300_v27 = vrot.slane %v2298_v58, 4  ;;  %v1707_v34 = vrot.slane %v1706_v5, 4  ;;  %819 = vst [vmem:[#allocation2 + $0x74] sm:$0x1] %v818_v52  ;;  %v1113_v35 = vshrl.u32 %v9886_v51, 16 }
  0xcf   : > { %v9893_v57 = vld [vmem:[#allocation2 + $0x68] sm:$0x1]  ;;  %v2291_v60 = vor.u32 %v2290_v43, %v2287_v44  ;;  %v1719_v21 = vshll.u32 %v1522_v61, 16  ;;  %v2033_v49 = vrot.slane %v1522_v61, 5  ;;  %3256 = vrot.lane.b32.xlu0 %v8272_v55, %s9069_s20  ;;  %v9922_v52 = vld [vmem:[#allocation2 + $0x64] sm:$0xf] }
  0xd0   : > { %v9904_v4 = vld [vmem:[#allocation2 + $0x70] sm:$0xf]  ;;  %v2296_v41 = vrot.slane %v2294_v17, 5  ;;  %v2304_v11 = vshll.u32 %v9893_v57, 16  ;;  %v1712_v40 = vsel %vm9313_vm14, %v1707_v34, %v9873_v37  ;;  %v1115_v24 = vrot.slane %v1113_v35, 4 }
  0xd1   : > { %v2322_v15 = vshrl.u32 %v9904_v4, 16  ;;  %v2318_v16 = vshll.u32 %v9904_v4, 16  ;;  %v2292_v46 = vrot.slane %v2291_v60, 4  ;;  %v1721_v62 = vrot.slane %v1719_v21, 5  ;;  %v9915_v7 = vld [vmem:[#allocation2 + $0x6c] sm:$0xf]  ;;  %v9924_v17 = vpop.permute.xlu0 %3068 }
  0xd2   : > { %v2034_v42 = vsel %vm9226_vm9, %v2032_v38, %v2033_v49  ;;  %v2301_v58 = vor.u32 %v2300_v27, %v2296_v41  ;;  %v2306_v5 = vrot.slane %v2304_v11, 5  ;;  %v2309_v43 = vshrl.u32 %v9915_v7, 16  ;;  %v9930_v11 = vld [vmem:[#allocation2 + $0x68] sm:$0x1]  ;;  %v888_v6 = vld [vmem:[#allocation2 + $0x70] sm:$0xf] }
  0xd3   : > { %v8257_v44 = vcombine.low %v9883_v18, %v2034_v42  ;;  %v2312_v37 = vshll.u32 %v9915_v7, 16  ;;  %v8273_v55 = vcombine.low %v9915_v7, %v9904_v4  ;;  %v1722_v38 = vsel %vm9313_vm14, %v1717_v9, %v1721_v62  ;;  %v9932_v42 = vpop.permute.xlu1 %2816 }
  0xd4   : > { %v2320_v61 = vrot.slane %v2318_v16, 5  ;;  %v2324_v34 = vrot.slane %v2322_v15, 4  ;;  %v2297_v27 = vsel %vm9313_vm14, %v2292_v46, %v2296_v41  ;;  %v8241_v18 = vcombine.low %v1712_v40, %v1722_v38  ;;  %v2530_v46 = vld [vmem:[#allocation2 + $0x60] sm:$0xe] }
  0xd5   : > { %v2311_v60 = vrot.slane %v2309_v43, 4  ;;  %v2314_v21 = vrot.slane %v2312_v37, 5  ;;  %v2302_v49 = vrot.slane %v2301_v58, 4  ;;  %v9934_v7 = vld [vmem:[#allocation2 + $0x74] sm:$0x1]  ;;  %v1116_v19 = vshll.u32 %v9886_v51, 16  ;;  %v9943_v62 = vpop.permute.xlu0 %3324 }
  0xd6   : > { %v2325_v0 = vor.u32 %v2324_v34, %v2320_v61  ;;  %v1122_v9 = vshll.u32 %v9922_v52, 16  ;;  %3082 = vrot.lane.b32.xlu1 %v8241_v18, %s9073_s29  ;;  %v2328_v41 = vshll.u32 %v9934_v7, 16  ;;  %v1126_v16 = vshrl.u32 %v9922_v52, 16 }
  0xd7   : > { %v2315_v15 = vor.u32 %v2314_v21, %v2311_v60  ;;  %v2307_v40 = vsel %vm9313_vm14, %v2302_v49, %v2306_v5  ;;  %v1118_v35 = vrot.slane %v1116_v19, 5  ;;  %v1132_v18 = vshll.u32 %v9930_v11, 16  ;;  %v887_v60 = vld [vmem:[#allocation2 + $0x6c] sm:$0xf] }
  0xd8   : > { %v2326_v58 = vrot.slane %v2325_v0, 4  ;;  %v8288_v43 = vcombine.low %v2297_v27, %v2307_v40  ;;  %v1124_v37 = vrot.slane %v1122_v9, 5  ;;  %v2330_v38 = vrot.slane %v2328_v41, 5  ;;  %v9954_v41 = vpop.permute.xlu1 %2818 }
  0xd9   : > { %v2316_v51 = vrot.slane %v2315_v15, 4  ;;  %v1128_v34 = vrot.slane %v1126_v16, 4  ;;  %v1119_v21 = vor.u32 %v1118_v35, %v1115_v24  ;;  %v8160_v47 = vrot.slane %v2530_v46, 9  ;;  %v910_v15 = vld [vmem:[#allocation2 + $0x74] sm:$0x1]  ;;  %v9956_v24 = vpop.permute.xlu0 %2896 }
  0xda   : > { %3336 = vrot.lane.b32.xlu0 %v8288_v43, %s9074_s8  ;;  %v2632_v5 = vrot.slane %v9856_v32, 5  ;;  %v2635_v49 = vrot.slane %v9893_v57, 5  ;;  %3162 = vrot.lane.b32.xlu1 %v8257_v44, %s9071_s22  ;;  %v2331_v19 = vsel %vm9313_vm14, %v2326_v58, %v2330_v38  ;;  %v1134_v9 = vrot.slane %v1132_v18, 5 }
  0xdb   : > { %v2321_v0 = vsel %vm9313_vm14, %v2316_v51, %v2320_v61  ;;  %v1129_v27 = vor.u32 %v1128_v34, %v1124_v37  ;;  %v1120_v32 = vrot.slane %v1119_v21, 4  ;;  %v1137_v46 = vshrl.u32 %v887_v60, 16  ;;  %v2531_v34 = vld [vmem:[#allocation2 + $0x6c] sm:$0xe] }
  0xdc   : > { %v8289_v40 = vcombine.low %v2321_v0, %v2331_v19  ;;  %v2633_v57 = vsel %vm9226_vm9, %v8160_v47, %v2632_v5  ;;  %v2634_v16 = vrot.slane %v2632_v5, 4  ;;  %v1140_v43 = vshll.u32 %v887_v60, 16  ;;  %v1313_v0 = vld [vmem:[#allocation2 + $0x6c] sm:$0xe] }
  0xdd   : > { %v1130_v44 = vrot.slane %v1129_v27, 4  ;;  %v1146_v61 = vshll.u32 %v888_v6, 16  ;;  %v1125_v58 = vsel %vm9313_vm14, %v1120_v32, %v1124_v37  ;;  %v1150_v51 = vshrl.u32 %v888_v6, 16  ;;  %v9967_v60 = vpop.permute.xlu0 %2992 }
  0xde   : > { %v2636_v35 = vsel %vm9226_vm9, %v2634_v16, %v2635_v49  ;;  %v1156_v38 = vshll.u32 %v910_v15, 16  ;;  %3258 = vrot.lane.b32.xlu1 %v8273_v55, %s9069_s20  ;;  %v1139_v21 = vrot.slane %v1137_v46, 4  ;;  %v1142_v5 = vrot.slane %v1140_v43, 5  ;;  %v8895_v49 = vld [vmem:[%s13196_s1 + $0x18] sm:$0xff]   ;;  %v9975_v46 = vpop.permute.xlu1 %2898 }
  0xdf   : > { %v1135_v18 = vsel %vm9313_vm14, %v1130_v44, %v1134_v9  ;;  %v8304_v47 = vcombine.low %v2633_v57, %v2636_v35  ;;  %v1148_v27 = vrot.slane %v1146_v61, 5  ;;  %v1152_v37 = vrot.slane %v1150_v51, 4  ;;  %v1312_v44 = vld [vmem:[#allocation2 + $0x60] sm:$0xe] }
  0xe0   : > { %v8194_v19 = vcombine.low %v1125_v58, %v1135_v18  ;;  %v1158_v32 = vrot.slane %v1156_v38, 5  ;;  %v1143_v55 = vor.u32 %v1142_v5, %v1139_v21  ;;  %v8161_v16 = vrot.slane %v2531_v34, 9 }
  0xe1   : > { %3416 = vrot.lane.b32.xlu0 %v8304_v47, %s9072_s23  ;;  %v2639_v9 = vrot.slane %v9904_v4, 5  ;;  %v2642_v57 = vrot.slane %v9934_v7, 5  ;;  %v1153_v43 = vor.u32 %v1152_v37, %v1148_v27  ;;  %v3787_v61 = vsel %vm13205_vm2, %v9835_v28, 0  ;;  %v296_v7 = vld [vmem:[%s9207_s17 + $0x48] sm:$0xf]  ;;  %v9983_v18 = vpop.permute.xlu0 %3072 }
  0xe2   : > { %v8131_v58 = vrot.slane %v1313_v0, 9  ;;  %v1436_v35 = vrot.slane %v888_v6, 5  ;;  %3338 = vrot.lane.b32.xlu1 %v8289_v40, %s9074_s8  ;;  %v1144_v51 = vrot.slane %v1143_v55, 4  ;;  %8745 = vmatpush3.bf16.msra.mxu0 %v3787_v61  ;;  %v1439_v4 = vrot.slane %v910_v15, 5  ;;  %v8898_v40 = vld [vmem:[%s13196_s1 + $0x10] sm:$0xff]  }
  0xe3   : > { %v2640_v38 = vsel %vm9226_vm9, %v8161_v16, %v2639_v9  ;;  %v2641_v34 = vrot.slane %v2639_v9, 4  ;;  %v1154_v47 = vrot.slane %v1153_v43, 4  ;;  %v8130_v6 = vrot.slane %v1312_v44, 9  ;;  %8746 = vmatprep.subr.bf16.mxu0 %v8895_v49  ;;  %v297_v55 = vld [vmem:[%s9207_s17 + $0x4c] sm:$0xf] }
  0xe4   : > { %v9987_v21 = vsel %vm9226_vm9, %v8131_v58, %v1436_v35  ;;  %v1438_v28 = vrot.slane %v1436_v35, 4  ;;  %v1149_v5 = vsel %vm9313_vm14, %v1144_v51, %v1148_v27  ;;  %v1429_v0 = vrot.slane %v9922_v52, 5  ;;  %v1499_v61 = vld [vmem:[#allocation2 + $0x6c] sm:$0xf]  ;;  %v10003_v58 = vld [vmem:[#allocation2 + $0x70] sm:$0xf]  ;;  %v10009_v35 = vpop.permute.xlu1 %2994 }
  0xe5   : > { %v2643_v15 = vsel %vm9226_vm9, %v2641_v34, %v2642_v57  ;;  %v1432_v37 = vrot.slane %v9930_v11, 5  ;;  %v1159_v16 = vsel %vm9313_vm14, %v1154_v47, %v1158_v32  ;;  %v588_v43 = vshrl.u32 %v296_v7, 16  ;;  %v10011_v32 = vpop.permute.xlu0 %3152 }
  0xe6   : > { %v8305_v9 = vcombine.low %v2640_v38, %v2643_v15  ;;  %v1440_v44 = vsel %vm9226_vm9, %v1438_v28, %v1439_v4  ;;  %2828 = vrot.lane.b32.xlu1 %v8194_v19, %s9070_s21  ;;  %v8195_v27 = vcombine.low %v1149_v5, %v1159_v16  ;;  %v1430_v52 = vsel %vm9226_vm9, %v8130_v6, %v1429_v0  ;;  %v8899_v19 = vld [vmem:[%s13196_s1 + $0x8] sm:$0xff]  }
  0xe7   : > { %v8211_v57 = vcombine.low %v9987_v21, %v1440_v44  ;;  %v1431_v11 = vrot.slane %v1429_v0, 4  ;;  %8747 = vmatpush3.bf16.msra.mxu0 %v8895_v49  ;;  %v590_v51 = vrot.slane %v588_v43, 7  ;;  %v591_v38 = vshll.u32 %v296_v7, 16  ;;  %v820_v21 = vld [vmem:[#allocation2 + $0x78] sm:$0xf] }
  0xe8   : > { %3418 = vrot.lane.b32.xlu0 %v8305_v9, %s9072_s23  ;;  %v596_v34 = vshrl.u32 %v297_v55, 16  ;;  %v599_v4 = vshll.u32 %v297_v55, 16  ;;  %8748 = vmatprep.subr.bf16.mxu0 %v8898_v40  ;;  %v1724_v49 = vshrl.u32 %v1499_v61, 16  ;;  %v1727_v28 = vshll.u32 %v1499_v61, 16  ;;  %v408_v7 = vld [vmem:[#allocation2 + $0x80] sm:$0x1] }
  0xe9   : > { %v1433_v47 = vsel %vm9226_vm9, %v1431_v11, %v1432_v37  ;;  %v1737_v6 = vshrl.u32 %v10003_v58, 16  ;;  %v593_v15 = vor.u32 %v591_v38, %v590_v51  ;;  %v594_v0 = vrot.slane %v590_v51, 4  ;;  %v10024_v37 = vld [vmem:[#allocation2 + $0x74] sm:$0x1] }
  0xea   : > { %v8210_v5 = vcombine.low %v1430_v52, %v1433_v47  ;;  %v10020_v16 = vrot.slane %v596_v34, 7  ;;  %2830 = vrot.lane.b32.xlu1 %v8195_v27, %s9070_s21  ;;  %v1726_v55 = vrot.slane %v1724_v49, 4  ;;  %v1729_v9 = vrot.slane %v1727_v28, 5  ;;  %v8900_v27 = vld [vmem:[%s13196_s1] sm:$0xff]   ;;  %v10044_v47 = vpop.permute.xlu0 %3248 }
  0xeb   : > { %v8226_v44 = vcombine.low %v1499_v61, %v10003_v58  ;;  %vm3518_vm4 = vcmask 195584   ;;  %8749 = vmatpush3.bf16.msra.mxu0 %v8898_v40  ;;  %v821_v11 = vsel %vm9232_vm10, %v593_v15, %v820_v21  ;;  %vm3551_vm6 = vcmask 261120  }
  0xec   : > { %2908 = vrot.lane.b32.xlu0 %v8210_v5, %s9067_s18  ;;  %v601_v43 = vor.u32 %v599_v4, %v10020_v16  ;;  %v603_v52 = vrot.slane %v10020_v16, 4  ;;  %8750 = vmatprep.subr.bf16.mxu0 %v8899_v19  ;;  %822 = vst [vmem:[#allocation2 + $0x78] sm:$0xf] %v821_v11  ;;  %v13224_v40 = vcombine.low %v9373_v56, %v9690_v53  ;;  %v409_v51 = vsel %vm9200_vm5, 0, %v408_v7  ;;  %v10042_v4 = vpop.permute.xlu1 %3074  ;;  %v351_v16 = vld [vmem:[#allocation2 + $0x84] sm:$0x1] }
  0xed   : > { %v1730_v38 = vor.u32 %v1729_v9, %v1726_v55  ;;  %v1733_v34 = vshll.u32 %v10003_v58, 16  ;;  %410 = vst [vmem:[#allocation2 + $0x80] sm:$0x1] %v409_v51  ;;  %v1739_v56 = vrot.slane %v1737_v6, 4  ;;  %v1743_v53 = vshll.u32 %v10024_v37, 16 }
  0xee   : > { %v3442_v61 = vsel %vm3436_vm15, %v13224_v40, %v9898_v3  ;;  %v602_v21 = vsel %vm9238_vm11, %v594_v0, %v601_v43  ;;  %v1923_v3 = vld [vmem:[#allocation2 + $0x6c] sm:$0xe]  ;;  %2910 = vrot.lane.b32.xlu1 %v8211_v57, %s9067_s18  ;;  %v13225_v0 = vcombine.low %v9397_v10, %v9402_v45  ;;  %vm3584_vm7 = vcmask 326656   ;;  %v298_v7 = vld [vmem:[%s9207_s17 + $0x50] sm:$0xf] }
  0xef   : > { %v3489_v49 = vsel %vm3485_vm1, %v3442_v61, %v9812_v36  ;;  %823 = vst.msk [vmem:[#allocation2 + $0x7c] sm:$0xf] %vm310_vm0, %v602_v21  ;;  %v1731_v5 = vrot.slane %v1730_v38, 4  ;;  %v1735_v15 = vrot.slane %v1733_v34, 5  ;;  %8751 = vmatpush3.bf16.msra.mxu0 %v8899_v19  ;;  %v1745_v6 = vrot.slane %v1743_v53, 5 }
  0xf0   : > { %v3522_v28 = vsel %vm3518_vm4, %v3489_v49, %v9767_v22  ;;  %v10060_v36 = vsel %vm3436_vm15, %v13225_v0, %v9932_v42  ;;  %3004 = vrot.lane.b32.xlu0 %v8226_v44, %s9068_s19  ;;  %v3520_v22 = vsel %vm3518_vm4, %v9867_v50, %v9756_v12  ;;  %8752 = vmatprep.subr.bf16.mxu0 %v8900_v27  ;;  %v8146_v19 = vrot.slane %v1923_v3, 9  ;;  %v10086_v44 = vpop.permute.xlu1 %3154  ;;  %v299_v53 = vld [vmem:[%s9207_s17 + $0x54] sm:$0xf] }
  0xf1   : > { %v10065_v57 = vsel %vm3551_vm6, %v3522_v28, %v9871_v25  ;;  %v1736_v10 = vsel %vm9313_vm14, %v1731_v5, %v1735_v15  ;;  %v1740_v45 = vor.u32 %v1739_v56, %v1735_v15  ;;  %v3553_v42 = vsel %vm3551_vm6, %v3520_v22, %v9924_v17  ;;  %v10090_v17 = vpop.permute.xlu0 %3328 }
  0xf2   : > { %v3586_v25 = vsel %vm3584_vm7, %v3553_v42, %v9819_v54  ;;  %v2037_v55 = vrot.slane %v10003_v58, 5  ;;  %v2040_v9 = vrot.slane %v10024_v37, 5  ;;  %v13226_v12 = vcombine.low %v9420_v23, %v9432_v31 }
  0xf3   : > { %v1741_v43 = vrot.slane %v1740_v45, 4  ;;  %vm3617_vm8 = vcmask 392192   ;;  %vm3650_vm12 = vcmask 457728   ;;  %8753 = vmatpush3.bf16.msra.mxu0 %v8900_v27  ;;  %v352_v54 = vsel %vm9172_vm3, 0, %v351_v16  ;;  %v1501_v58 = vld [vmem:[#allocation2 + $0x78] sm:$0xf] }
  0xf4   : > { %v10084_v50 = vsel %vm3436_vm15, %v13226_v12, %v9954_v41  ;;  %v1924_v37 = vld [vmem:[#allocation2 + $0x78] sm:$0xe]  ;;  %v2038_v23 = vsel %vm9226_vm9, %v8146_v19, %v2037_v55  ;;  %v2039_v31 = vrot.slane %v2037_v55, 4  ;;  %v3619_v41 = vsel %vm3617_vm8, %v3586_v25, %v9774_v48  ;;  %353 = vst [vmem:[#allocation2 + $0x84] sm:$0x1] %v352_v54 }
  0xf5   : > { %v605_v11 = vshrl.u32 %v298_v7, 16  ;;  %v1748_v40 = vshrl.u32 %v1501_v58, 16  ;;  %v1751_v61 = vshll.u32 %v1501_v58, 16  ;;  %v824_v27 = vld [vmem:[#allocation2 + $0x80] sm:$0x1]  ;;  %v1746_v51 = vsel %vm9313_vm14, %v1741_v43, %v1745_v6 }
  0xf6   : > { %v8147_v38 = vrot.slane %v1924_v37, 9  ;;  %v1502_v34 = vld [vmem:[#allocation2 + $0x7c] sm:$0xf]  ;;  %v825_v21 = vsel %vm9172_vm3, %v603_v52, %v824_v27  ;;  %v8242_v49 = vcombine.low %v1736_v10, %v1746_v51  ;;  %v2041_v56 = vsel %vm9226_vm9, %v2039_v31, %v2040_v9  ;;  %v2108_v52 = vld [vmem:[#allocation2 + $0x78] sm:$0xf]  ;;  %v10106_v10 = vpop.permute.xlu1 %3250 }
  0xf7   : > { %v3652_v48 = vsel %vm3650_vm12, %v3619_v41, %v9943_v62  ;;  %v1750_v3 = vrot.slane %v1748_v40, 4  ;;  %v1753_v28 = vrot.slane %v1751_v61, 5  ;;  %v1761_v5 = vshrl.u32 %v1502_v34, 16  ;;  %826 = vst [vmem:[#allocation2 + $0x80] sm:$0x1] %v825_v21  ;;  %v10111_v55 = vpop.permute.xlu0 %3408 }
  0xf8   : > { %v8227_v15 = vcombine.low %v1501_v58, %v1502_v34  ;;  %v1757_v0 = vshll.u32 %v1502_v34, 16  ;;  %3084 = vrot.lane.b32.xlu0 %v8242_v49, %s9073_s29  ;;  %v2044_v6 = vrot.slane %v1502_v34, 5  ;;  %v8258_v22 = vcombine.low %v2038_v23, %v2041_v56  ;;  %v10109_v25 = vld [vmem:[#allocation2 + $0x7c] sm:$0xf] }
  0xf9   : > { %v607_v16 = vrot.slane %v605_v11, 7  ;;  %v1754_v45 = vor.u32 %v1753_v28, %v1750_v3  ;;  %v1763_v42 = vrot.slane %v1761_v5, 4  ;;  %v608_v62 = vshll.u32 %v298_v7, 16 }
  0xfa   : > { %3006 = vrot.lane.b32.xlu1 %v8227_v15, %s9068_s19  ;;  %v613_v19 = vshrl.u32 %v299_v53, 16  ;;  %v1759_v9 = vrot.slane %v1757_v0, 5  ;;  %v10115_v12 = vsel %vm9226_vm9, %v8147_v38, %v2044_v6  ;;  %v2046_v43 = vrot.slane %v2044_v6, 4  ;;  %v10128_v28 = vpop.permute.xlu1 %3330 }
  0xfb   : > { %v611_v54 = vrot.slane %v607_v16, 4  ;;  %v1755_v58 = vrot.slane %v1754_v45, 4  ;;  %v610_v37 = vor.u32 %v608_v62, %v607_v16  ;;  %v616_v31 = vshll.u32 %v299_v53, 16  ;;  %v827_v41 = vld [vmem:[#allocation2 + $0x84] sm:$0xf] }
  0xfc   : > { %v10117_v23 = vrot.slane %v613_v19, 7  ;;  %v1764_v11 = vor.u32 %v1763_v42, %v1759_v9  ;;  %3164 = vrot.lane.b32.xlu0 %v8258_v22, %s9071_s22  ;;  %v2333_v7 = vshrl.u32 %v2108_v52, 16  ;;  %v2336_v40 = vshll.u32 %v2108_v52, 16  ;;  %v411_v22 = vld [vmem:[#allocation2 + $0x8c] sm:$0x1] }
  0xfd   : > { %v2346_v61 = vshrl.u32 %v10109_v25, 16  ;;  %v1760_v27 = vsel %vm9313_vm14, %v1755_v58, %v1759_v9  ;;  %v828_v34 = vsel %vm9232_vm10, %v610_v37, %v827_v41  ;;  %v8274_v3 = vcombine.low %v2108_v52, %v10109_v25  ;;  %v10135_v16 = vpop.permute.xlu0 %3410 }
  0xfe   : > { %v618_v51 = vor.u32 %v616_v31, %v10117_v23  ;;  %v620_v38 = vrot.slane %v10117_v23, 4  ;;  %v1524_v21 = vld [vmem:[#allocation2 + $0x80] sm:$0x1]  ;;  %v1765_v49 = vrot.slane %v1764_v11, 4  ;;  %829 = vst [vmem:[#allocation2 + $0x84] sm:$0xf] %v828_v34  ;;  %v3493_v6 = vsel %vm3485_vm1, %v10084_v50, %v9975_v46  ;;  %v10170_v31 = vpop.permute.xlu1 %2820 }
  0xff   : > { %v2335_v56 = vrot.slane %v2333_v7, 4  ;;  %v2338_v53 = vrot.slane %v2336_v40, 5  ;;  %v1767_v5 = vshll.u32 %v1524_v21, 16  ;;  %v2047_v15 = vrot.slane %v1524_v21, 5  ;;  %v10151_v19 = vld [vmem:[#allocation2 + $0x80] sm:$0x1] }
 0x100   : > { %v619_v0 = vsel %vm9238_vm11, %v611_v54, %v618_v51  ;;  %3260 = vrot.lane.b32.xlu0 %v8274_v3, %s9069_s20  ;;  %vm3683_vm13 = vcmask 523264   ;;  %vm13206_vm2 = vcmask 588800   ;;  %v3588_v52 = vsel %vm3584_vm7, %v10065_v57, %v9843_v2  ;;  %v889_v57 = vld [vmem:[#allocation2 + $0x78] sm:$0xf] }
 0x101   : > { %830 = vst.msk [vmem:[#allocation2 + $0x88] sm:$0xf] %vm310_vm0, %v619_v0  ;;  %v3491_v45 = vsel %vm3485_vm1, %v10060_v36, %v9956_v24  ;;  %v1769_v42 = vrot.slane %v1767_v5, 5  ;;  %v2048_v46 = vsel %vm9226_vm9, %v2046_v43, %v2047_v15  ;;  %v3685_v50 = vsel %vm3683_vm13, %v3652_v48, %v9846_v59  ;;  %v10164_v43 = vld [vmem:[#allocation2 + $0x7c] sm:$0xf]  ;;  %v10172_v41 = vpop.permute.xlu0 %2900 }
 0x102   : > { %v3621_v62 = vsel %vm3617_vm8, %v3588_v52, %v9791_v14  ;;  %v8259_v9 = vcombine.low %v10115_v12, %v2048_v46  ;;  %8754 = vmatprep.mubr.msk.bf16.mxu0 %vm13206_vm2, %v3685_v50  ;;  %v412_v24 = vsel %vm9200_vm5, 0, %v411_v22  ;;  %v2339_v36 = vor.u32 %v2338_v53, %v2335_v56  ;;  %v10182_v53 = vld [vmem:[#allocation2 + $0x80] sm:$0x1]  ;;  %v2532_v46 = vld [vmem:[#allocation2 + $0x78] sm:$0xe] }
 0x103   : > { %v3654_v2 = vsel %vm3650_vm12, %v3621_v62, %v9896_v13  ;;  %v1770_v59 = vsel %vm9313_vm14, %v1765_v49, %v1769_v42  ;;  %413 = vst [vmem:[#allocation2 + $0x8c] sm:$0x1] %v412_v24  ;;  %v2342_v48 = vshll.u32 %v10109_v25, 16  ;;  %v2348_v12 = vrot.slane %v2346_v61, 4 }
 0x104   : > { %v3687_v14 = vsel %vm3683_vm13, %v3654_v2, %v9878_v20  ;;  %v8243_v54 = vcombine.low %v1760_v27, %v1770_v59  ;;  %v2340_v13 = vrot.slane %v2339_v36, 4  ;;  %v2352_v58 = vshll.u32 %v10151_v19, 16 }
 0x105   : > { %8755 = vmatmul.mubr.msk.bf16.vlgmr.msra.gmra.mxu0 %vm13206_vm2, %v3687_v14  ;;  %v3526_v37 = vsel %vm3518_vm4, %v3493_v6, %v10009_v35  ;;  %v2110_v20 = vld [vmem:[#allocation2 + $0x84] sm:$0xf]  ;;  %v2344_v11 = vrot.slane %v2342_v48, 5  ;;  %v3524_v7 = vsel %vm3518_vm4, %v3491_v45, %v9967_v60  ;;  %v1161_v40 = vshrl.u32 %v889_v57, 16  ;;  %v10192_v59 = vpop.permute.xlu0 %2996 }
 0x106   : > { %v1164_v61 = vshll.u32 %v889_v57, 16  ;;  %3086 = vrot.lane.b32.xlu1 %v8243_v54, %s9073_s29  ;;  %v2357_v27 = vshrl.u32 %v2110_v20, 16  ;;  %v2360_v51 = vshll.u32 %v2110_v20, 16  ;;  %v2354_v34 = vrot.slane %v2352_v58, 5  ;;  %v10190_v57 = vpop.permute.xlu1 %2822 }
 0x107   : > { %v1170_v21 = vshll.u32 %v10164_v43, 16  ;;  %v2345_v35 = vsel %vm9313_vm14, %v2340_v13, %v2344_v11  ;;  %v2349_v56 = vor.u32 %v2348_v12, %v2344_v11  ;;  %v1163_v3 = vrot.slane %v1161_v40, 4 }
 0x108   : > { %v10178_v49 = vld [vmem:[#allocation2 + $0x88] sm:$0xf]  ;;  %v1166_v5 = vrot.slane %v1164_v61, 5  ;;  %v2359_v60 = vrot.slane %v2357_v27, 4  ;;  %v2362_v15 = vrot.slane %v2360_v51, 5  ;;  %v1174_v24 = vshrl.u32 %v10164_v43, 16 }
 0x109   : > { %v2370_v0 = vshrl.u32 %v10178_v49, 16  ;;  %v8275_v6 = vcombine.low %v2110_v20, %v10178_v49  ;;  %v2366_v22 = vshll.u32 %v10178_v49, 16  ;;  %v2350_v52 = vrot.slane %v2349_v56, 4  ;;  %v891_v61 = vld [vmem:[#allocation2 + $0x84] sm:$0xf] }
 0x10a   : > { %v1167_v45 = vor.u32 %v1166_v5, %v1163_v3  ;;  %v1172_v42 = vrot.slane %v1170_v21, 5  ;;  %3166 = vrot.lane.b32.xlu1 %v8259_v9, %s9071_s22  ;;  %v831_v50 = vld [vmem:[#allocation2 + $0x8c] sm:$0x1]  ;;  %v2363_v62 = vor.u32 %v2362_v15, %v2359_v60  ;;  %v1180_v36 = vshll.u32 %v10182_v53, 16  ;;  %v10208_v27 = vld [vmem:[#allocation2 + $0x88] sm:$0xf] }
 0x10b   : > { %v2372_v2 = vrot.slane %v2370_v0, 4  ;;  %v832_v14 = vsel %vm9172_vm3, %v620_v38, %v831_v50  ;;  %v10198_v48 = vrot.slane %v2366_v22, 5  ;;  %v2355_v9 = vsel %vm9313_vm14, %v2350_v52, %v2354_v34  ;;  %v2533_v56 = vld [vmem:[#allocation2 + $0x84] sm:$0xe]  ;;  %v10224_v52 = vpop.permute.xlu1 %2902 }
 0x10c   : > { %v1168_v12 = vrot.slane %v1167_v45, 4  ;;  %833 = vst [vmem:[#allocation2 + $0x8c] sm:$0x1] %v832_v14  ;;  %v10202_v54 = vrot.slane %v2363_v62, 4  ;;  %v8290_v13 = vcombine.low %v2345_v35, %v2355_v9  ;;  %v1176_v58 = vrot.slane %v1174_v24, 4 }
 0x10d   : > { %v1182_v20 = vrot.slane %v1180_v36, 5  ;;  %v2373_v11 = vor.u32 %v2372_v2, %v10198_v48  ;;  %v8162_v40 = vrot.slane %v2532_v46, 9  ;;  %v2646_v38 = vrot.slane %v10109_v25, 5  ;;  %v1315_v62 = vld [vmem:[#allocation2 + $0x84] sm:$0xe] }
 0x10e   : > { %v1173_v23 = vsel %vm9313_vm14, %v1168_v12, %v1172_v42  ;;  %3262 = vrot.lane.b32.xlu1 %v8275_v6, %s9069_s20  ;;  %v2369_v51 = vsel %vm9313_vm14, %v10202_v54, %v10198_v48  ;;  %3340 = vrot.lane.b32.xlu0 %v8290_v13, %s9074_s8  ;;  %v1177_v34 = vor.u32 %v1176_v58, %v1172_v42  ;;  %v2649_v21 = vrot.slane %v10151_v19, 5  ;;  %v10226_v19 = vpop.permute.xlu0 %3076 }
 0x10f   : > { %v3559_v35 = vsel %vm3551_vm6, %v3526_v37, %v10042_v4  ;;  %v2374_v25 = vrot.slane %v2373_v11, 4  ;;  %v2647_v3 = vsel %vm9226_vm9, %v8162_v40, %v2646_v38  ;;  %v2648_v5 = vrot.slane %v2646_v38, 4  ;;  %v1314_v40 = vld [vmem:[#allocation2 + $0x78] sm:$0xe] }
 0x110   : > { %v3557_v60 = vsel %vm3551_vm6, %v3524_v7, %v9983_v18  ;;  %v1178_v15 = vrot.slane %v1177_v34, 4  ;;  %v1185_v0 = vshrl.u32 %v891_v61, 16  ;;  %v1188_v6 = vshll.u32 %v891_v61, 16 }
 0x111   : > { %v1194_v22 = vshll.u32 %v10208_v27, 16  ;;  %v2650_v4 = vsel %vm9226_vm9, %v2648_v5, %v2649_v21  ;;  %v1198_v37 = vshrl.u32 %v10208_v27, 16  ;;  %v8163_v45 = vrot.slane %v2533_v56, 9  ;;  %v10243_v56 = vpop.permute.xlu1 %2998 }
 0x112   : > { %v2653_v42 = vrot.slane %v10178_v49, 5  ;;  %v1183_v18 = vsel %vm9313_vm14, %v1178_v15, %v1182_v20  ;;  %v8306_v7 = vcombine.low %v2647_v3, %v2650_v4  ;;  %v1187_v46 = vrot.slane %v1185_v0, 4  ;;  %v10245_v3 = vpop.permute.xlu0 %3156  ;;  %v354_v4 = vld [vmem:[#allocation2 + $0x90] sm:$0x1] }
 0x113   : > { %v1190_v50 = vrot.slane %v1188_v6, 5  ;;  %v2133_v2 = vld [vmem:[#allocation2 + $0x8c] sm:$0x1]  ;;  %v10234_v24 = vcombine.low %v1173_v23, %v1183_v18  ;;  %v1196_v14 = vrot.slane %v1194_v22, 5  ;;  %v1200_v48 = vrot.slane %v1198_v37, 4 }
 0x114   : > { %v912_v36 = vld [vmem:[#allocation2 + $0x8c] sm:$0x1]  ;;  %v2654_v9 = vsel %vm9226_vm9, %v8163_v45, %v2653_v42  ;;  %v2376_v12 = vshll.u32 %v2133_v2, 16  ;;  %3420 = vrot.lane.b32.xlu0 %v8306_v7, %s9072_s23  ;;  %v2655_v13 = vrot.slane %v2653_v42, 4  ;;  %v2656_v20 = vrot.slane %v2133_v2, 5 }
 0x115   : > { %v1191_v49 = vor.u32 %v1190_v50, %v1187_v46  ;;  %v1204_v54 = vshll.u32 %v912_v36, 16  ;;  %v1201_v58 = vor.u32 %v1200_v48, %v1196_v14  ;;  %v3592_v11 = vsel %vm3584_vm7, %v3559_v35, %v10086_v44  ;;  %v300_v22 = vld [vmem:[%s9207_s17 + $0x58] sm:$0xf]  ;;  %v301_v50 = vld [vmem:[%s9207_s17 + $0x5c] sm:$0xf] }
 0x116   : > { %v3590_v23 = vsel %vm3584_vm7, %v3557_v60, %v10011_v32  ;;  %v2378_v38 = vrot.slane %v2376_v12, 5  ;;  %v8133_v21 = vrot.slane %v1315_v62, 9  ;;  %v2657_v15 = vsel %vm9226_vm9, %v2655_v13, %v2656_v20 }
 0x117   : > { %v1192_v61 = vrot.slane %v1191_v49, 4  ;;  %v1206_v34 = vrot.slane %v1204_v54, 5  ;;  %v1202_v5 = vrot.slane %v1201_v58, 4  ;;  %v1450_v0 = vrot.slane %v10208_v27, 5  ;;  %v10284_v49 = vpop.permute.xlu0 %3252 }
 0x118   : > { %v1453_v44 = vrot.slane %v912_v36, 5  ;;  %v2379_v32 = vsel %vm9313_vm14, %v2374_v25, %v2378_v38  ;;  %v8307_v60 = vcombine.low %v2654_v9, %v2657_v15  ;;  %v8132_v6 = vrot.slane %v1314_v40, 9  ;;  %v414_v38 = vld [vmem:[#allocation2 + $0x98] sm:$0x1]  ;;  %v1525_v15 = vld [vmem:[#allocation2 + $0x8c] sm:$0x1] }
 0x119   : > { %v1197_v35 = vsel %vm9313_vm14, %v1192_v61, %v1196_v14  ;;  %v8291_v37 = vcombine.low %v2369_v51, %v2379_v32  ;;  %v1207_v45 = vsel %vm9313_vm14, %v1202_v5, %v1206_v34  ;;  %v10259_v42 = vsel %vm9226_vm9, %v8133_v21, %v1450_v0  ;;  %v1503_v51 = vld [vmem:[#allocation2 + $0x84] sm:$0xf]  ;;  %v10276_v14 = vld [vmem:[#allocation2 + $0x88] sm:$0xf] }
 0x11a   : > { %v1452_v27 = vrot.slane %v1450_v0, 4  ;;  %v8197_v18 = vcombine.low %v1197_v35, %v1207_v45  ;;  %3422 = vrot.lane.b32.xlu0 %v8307_v60, %s9072_s23  ;;  %v1443_v25 = vrot.slane %v10164_v43, 5  ;;  %v1446_v7 = vrot.slane %v10182_v53, 5  ;;  %v10282_v12 = vpop.permute.xlu1 %3078  ;;  %v1925_v60 = vld [vmem:[#allocation2 + $0x84] sm:$0xe] }
 0x11b   : > { %v3625_v46 = vsel %vm3617_vm8, %v3592_v11, %v10106_v10  ;;  %3342 = vrot.lane.b32.xlu1 %v8291_v37, %s9074_s8  ;;  %v3623_v2 = vsel %vm3617_vm8, %v3590_v23, %v10044_v47  ;;  %v355_v36 = vsel %vm9172_vm3, 0, %v354_v4  ;;  %v622_v43 = vshrl.u32 %v300_v22, 16 }
 0x11c   : > { %v10270_v62 = vsel %vm9226_vm9, %v1452_v27, %v1453_v44  ;;  %v1444_v53 = vsel %vm9226_vm9, %v8132_v6, %v1443_v25  ;;  %v1445_v48 = vrot.slane %v1443_v25, 4  ;;  %356 = vst [vmem:[#allocation2 + $0x90] sm:$0x1] %v355_v36  ;;  %v625_v9 = vshll.u32 %v300_v22, 16 }
 0x11d   : > { %v8213_v10 = vcombine.low %v10259_v42, %v10270_v62  ;;  %v624_v47 = vrot.slane %v622_v43, 7  ;;  %v630_v54 = vshrl.u32 %v301_v50, 16  ;;  %v633_v13 = vshll.u32 %v301_v50, 16  ;;  %v357_v43 = vld [vmem:[#allocation2 + $0x9c] sm:$0x1] }
 0x11e   : > { %v1772_v58 = vshrl.u32 %v1503_v51, 16  ;;  %v1447_v20 = vsel %vm9226_vm9, %v1445_v48, %v1446_v7  ;;  %v1775_v11 = vshll.u32 %v1503_v51, 16  ;;  %v1785_v23 = vshrl.u32 %v10276_v14, 16  ;;  %v10309_v25 = vpop.permute.xlu1 %3158  ;;  %v10311_v7 = vpop.permute.xlu0 %3332 }
 0x11f   : > { %v8228_v40 = vcombine.low %v1503_v51, %v10276_v14  ;;  %2832 = vrot.lane.b32.xlu1 %v10234_v24, %s9070_s21  ;;  %v8212_v61 = vcombine.low %v1444_v53, %v1447_v20  ;;  %v627_v34 = vor.u32 %v625_v9, %v624_v47  ;;  %v628_v21 = vrot.slane %v624_v47, 4  ;;  %v302_v53 = vld [vmem:[%s9207_s17 + $0x60] sm:$0xf]  ;;  %v8957_v47 = vld [vmem:[#allocation2 + $0x3c] sm:$0xf] }
 0x120   : > { %v10292_v5 = vrot.slane %v630_v54, 7  ;;  %v1774_v0 = vrot.slane %v1772_v58, 4  ;;  %v1777_v44 = vrot.slane %v1775_v11, 5  ;;  %v3658_v32 = vsel %vm3650_vm12, %v3625_v46, %v10128_v28  ;;  %v8956_v9 = vld [vmem:[#allocation2 + $0x40] sm:$0xf] }
 0x121   : > { %v3656_v35 = vsel %vm3650_vm12, %v3623_v2, %v10090_v17  ;;  %2912 = vrot.lane.b32.xlu0 %v8212_v61, %s9067_s18  ;;  %v415_v22 = vsel %vm9200_vm5, 0, %v414_v38  ;;  %v1781_v4 = vshll.u32 %v10276_v14, 16  ;;  %v1787_v45 = vrot.slane %v1785_v23, 4  ;;  %v303_v58 = vld [vmem:[%s9207_s17 + $0x64] sm:$0xf] }
 0x122   : > { %v635_v6 = vor.u32 %v633_v13, %v10292_v5  ;;  %v637_v24 = vrot.slane %v10292_v5, 4  ;;  %416 = vst [vmem:[#allocation2 + $0x98] sm:$0x1] %v415_v22  ;;  %v1778_v37 = vor.u32 %v1777_v44, %v1774_v0  ;;  %v1791_v27 = vshll.u32 %v1525_v15, 16  ;;  %v10345_v44 = vpop.permute.xlu1 %3254 }
 0x123   : > { %v13227_v17 = vcombine.low %v9900_v26, %v9584_v30  ;;  %2834 = vrot.lane.b32.xlu1 %v8197_v18, %s9070_s21  ;;  %v834_v50 = vld [vmem:[#allocation2 + $0x90] sm:$0xf]  ;;  %v1783_v51 = vrot.slane %v1781_v4, 5  ;;  %v3689_v2 = vsel %vm3683_vm13, %v3656_v35, %v10111_v55  ;;  %v8148_v36 = vrot.slane %v1925_v60, 9  ;;  %v10347_v42 = vpop.permute.xlu0 %3412 }
 0x124   : > { %v636_v46 = vsel %vm9238_vm11, %v628_v21, %v635_v6  ;;  %v835_v30 = vsel %vm9232_vm10, %v627_v34, %v834_v50  ;;  %v1779_v26 = vrot.slane %v1778_v37, 4  ;;  %v2051_v18 = vrot.slane %v10276_v14, 5  ;;  %8758 = vmatprep.mubr.msk.bf16.mxu0 %vm13206_vm2, %v3689_v2  ;;  %v417_v34 = vld [vmem:[#allocation2 + $0xa4] sm:$0x1] }
 0x125   : > { %v3451_v28 = vsel %vm3436_vm15, %v13227_v17, %v10170_v31  ;;  %837 = vst.msk [vmem:[#allocation2 + $0x94] sm:$0xf] %vm310_vm0, %v636_v46  ;;  %v1793_v31 = vrot.slane %v1791_v27, 5  ;;  %836 = vst [vmem:[#allocation2 + $0x90] sm:$0xf] %v835_v30  ;;  %3008 = vrot.lane.b32.xlu0 %v8228_v40, %s9068_s19  ;;  %v1788_v48 = vor.u32 %v1787_v45, %v1783_v51  ;;  %v2054_v55 = vrot.slane %v1525_v15, 5 }
 0x126   : > { %v8175_v54 = vcombine.low %v8957_v47, %v8956_v9  ;;  %v3691_v13 = vsel %vm3683_vm13, %v3658_v32, %v10135_v16  ;;  %v1784_v20 = vsel %vm9313_vm14, %v1779_v26, %v1783_v51  ;;  %v2052_v14 = vsel %vm9226_vm9, %v8148_v36, %v2051_v18 }
 0x127   : > { %v2053_v11 = vrot.slane %v2051_v18, 4  ;;  %v358_v23 = vsel %vm9172_vm3, 0, %v357_v43  ;;  %8759 = vmatmul.mubr.msk.bf16.gmra.mxu0 %vm13206_vm2, %v3691_v13  ;;  %2914 = vrot.lane.b32.xlu1 %v8213_v10, %s9067_s18  ;;  %v1789_v40 = vrot.slane %v1788_v48, 4  ;;  %v639_v38 = vshrl.u32 %v302_v53, 16 }
 0x128   : > { %v3454_v16 = vsel %vm3436_vm15, %v8175_v54, %v10190_v57  ;;  %359 = vst [vmem:[#allocation2 + $0x9c] sm:$0x1] %v358_v23  ;;  %v642_v61 = vshll.u32 %v302_v53, 16  ;;  %v647_v5 = vshrl.u32 %v303_v58, 16  ;;  %v650_v15 = vshll.u32 %v303_v58, 16 }
 0x129   : > { %v2055_v21 = vsel %vm9226_vm9, %v2053_v11, %v2054_v55  ;;  %v3497_v0 = vsel %vm3485_vm1, %v3454_v16, %v10224_v52  ;;  %v838_v62 = vld [vmem:[#allocation2 + $0x98] sm:$0x1]  ;;  %v1794_v57 = vsel %vm9313_vm14, %v1789_v40, %v1793_v31  ;;  %v641_v32 = vrot.slane %v639_v38, 7  ;;  %v10366_v55 = vpop.permute.xlu1 %3334 }
 0x12a   : > { %v8260_v10 = vcombine.low %v2052_v14, %v2055_v21  ;;  %v839_v35 = vsel %vm9172_vm3, %v637_v24, %v838_v62  ;;  %v8244_v60 = vcombine.low %v1784_v20, %v1794_v57  ;;  %v649_v6 = vrot.slane %v647_v5, 7  ;;  %v10368_v9 = vpop.permute.xlu0 %3414 }
 0x12b   : > { %v418_v22 = vsel %vm9200_vm5, 0, %v417_v34  ;;  %840 = vst [vmem:[#allocation2 + $0x98] sm:$0x1] %v839_v35  ;;  %v644_v52 = vor.u32 %v642_v61, %v641_v32  ;;  %v645_v37 = vrot.slane %v641_v32, 4  ;;  %v3495_v45 = vsel %vm3485_vm1, %v3451_v28, %v10172_v41 }
 0x12c   : > { %v1506_v4 = vld [vmem:[#allocation2 + $0x94] sm:$0xf]  ;;  %419 = vst [vmem:[#allocation2 + $0xa4] sm:$0x1] %v418_v22  ;;  %v3530_v27 = vsel %vm3518_vm4, %v3497_v0, %v10243_v56  ;;  %v1505_v17 = vld [vmem:[#allocation2 + $0x90] sm:$0xf]  ;;  %3088 = vrot.lane.b32.xlu0 %v8244_v60, %s9073_s29  ;;  %v652_v51 = vor.u32 %v650_v15, %v649_v6  ;;  %v3528_v36 = vsel %vm3518_vm4, %v3495_v45, %v10192_v59 }
 0x12d   : > { %v1809_v46 = vshrl.u32 %v1506_v4, 16  ;;  %v1805_v50 = vshll.u32 %v1506_v4, 16  ;;  %v1926_v24 = vld [vmem:[#allocation2 + $0x90] sm:$0xe]  ;;  %v10360_v2 = vld [vmem:[#allocation2 + $0x94] sm:$0xf]  ;;  %v8229_v26 = vcombine.low %v1505_v17, %v1506_v4  ;;  %v3563_v13 = vsel %vm3551_vm6, %v3530_v27, %v10282_v12 }
 0x12e   : > { %v1796_v43 = vshrl.u32 %v1505_v17, 16  ;;  %v1799_v30 = vshll.u32 %v1505_v17, 16  ;;  %v8149_v41 = vrot.slane %v1926_v24, 9  ;;  %v2112_v28 = vld [vmem:[#allocation2 + $0x90] sm:$0xf]  ;;  %v2058_v56 = vrot.slane %v1506_v4, 5 }
 0x12f   : > { %v1807_v31 = vrot.slane %v1805_v50, 5  ;;  %v1811_v18 = vrot.slane %v1809_v46, 4  ;;  %v653_v53 = vsel %vm9238_vm11, %v645_v37, %v652_v51  ;;  %v841_v48 = vld [vmem:[#allocation2 + $0x9c] sm:$0xf]  ;;  %3010 = vrot.lane.b32.xlu1 %v8229_v26, %s9068_s19  ;;  %v654_v14 = vrot.slane %v649_v6, 4 }
 0x130   : > { %v1798_v47 = vrot.slane %v1796_v43, 4  ;;  %v1801_v54 = vrot.slane %v1799_v30, 5  ;;  %v842_v59 = vsel %vm9232_vm10, %v644_v52, %v841_v48  ;;  %844 = vst.msk [vmem:[#allocation2 + $0xa0] sm:$0xf] %vm310_vm0, %v653_v53  ;;  %v2060_v20 = vrot.slane %v2058_v56, 4  ;;  %3168 = vrot.lane.b32.xlu0 %v8260_v10, %s9071_s22  ;;  %v10392_v52 = vpop.permute.xlu1 %2824 }
 0x131   : > { %v1812_v58 = vor.u32 %v1811_v18, %v1807_v31  ;;  %843 = vst [vmem:[#allocation2 + $0x9c] sm:$0xf] %v842_v59  ;;  %v2381_v11 = vshrl.u32 %v2112_v28, 16  ;;  %v2384_v40 = vshll.u32 %v2112_v28, 16  ;;  %v2394_v16 = vshrl.u32 %v10360_v2, 16 }
 0x132   : > { %v1802_v23 = vor.u32 %v1801_v54, %v1798_v47  ;;  %v8276_v38 = vcombine.low %v2112_v28, %v10360_v2  ;;  %v893_v61 = vld [vmem:[#allocation2 + $0x90] sm:$0xf]  ;;  %v1526_v34 = vld [vmem:[#allocation2 + $0x98] sm:$0x1]  ;;  %v2059_v5 = vsel %vm9226_vm9, %v8149_v41, %v2058_v56  ;;  %v10383_v0 = vsel %vm3551_vm6, %v3528_v36, %v10226_v19  ;;  %v10394_v19 = vpop.permute.xlu0 %2904  ;;  %v10410_v48 = vld [vmem:[#allocation2 + $0x94] sm:$0xf] }
 0x133   : > { %v1813_v21 = vrot.slane %v1812_v58, 4  ;;  %v2383_v12 = vrot.slane %v2381_v11, 4  ;;  %v845_v15 = vld [vmem:[#allocation2 + $0xa4] sm:$0x1]  ;;  %v1815_v57 = vshll.u32 %v1526_v34, 16  ;;  %v2061_v10 = vrot.slane %v1526_v34, 5 }
 0x134   : > { %v1803_v62 = vrot.slane %v1802_v23, 4  ;;  %v2386_v32 = vrot.slane %v2384_v40, 5  ;;  %v10385_v35 = vld [vmem:[#allocation2 + $0x98] sm:$0x1]  ;;  %3264 = vrot.lane.b32.xlu0 %v8276_v38, %s9069_s20  ;;  %v846_v60 = vsel %vm9172_vm3, %v654_v14, %v845_v15  ;;  %v2390_v6 = vshll.u32 %v10360_v2, 16  ;;  %v10417_v23 = vpop.permute.xlu1 %2826 }
 0x135   : > { %v2396_v22 = vrot.slane %v2394_v16, 4  ;;  %v2400_v4 = vshll.u32 %v10385_v35, 16  ;;  %v1817_v45 = vrot.slane %v1815_v57, 5  ;;  %v2062_v27 = vsel %vm9226_vm9, %v2060_v20, %v2061_v10  ;;  %847 = vst [vmem:[#allocation2 + $0xa4] sm:$0x1] %v846_v60 }
 0x136   : > { %v1808_v37 = vsel %vm9313_vm14, %v1803_v62, %v1807_v31  ;;  %v2387_v17 = vor.u32 %v2386_v32, %v2383_v12  ;;  %v8261_v46 = vcombine.low %v2059_v5, %v2062_v27  ;;  %v2392_v24 = vrot.slane %v2390_v6, 5  ;;  %v10419_v40 = vpop.permute.xlu0 %3000  ;;  %v2534_v10 = vld [vmem:[#allocation2 + $0x90] sm:$0xe] }
 0x137   : > { %v10400_v50 = vld [vmem:[#allocation2 + $0xa0] sm:$0xf]  ;;  %v1209_v51 = vshrl.u32 %v893_v61, 16  ;;  %v10404_v36 = vsel %vm3584_vm7, %v3563_v13, %v10309_v25  ;;  %v1818_v43 = vsel %vm9313_vm14, %v1813_v21, %v1817_v45  ;;  %v2402_v53 = vrot.slane %v2400_v4, 5  ;;  %v10414_v13 = vld [vmem:[#allocation2 + $0x98] sm:$0x1] }
 0x138   : > { %v2114_v30 = vld [vmem:[#allocation2 + $0x9c] sm:$0xf]  ;;  %v2418_v26 = vshrl.u32 %v10400_v50, 16  ;;  %v2414_v41 = vshll.u32 %v10400_v50, 16  ;;  %v2388_v28 = vrot.slane %v2387_v17, 4  ;;  %v8245_v31 = vcombine.low %v1808_v37, %v1818_v43 }
 0x139   : > { %v2405_v18 = vshrl.u32 %v2114_v30, 16  ;;  %v2408_v56 = vshll.u32 %v2114_v30, 16  ;;  %v2397_v59 = vor.u32 %v2396_v22, %v2392_v24  ;;  %v1211_v14 = vrot.slane %v1209_v51, 4  ;;  %v895_v27 = vld [vmem:[#allocation2 + $0x9c] sm:$0xf] }
 0x13a   : > { %v2416_v47 = vrot.slane %v2414_v41, 5  ;;  %v2420_v54 = vrot.slane %v2418_v26, 4  ;;  %v2393_v25 = vsel %vm9313_vm14, %v2388_v28, %v2392_v24  ;;  %3090 = vrot.lane.b32.xlu1 %v8245_v31, %s9073_s29  ;;  %v1212_v11 = vshll.u32 %v893_v61, 16  ;;  %v10436_v31 = vpop.permute.xlu1 %2906 }
 0x13b   : > { %v2407_v58 = vrot.slane %v2405_v18, 4  ;;  %v2410_v20 = vrot.slane %v2408_v56, 5  ;;  %v2398_v38 = vrot.slane %v2397_v59, 4  ;;  %v1218_v34 = vshll.u32 %v10410_v48, 16  ;;  %v10438_v18 = vpop.permute.xlu0 %3080 }
 0x13c   : > { %v2421_v16 = vor.u32 %v2420_v54, %v2416_v47  ;;  %v1222_v21 = vshrl.u32 %v10410_v48, 16  ;;  %v8277_v5 = vcombine.low %v2114_v30, %v10400_v50  ;;  %v10424_v12 = vld [vmem:[#allocation2 + $0xa4] sm:$0x1]  ;;  %v1214_v62 = vrot.slane %v1212_v11, 5 }
 0x13d   : > { %v2411_v15 = vor.u32 %v2410_v20, %v2407_v58  ;;  %v1228_v57 = vshll.u32 %v10414_v13, 16  ;;  %v2424_v32 = vshll.u32 %v10424_v12, 16  ;;  %v2403_v60 = vsel %vm9313_vm14, %v2398_v38, %v2402_v53  ;;  %v914_v54 = vld [vmem:[#allocation2 + $0xa4] sm:$0x1]  ;;  %v2535_v38 = vld [vmem:[#allocation2 + $0x9c] sm:$0xe] }
 0x13e   : > { %v2422_v61 = vrot.slane %v2421_v16, 4  ;;  %v1220_v6 = vrot.slane %v1218_v34, 5  ;;  %3170 = vrot.lane.b32.xlu1 %v8261_v46, %s9071_s22  ;;  %v8292_v4 = vcombine.low %v2393_v25, %v2403_v60  ;;  %v1215_v37 = vor.u32 %v1214_v62, %v1211_v14  ;;  %v896_v46 = vld [vmem:[#allocation2 + $0xa0] sm:$0xf] }
 0x13f   : > { %v2412_v22 = vrot.slane %v2411_v15, 4  ;;  %v1224_v45 = vrot.slane %v1222_v21, 4  ;;  %v2426_v17 = vrot.slane %v2424_v32, 5  ;;  %v1230_v24 = vrot.slane %v1228_v57, 5 }
 0x140   : > { %v8164_v51 = vrot.slane %v2534_v10, 9  ;;  %v2660_v43 = vrot.slane %v10360_v2, 5  ;;  %3344 = vrot.lane.b32.xlu0 %v8292_v4, %s9074_s8  ;;  %v1216_v26 = vrot.slane %v1215_v37, 4  ;;  %v2663_v28 = vrot.slane %v10385_v35, 5  ;;  %v1316_v37 = vld [vmem:[#allocation2 + $0x90] sm:$0xe] }
 0x141   : > { %v2417_v30 = vsel %vm9313_vm14, %v2412_v22, %v2416_v47  ;;  %v1225_v41 = vor.u32 %v1224_v45, %v1220_v6  ;;  %v2427_v56 = vsel %vm9313_vm14, %v2422_v61, %v2426_v17  ;;  %v1233_v47 = vshrl.u32 %v895_v27, 16  ;;  %v10455_v45 = vpop.permute.xlu1 %3002 }
 0x142   : > { %v2661_v2 = vsel %vm9226_vm9, %v8164_v51, %v2660_v43  ;;  %v2662_v53 = vrot.slane %v2660_v43, 4  ;;  %3266 = vrot.lane.b32.xlu1 %v8277_v5, %s9069_s20  ;;  %v8293_v25 = vcombine.low %v2417_v30, %v2427_v56  ;;  %v1221_v35 = vsel %vm9313_vm14, %v1216_v26, %v1220_v6  ;;  %v1317_v5 = vld [vmem:[#allocation2 + $0x9c] sm:$0xe] }
 0x143   : > { %v1226_v59 = vrot.slane %v1225_v41, 4  ;;  %v1236_v58 = vshll.u32 %v895_v27, 16  ;;  %v1235_v14 = vrot.slane %v1233_v47, 4  ;;  %v1242_v11 = vshll.u32 %v896_v46, 16  ;;  %v10457_v27 = vpop.permute.xlu0 %3160 }
 0x144   : > { %v2664_v20 = vsel %vm9226_vm9, %v2662_v53, %v2663_v28  ;;  %v1246_v16 = vshrl.u32 %v896_v46, 16  ;;  %v1252_v62 = vshll.u32 %v914_v54, 16  ;;  %v1460_v57 = vrot.slane %v10414_v13, 5  ;;  %v360_v53 = vld [vmem:[#allocation2 + $0xa8] sm:$0x1] }
 0x145   : > { %v1231_v34 = vsel %vm9313_vm14, %v1226_v59, %v1230_v24  ;;  %v8308_v21 = vcombine.low %v2661_v2, %v2664_v20  ;;  %v1238_v15 = vrot.slane %v1236_v58, 5  ;;  %v1244_v61 = vrot.slane %v1242_v11, 5  ;;  %v305_v59 = vld [vmem:[%s9207_s17 + $0x6c] sm:$0xf]  ;;  %v1507_v58 = vld [vmem:[#allocation2 + $0x9c] sm:$0xf] }
 0x146   : > { %v8198_v10 = vcombine.low %v1221_v35, %v1231_v34  ;;  %v1248_v32 = vrot.slane %v1246_v16, 4  ;;  %3346 = vrot.lane.b32.xlu1 %v8293_v25, %s9074_s8  ;;  %v1467_v6 = vrot.slane %v914_v54, 5  ;;  %v8165_v22 = vrot.slane %v2535_v38, 9  ;;  %v304_v25 = vld [vmem:[%s9207_s17 + $0x68] sm:$0xf] }
 0x147   : > { %3424 = vrot.lane.b32.xlu0 %v8308_v21, %s9072_s23  ;;  %v1239_v60 = vor.u32 %v1238_v15, %v1235_v14  ;;  %v2667_v4 = vrot.slane %v10400_v50, 5  ;;  %v1254_v24 = vrot.slane %v1252_v62, 5  ;;  %v2670_v13 = vrot.slane %v10424_v12, 5  ;;  %v10486_v38 = vld [vmem:[#allocation2 + $0xa0] sm:$0xf]  ;;  %v10490_v21 = vpop.permute.xlu0 %3256 }
 0x148   : > { %v1249_v17 = vor.u32 %v1248_v32, %v1244_v61  ;;  %v8135_v51 = vrot.slane %v1317_v5, 9  ;;  %v1464_v41 = vrot.slane %v896_v46, 5  ;;  %v3594_v50 = vsel %vm3584_vm7, %v10383_v0, %v10245_v3  ;;  %v10488_v34 = vpop.permute.xlu1 %3082 }
 0x149   : > { %v1240_v43 = vrot.slane %v1239_v60, 4  ;;  %v2668_v30 = vsel %vm9226_vm9, %v8165_v22, %v2667_v4  ;;  %v2669_v26 = vrot.slane %v2667_v4, 4  ;;  %v8134_v56 = vrot.slane %v1316_v37, 9  ;;  %v420_v60 = vld [vmem:[#allocation2 + $0xb0] sm:$0x1] }
 0x14a   : > { %v1250_v28 = vrot.slane %v1249_v17, 4  ;;  %v1457_v2 = vrot.slane %v10410_v48, 5  ;;  %2836 = vrot.lane.b32.xlu1 %v8198_v10, %s9070_s21  ;;  %v1465_v46 = vsel %vm9226_vm9, %v8135_v51, %v1464_v41  ;;  %v1466_v47 = vrot.slane %v1464_v41, 4  ;;  %v1527_v51 = vld [vmem:[#allocation2 + $0xa4] sm:$0x1] }
 0x14b   : > { %v1245_v12 = vsel %vm9313_vm14, %v1240_v43, %v1244_v61  ;;  %v2671_v54 = vsel %vm9226_vm9, %v2669_v26, %v2670_v13  ;;  %v3629_v11 = vsel %vm3617_vm8, %v10404_v36, %v10345_v44  ;;  %v361_v16 = vsel %vm9172_vm3, 0, %v360_v53  ;;  %v1927_v41 = vld [vmem:[#allocation2 + $0x9c] sm:$0xe] }
 0x14c   : > { %v1255_v3 = vsel %vm9313_vm14, %v1250_v28, %v1254_v24  ;;  %v8309_v0 = vcombine.low %v2668_v30, %v2671_v54  ;;  %v1458_v48 = vsel %vm9226_vm9, %v8134_v56, %v1457_v2  ;;  %v1459_v35 = vrot.slane %v1457_v2, 4  ;;  %362 = vst [vmem:[#allocation2 + $0xa8] sm:$0x1] %v361_v16  ;;  %v10512_v2 = vpop.permute.xlu1 %3162  ;;  %v10514_v53 = vpop.permute.xlu0 %3336  ;;  %v306_v16 = vld [vmem:[%s9207_s17 + $0x70] sm:$0xf] }
 0x14d   : > { %v8199_v20 = vcombine.low %v1245_v12, %v1255_v3  ;;  %v1468_v14 = vsel %vm9226_vm9, %v1466_v47, %v1467_v6  ;;  %v656_v5 = vshrl.u32 %v304_v25, 16  ;;  %v659_v10 = vshll.u32 %v304_v25, 16  ;;  %v8959_v47 = vld [vmem:[#allocation2 + $0x4c] sm:$0xf] }
 0x14e   : > { %3426 = vrot.lane.b32.xlu0 %v8309_v0, %s9072_s23  ;;  %v8215_v15 = vcombine.low %v1465_v46, %v1468_v14  ;;  %v1461_v62 = vsel %vm9226_vm9, %v1459_v35, %v1460_v57  ;;  %v664_v36 = vshrl.u32 %v305_v59, 16  ;;  %v667_v61 = vshll.u32 %v305_v59, 16  ;;  %v8958_v46 = vld [vmem:[#allocation2 + $0x48] sm:$0xf]  ;;  %v363_v0 = vld [vmem:[#allocation2 + $0xb4] sm:$0x1] }
 0x14f   : > { %2838 = vrot.lane.b32.xlu1 %v8199_v20, %s9070_s21  ;;  %v8214_v44 = vcombine.low %v1458_v48, %v1461_v62  ;;  %v1820_v32 = vshrl.u32 %v1507_v58, 16  ;;  %v3627_v6 = vsel %vm3617_vm8, %v3594_v50, %v10284_v49  ;;  %v658_v22 = vrot.slane %v656_v5, 7 }
 0x150   : > { %v1823_v4 = vshll.u32 %v1507_v58, 16  ;;  %v1833_v37 = vshrl.u32 %v10486_v38, 16  ;;  %v10499_v17 = vrot.slane %v664_v36, 7  ;;  %v8230_v24 = vcombine.low %v1507_v58, %v10486_v38  ;;  %v8960_v36 = vld [vmem:[#allocation2 + $0x54] sm:$0xf] }
 0x151   : > { %v1822_v57 = vrot.slane %v1820_v32, 4  ;;  %v3662_v13 = vsel %vm3650_vm12, %v3629_v11, %v10366_v55  ;;  %v661_v43 = vor.u32 %v659_v10, %v658_v22  ;;  %v662_v30 = vrot.slane %v658_v22, 4  ;;  %v307_v10 = vld [vmem:[%s9207_s17 + $0x74] sm:$0xf] }
 0x152   : > { %2916 = vrot.lane.b32.xlu0 %v8214_v44, %s9067_s18  ;;  %v1825_v26 = vrot.slane %v1823_v4, 5  ;;  %v421_v49 = vsel %vm9200_vm5, 0, %v420_v60  ;;  %v669_v28 = vor.u32 %v667_v61, %v10499_v17  ;;  %v3660_v50 = vsel %vm3650_vm12, %v3627_v6, %v10311_v7  ;;  %v8961_v61 = vld [vmem:[#allocation2 + $0x58] sm:$0xf] }
 0x153   : > { %2918 = vrot.lane.b32.xlu1 %v8215_v15, %s9067_s18  ;;  %422 = vst [vmem:[#allocation2 + $0xb0] sm:$0x1] %v421_v49  ;;  %v1829_v55 = vshll.u32 %v10486_v38, 16  ;;  %v1835_v56 = vrot.slane %v1833_v37, 4  ;;  %v1839_v54 = vshll.u32 %v1527_v51, 16  ;;  %v8176_v25 = vcombine.low %v8958_v46, %v8959_v47 }
 0x154   : > { %v1826_v12 = vor.u32 %v1825_v26, %v1822_v57  ;;  %v3693_v3 = vsel %vm3683_vm13, %v3660_v50, %v10347_v42  ;;  %v670_v7 = vsel %vm9238_vm11, %v662_v30, %v669_v28  ;;  %v848_v48 = vld [vmem:[#allocation2 + $0xa8] sm:$0xf]  ;;  %v8150_v59 = vrot.slane %v1927_v41, 9  ;;  %v10542_v57 = vpop.permute.xlu1 %3258 }
 0x155   : > { %v1831_v35 = vrot.slane %v1829_v55, 5  ;;  %v2065_v58 = vrot.slane %v10486_v38, 5  ;;  %8762 = vmatprep.mubr.msk.bf16.mxu0 %vm13206_vm2, %v3693_v3  ;;  %v671_v20 = vrot.slane %v10499_v17, 4  ;;  %v849_v14 = vsel %vm9232_vm10, %v661_v43, %v848_v48  ;;  %851 = vst.msk [vmem:[#allocation2 + $0xac] sm:$0xf] %vm310_vm0, %v670_v7 }
 0x156   : > { %3012 = vrot.lane.b32.xlu0 %v8230_v24, %s9068_s19  ;;  %v1827_v42 = vrot.slane %v1826_v12, 4  ;;  %v1841_v11 = vrot.slane %v1839_v54, 5  ;;  %850 = vst [vmem:[#allocation2 + $0xa8] sm:$0xf] %v849_v14  ;;  %v3457_v62 = vsel %vm3436_vm15, %v8176_v25, %v10392_v52  ;;  %v2068_v5 = vrot.slane %v1527_v51, 5  ;;  %v10544_v24 = vpop.permute.xlu0 %3416 }
 0x157   : > { %v1836_v15 = vor.u32 %v1835_v56, %v1831_v35  ;;  %v2067_v38 = vrot.slane %v2065_v58, 4  ;;  %v10533_v44 = vsel %vm9226_vm9, %v8150_v59, %v2065_v58  ;;  %v8177_v32 = vcombine.low %v8960_v36, %v8961_v61  ;;  %v423_v17 = vld [vmem:[#allocation2 + $0xbc] sm:$0x1] }
 0x158   : > { %v3695_v60 = vsel %vm3683_vm13, %v3662_v13, %v10368_v9  ;;  %v364_v6 = vsel %vm9172_vm3, 0, %v363_v0  ;;  %v1832_v22 = vsel %vm9313_vm14, %v1827_v42, %v1831_v35  ;;  %v673_v4 = vshrl.u32 %v306_v16, 16  ;;  %v10570_v42 = vpop.permute.xlu1 %3338 }
 0x159   : > { %v1837_v52 = vrot.slane %v1836_v15, 4  ;;  %365 = vst [vmem:[#allocation2 + $0xb4] sm:$0x1] %v364_v6  ;;  %v676_v37 = vshll.u32 %v306_v16, 16  ;;  %8763 = vmatmul.mubr.msk.bf16.gmra.mxu0 %vm13206_vm2, %v3695_v60  ;;  %v2069_v9 = vsel %vm9226_vm9, %v2067_v38, %v2068_v5  ;;  %v3460_v13 = vsel %vm3436_vm15, %v8177_v32, %v10417_v23 }
 0x15a   : > { %v852_v51 = vld [vmem:[#allocation2 + $0xb0] sm:$0x1]  ;;  %v681_v43 = vshrl.u32 %v307_v10, 16  ;;  %v684_v30 = vshll.u32 %v307_v10, 16  ;;  %v675_v41 = vrot.slane %v673_v4, 7  ;;  %v3501_v28 = vsel %vm3485_vm1, %v3460_v13, %v10436_v31 }
 0x15b   : > { %v853_v26 = vsel %vm9172_vm3, %v671_v20, %v852_v51  ;;  %v1842_v49 = vsel %vm9313_vm14, %v1837_v52, %v1841_v11  ;;  %v424_v56 = vsel %vm9200_vm5, 0, %v423_v17  ;;  %v8262_v23 = vcombine.low %v10533_v44, %v2069_v9  ;;  %v10572_v11 = vpop.permute.xlu0 %3418 }
 0x15c   : > { %854 = vst [vmem:[#allocation2 + $0xb0] sm:$0x1] %v853_v26  ;;  %v8246_v50 = vcombine.low %v1832_v22, %v1842_v49  ;;  %v683_v55 = vrot.slane %v681_v43, 7  ;;  %v1510_v12 = vld [vmem:[#allocation2 + $0xac] sm:$0xf]  ;;  %v678_v54 = vor.u32 %v676_v37, %v675_v41  ;;  %v679_v46 = vrot.slane %v675_v41, 4 }
 0x15d   : > { %v10561_v47 = vsel %vm3485_vm1, %v3457_v62, %v10394_v19  ;;  %425 = vst [vmem:[#allocation2 + $0xbc] sm:$0x1] %v424_v56  ;;  %v1509_v25 = vld [vmem:[#allocation2 + $0xa8] sm:$0xf]  ;;  %v1857_v3 = vshrl.u32 %v1510_v12, 16  ;;  %v1853_v0 = vshll.u32 %v1510_v12, 16  ;;  %v10568_v35 = vsel %vm3518_vm4, %v3501_v28, %v10455_v45  ;;  %v10594_v56 = vpop.permute.xlu1 %2828 }
 0x15e   : > { %3092 = vrot.lane.b32.xlu0 %v8246_v50, %s9073_s29  ;;  %v1928_v31 = vld [vmem:[#allocation2 + $0xa8] sm:$0xe]  ;;  %v686_v7 = vor.u32 %v684_v30, %v683_v55  ;;  %v10564_v48 = vld [vmem:[#allocation2 + $0xac] sm:$0xf]  ;;  %v1844_v59 = vshrl.u32 %v1509_v25, 16  ;;  %v1847_v58 = vshll.u32 %v1509_v25, 16  ;;  %v8231_v20 = vcombine.low %v1509_v25, %v1510_v12 }
 0x15f   : > { %v8151_v14 = vrot.slane %v1928_v31, 9  ;;  %v2116_v19 = vld [vmem:[#allocation2 + $0xa8] sm:$0xf]  ;;  %v1855_v16 = vrot.slane %v1853_v0, 5  ;;  %v1859_v15 = vrot.slane %v1857_v3, 4  ;;  %v2072_v62 = vrot.slane %v1510_v12, 5  ;;  %v10596_v12 = vpop.permute.xlu0 %2908 }
 0x160   : > { %v687_v38 = vsel %vm9238_vm11, %v679_v46, %v686_v7  ;;  %v855_v5 = vld [vmem:[#allocation2 + $0xb4] sm:$0xf]  ;;  %v1846_v10 = vrot.slane %v1844_v59, 4  ;;  %v1849_v44 = vrot.slane %v1847_v58, 5  ;;  %3014 = vrot.lane.b32.xlu1 %v8231_v20, %s9068_s19  ;;  %v688_v45 = vrot.slane %v683_v55, 4 }
 0x161   : > { %v856_v36 = vsel %vm9232_vm10, %v678_v54, %v855_v5  ;;  %858 = vst.msk [vmem:[#allocation2 + $0xb8] sm:$0xf] %vm310_vm0, %v687_v38  ;;  %v1860_v61 = vor.u32 %v1859_v15, %v1855_v16  ;;  %v10582_v32 = vsel %vm9226_vm9, %v8151_v14, %v2072_v62  ;;  %v2074_v60 = vrot.slane %v2072_v62, 4  ;;  %v10592_v55 = vld [vmem:[#allocation2 + $0xa8] sm:$0xf] }
 0x162   : > { %3172 = vrot.lane.b32.xlu0 %v8262_v23, %s9071_s22  ;;  %857 = vst [vmem:[#allocation2 + $0xb4] sm:$0xf] %v856_v36  ;;  %v2429_v6 = vshrl.u32 %v2116_v19, 16  ;;  %v1850_v52 = vor.u32 %v1849_v44, %v1846_v10  ;;  %v2432_v4 = vshll.u32 %v2116_v19, 16  ;;  %v2442_v37 = vshrl.u32 %v10564_v48, 16 }
 0x163   : > { %v1528_v22 = vld [vmem:[#allocation2 + $0xb0] sm:$0x1]  ;;  %v8278_v17 = vcombine.low %v2116_v19, %v10564_v48  ;;  %v1861_v9 = vrot.slane %v1860_v61, 4  ;;  %v2438_v50 = vshll.u32 %v10564_v48, 16  ;;  %v1257_v14 = vshrl.u32 %v10592_v55, 16 }
 0x164   : > { %v10587_v51 = vld [vmem:[#allocation2 + $0xb0] sm:$0x1]  ;;  %v1863_v13 = vshll.u32 %v1528_v22, 16  ;;  %v2075_v43 = vrot.slane %v1528_v22, 5  ;;  %v2431_v30 = vrot.slane %v2429_v6, 4  ;;  %v1851_v49 = vrot.slane %v1850_v52, 4 }
 0x165   : > { %v859_v26 = vld [vmem:[#allocation2 + $0xbc] sm:$0x1]  ;;  %v2434_v41 = vrot.slane %v2432_v4, 5  ;;  %v2444_v46 = vrot.slane %v2442_v37, 4  ;;  %v2448_v25 = vshll.u32 %v10587_v51, 16  ;;  %v2440_v7 = vrot.slane %v2438_v50, 5  ;;  %v10621_v4 = vpop.permute.xlu1 %2830  ;;  %v10623_v37 = vpop.permute.xlu0 %3004 }
 0x166   : > { %v860_v28 = vsel %vm9172_vm3, %v688_v45, %v859_v26  ;;  %v1865_v23 = vrot.slane %v1863_v13, 5  ;;  %v2076_v54 = vsel %vm9226_vm9, %v2074_v60, %v2075_v43  ;;  %3268 = vrot.lane.b32.xlu0 %v8278_v17, %s9069_s20  ;;  %v1856_v3 = vsel %vm9313_vm14, %v1851_v49, %v1855_v16  ;;  %v10614_v61 = vld [vmem:[#allocation2 + $0xac] sm:$0xf] }
 0x167   : > { %861 = vst [vmem:[#allocation2 + $0xbc] sm:$0x1] %v860_v28  ;;  %v8263_v0 = vcombine.low %v10582_v32, %v2076_v54  ;;  %v2435_v31 = vor.u32 %v2434_v41, %v2431_v30  ;;  %v2450_v20 = vrot.slane %v2448_v25, 5  ;;  %v1260_v19 = vshll.u32 %v10592_v55, 16  ;;  %v10616_v32 = vld [vmem:[#allocation2 + $0xb0] sm:$0x1] }
 0x168   : > { %v1866_v59 = vsel %vm9313_vm14, %v1861_v9, %v1865_v23  ;;  %v10607_v58 = vld [vmem:[#allocation2 + $0xb8] sm:$0xf]  ;;  %v2445_v36 = vor.u32 %v2444_v46, %v2440_v7  ;;  %v1259_v52 = vrot.slane %v1257_v14, 4  ;;  %v1266_v49 = vshll.u32 %v10614_v61, 16  ;;  %v2536_v25 = vld [vmem:[#allocation2 + $0xa8] sm:$0xe] }
 0x169   : > { %v8247_v15 = vcombine.low %v1856_v3, %v1866_v59  ;;  %v2118_v62 = vld [vmem:[#allocation2 + $0xb4] sm:$0xf]  ;;  %v2466_v38 = vshrl.u32 %v10607_v58, 16  ;;  %v2462_v16 = vshll.u32 %v10607_v58, 16  ;;  %v2436_v5 = vrot.slane %v2435_v31, 4 }
 0x16a   : > { %v2453_v10 = vshrl.u32 %v2118_v62, 16  ;;  %v2456_v44 = vshll.u32 %v2118_v62, 16  ;;  %v8279_v45 = vcombine.low %v2118_v62, %v10607_v58  ;;  %v2446_v13 = vrot.slane %v2445_v36, 4  ;;  %v10643_v36 = vpop.permute.xlu0 %3084 }
 0x16b   : > { %3094 = vrot.lane.b32.xlu1 %v8247_v15, %s9073_s29  ;;  %v2464_v60 = vrot.slane %v2462_v16, 5  ;;  %v2468_v6 = vrot.slane %v2466_v38, 4  ;;  %v2441_v22 = vsel %vm9313_vm14, %v2436_v5, %v2440_v7  ;;  %v1262_v43 = vrot.slane %v1260_v19, 5  ;;  %v10634_v38 = vld [vmem:[#allocation2 + $0xb4] sm:$0xf] }
 0x16c   : > { %v2455_v17 = vrot.slane %v2453_v10, 4  ;;  %v2458_v9 = vrot.slane %v2456_v44, 5  ;;  %v1270_v41 = vshrl.u32 %v10614_v61, 16  ;;  %v1276_v28 = vshll.u32 %v10616_v32, 16  ;;  %v10639_v44 = vld [vmem:[#allocation2 + $0xb8] sm:$0xf] }
 0x16d   : > { %v2469_v26 = vor.u32 %v2468_v6, %v2464_v60  ;;  %v2451_v54 = vsel %vm9313_vm14, %v2446_v13, %v2450_v20  ;;  %v1263_v46 = vor.u32 %v1262_v43, %v1259_v52  ;;  %v1268_v7 = vrot.slane %v1266_v49, 5 }
 0x16e   : > { %v10625_v30 = vld [vmem:[#allocation2 + $0xbc] sm:$0x1]  ;;  %v2459_v50 = vor.u32 %v2458_v9, %v2455_v17  ;;  %v8294_v31 = vcombine.low %v2441_v22, %v2451_v54  ;;  %v1272_v59 = vrot.slane %v1270_v41, 4  ;;  %v1278_v62 = vrot.slane %v1276_v28, 5  ;;  %v2537_v17 = vld [vmem:[#allocation2 + $0xb4] sm:$0xe] }
 0x16f   : > { %v2472_v23 = vshll.u32 %v10625_v30, 16  ;;  %3174 = vrot.lane.b32.xlu1 %v8263_v0, %s9071_s22  ;;  %v2470_v3 = vrot.slane %v2469_v26, 4  ;;  %v1264_v15 = vrot.slane %v1263_v46, 4  ;;  %v8166_v5 = vrot.slane %v2536_v25, 9  ;;  %v10641_v0 = vpop.permute.xlu1 %2910 }
 0x170   : > { %v2460_v14 = vrot.slane %v2459_v50, 4  ;;  %3348 = vrot.lane.b32.xlu0 %v8294_v31, %s9074_s8  ;;  %v1273_v16 = vor.u32 %v1272_v59, %v1268_v7  ;;  %v2674_v20 = vrot.slane %v10564_v48, 5  ;;  %v2677_v10 = vrot.slane %v10587_v51, 5  ;;  %v10654_v51 = vld [vmem:[#allocation2 + $0xbc] sm:$0x1] }
 0x171   : > { %v2474_v19 = vrot.slane %v2472_v23, 5  ;;  %v3532_v52 = vsel %vm3518_vm4, %v10561_v47, %v10419_v40  ;;  %v1269_v48 = vsel %vm9313_vm14, %v1264_v15, %v1268_v7  ;;  %v1281_v26 = vshrl.u32 %v10634_v38, 16 }
 0x172   : > { %v2465_v6 = vsel %vm9313_vm14, %v2460_v14, %v2464_v60  ;;  %v1274_v13 = vrot.slane %v1273_v16, 4  ;;  %v2675_v60 = vsel %vm9226_vm9, %v8166_v5, %v2674_v20  ;;  %v2676_v43 = vrot.slane %v2674_v20, 4 }
 0x173   : > { %v2475_v22 = vsel %vm9313_vm14, %v2470_v3, %v2474_v19  ;;  %3270 = vrot.lane.b32.xlu1 %v8279_v45, %s9069_s20  ;;  %v1284_v49 = vshll.u32 %v10634_v38, 16  ;;  %v1290_v40 = vshll.u32 %v10639_v44, 16  ;;  %v1294_v47 = vshrl.u32 %v10639_v44, 16  ;;  %v1319_v3 = vld [vmem:[#allocation2 + $0xb4] sm:$0xe]  ;;  %v10673_v15 = vpop.permute.xlu1 %3006 }
 0x174   : > { %v8295_v9 = vcombine.low %v2465_v6, %v2475_v22  ;;  %v1279_v41 = vsel %vm9313_vm14, %v1274_v13, %v1278_v62  ;;  %v2678_v45 = vsel %vm9226_vm9, %v2676_v43, %v2677_v10  ;;  %v1300_v28 = vshll.u32 %v10654_v51, 16  ;;  %v1318_v19 = vld [vmem:[#allocation2 + $0xa8] sm:$0xe]  ;;  %v10675_v62 = vpop.permute.xlu0 %3164 }
 0x175   : > { %v8167_v50 = vrot.slane %v2537_v17, 9  ;;  %v8310_v23 = vcombine.low %v2675_v60, %v2678_v45  ;;  %v3567_v54 = vsel %vm3551_vm6, %v10568_v35, %v10488_v34  ;;  %v1283_v46 = vrot.slane %v1281_v26, 4  ;;  %v366_v60 = vld [vmem:[#allocation2 + $0xc0] sm:$0x1] }
 0x176   : > { %v1286_v25 = vrot.slane %v1284_v49, 5  ;;  %v8200_v31 = vcombine.low %v1269_v48, %v1279_v41  ;;  %v1292_v7 = vrot.slane %v1290_v40, 5  ;;  %v1296_v59 = vrot.slane %v1294_v47, 4  ;;  %v308_v40 = vld [vmem:[%s9207_s17 + $0x78] sm:$0xf] }
 0x177   : > { %3350 = vrot.lane.b32.xlu1 %v8295_v9, %s9074_s8  ;;  %v2681_v14 = vrot.slane %v10607_v58, 5  ;;  %3428 = vrot.lane.b32.xlu0 %v8310_v23, %s9072_s23  ;;  %v3565_v34 = vsel %vm3551_vm6, %v3532_v52, %v10438_v18  ;;  %v1302_v16 = vrot.slane %v1300_v28, 5  ;;  %v2684_v5 = vrot.slane %v10625_v30, 5  ;;  %v309_v28 = vld [vmem:[%s9207_s17 + $0x7c] sm:$0xf] }
 0x178   : > { %v1287_v35 = vor.u32 %v1286_v25, %v1283_v46  ;;  %v1297_v20 = vor.u32 %v1296_v59, %v1292_v7  ;;  %v8137_v58 = vrot.slane %v1319_v3, 9  ;;  %v1478_v48 = vrot.slane %v10639_v44, 5  ;;  %v10702_v23 = vpop.permute.xlu1 %3086  ;;  %v10704_v46 = vpop.permute.xlu0 %3260 }
 0x179   : > { %v2682_v10 = vsel %vm9226_vm9, %v8167_v50, %v2681_v14  ;;  %v2683_v6 = vrot.slane %v2681_v14, 4  ;;  %v1481_v17 = vrot.slane %v10654_v51, 5  ;;  %v8136_v9 = vrot.slane %v1318_v19, 9  ;;  %v1511_v50 = vld [vmem:[#allocation2 + $0xb4] sm:$0xf] }
 0x17a   : > { %v1288_v22 = vrot.slane %v1287_v35, 4  ;;  %v1298_v18 = vrot.slane %v1297_v20, 4  ;;  %v1471_v52 = vrot.slane %v10614_v61, 5  ;;  %v1474_v13 = vrot.slane %v10616_v32, 5 }
 0x17b   : > { %2840 = vrot.lane.b32.xlu1 %v8200_v31, %s9070_s21  ;;  %v2685_v30 = vsel %vm9226_vm9, %v2683_v6, %v2684_v5  ;;  %v1479_v51 = vsel %vm9226_vm9, %v8137_v58, %v1478_v48  ;;  %v1480_v49 = vrot.slane %v1478_v48, 4  ;;  %v3600_v41 = vsel %vm3584_vm7, %v3567_v54, %v10512_v2  ;;  %v10713_v54 = vld [vmem:[#allocation2 + $0xb8] sm:$0xf]  ;;  %v426_v5 = vld [vmem:[#allocation2 + $0xc8] sm:$0x1] }
 0x17c   : > { %v1293_v43 = vsel %vm9313_vm14, %v1288_v22, %v1292_v7  ;;  %v8311_v26 = vcombine.low %v2682_v10, %v2685_v30  ;;  %v1303_v47 = vsel %vm9313_vm14, %v1298_v18, %v1302_v16  ;;  %v1472_v45 = vsel %vm9226_vm9, %v8136_v9, %v1471_v52  ;;  %v10727_v18 = vld [vmem:[#allocation2 + $0xbc] sm:$0x1] }
 0x17d   : > { %v1473_v32 = vrot.slane %v1471_v52, 4  ;;  %v8201_v25 = vcombine.low %v1293_v43, %v1303_v47  ;;  %v3598_v3 = vsel %vm3584_vm7, %v3565_v34, %v10457_v27  ;;  %v1482_v31 = vsel %vm9226_vm9, %v1480_v49, %v1481_v17 }
 0x17e   : > { %3430 = vrot.lane.b32.xlu0 %v8311_v26, %s9072_s23  ;;  %v367_v2 = vsel %vm9172_vm3, 0, %v366_v60  ;;  %v8217_v7 = vcombine.low %v1479_v51, %v1482_v31  ;;  %v690_v14 = vshrl.u32 %v308_v40, 16  ;;  %v693_v19 = vshll.u32 %v308_v40, 16  ;;  %v10731_v60 = vpop.permute.xlu1 %3166  ;;  %v1929_v40 = vld [vmem:[#allocation2 + $0xb4] sm:$0xe] }
 0x17f   : > { %v1475_v59 = vsel %vm9226_vm9, %v1473_v32, %v1474_v13  ;;  %368 = vst [vmem:[#allocation2 + $0xc0] sm:$0x1] %v367_v2  ;;  %2842 = vrot.lane.b32.xlu1 %v8201_v25, %s9070_s21  ;;  %v698_v16 = vshrl.u32 %v309_v28, 16  ;;  %v701_v27 = vshll.u32 %v309_v28, 16  ;;  %v1868_v34 = vshrl.u32 %v1511_v50, 16 }
 0x180   : > { %v8216_v35 = vcombine.low %v1472_v45, %v1475_v59  ;;  %v3633_v20 = vsel %vm3617_vm8, %v3600_v41, %v10542_v57  ;;  %v692_v10 = vrot.slane %v690_v14, 7  ;;  %v1871_v6 = vshll.u32 %v1511_v50, 16  ;;  %v10733_v43 = vpop.permute.xlu0 %3340  ;;  %v8962_v25 = vld [vmem:[#allocation2 + $0x60] sm:$0xf] }
 0x181   : > { %v1881_v58 = vshrl.u32 %v10713_v54, 16  ;;  %v3631_v22 = vsel %vm3617_vm8, %v3598_v3, %v10490_v21  ;;  %v10724_v48 = vrot.slane %v698_v16, 7  ;;  %v1870_v17 = vrot.slane %v1868_v34, 4  ;;  %v8963_v3 = vld [vmem:[#allocation2 + $0x64] sm:$0xf] }
 0x182   : > { %2920 = vrot.lane.b32.xlu0 %v8216_v35, %s9067_s18  ;;  %v8232_v9 = vcombine.low %v1511_v50, %v10713_v54  ;;  %v695_v30 = vor.u32 %v693_v19, %v692_v10  ;;  %v696_v52 = vrot.slane %v692_v10, 4  ;;  %v1873_v13 = vrot.slane %v1871_v6, 5  ;;  %v10754_v19 = vld [vmem:[#allocation2 + $0xd0] sm:$0xf]  ;;  %v429_v34 = vld [vmem:[#allocation2 + $0xd4] sm:$0x1] }
 0x183   : > { %v427_v57 = vsel %vm9200_vm5, 0, %v426_v5  ;;  %2922 = vrot.lane.b32.xlu1 %v8217_v7, %s9067_s18  ;;  %v703_v21 = vor.u32 %v701_v27, %v10724_v48  ;;  %v3664_v26 = vsel %vm3650_vm12, %v3631_v22, %v10514_v53  ;;  %v1877_v51 = vshll.u32 %v10713_v54, 16  ;;  %v8964_v5 = vld [vmem:[#allocation2 + $0x6c] sm:$0xf]  ;;  %v10761_v22 = vpop.permute.xlu1 %3262 }
 0x184   : > { %428 = vst [vmem:[#allocation2 + $0xc8] sm:$0x1] %v427_v57  ;;  %v1883_v49 = vrot.slane %v1881_v58, 4  ;;  %v3666_v47 = vsel %vm3650_vm12, %v3633_v20, %v10570_v42  ;;  %v1874_v41 = vor.u32 %v1873_v13, %v1870_v17  ;;  %v1887_v45 = vshll.u32 %v10727_v18, 16  ;;  %v369_v42 = vld [vmem:[#allocation2 + $0xcc] sm:$0x1] }
 0x185   : > { %v3697_v32 = vsel %vm3683_vm13, %v3664_v26, %v10544_v24  ;;  %v704_v28 = vsel %vm9238_vm11, %v696_v52, %v703_v21  ;;  %v1879_v53 = vrot.slane %v1877_v51, 5  ;;  %v8178_v31 = vcombine.low %v8962_v25, %v8963_v3  ;;  %v8965_v20 = vld [vmem:[#allocation2 + $0x70] sm:$0xf] }
 0x186   : > { %v862_v50 = vld [vmem:[#allocation2 + $0xc0] sm:$0xf]  ;;  %3016 = vrot.lane.b32.xlu0 %v8232_v9, %s9068_s19  ;;  %v2079_v2 = vrot.slane %v10713_v54, 5  ;;  %8766 = vmatprep.mubr.msk.bf16.mxu0 %vm13206_vm2, %v3697_v32  ;;  %v705_v7 = vrot.slane %v10724_v48, 4  ;;  %865 = vst.msk [vmem:[#allocation2 + $0xc4] sm:$0xf] %vm310_vm0, %v704_v28  ;;  %v8179_v10 = vcombine.low %v8964_v5, %v8965_v20  ;;  %v3699_v6 = vsel %vm3683_vm13, %v3666_v47, %v10572_v11  ;;  %v10763_v48 = vpop.permute.xlu0 %3420 }
 0x187   : > { %v863_v24 = vsel %vm9232_vm10, %v695_v30, %v862_v50  ;;  %v1875_v59 = vrot.slane %v1874_v41, 4  ;;  %v8152_v14 = vrot.slane %v1929_v40, 9  ;;  %v1884_v35 = vor.u32 %v1883_v49, %v1879_v53  ;;  %8767 = vmatmul.mubr.msk.bf16.gmra.mxu0 %vm13206_vm2, %v3699_v6 }
 0x188   : > { %864 = vst [vmem:[#allocation2 + $0xc0] sm:$0xf] %v863_v24  ;;  %v1889_v16 = vrot.slane %v1887_v45, 5  ;;  %v2081_v27 = vrot.slane %v2079_v2, 4  ;;  %v2082_v54 = vrot.slane %v10727_v18, 5  ;;  %v370_v58 = vsel %vm9172_vm3, 0, %v369_v42 }
 0x189   : > { %v1880_v17 = vsel %vm9313_vm14, %v1875_v59, %v1879_v53  ;;  %v1885_v9 = vrot.slane %v1884_v35, 4  ;;  %v3463_v18 = vsel %vm3436_vm15, %v8178_v31, %v10594_v56  ;;  %371 = vst [vmem:[#allocation2 + $0xcc] sm:$0x1] %v370_v58  ;;  %v2514_v30 = vshrl.u32 %v10754_v19, 16 }
 0x18a   : > { %v2080_v52 = vsel %vm9226_vm9, %v8152_v14, %v2079_v2  ;;  %v3466_v13 = vsel %vm3436_vm15, %v8179_v10, %v10621_v4  ;;  %v13228_v57 = vmov 0   ;;  %v430_v21 = vsel %vm9200_vm5, 0, %v429_v34 }
 0x18b   : > { %v866_v11 = vld [vmem:[#allocation2 + $0xc8] sm:$0x1]  ;;  %373 = vst.msk [vmem:[#allocation2 + $0xcc] sm:$0xf] %vm310_vm0, %v13228_v57  ;;  %v2510_v56 = vshll.u32 %v10754_v19, 16  ;;  %v1890_v51 = vsel %vm9313_vm14, %v1885_v9, %v1889_v16  ;;  %v2083_v49 = vsel %vm9226_vm9, %v2081_v27, %v2082_v54  ;;  %v3505_v4 = vsel %vm3485_vm1, %v3466_v13, %v10641_v0 }
 0x18c   : > { %v867_v26 = vsel %vm9172_vm3, %v705_v7, %v866_v11  ;;  %431 = vst [vmem:[#allocation2 + $0xd4] sm:$0x1] %v430_v21  ;;  %v8248_v40 = vcombine.low %v1880_v17, %v1890_v51  ;;  %v3503_v41 = vsel %vm3485_vm1, %v3463_v18, %v10596_v12  ;;  %v2516_v32 = vrot.slane %v2514_v30, 4  ;;  %v10797_v2 = vpop.permute.xlu0 %3422 }
 0x18d   : > { %868 = vst [vmem:[#allocation2 + $0xc8] sm:$0x1] %v867_v26  ;;  %v1514_v47 = vld [vmem:[#allocation2 + $0xc4] sm:$0xf]  ;;  %v10790_v45 = vrot.slane %v2510_v56, 5  ;;  %v8264_v3 = vcombine.low %v2080_v52, %v2083_v49  ;;  %v3538_v0 = vsel %vm3518_vm4, %v3505_v4, %v10673_v15  ;;  %v10795_v31 = vpop.permute.xlu1 %3342  ;;  %v3536_v14 = vsel %vm3518_vm4, %v3503_v41, %v10623_v37 }
 0x18e   : > { %v1905_v50 = vshrl.u32 %v1514_v47, 16  ;;  %v1901_v53 = vshll.u32 %v1514_v47, 16  ;;  %3096 = vrot.lane.b32.xlu0 %v8248_v40, %s9073_s29  ;;  %v10799_v59 = vld [vmem:[#allocation2 + $0xc4] sm:$0xf]  ;;  %v2086_v27 = vrot.slane %v1514_v47, 5 }
 0x18f   : > { %v1513_v28 = vld [vmem:[#allocation2 + $0xc0] sm:$0xf]  ;;  %v2490_v37 = vshrl.u32 %v10799_v59, 16  ;;  %v2517_v13 = vor.u32 %v2516_v32, %v10790_v45 }
 0x190   : > { %v1930_v25 = vld [vmem:[#allocation2 + $0xc0] sm:$0xe]  ;;  %v1892_v42 = vshrl.u32 %v1513_v28, 16  ;;  %v1895_v7 = vshll.u32 %v1513_v28, 16  ;;  %v8233_v12 = vcombine.low %v1513_v28, %v1514_v47  ;;  %v1903_v35 = vrot.slane %v1901_v53, 5 }
 0x191   : > { %v2120_v24 = vld [vmem:[#allocation2 + $0xc0] sm:$0xf]  ;;  %v1907_v16 = vrot.slane %v1905_v50, 4  ;;  %v8153_v15 = vrot.slane %v1930_v25, 9  ;;  %v2088_v58 = vrot.slane %v2086_v27, 4  ;;  %v10813_v49 = vpop.permute.xlu1 %2832 }
 0x192   : > { %v2477_v54 = vshrl.u32 %v2120_v24, 16  ;;  %v1894_v34 = vrot.slane %v1892_v42, 4  ;;  %v1897_v5 = vrot.slane %v1895_v7, 5  ;;  %3018 = vrot.lane.b32.xlu1 %v8233_v12, %s9068_s19  ;;  %v10804_v20 = vld [vmem:[#allocation2 + $0xcc] sm:$0xf]  ;;  %v2480_v10 = vshll.u32 %v2120_v24, 16  ;;  %3176 = vrot.lane.b32.xlu0 %v8264_v3, %s9071_s22 }
 0x193   : > { %v1908_v6 = vor.u32 %v1907_v16, %v1903_v35  ;;  %v2501_v17 = vshrl.u32 %v10804_v20, 16  ;;  %v2504_v30 = vshll.u32 %v10804_v20, 16  ;;  %v10810_v52 = vld [vmem:[#allocation2 + $0xd4] sm:$0x1]  ;;  %v10815_v4 = vpop.permute.xlu0 %2912  ;;  %v8280_v28 = vcombine.low %v2120_v24, %v10799_v59 }
 0x194   : > { %v1530_v9 = vld [vmem:[#allocation2 + $0xc8] sm:$0x1]  ;;  %v1898_v18 = vor.u32 %v1897_v5, %v1894_v34  ;;  %v2479_v11 = vrot.slane %v2477_v54, 4  ;;  %v2482_v41 = vrot.slane %v2480_v10, 5  ;;  %v2087_v53 = vsel %vm9226_vm9, %v8153_v15, %v2086_v27  ;;  %v2539_v10 = vld [vmem:[#allocation2 + $0xcc] sm:$0xe] }
 0x195   : > { %v1909_v21 = vrot.slane %v1908_v6, 4  ;;  %v1911_v56 = vshll.u32 %v1530_v9, 16  ;;  %v2089_v26 = vrot.slane %v1530_v9, 5  ;;  %v2503_v51 = vrot.slane %v2501_v17, 4  ;;  %v2138_v3 = vld [vmem:[#allocation2 + $0xc8] sm:$0x1] }
 0x196   : > { %v1899_v40 = vrot.slane %v1898_v18, 4  ;;  %v2506_v47 = vrot.slane %v2504_v30, 5  ;;  %v2520_v25 = vshll.u32 %v10810_v52, 16  ;;  %3272 = vrot.lane.b32.xlu0 %v8280_v28, %s9069_s20  ;;  %v2518_v12 = vrot.slane %v2517_v13, 4 }
 0x197   : > { %v1913_v50 = vrot.slane %v1911_v56, 5  ;;  %v2090_v32 = vsel %vm9226_vm9, %v2088_v58, %v2089_v26  ;;  %v2483_v16 = vor.u32 %v2482_v41, %v2479_v11  ;;  %v2486_v27 = vshll.u32 %v10799_v59, 16  ;;  %v2538_v58 = vld [vmem:[#allocation2 + $0xc0] sm:$0xe]  ;;  %v10834_v11 = vpop.permute.xlu1 %2834  ;;  %v10836_v13 = vpop.permute.xlu0 %3008 }
 0x198   : > { %v1904_v42 = vsel %vm9313_vm14, %v1899_v40, %v1903_v35  ;;  %v2507_v7 = vor.u32 %v2506_v47, %v2503_v51  ;;  %v2522_v54 = vrot.slane %v2520_v25, 5  ;;  %v2492_v34 = vrot.slane %v2490_v37, 4 }
 0x199   : > { %v1914_v24 = vsel %vm9313_vm14, %v1909_v21, %v1913_v50  ;;  %v2496_v15 = vshll.u32 %v2138_v3, 16  ;;  %v2695_v6 = vrot.slane %v10754_v19, 5  ;;  %v3571_v35 = vsel %vm3551_vm6, %v3538_v0, %v10702_v23 }
 0x19a   : > { %v8249_v5 = vcombine.low %v1904_v42, %v1914_v24  ;;  %v2508_v17 = vrot.slane %v2507_v7, 4  ;;  %v2484_v9 = vrot.slane %v2483_v16, 4  ;;  %v2488_v18 = vrot.slane %v2486_v27, 5  ;;  %v4140_v16 = vld [vmem:[#allocation3 + $0x14] sm:$0x1] }
 0x19b   : > { %v3569_v30 = vsel %vm3551_vm6, %v3536_v14, %v10643_v36  ;;  %v8265_v37 = vcombine.low %v2087_v53, %v2090_v32  ;;  %v8281_v21 = vcombine.low %v10804_v20, %v10754_v19  ;;  %v2523_v56 = vsel %vm9313_vm14, %v2518_v12, %v2522_v54  ;;  %v4082_v12 = vld [vmem:[#allocation3 + $0xc] sm:$0x1] }
 0x19c   : > { %3098 = vrot.lane.b32.xlu1 %v8249_v5, %s9073_s29  ;;  %v3604_v23 = vsel %vm3584_vm7, %v3571_v35, %v10731_v60  ;;  %v2493_v0 = vor.u32 %v2492_v34, %v2488_v18  ;;  %v2498_v26 = vrot.slane %v2496_v15, 5  ;;  %v8169_v51 = vrot.slane %v2539_v10, 9  ;;  %v4137_v34 = vld [vmem:[#allocation3 + $0x8] sm:$0x1]  ;;  %v10883_v5 = vld [vmem:[#allocation3 + $0x4] sm:$0xf] }
 0x19d   : > { %v8168_v36 = vrot.slane %v2538_v58, 9  ;;  %v2697_v14 = vrot.slane %v2695_v6, 4  ;;  %v2688_v40 = vrot.slane %v10799_v59, 5  ;;  %v2691_v47 = vrot.slane %v2138_v3, 5  ;;  %v4091_v35 = vld [vmem:[#allocation3 + $0x30] sm:$0x1] }
 0x19e   : > { %v3602_v41 = vsel %vm3584_vm7, %v3569_v30, %v10675_v62  ;;  %v2513_v19 = vsel %vm9313_vm14, %v2508_v17, %v10790_v45  ;;  %v2489_v20 = vsel %vm9313_vm14, %v2484_v9, %v2488_v18  ;;  %v2494_v28 = vrot.slane %v2493_v0, 4  ;;  %v10871_v3 = vpop.permute.xlu0 %3088  ;;  %v4088_v17 = vld [vmem:[#allocation3 + $0x24] sm:$0x1]  ;;  %v4149_v9 = vld [vmem:[#allocation3 + $0x38] sm:$0x1] }
 0x19f   : > { %v3635_v60 = vsel %vm3617_vm8, %v3602_v41, %v10704_v46  ;;  %v2698_v50 = vrot.slane %v10810_v52, 5  ;;  %v2690_v59 = vrot.slane %v2688_v40, 4  ;;  %v3637_v53 = vsel %vm3617_vm8, %v3604_v23, %v10761_v22  ;;  %v10869_v52 = vpop.permute.xlu1 %2914  ;;  %v4085_v22 = vld [vmem:[#allocation3 + $0x18] sm:$0x1] }
 0x1a0   : > { %3178 = vrot.lane.b32.xlu1 %v8265_v37, %s9071_s22  ;;  %v3668_v62 = vsel %vm3650_vm12, %v3635_v60, %v10733_v43  ;;  %v2499_v45 = vsel %vm9313_vm14, %v2494_v28, %v2498_v26  ;;  %v2689_v32 = vsel %vm9226_vm9, %v8168_v36, %v2688_v40  ;;  %v3670_v46 = vsel %vm3650_vm12, %v3637_v53, %v10795_v31  ;;  %v4143_v31 = vld [vmem:[#allocation3 + $0x20] sm:$0x1]  ;;  %v4097_v36 = vld [vmem:[#allocation3 + $0x48] sm:$0x1] }
 0x1a1   : > { %v3701_v25 = vsel %vm3683_vm13, %v3668_v62, %v10763_v48  ;;  %v8296_v42 = vcombine.low %v2489_v20, %v2499_v45  ;;  %v2692_v43 = vsel %vm9226_vm9, %v2690_v59, %v2691_v47  ;;  %v3703_v7 = vsel %vm3683_vm13, %v3670_v46, %v10797_v2  ;;  %v4079_v48 = vld [vmem:[#allocation3] sm:$0x1]  ;;  %v4094_v20 = vld [vmem:[#allocation3 + $0x3c] sm:$0x1]  ;;  %v8967_v62 = vld [vmem:[#allocation2 + $0x7c] sm:$0xf] }
 0x1a2   : > { %8770 = vmatprep.mubr.msk.bf16.mxu0 %vm13206_vm2, %v3701_v25  ;;  %v8297_v24 = vcombine.low %v2513_v19, %v2523_v56  ;;  %v8312_v54 = vcombine.low %v2689_v32, %v2692_v43  ;;  %v4086_v27 = vsel %vm9172_vm3, 0, %v4085_v22  ;;  %v2696_v2 = vsel %vm9226_vm9, %v8169_v51, %v2695_v6  ;;  %v10903_v23 = vpop.permute.xlu0 %3168  ;;  %v8966_v53 = vld [vmem:[#allocation2 + $0x78] sm:$0xf]  ;;  %v4155_v32 = vld [vmem:[#allocation3 + $0x50] sm:$0x1] }
 0x1a3   : > { %8771 = vmatmul.mubr.msk.bf16.gmra.mxu0 %vm13206_vm2, %v3703_v7  ;;  %3352 = vrot.lane.b32.xlu0 %v8296_v42, %s9074_s8  ;;  %v2699_v15 = vsel %vm9226_vm9, %v2697_v14, %v2698_v50  ;;  %v8184_v10 = vcombine.low %v10592_v55, %v10614_v61  ;;  %v8185_v58 = vcombine.low %v10634_v38, %v10639_v44  ;;  %v4083_v18 = vsel %vm9172_vm3, 0, %v4082_v12  ;;  %v10901_v56 = vpop.permute.xlu1 %3010  ;;  %v4152_v42 = vld [vmem:[#allocation3 + $0x44] sm:$0x1]  ;;  %v8968_v12 = vld [vmem:[#allocation2 + $0x84] sm:$0xf] }
 0x1a4   : > { %3274 = vrot.lane.b32.xlu1 %v8281_v21, %s9069_s20  ;;  %4087 = vst [vmem:[#allocation3 + $0x18] sm:$0x1] %v4086_v27  ;;  %v4144_v30 = vsel %vm9200_vm5, 0, %v4143_v31  ;;  %v4141_v6 = vsel %vm9200_vm5, 0, %v4140_v16  ;;  %v4080_v37 = vsel %vm9172_vm3, 0, %v4079_v48  ;;  %v4138_v0 = vsel %vm9200_vm5, 0, %v4137_v34 }
 0x1a5   : > { %v4146_v21 = vld [vmem:[#allocation3 + $0x2c] sm:$0x1]  ;;  %4084 = vst [vmem:[#allocation3 + $0xc] sm:$0x1] %v4083_v18  ;;  %4145 = vst [vmem:[#allocation3 + $0x20] sm:$0x1] %v4144_v30  ;;  %v8313_v14 = vcombine.low %v2696_v2, %v2699_v15  ;;  %v8180_v45 = vcombine.low %v8966_v53, %v8967_v62 }
 0x1a6   : > { %4142 = vst [vmem:[#allocation3 + $0x14] sm:$0x1] %v4141_v6  ;;  %4081 = vst [vmem:[#allocation3] sm:$0x1] %v4080_v37  ;;  %v4762_v26 = vshll.u32 %v10883_v5, 16  ;;  %v4766_v51 = vshrl.u32 %v10883_v5, 16  ;;  %v3265_v22 = vpop.permute.xlu0 %3264 }
 0x1a7   : > { %3432 = vrot.lane.b32.xlu0 %v8312_v54, %s9072_s23  ;;  %4139 = vst [vmem:[#allocation3 + $0x8] sm:$0x1] %v4138_v0  ;;  %v4092_v40 = vsel %vm9172_vm3, 0, %v4091_v35  ;;  %v4089_v47 = vsel %vm9172_vm3, 0, %v4088_v17  ;;  %v4150_v41 = vsel %vm9200_vm5, 0, %v4149_v9  ;;  %v4147_v19 = vsel %vm9200_vm5, 0, %v4146_v21 }
 0x1a8   : > { %3354 = vrot.lane.b32.xlu1 %v8297_v24, %s9074_s8  ;;  %4093 = vst [vmem:[#allocation3 + $0x30] sm:$0x1] %v4092_v40  ;;  %4090 = vst [vmem:[#allocation3 + $0x24] sm:$0x1] %v4089_v47  ;;  %v4764_v28 = vrot.slane %v4762_v26, 5  ;;  %v4768_v60 = vrot.slane %v4766_v51, 4  ;;  %v3469_v7 = vsel %vm3436_vm15, %v8180_v45, %v10813_v49 }
 0x1a9   : > { %4151 = vst [vmem:[#allocation3 + $0x38] sm:$0x1] %v4150_v41  ;;  %4148 = vst [vmem:[#allocation3 + $0x2c] sm:$0x1] %v4147_v19  ;;  %v4098_v50 = vsel %vm9172_vm3, 0, %v4097_v36  ;;  %v4095_v59 = vsel %vm9172_vm3, 0, %v4094_v20  ;;  %v3507_v37 = vsel %vm3485_vm1, %v3469_v7, %v10815_v4 }
 0x1aa   : > { %4099 = vst [vmem:[#allocation3 + $0x48] sm:$0x1] %v4098_v50  ;;  %4096 = vst [vmem:[#allocation3 + $0x3c] sm:$0x1] %v4095_v59  ;;  %v4156_v46 = vsel %vm9200_vm5, 0, %v4155_v32  ;;  %v4769_v43 = vor.u32 %v4768_v60, %v4764_v28  ;;  %v4153_v54 = vsel %vm9200_vm5, 0, %v4152_v42 }
 0x1ab   : > { %4157 = vst [vmem:[#allocation3 + $0x50] sm:$0x1] %v4156_v46  ;;  %v8969_v31 = vld [vmem:[#allocation2 + $0x88] sm:$0xf]  ;;  %v5202_v15 = vrot.slane %v10883_v5, 5  ;;  %v3540_v5 = vsel %vm3518_vm4, %v3507_v37, %v10836_v13 }
 0x1ac   : > { %3434 = vrot.lane.b32.xlu1 %v8313_v14, %s9072_s23  ;;  %v3091_v25 = vpop.permute.xlu1 %3090  ;;  %v8181_v16 = vcombine.low %v8968_v12, %v8969_v31  ;;  %4154 = vst [vmem:[#allocation3 + $0x44] sm:$0x1] %v4153_v54  ;;  %v5136_v17 = vld [vmem:[#allocation3] sm:$0xe]  ;;  %v4770_v30 = vrot.slane %v4769_v43, 4  ;;  %v3573_v14 = vsel %vm3551_vm6, %v3540_v5, %v10871_v3 }
 0x1ad   : > { %v4704_v48 = vld [vmem:[#allocation3] sm:$0xf]  ;;  %v8369_v26 = vrot.slane %v5136_v17, 9  ;;  %v5204_v51 = vrot.slane %v5202_v15, 4  ;;  %v3606_v4 = vsel %vm3584_vm7, %v3573_v14, %v10903_v23  ;;  %v10968_v42 = vld [vmem:[%s13197_s2] ss:$0 sm:$0xff] }
 0x1ae   : > { %v4736_v24 = vld [vmem:[#allocation3 + $0x8] sm:$0x1]  ;;  %v4753_v27 = vshrl.u32 %v4704_v48, 16  ;;  %v4756_v34 = vshll.u32 %v4704_v48, 16  ;;  %v3472_v6 = vsel %vm3436_vm15, %v8181_v16, %v10834_v11  ;;  %v3639_v19 = vsel %vm3617_vm8, %v3606_v4, %v3265_v22 }
 0x1af   : > { %v4772_v2 = vshll.u32 %v4736_v24, 16  ;;  %v5205_v36 = vrot.slane %v4736_v24, 5  ;;  %v3509_v11 = vsel %vm3485_vm1, %v3472_v6, %v10869_v52  ;;  %v5203_v13 = vsel %vm9226_vm9, %v8369_v26, %v5202_v15  ;;  %v10975_v12 = vld [vmem:[%s13198_s3] ss:$0 sm:$0xff]  ;;  %v4103_v26 = vld [vmem:[#allocation3 + $0x60] sm:$0x1] }
 0x1b0   : > { %v3171_v35 = vpop.permute.xlu1 %3170  ;;  %v4755_v9 = vrot.slane %v4753_v27, 4  ;;  %v4758_v18 = vrot.slane %v4756_v34, 5  ;;  %v3542_v52 = vsel %vm3518_vm4, %v3509_v11, %v10901_v56  ;;  %v4606_v55 = vld [vmem:[#allocation3 + $0x24] sm:$0xf] }
 0x1b1   : > { %v4774_v49 = vrot.slane %v4772_v2, 5  ;;  %v5206_v3 = vsel %vm9226_vm9, %v5204_v51, %v5205_v36  ;;  %v3575_v53 = vsel %vm3551_vm6, %v3542_v52, %v3091_v25  ;;  %v4592_v52 = vld [vmem:[#allocation3 + $0xc] sm:$0xf] }
 0x1b2   : > { %v3345_v21 = vpop.permute.xlu0 %3344  ;;  %v4759_v0 = vor.u32 %v4758_v18, %v4755_v9  ;;  %v3608_v45 = vsel %vm3584_vm7, %v3575_v53, %v3171_v35  ;;  %v8973_v53 = vld [vmem:[#allocation2 + $0xa0] sm:$0xf] }
 0x1b3   : > { %v4775_v47 = vsel %vm9313_vm14, %v4770_v30, %v4774_v49  ;;  %v3672_v60 = vsel %vm3650_vm12, %v3639_v19, %v3345_v21  ;;  %v4599_v19 = vld [vmem:[#allocation3 + $0x18] sm:$0xf] }
 0x1b4   : > { %v4760_v40 = vrot.slane %v4759_v0, 4  ;;  %v3267_v41 = vpop.permute.xlu1 %3266 }
 0x1b5   : > { %v3641_v32 = vsel %vm3617_vm8, %v3608_v45, %v3267_v41 }
 0x1b6   : > { %v4765_v20 = vsel %vm9313_vm14, %v4760_v40, %v4764_v28  ;;  %v8449_v28 = vcombine.low %v5203_v13, %v5206_v3  ;;  %v8970_v40 = vld [vmem:[#allocation2 + $0x90] sm:$0xf]  ;;  %v4104_v13 = vsel %vm9172_vm3, 0, %v4103_v26 }
 0x1b7   : > { %v8433_v59 = vcombine.low %v4765_v20, %v4775_v47  ;;  %v8971_v47 = vld [vmem:[#allocation2 + $0x94] sm:$0xf]  ;;  %4105 = vst [vmem:[#allocation3 + $0x60] sm:$0x1] %v4104_v13 }
 0x1b8   : > { %v3347_v62 = vpop.permute.xlu1 %3346  ;;  %v8182_v11 = vcombine.low %v8970_v40, %v8971_v47 }
 0x1b9   : > { %v3425_v50 = vpop.permute.xlu0 %3424  ;;  %6641 = vrot.lane.b32.xlu0 %v8433_v59, %s9070_s21  ;;  %v3674_v46 = vsel %vm3650_vm12, %v3641_v32, %v3347_v62 }
 0x1ba   : > { %v3705_v23 = vsel %vm3683_vm13, %v3672_v60, %v3425_v50 }
 0x1bb   : > { %8774 = vmatprep.mubr.msk.bf16.mxu0 %vm13206_vm2, %v3705_v23 }
 0x1bc   : > { %v2837_v25 = vpop.permute.xlu1 %2836 }
 0x1bd   : > { %6721 = vrot.lane.b32.xlu0 %v8449_v28, %s9067_s18  ;;  %v8972_v28 = vld [vmem:[#allocation2 + $0x9c] sm:$0xf] }
 0x1be   : > { %v8183_v62 = vcombine.low %v8972_v28, %v8973_v53 }
 0x1c0   : > { %v3427_v22 = vpop.permute.xlu0 %3426 }
 0x1c1   : > { %v3707_v56 = vsel %vm3683_vm13, %v3674_v46, %v3427_v22  ;;  %v2839_v27 = vpop.permute.xlu1 %2838  ;;  %v3475_v46 = vsel %vm3436_vm15, %v8182_v11, %v2837_v25 }
 0x1c2   : > { %8775 = vmatmul.mubr.msk.bf16.gmra.mxu0 %vm13206_vm2, %v3707_v56 }
 0x1c4   : > { %v10970_v43 = vpop.permute.xlu0 %2916 }
 0x1c5   : > { %v8756_v7 = vpop.f32.mrf.mxu0  ;;  %v2919_v4 = vpop.permute.xlu1 %2918  ;;  %v3511_v25 = vsel %vm3485_vm1, %v3475_v46, %v10970_v43 }
 0x1c6   : > { %v3959_v31 = vmul.f32 %v8756_v7, %v10968_v42 }
 0x1c7   : > { %v3823_v16 = vpop.f32.mrf.mxu0 }
 0x1c8   : > { %v3998_v48 = vadd.f32 %v10975_v12, %v3959_v31  ;;  %v3957_v24 = vmul.f32 %v10968_v42, %v3823_v16  ;;  %v10982_v35 = vpop.permute.xlu0 %3012 }
 0x1c9   : > { %v8757_v54 = vpop.f32.mrf.mxu0 }
 0x1ca   : > { %v4030_v34 = vmax.f32 %v3998_v48, 0.0  ;;  %v3996_v2 = vadd.f32 %v10975_v12, %v3957_v24  ;;  %v3960_v15 = vmul.f32 %v8757_v54, %v10968_v42  ;;  %v4603_v48 = vld [vmem:[#allocation3 + $0x20] sm:$0x1] }
 0x1cb   : > { %v3826_v17 = vpop.f32.mrf.mxu0 }
 0x1cc   : > { %v8592_v9 = vpack.c.bf16 %v4030_v34, %v4030_v34  ;;  %v4028_v18 = vmax.f32 %v3996_v2, 0.0  ;;  %v3999_v30 = vadd.f32 %v10975_v12, %v3960_v15  ;;  %v3958_v49 = vmul.f32 %v10968_v42, %v3826_v17 }
 0x1ce   : > { %v4289_v6 = vshrl.u32 %v8592_v9, 16  ;;  %v8590_v37 = vpack.c.bf16 %v4028_v18, %v4028_v18  ;;  %v4031_v21 = vmax.f32 %v3999_v30, 0.0  ;;  %v3997_v0 = vadd.f32 %v10975_v12, %v3958_v49 }
 0x1cf   : > { %v4292_v36 = vshll.u32 %v8592_v9, 16  ;;  %v3478_v9 = vsel %vm3436_vm15, %v8183_v62, %v2839_v27 }
 0x1d0   : > { %v4291_v51 = vrot.slane %v4289_v6, 7  ;;  %v4272_v5 = vshrl.u32 %v8590_v37, 16  ;;  %v8593_v14 = vpack.c.bf16 %v4031_v21, %v4031_v21  ;;  %v3093_v41 = vpop.permute.xlu0 %3092  ;;  %v4029_v20 = vmax.f32 %v3997_v0, 0.0  ;;  %v4100_v0 = vld [vmem:[#allocation3 + $0x54] sm:$0x1] }
 0x1d1   : > { %v4275_v50 = vshll.u32 %v8590_v37, 16  ;;  %v4596_v37 = vld [vmem:[#allocation3 + $0x14] sm:$0x1]  ;;  %v3513_v26 = vsel %vm3485_vm1, %v3478_v9, %v2919_v4  ;;  %v4101_v43 = vsel %vm9172_vm3, 0, %v4100_v0 }
 0x1d2   : > { %v4294_v3 = vor.u32 %v4292_v36, %v4291_v51  ;;  %v4274_v60 = vrot.slane %v4272_v5, 7  ;;  %v4297_v59 = vshrl.u32 %v8593_v14, 16  ;;  %v8591_v23 = vpack.c.bf16 %v4029_v20, %v4029_v20  ;;  %v3015_v24 = vpop.permute.xlu1 %3014  ;;  %4102 = vst [vmem:[#allocation3 + $0x54] sm:$0x1] %v4101_v43 }
 0x1d3   : > { %v4300_v56 = vshll.u32 %v8593_v14, 16  ;;  %v4295_v31 = vrot.slane %v4291_v51, 4  ;;  %v3544_v51 = vsel %vm3518_vm4, %v3511_v25, %v10982_v35 }
 0x1d4   : > { %v4600_v45 = vsel %vm9232_vm10, %v4294_v3, %v4599_v19  ;;  %v4277_v32 = vor.u32 %v4275_v50, %v4274_v60  ;;  %v4299_v22 = vrot.slane %v4297_v59, 7  ;;  %v4280_v7 = vshrl.u32 %v8591_v23, 16  ;;  %v3173_v54 = vpop.permute.xlu0 %3172 }
 0x1d5   : > { %4601 = vst [vmem:[#allocation3 + $0x18] sm:$0xf] %v4600_v45  ;;  %v4283_v17 = vshll.u32 %v8591_v23, 16  ;;  %v4278_v18 = vrot.slane %v4274_v60, 4  ;;  %v3546_v3 = vsel %vm3518_vm4, %v3513_v26, %v3015_v24  ;;  %v3577_v35 = vsel %vm3551_vm6, %v3544_v51, %v3093_v41 }
 0x1d6   : > { %v4593_v16 = vsel %vm9232_vm10, %v4277_v32, %v4592_v52  ;;  %v4302_v34 = vor.u32 %v4300_v56, %v4299_v22  ;;  %v4304_v2 = vrot.slane %v4299_v22, 4  ;;  %v4282_v15 = vrot.slane %v4280_v7, 7 }
 0x1d7   : > { %4594 = vst [vmem:[#allocation3 + $0xc] sm:$0xf] %v4593_v16  ;;  %v3610_v45 = vsel %vm3584_vm7, %v3577_v35, %v3173_v54 }
 0x1d8   : > { %v4303_v30 = vsel %vm9238_vm11, %v4295_v31, %v4302_v34  ;;  %v4604_v49 = vsel %vm9172_vm3, %v4304_v2, %v4603_v48  ;;  %v4285_v6 = vor.u32 %v4283_v17, %v4282_v15  ;;  %v4287_v21 = vrot.slane %v4282_v15, 4  ;;  %v3269_v47 = vpop.permute.xlu0 %3268 }
 0x1d9   : > { %4602 = vst.msk [vmem:[#allocation3 + $0x1c] sm:$0xf] %vm310_vm0, %v4303_v30  ;;  %4605 = vst [vmem:[#allocation3 + $0x20] sm:$0x1] %v4604_v49  ;;  %v3643_v7 = vsel %vm3617_vm8, %v3610_v45, %v3269_v47 }
 0x1da   : > { %v4286_v27 = vsel %vm9238_vm11, %v4278_v18, %v4285_v6  ;;  %v4597_v36 = vsel %vm9172_vm3, %v4287_v21, %v4596_v37 }
 0x1db   : > { %4595 = vst.msk [vmem:[#allocation3 + $0x10] sm:$0xf] %vm310_vm0, %v4286_v27  ;;  %4598 = vst [vmem:[#allocation3 + $0x14] sm:$0x1] %v4597_v36 }
 0x1dc   : > { %v5314_v5 = vld [vmem:[#allocation3 + $0x18] sm:$0xf] }
 0x1dd   : > { %v5921_v14 = vld [vmem:[#allocation3 + $0x18] sm:$0xf]  ;;  %v3095_v40 = vpop.permute.xlu1 %3094  ;;  %v5385_v11 = vshrl.u32 %v5314_v5, 16  ;;  %v5388_v4 = vshll.u32 %v5314_v5, 16 }
 0x1de   : > { %v5970_v19 = vshrl.u32 %v5921_v14, 16  ;;  %v5973_v20 = vshll.u32 %v5921_v14, 16  ;;  %v5745_v13 = vld [vmem:[#allocation3 + $0x18] sm:$0xe]  ;;  %v5312_v60 = vld [vmem:[#allocation3 + $0xc] sm:$0xf]  ;;  %v3579_v22 = vsel %vm3551_vm6, %v3546_v3, %v3095_v40 }
 0x1df   : > { %v11014_v50 = vld [vmem:[#allocation3 + $0x18] sm:$0xe]  ;;  %v11016_v59 = vld [vmem:[#allocation3 + $0xc] sm:$0xe]  ;;  %v11018_v52 = vrot.slane %v5385_v11, 4  ;;  %v11020_v23 = vrot.slane %v5388_v4, 5 }
 0x1e0   : > { %v11022_v28 = vrot.slane %v5970_v19, 4  ;;  %v11024_v53 = vrot.slane %v5973_v20, 5  ;;  %v11026_v62 = vld [vmem:[#allocation3 + $0x18] sm:$0xe]  ;;  %v5361_v32 = vshrl.u32 %v5312_v60, 16  ;;  %v5364_v46 = vshll.u32 %v5312_v60, 16 }
 0x1e1   : > { %v8386_v41 = vrot.slane %v5745_v13, 9  ;;  %v3175_v56 = vpop.permute.xlu1 %3174  ;;  %v11031_v31 = vld [vmem:[#allocation3 + $0x1c] sm:$0xf]  ;;  %v8401_v48 = vrot.slane %v11014_v50, 9  ;;  %v8370_v24 = vrot.slane %v11016_v59, 9  ;;  %v8371_v15 = vrot.slane %v11026_v62, 9 }
 0x1e2   : > { %v11033_v16 = vld [vmem:[#allocation3 + $0x1c] sm:$0xf]  ;;  %v8466_v34 = vcombine.low %v5314_v5, %v11031_v31  ;;  %v5398_v54 = vshrl.u32 %v11031_v31, 16  ;;  %v11039_v2 = vld [vmem:[#allocation3 + $0x20] sm:$0x1]  ;;  %v5391_v17 = vor.u32 %v11020_v23, %v11018_v52  ;;  %v3349_v9 = vpop.permute.xlu0 %3348  ;;  %v5817_v49 = vrot.slane %v11031_v31, 5 }
 0x1e3   : > { %v5983_v25 = vshrl.u32 %v11033_v16, 16  ;;  %v8513_v18 = vcombine.low %v5921_v14, %v11033_v16  ;;  %v11046_v30 = vld [vmem:[#allocation3 + $0x10] sm:$0xf]  ;;  %v11049_v6 = vld [vmem:[#allocation3 + $0x1c] sm:$0xf]  ;;  %v5976_v37 = vor.u32 %v11024_v53, %v11022_v28  ;;  %v3612_v21 = vsel %vm3584_vm7, %v3579_v22, %v3175_v56 }
 0x1e4   : > { %v3676_v0 = vsel %vm3650_vm12, %v3643_v7, %v3349_v9  ;;  %6819 = vrot.lane.b32.xlu1 %v8466_v34, %s9068_s19  ;;  %v11056_v26 = vrot.slane %v5361_v32, 4  ;;  %v11058_v27 = vrot.slane %v5364_v46, 5  ;;  %v11060_v43 = vld [vmem:[#allocation3 + $0x20] sm:$0x1]  ;;  %v11062_v51 = vld [vmem:[#allocation3 + $0x10] sm:$0xf]  ;;  %v8465_v4 = vcombine.low %v5312_v60, %v11046_v30 }
 0x1e5   : > { %v3271_v36 = vpop.permute.xlu1 %3270  ;;  %7073 = vrot.lane.b32.xlu0 %v8513_v18, %s9069_s20  ;;  %v5374_v5 = vshrl.u32 %v11046_v30, 16  ;;  %v5819_v14 = vrot.slane %v5817_v49, 4  ;;  %v5820_v40 = vrot.slane %v11039_v2, 5  ;;  %v6419_v47 = vrot.slane %v11033_v16, 5  ;;  %v11068_v11 = vld [vmem:[#allocation3 + $0x14] sm:$0x1] }
 0x1e6   : > { %v5818_v19 = vsel %vm9226_vm9, %v8386_v41, %v5817_v49  ;;  %v5209_v20 = vrot.slane %v11062_v51, 5  ;;  %v11074_v13 = vld [vmem:[#allocation3 + $0x20] sm:$0x1]  ;;  %v5216_v3 = vrot.slane %v11049_v6, 5  ;;  %v3645_v35 = vsel %vm3617_vm8, %v3612_v21, %v3271_v36 }
 0x1e7   : > { %v8760_v50 = vpop.f32.mrf.mxu0  ;;  %v5821_v59 = vsel %vm9226_vm9, %v5819_v14, %v5820_v40  ;;  %v6421_v45 = vrot.slane %v6419_v47, 4  ;;  %v6422_v32 = vrot.slane %v11060_v43, 5  ;;  %v5212_v41 = vrot.slane %v11068_v11, 5 }
 0x1e8   : > { %v3963_v60 = vmul.f32 %v8760_v50, %v10968_v42  ;;  %v8498_v46 = vcombine.low %v5818_v19, %v5821_v59  ;;  %v5211_v22 = vrot.slane %v5209_v20, 4  ;;  %v6420_v34 = vsel %vm9226_vm9, %v8401_v48, %v6419_v47  ;;  %v5744_v19 = vld [vmem:[#allocation3 + $0xc] sm:$0xe] }
 0x1e9   : > { %v3351_v56 = vpop.permute.xlu1 %3350  ;;  %v3839_v7 = vpop.f32.mrf.mxu0  ;;  %6817 = vrot.lane.b32.xlu0 %v8465_v4, %s9068_s19  ;;  %v6423_v9 = vsel %vm9226_vm9, %v6421_v45, %v6422_v32  ;;  %v5218_v18 = vrot.slane %v5216_v3, 4  ;;  %v5219_v49 = vrot.slane %v11074_v13, 5  ;;  %v5210_v4 = vsel %vm9226_vm9, %v8370_v24, %v5209_v20  ;;  %v11099_v45 = vld [vmem:[#allocation3 + $0x14] sm:$0x1] }
 0x1ea   : > { %v3429_v21 = vpop.permute.xlu0 %3428  ;;  %v4002_v36 = vadd.f32 %v10975_v12, %v3963_v60  ;;  %v3961_v14 = vmul.f32 %v10968_v42, %v3839_v7  ;;  %6979 = vrot.lane.b32.xlu1 %v8498_v46, %s9071_s22  ;;  %v8545_v40 = vcombine.low %v6420_v34, %v6423_v9  ;;  %v5213_v50 = vsel %vm9226_vm9, %v5211_v22, %v5212_v41 }
 0x1eb   : > { %v3709_v48 = vsel %vm3683_vm13, %v3676_v0, %v3429_v21  ;;  %v8761_v47 = vpop.f32.mrf.mxu0  ;;  %v5220_v59 = vsel %vm9226_vm9, %v5218_v18, %v5219_v49  ;;  %v5810_v32 = vrot.slane %v11046_v30, 5  ;;  %v8450_v20 = vcombine.low %v5210_v4, %v5213_v50 }
 0x1ec   : > { %8778 = vmatprep.mubr.msk.bf16.mxu0 %vm13206_vm2, %v3709_v48  ;;  %v4034_v60 = vmax.f32 %v4002_v36, 0.0  ;;  %v4000_v46 = vadd.f32 %v10975_v12, %v3961_v14  ;;  %v3964_v24 = vmul.f32 %v8761_v47, %v10968_v42  ;;  %v3678_v0 = vsel %vm3650_vm12, %v3645_v35, %v3351_v56 }
 0x1ed   : > { %v3842_v7 = vpop.f32.mrf.mxu0  ;;  %7233 = vrot.lane.b32.xlu0 %v8545_v40, %s9072_s23  ;;  %v5217_v22 = vsel %vm9226_vm9, %v8371_v15, %v5216_v3  ;;  %v8385_v41 = vrot.slane %v5744_v19, 9  ;;  %v5812_v34 = vrot.slane %v5810_v32, 4  ;;  %v2841_v9 = vpop.permute.xlu1 %2840  ;;  %v5813_v36 = vrot.slane %v11099_v45, 5 }
 0x1ee   : > { %v8596_v18 = vpack.c.bf16 %v4034_v60, %v4034_v60  ;;  %v4032_v49 = vmax.f32 %v4000_v46, 0.0  ;;  %v4003_v21 = vadd.f32 %v10975_v12, %v3964_v24  ;;  %6723 = vrot.lane.b32.xlu1 %v8450_v20, %s9067_s18  ;;  %v3962_v35 = vmul.f32 %v10968_v42, %v3842_v7 }
 0x1ef   : > { %v8451_v56 = vcombine.low %v5217_v22, %v5220_v59  ;;  %v5811_v62 = vsel %vm9226_vm9, %v8385_v41, %v5810_v32  ;;  %v5394_v14 = vshll.u32 %v11031_v31, 16  ;;  %v5814_v19 = vsel %vm9226_vm9, %v5812_v34, %v5813_v36 }
 0x1f0   : > { %v3431_v15 = vpop.permute.xlu0 %3430  ;;  %v4323_v3 = vshrl.u32 %v8596_v18, 16  ;;  %v8594_v40 = vpack.c.bf16 %v4032_v49, %v4032_v49  ;;  %v4035_v4 = vmax.f32 %v4003_v21, 0.0  ;;  %v4001_v47 = vadd.f32 %v10975_v12, %v3962_v35  ;;  %v4617_v35 = vld [vmem:[#allocation3 + $0x38] sm:$0x1] }
 0x1f1   : > { %v3711_v48 = vsel %vm3683_vm13, %v3678_v0, %v3431_v15  ;;  %6725 = vrot.lane.b32.xlu0 %v8451_v56, %s9067_s18  ;;  %v11126_v50 = vrot.slane %v5391_v17, 4  ;;  %v11128_v59 = vrot.slane %v5394_v14, 5  ;;  %v4326_v60 = vshll.u32 %v8596_v18, 16  ;;  %v4613_v0 = vld [vmem:[#allocation3 + $0x30] sm:$0xf]  ;;  %v2843_v23 = vpop.permute.xlu1 %2842 }
 0x1f2   : > { %8779 = vmatmul.mubr.msk.bf16.gmra.mxu0 %vm13206_vm2, %v3711_v48  ;;  %v4325_v32 = vrot.slane %v4323_v3, 7  ;;  %v4306_v46 = vshrl.u32 %v8594_v40, 16  ;;  %v8597_v24 = vpack.c.bf16 %v4035_v4, %v4035_v4  ;;  %v3481_v20 = vsel %vm3436_vm15, %v8184_v10, %v2841_v9 }
 0x1f3   : > { %v4033_v7 = vmax.f32 %v4001_v47, 0.0  ;;  %v8497_v22 = vcombine.low %v5811_v62, %v5814_v19  ;;  %v5400_v52 = vrot.slane %v5398_v54, 4  ;;  %v4309_v34 = vshll.u32 %v8594_v40, 16 }
 0x1f4   : > { %v4328_v17 = vor.u32 %v4326_v60, %v4325_v32  ;;  %v4308_v41 = vrot.slane %v4306_v46, 7  ;;  %v4331_v49 = vshrl.u32 %v8597_v24, 16  ;;  %v3484_v18 = vsel %vm3436_vm15, %v8185_v58, %v2843_v23  ;;  %v2921_v21 = vpop.permute.xlu0 %2920  ;;  %v4610_v46 = vld [vmem:[#allocation3 + $0x2c] sm:$0x1] }
 0x1f5   : > { %v8595_v61 = vpack.c.bf16 %v4033_v7, %v4033_v7  ;;  %6977 = vrot.lane.b32.xlu0 %v8497_v22, %s9071_s22  ;;  %v5397_v10 = vsel %vm9313_vm14, %v11126_v50, %v11128_v59  ;;  %v5401_v31 = vor.u32 %v5400_v52, %v11128_v59  ;;  %v4334_v38 = vshll.u32 %v8597_v24, 16  ;;  %v4708_v50 = vld [vmem:[#allocation3 + $0x18] sm:$0xf]  ;;  %v2923_v59 = vpop.permute.xlu1 %2922 }
 0x1f6   : > { %v4614_v54 = vsel %vm9232_vm10, %v4328_v17, %v4613_v0  ;;  %v4311_v9 = vor.u32 %v4309_v34, %v4308_v41  ;;  %v4333_v36 = vrot.slane %v4331_v49, 7  ;;  %v3515_v44 = vsel %vm3485_vm1, %v3481_v20, %v2921_v21 }
 0x1f7   : > { %v4329_v58 = vrot.slane %v4325_v32, 4  ;;  %4615 = vst [vmem:[#allocation3 + $0x30] sm:$0xf] %v4614_v54  ;;  %v4314_v56 = vshrl.u32 %v8595_v61, 16  ;;  %v5402_v62 = vrot.slane %v5401_v31, 4  ;;  %v5404_v40 = vshll.u32 %v11039_v2, 16 }
 0x1f8   : > { %v4607_v14 = vsel %vm9232_vm10, %v4311_v9, %v4606_v55  ;;  %v4336_v15 = vor.u32 %v4334_v38, %v4333_v36  ;;  %v4338_v3 = vrot.slane %v4333_v36, 4  ;;  %v4312_v4 = vrot.slane %v4308_v41, 4  ;;  %v3017_v0 = vpop.permute.xlu0 %3016 }
 0x1f9   : > { %4608 = vst [vmem:[#allocation3 + $0x24] sm:$0xf] %v4607_v14  ;;  %v4316_v19 = vrot.slane %v4314_v56, 7  ;;  %v4317_v48 = vshll.u32 %v8595_v61, 16  ;;  %v5979_v47 = vshll.u32 %v11033_v16, 16  ;;  %v5406_v24 = vrot.slane %v5404_v40, 5 }
 0x1fa   : > { %v4337_v32 = vsel %vm9238_vm11, %v4329_v58, %v4336_v15  ;;  %v4618_v60 = vsel %vm9172_vm3, %v4338_v3, %v4617_v35  ;;  %v5985_v20 = vrot.slane %v5983_v25, 4  ;;  %v3517_v2 = vsel %vm3485_vm1, %v3484_v18, %v2923_v59 }
 0x1fb   : > { %4616 = vst.msk [vmem:[#allocation3 + $0x34] sm:$0xf] %vm310_vm0, %v4337_v32  ;;  %4619 = vst [vmem:[#allocation3 + $0x38] sm:$0x1] %v4618_v60  ;;  %v4319_v7 = vor.u32 %v4317_v48, %v4316_v19  ;;  %v4321_v22 = vrot.slane %v4316_v19, 4  ;;  %v5981_v52 = vrot.slane %v5979_v47, 5  ;;  %v5407_v23 = vsel %vm9313_vm14, %v5402_v62, %v5406_v24 }
 0x1fc   : > { %v4801_v17 = vshrl.u32 %v4708_v50, 16  ;;  %v4804_v41 = vshll.u32 %v4708_v50, 16  ;;  %v4810_v34 = vshll.u32 %v11049_v6, 16  ;;  %v5977_v49 = vrot.slane %v5976_v37, 4 }
 0x1fd   : > { %v4320_v16 = vsel %vm9238_vm11, %v4312_v4, %v4319_v7  ;;  %v4611_v25 = vsel %vm9172_vm3, %v4321_v22, %v4610_v46  ;;  %v5989_v18 = vshll.u32 %v11060_v43, 16  ;;  %v3548_v21 = vsel %vm3518_vm4, %v3515_v44, %v3017_v0 }
 0x1fe   : > { %4609 = vst.msk [vmem:[#allocation3 + $0x28] sm:$0xf] %vm310_vm0, %v4320_v16  ;;  %4612 = vst [vmem:[#allocation3 + $0x2c] sm:$0x1] %v4611_v25  ;;  %v5318_v55 = vld [vmem:[#allocation3 + $0x30] sm:$0xf]  ;;  %v8482_v31 = vcombine.low %v5397_v10, %v5407_v23  ;;  %v5986_v54 = vor.u32 %v5985_v20, %v5981_v52  ;;  %v5982_v14 = vsel %vm9313_vm14, %v5977_v49, %v5981_v52 }
 0x1ff   : > { %v5925_v61 = vld [vmem:[#allocation3 + $0x30] sm:$0xf]  ;;  %v4803_v9 = vrot.slane %v4801_v17, 4  ;;  %v5433_v36 = vshrl.u32 %v5318_v55, 16  ;;  %v5436_v38 = vshll.u32 %v5318_v55, 16  ;;  %v4806_v62 = vrot.slane %v4804_v41, 5 }
 0x200   : > { %v6018_v58 = vshrl.u32 %v5925_v61, 16  ;;  %v6021_v35 = vshll.u32 %v5925_v61, 16  ;;  %v5987_v56 = vrot.slane %v5986_v54, 4  ;;  %v4812_v28 = vrot.slane %v4810_v34, 5  ;;  %v3097_v37 = vpop.permute.xlu0 %3096  ;;  %v5316_v15 = vld [vmem:[#allocation3 + $0x24] sm:$0xf] }
 0x201   : > { %v4814_v53 = vshrl.u32 %v11049_v6, 16  ;;  %v11176_v43 = vrot.slane %v5433_v36, 4  ;;  %v11178_v44 = vrot.slane %v5436_v38, 5  ;;  %v5991_v10 = vrot.slane %v5989_v18, 5  ;;  %v4706_v36 = vld [vmem:[#allocation3 + $0xc] sm:$0xf] }
 0x202   : > { %v11182_v3 = vld [vmem:[#allocation3 + $0x34] sm:$0xf]  ;;  %v11186_v4 = vrot.slane %v6018_v58, 4  ;;  %v4807_v19 = vor.u32 %v4806_v62, %v4803_v9  ;;  %v5367_v6 = vor.u32 %v11058_v27, %v11056_v26  ;;  %v11191_v50 = vrot.slane %v6021_v35, 5 }
 0x203   : > { %v11184_v40 = vld [vmem:[#allocation3 + $0x34] sm:$0xf]  ;;  %v4816_v48 = vrot.slane %v4814_v53, 4  ;;  %v8468_v47 = vcombine.low %v5318_v55, %v11182_v3  ;;  %v5992_v32 = vsel %vm9313_vm14, %v5987_v56, %v5991_v10  ;;  %v3581_v60 = vsel %vm3551_vm6, %v3548_v21, %v3097_v37 }
 0x204   : > { %v8515_v59 = vcombine.low %v5925_v61, %v11184_v40  ;;  %v4808_v46 = vrot.slane %v4807_v19, 4  ;;  %v4820_v20 = vshll.u32 %v11074_v13, 16  ;;  %v3019_v0 = vpop.permute.xlu1 %3018  ;;  %v3177_v7 = vpop.permute.xlu0 %3176  ;;  %v5446_v26 = vshrl.u32 %v11182_v3, 16  ;;  %v11205_v13 = vld [vmem:[#allocation3 + $0x24] sm:$0xf] }
 0x205   : > { %v4817_v24 = vor.u32 %v4816_v48, %v4812_v28  ;;  %6823 = vrot.lane.b32.xlu1 %v8468_v47, %s9068_s19  ;;  %v6031_v27 = vshrl.u32 %v11184_v40, 16  ;;  %v11202_v22 = vld [vmem:[#allocation3 + $0x28] sm:$0xf]  ;;  %v5409_v52 = vshrl.u32 %v5316_v15, 16  ;;  %v5412_v23 = vshll.u32 %v5316_v15, 16 }
 0x206   : > { %7077 = vrot.lane.b32.xlu0 %v8515_v59, %s9069_s20  ;;  %v3550_v17 = vsel %vm3518_vm4, %v3517_v2, %v3019_v0  ;;  %v8529_v41 = vcombine.low %v5982_v14, %v5992_v32  ;;  %v4822_v16 = vrot.slane %v4820_v20, 5  ;;  %v11207_v25 = vld [vmem:[#allocation3 + $0x28] sm:$0xf]  ;;  %v3614_v49 = vsel %vm3584_vm7, %v3581_v60, %v3177_v7 }
 0x207   : > { %v4818_v34 = vrot.slane %v4817_v24, 4  ;;  %v4813_v18 = vsel %vm9313_vm14, %v4808_v46, %v4812_v28  ;;  %v11212_v21 = vrot.slane %v5409_v52, 4  ;;  %v5439_v55 = vor.u32 %v11178_v44, %v11176_v43  ;;  %v11241_v46 = vld [vmem:[#allocation3 + $0x38] sm:$0x1]  ;;  %v5747_v52 = vld [vmem:[#allocation3 + $0x30] sm:$0xe] }
 0x208   : > { %v11218_v61 = vrot.slane %v5412_v23, 5  ;;  %v5422_v54 = vshrl.u32 %v11202_v22, 16  ;;  %v8467_v9 = vcombine.low %v5316_v15, %v11202_v22  ;;  %v5994_v38 = vshrl.u32 %v11205_v13, 16  ;;  %v3273_v62 = vpop.permute.xlu0 %3272 }
 0x209   : > { %v4823_v2 = vsel %vm9313_vm14, %v4818_v34, %v4822_v16  ;;  %6899 = vrot.lane.b32.xlu1 %v8482_v31, %s9073_s29  ;;  %v5997_v58 = vshll.u32 %v11205_v13, 16  ;;  %v8514_v35 = vcombine.low %v11205_v13, %v11207_v25  ;;  %v5370_v56 = vshll.u32 %v11046_v30, 16 }
 0x20a   : > { %7153 = vrot.lane.b32.xlu0 %v8529_v41, %s9074_s8  ;;  %v8435_v28 = vcombine.low %v4813_v18, %v4823_v2  ;;  %v5368_v53 = vrot.slane %v5367_v6, 4  ;;  %v5376_v37 = vrot.slane %v5374_v5, 4  ;;  %v5380_v14 = vshll.u32 %v11099_v45, 16  ;;  %v6355_v6 = vld [vmem:[#allocation3 + $0x30] sm:$0xe] }
 0x20b   : > { %v6007_v31 = vshrl.u32 %v11207_v25, 16  ;;  %v5372_v10 = vrot.slane %v5370_v56, 5  ;;  %v4777_v15 = vshrl.u32 %v4706_v36, 16  ;;  %v4780_v19 = vshll.u32 %v4706_v36, 16  ;;  %v11248_v2 = vld [vmem:[#allocation3 + $0x38] sm:$0x1] }
 0x20c   : > { %v11234_v48 = vsel %vm3617_vm8, %v3614_v49, %v3273_v62  ;;  %v4786_v47 = vshll.u32 %v11062_v51, 16  ;;  %v4790_v59 = vshrl.u32 %v11062_v51, 16  ;;  %v4796_v32 = vshll.u32 %v11068_v11, 16 }
 0x20d   : > { %6645 = vrot.lane.b32.xlu1 %v8435_v28, %s9070_s21  ;;  %v5377_v30 = vor.u32 %v5376_v37, %v5372_v10  ;;  %v5382_v5 = vrot.slane %v5380_v14, 5  ;;  %v4779_v45 = vrot.slane %v4777_v15, 4  ;;  %v4782_v60 = vrot.slane %v4780_v19, 5  ;;  %v11258_v19 = vld [vmem:[#allocation3 + $0x38] sm:$0x1] }
 0x20e   : > { %6821 = vrot.lane.b32.xlu0 %v8467_v9, %s9068_s19  ;;  %v3099_v24 = vpop.permute.xlu1 %3098  ;;  %v5373_v20 = vsel %vm9313_vm14, %v5368_v53, %v5372_v10  ;;  %v4788_v0 = vrot.slane %v4786_v47, 5  ;;  %v4792_v7 = vrot.slane %v4790_v59, 4  ;;  %v4798_v51 = vrot.slane %v4796_v32, 5  ;;  %v11254_v53 = vld [vmem:[#allocation3 + $0x34] sm:$0xf] }
 0x20f   : > { %v5378_v11 = vrot.slane %v5377_v30, 4  ;;  %v4783_v23 = vor.u32 %v4782_v60, %v4779_v45  ;;  %v8403_v41 = vrot.slane %v6355_v6, 9  ;;  %v6433_v34 = vrot.slane %v11184_v40, 5  ;;  %v5140_v47 = vld [vmem:[#allocation3 + $0x30] sm:$0xe] }
 0x210   : > { %v3583_v16 = vsel %vm3551_vm6, %v3550_v17, %v3099_v24  ;;  %v4793_v49 = vor.u32 %v4792_v7, %v4788_v0  ;;  %v6436_v18 = vrot.slane %v11241_v46, 5  ;;  %v5831_v9 = vrot.slane %v11182_v3, 5  ;;  %v11266_v30 = vld [vmem:[#allocation3 + $0x28] sm:$0xf]  ;;  %v11274_v7 = vld [vmem:[#allocation3 + $0x2c] sm:$0x1] }
 0x211   : > { %7075 = vrot.lane.b32.xlu1 %v8514_v35, %s9069_s20  ;;  %v5383_v36 = vsel %vm9313_vm14, %v5378_v11, %v5382_v5  ;;  %v4784_v56 = vrot.slane %v4783_v23, 4  ;;  %v6435_v62 = vrot.slane %v6433_v34, 4  ;;  %v8388_v28 = vrot.slane %v5747_v52, 9  ;;  %v5139_v5 = vld [vmem:[#allocation3 + $0x24] sm:$0xe] }
 0x212   : > { %v3179_v37 = vpop.permute.xlu1 %3178  ;;  %v8481_v14 = vcombine.low %v5373_v20, %v5383_v36  ;;  %v4794_v17 = vrot.slane %v4793_v49, 4  ;;  %v6434_v10 = vsel %vm9226_vm9, %v8403_v41, %v6433_v34  ;;  %v5833_v15 = vrot.slane %v5831_v9, 4  ;;  %v6354_v34 = vld [vmem:[#allocation3 + $0x24] sm:$0xe]  ;;  %v11280_v36 = vld [vmem:[#allocation3 + $0x2c] sm:$0x1] }
 0x213   : > { %v3616_v35 = vsel %vm3584_vm7, %v3583_v16, %v3179_v37  ;;  %v6437_v59 = vsel %vm9226_vm9, %v6435_v62, %v6436_v18  ;;  %v5832_v32 = vsel %vm9226_vm9, %v8388_v28, %v5831_v9  ;;  %v5834_v6 = vrot.slane %v11248_v2, 5 }
 0x214   : > { %6897 = vrot.lane.b32.xlu0 %v8481_v14, %s9073_s29  ;;  %v4789_v45 = vsel %vm9313_vm14, %v4784_v56, %v4788_v0  ;;  %v4799_v60 = vsel %vm9313_vm14, %v4794_v17, %v4798_v51  ;;  %v8547_v24 = vcombine.low %v6434_v10, %v6437_v59  ;;  %v5230_v20 = vrot.slane %v11254_v53, 5  ;;  %v5746_v14 = vld [vmem:[#allocation3 + $0x24] sm:$0xe] }
 0x215   : > { %v8434_v52 = vcombine.low %v4789_v45, %v4799_v60  ;;  %v5835_v11 = vsel %vm9226_vm9, %v5833_v15, %v5834_v6  ;;  %v8373_v23 = vrot.slane %v5140_v47, 9  ;;  %v5233_v41 = vrot.slane %v11258_v19, 5  ;;  %v3353_v49 = vpop.permute.xlu0 %3352 }
 0x216   : > { %v3275_v16 = vpop.permute.xlu1 %3274  ;;  %v8500_v18 = vcombine.low %v5832_v32, %v5835_v11  ;;  %v5232_v0 = vrot.slane %v5230_v20, 4  ;;  %v8372_v9 = vrot.slane %v5139_v5, 9  ;;  %v5223_v51 = vrot.slane %v11266_v30, 5 }
 0x217   : > { %v3649_v56 = vsel %vm3617_vm8, %v3616_v35, %v3275_v16  ;;  %v3680_v62 = vsel %vm3650_vm12, %v11234_v48, %v3353_v49  ;;  %6643 = vrot.lane.b32.xlu1 %v8434_v52, %s9070_s21  ;;  %v5231_v28 = vsel %vm9226_vm9, %v8373_v23, %v5230_v20  ;;  %v5226_v37 = vrot.slane %v11274_v7, 5  ;;  %v11300_v52 = vld [vmem:[#allocation3 + $0x2c] sm:$0x1] }
 0x218   : > { %7237 = vrot.lane.b32.xlu0 %v8547_v24, %s9072_s23  ;;  %v5234_v17 = vsel %vm9226_vm9, %v5232_v0, %v5233_v41  ;;  %v5225_v10 = vrot.slane %v5223_v51, 4  ;;  %v8402_v15 = vrot.slane %v6354_v34, 9  ;;  %v6426_v47 = vrot.slane %v11207_v25, 5 }
 0x219   : > { %v8764_v35 = vpop.f32.mrf.mxu0  ;;  %v8453_v59 = vcombine.low %v5231_v28, %v5234_v17  ;;  %v5224_v48 = vsel %vm9226_vm9, %v8372_v9, %v5223_v51  ;;  %v6429_v32 = vrot.slane %v11280_v36, 5  ;;  %v5824_v6 = vrot.slane %v11202_v22, 5  ;;  %v3433_v45 = vpop.permute.xlu0 %3432 }
 0x21a   : > { %v3355_v5 = vpop.permute.xlu1 %3354  ;;  %v3967_v60 = vmul.f32 %v8764_v35, %v10968_v42  ;;  %v5227_v24 = vsel %vm9226_vm9, %v5225_v10, %v5226_v37  ;;  %v6428_v20 = vrot.slane %v6426_v47, 4  ;;  %v8387_v11 = vrot.slane %v5746_v14, 9 }
 0x21b   : > { %v3682_v23 = vsel %vm3650_vm12, %v3649_v56, %v3355_v5  ;;  %v3713_v41 = vsel %vm3683_vm13, %v3680_v62, %v3433_v45  ;;  %v3855_v34 = vpop.f32.mrf.mxu0  ;;  %6983 = vrot.lane.b32.xlu1 %v8500_v18, %s9071_s22  ;;  %v8452_v16 = vcombine.low %v5224_v48, %v5227_v24  ;;  %v6427_v49 = vsel %vm9226_vm9, %v8402_v15, %v6426_v47 }
 0x21c   : > { %8782 = vmatprep.mubr.msk.bf16.mxu0 %vm13206_vm2, %v3713_v41  ;;  %v4006_v0 = vadd.f32 %v10975_v12, %v3967_v60  ;;  %v3965_v9 = vmul.f32 %v10968_v42, %v3855_v34  ;;  %6729 = vrot.lane.b32.xlu0 %v8453_v59, %s9067_s18  ;;  %v6430_v51 = vsel %vm9226_vm9, %v6428_v20, %v6429_v32  ;;  %v5826_v56 = vrot.slane %v5824_v6, 4 }
 0x21d   : > { %v8765_v62 = vpop.f32.mrf.mxu0  ;;  %v8546_v28 = vcombine.low %v6427_v49, %v6430_v51  ;;  %v5825_v18 = vsel %vm9226_vm9, %v8387_v11, %v5824_v6  ;;  %v5827_v37 = vrot.slane %v11300_v52, 5  ;;  %v5442_v14 = vshll.u32 %v11182_v3, 16 }
 0x21e   : > { %v3435_v17 = vpop.permute.xlu1 %3434  ;;  %v4038_v10 = vmax.f32 %v4006_v0, 0.0  ;;  %v4004_v15 = vadd.f32 %v10975_v12, %v3965_v9  ;;  %v3968_v47 = vmul.f32 %v8765_v62, %v10968_v42  ;;  %v5448_v35 = vrot.slane %v5446_v26, 4 }
 0x21f   : > { %v3715_v59 = vsel %vm3683_vm13, %v3682_v23, %v3435_v17  ;;  %v3858_v48 = vpop.f32.mrf.mxu0  ;;  %6727 = vrot.lane.b32.xlu1 %v8452_v16, %s9067_s18  ;;  %v5828_v32 = vsel %vm9226_vm9, %v5826_v56, %v5827_v37  ;;  %v11325_v6 = vrot.slane %v5442_v14, 5  ;;  %v5452_v5 = vshll.u32 %v11248_v2, 16  ;;  %v4627_v56 = vld [vmem:[#allocation3 + $0x48] sm:$0xf]  ;;  %v4620_v37 = vld [vmem:[#allocation3 + $0x3c] sm:$0xf] }
 0x220   : > { %8783 = vmatmul.mubr.msk.bf16.gmra.mxu0 %vm13206_vm2, %v3715_v59  ;;  %v8600_v45 = vpack.c.bf16 %v4038_v10, %v4038_v10  ;;  %v4036_v60 = vmax.f32 %v4004_v15, 0.0  ;;  %v4007_v24 = vadd.f32 %v10975_v12, %v3968_v47  ;;  %v3966_v3 = vmul.f32 %v10968_v42, %v3858_v48  ;;  %7235 = vrot.lane.b32.xlu0 %v8546_v28, %s9072_s23  ;;  %v4161_v59 = vld [vmem:[#allocation3 + $0x68] sm:$0x1] }
 0x221   : > { %v11334_v26 = vrot.slane %v5994_v38, 4  ;;  %v11338_v20 = vrot.slane %v5997_v58, 5  ;;  %v8499_v11 = vcombine.low %v5825_v18, %v5828_v32  ;;  %v5449_v2 = vor.u32 %v5448_v35, %v11325_v6  ;;  %v4712_v32 = vld [vmem:[#allocation3 + $0x30] sm:$0xf] }
 0x222   : > { %v4357_v23 = vshrl.u32 %v8600_v45, 16  ;;  %v8598_v41 = vpack.c.bf16 %v4036_v60, %v4036_v60  ;;  %v4039_v34 = vmax.f32 %v4007_v24, 0.0  ;;  %v11341_v16 = vrot.slane %v5452_v5, 5  ;;  %v4631_v5 = vld [vmem:[#allocation3 + $0x50] sm:$0x1] }
 0x223   : > { %v4005_v42 = vadd.f32 %v10975_v12, %v3966_v3  ;;  %v11344_v49 = vrot.slane %v5449_v2, 4  ;;  %v6024_v38 = vor.u32 %v11191_v50, %v11186_v4  ;;  %v6027_v0 = vshll.u32 %v11184_v40, 16 }
 0x224   : > { %v4359_v13 = vrot.slane %v4357_v23, 7  ;;  %v4360_v58 = vshll.u32 %v8600_v45, 16  ;;  %v4340_v9 = vshrl.u32 %v8598_v41, 16  ;;  %v8601_v51 = vpack.c.bf16 %v4039_v34, %v4039_v34  ;;  %6981 = vrot.lane.b32.xlu0 %v8499_v11, %s9071_s22 }
 0x225   : > { %v4343_v62 = vshll.u32 %v8598_v41, 16  ;;  %v4037_v28 = vmax.f32 %v4005_v42, 0.0  ;;  %v5440_v12 = vrot.slane %v5439_v55, 4  ;;  %v5455_v4 = vsel %vm9313_vm14, %v11344_v49, %v11341_v16 }
 0x226   : > { %v4362_v50 = vor.u32 %v4360_v58, %v4359_v13  ;;  %v4342_v18 = vrot.slane %v4340_v9, 7  ;;  %v4365_v14 = vshrl.u32 %v8601_v51, 16  ;;  %v11357_v17 = vrot.slane %v6024_v38, 4 }
 0x227   : > { %v4363_v10 = vrot.slane %v4359_v13, 4  ;;  %v4368_v15 = vshll.u32 %v8601_v51, 16  ;;  %v8599_v47 = vpack.c.bf16 %v4037_v28, %v4037_v28  ;;  %v11359_v35 = vrot.slane %v6027_v0, 5  ;;  %v4158_v13 = vld [vmem:[#allocation3 + $0x5c] sm:$0x1] }
 0x228   : > { %v4628_v43 = vsel %vm9232_vm10, %v4362_v50, %v4627_v56  ;;  %v4345_v44 = vor.u32 %v4343_v62, %v4342_v18  ;;  %v4346_v55 = vrot.slane %v4342_v18, 4  ;;  %v4367_v48 = vrot.slane %v4365_v14, 7 }
 0x229   : > { %4629 = vst [vmem:[#allocation3 + $0x48] sm:$0xf] %v4628_v43  ;;  %v4348_v45 = vshrl.u32 %v8599_v47, 16  ;;  %v4351_v60 = vshll.u32 %v8599_v47, 16  ;;  %v6033_v24 = vrot.slane %v6031_v27, 4  ;;  %v6037_v3 = vshll.u32 %v11241_v46, 16 }
 0x22a   : > { %v4621_v11 = vsel %vm9232_vm10, %v4345_v44, %v4620_v37  ;;  %v4370_v2 = vor.u32 %v4368_v15, %v4367_v48  ;;  %v4372_v23 = vrot.slane %v4367_v48, 4  ;;  %v4162_v41 = vsel %vm9200_vm5, 0, %v4161_v59  ;;  %v4624_v46 = vld [vmem:[#allocation3 + $0x44] sm:$0x1] }
 0x22b   : > { %4622 = vst [vmem:[#allocation3 + $0x3c] sm:$0xf] %v4621_v11  ;;  %v4350_v34 = vrot.slane %v4348_v45, 7  ;;  %v6034_v16 = vor.u32 %v6033_v24, %v11359_v35  ;;  %v6039_v42 = vrot.slane %v6037_v3, 5  ;;  %4163 = vst [vmem:[#allocation3 + $0x68] sm:$0x1] %v4162_v41 }
 0x22c   : > { %v4849_v49 = vshrl.u32 %v4712_v32, 16  ;;  %v4371_v40 = vsel %vm9238_vm11, %v4363_v10, %v4370_v2  ;;  %v4632_v27 = vsel %vm9172_vm3, %v4372_v23, %v4631_v5  ;;  %v4852_v38 = vshll.u32 %v4712_v32, 16 }
 0x22d   : > { %v4858_v0 = vshll.u32 %v11254_v53, 16  ;;  %4630 = vst.msk [vmem:[#allocation3 + $0x4c] sm:$0xf] %vm310_vm0, %v4371_v40  ;;  %4633 = vst [vmem:[#allocation3 + $0x50] sm:$0x1] %v4632_v27  ;;  %v4353_v58 = vor.u32 %v4351_v60, %v4350_v34  ;;  %v4355_v9 = vrot.slane %v4350_v34, 4  ;;  %v5445_v10 = vsel %vm9313_vm14, %v5440_v12, %v11325_v6 }
 0x22e   : > { %v6035_v51 = vrot.slane %v6034_v16, 4  ;;  %v4851_v56 = vrot.slane %v4849_v49, 4  ;;  %v4854_v62 = vrot.slane %v4852_v38, 5  ;;  %v4862_v50 = vshrl.u32 %v11254_v53, 16 }
 0x22f   : > { %v4860_v28 = vrot.slane %v4858_v0, 5  ;;  %v4868_v18 = vshll.u32 %v11258_v19, 16  ;;  %v4354_v37 = vsel %vm9238_vm11, %v4346_v55, %v4353_v58  ;;  %v4625_v14 = vsel %vm9172_vm3, %v4355_v9, %v4624_v46 }
 0x230   : > { %v4159_v15 = vsel %vm9200_vm5, 0, %v4158_v13  ;;  %4623 = vst.msk [vmem:[#allocation3 + $0x40] sm:$0xf] %vm310_vm0, %v4354_v37  ;;  %4626 = vst [vmem:[#allocation3 + $0x44] sm:$0x1] %v4625_v14  ;;  %v8484_v59 = vcombine.low %v5445_v10, %v5455_v4  ;;  %v6040_v19 = vsel %vm9313_vm14, %v6035_v51, %v6039_v42  ;;  %v4855_v43 = vor.u32 %v4854_v62, %v4851_v56 }
 0x231   : > { %v5322_v47 = vld [vmem:[#allocation3 + $0x48] sm:$0xf]  ;;  %v4864_v44 = vrot.slane %v4862_v50, 4  ;;  %4160 = vst [vmem:[#allocation3 + $0x5c] sm:$0x1] %v4159_v15  ;;  %v6030_v6 = vsel %vm9313_vm14, %v11357_v17, %v11359_v35  ;;  %v4870_v60 = vrot.slane %v4868_v18, 5  ;;  %v5415_v42 = vor.u32 %v11218_v61, %v11212_v21 }
 0x232   : > { %v5929_v53 = vld [vmem:[#allocation3 + $0x48] sm:$0xf]  ;;  %v5481_v55 = vshrl.u32 %v5322_v47, 16  ;;  %v5484_v48 = vshll.u32 %v5322_v47, 16  ;;  %v4856_v12 = vrot.slane %v4855_v43, 4  ;;  %v8531_v16 = vcombine.low %v6030_v6, %v6040_v19 }
 0x233   : > { %v6066_v32 = vshrl.u32 %v5929_v53, 16  ;;  %v6069_v5 = vshll.u32 %v5929_v53, 16  ;;  %v4865_v45 = vor.u32 %v4864_v44, %v4860_v28  ;;  %v5320_v24 = vld [vmem:[#allocation3 + $0x3c] sm:$0xf]  ;;  %v5418_v46 = vshll.u32 %v11202_v22, 16 }
 0x234   : > { %v11395_v4 = vrot.slane %v5481_v55, 4  ;;  %v11397_v3 = vrot.slane %v5484_v48, 5  ;;  %v11403_v23 = vld [vmem:[#allocation3 + $0x3c] sm:$0xf]  ;;  %v11405_v41 = vld [vmem:[#allocation3 + $0x4c] sm:$0xf]  ;;  %v4861_v27 = vsel %vm9313_vm14, %v4856_v12, %v4860_v28  ;;  %v6000_v62 = vor.u32 %v11338_v20, %v11334_v26 }
 0x235   : > { %v11399_v11 = vrot.slane %v6066_v32, 4  ;;  %v11401_v2 = vrot.slane %v6069_v5, 5  ;;  %v11407_v34 = vld [vmem:[#allocation3 + $0x4c] sm:$0xf]  ;;  %v4866_v17 = vrot.slane %v4865_v45, 4  ;;  %v5457_v35 = vshrl.u32 %v5320_v24, 16 }
 0x236   : > { %v8470_v49 = vcombine.low %v5322_v47, %v11405_v41  ;;  %v8517_v40 = vcombine.low %v5929_v53, %v11407_v34  ;;  %v5494_v38 = vshrl.u32 %v11405_v41, 16  ;;  %v5460_v13 = vshll.u32 %v5320_v24, 16  ;;  %v6357_v43 = vld [vmem:[#allocation3 + $0x48] sm:$0xe]  ;;  %v4710_v5 = vld [vmem:[#allocation3 + $0x24] sm:$0xf] }
 0x237   : > { %v4871_v0 = vsel %vm9313_vm14, %v4866_v17, %v4870_v60  ;;  %v6042_v58 = vshrl.u32 %v11403_v23, 16  ;;  %v6079_v21 = vshrl.u32 %v11407_v34, 16  ;;  %v11423_v9 = vld [vmem:[#allocation3 + $0x40] sm:$0xf]  ;;  %v11425_v51 = vrot.slane %v5457_v35, 4 }
 0x238   : > { %6827 = vrot.lane.b32.xlu1 %v8470_v49, %s9068_s19  ;;  %7081 = vrot.lane.b32.xlu0 %v8517_v40, %s9069_s20  ;;  %v8437_v61 = vcombine.low %v4861_v27, %v4871_v0  ;;  %v11427_v56 = vld [vmem:[#allocation3 + $0x40] sm:$0xf]  ;;  %v11431_v28 = vrot.slane %v5460_v13, 5  ;;  %v5470_v50 = vshrl.u32 %v11423_v9, 16  ;;  %v5487_v18 = vor.u32 %v11397_v3, %v11395_v4  ;;  %v11467_v0 = vld [vmem:[#allocation3 + $0x4c] sm:$0xf] }
 0x239   : > { %v6072_v37 = vor.u32 %v11401_v2, %v11399_v11  ;;  %v8469_v14 = vcombine.low %v5320_v24, %v11423_v9  ;;  %v11439_v10 = vrot.slane %v6042_v58, 4  ;;  %v6045_v15 = vshll.u32 %v11403_v23, 16 }
 0x23a   : > { %v5416_v47 = vrot.slane %v5415_v42, 4  ;;  %v8516_v26 = vcombine.low %v11403_v23, %v11427_v56  ;;  %v5420_v20 = vrot.slane %v5418_v46, 5  ;;  %v5424_v53 = vrot.slane %v5422_v54, 4 }
 0x23b   : > { %v5428_v19 = vshll.u32 %v11300_v52, 16  ;;  %v6055_v44 = vshrl.u32 %v11427_v56, 16  ;;  %v6003_v55 = vshll.u32 %v11207_v25, 16  ;;  %v6009_v48 = vrot.slane %v6007_v31, 4 }
 0x23c   : > { %6903 = vrot.lane.b32.xlu1 %v8484_v59, %s9073_s29  ;;  %7157 = vrot.lane.b32.xlu0 %v8531_v16, %s9074_s8  ;;  %v6013_v32 = vshll.u32 %v11280_v36, 16  ;;  %v11454_v6 = vrot.slane %v6045_v15, 5  ;;  %v5421_v22 = vsel %vm9313_vm14, %v5416_v47, %v5420_v20  ;;  %v5425_v54 = vor.u32 %v5424_v53, %v5420_v20  ;;  %v11458_v59 = vld [vmem:[#allocation3 + $0x50] sm:$0x1]  ;;  %v5142_v15 = vld [vmem:[#allocation3 + $0x48] sm:$0xe] }
 0x23d   : > { %v6001_v52 = vrot.slane %v6000_v62, 4  ;;  %v5430_v12 = vrot.slane %v5428_v19, 5  ;;  %v6005_v45 = vrot.slane %v6003_v55, 5  ;;  %v8405_v60 = vrot.slane %v6357_v43, 9 }
 0x23e   : > { %v6447_v24 = vrot.slane %v11407_v34, 5  ;;  %v5426_v23 = vrot.slane %v5425_v54, 4  ;;  %v4825_v25 = vshrl.u32 %v4710_v5, 16  ;;  %v4828_v31 = vshll.u32 %v4710_v5, 16  ;;  %v5749_v5 = vld [vmem:[#allocation3 + $0x48] sm:$0xe] }
 0x23f   : > { %v4834_v36 = vshll.u32 %v11266_v30, 16  ;;  %v6010_v16 = vor.u32 %v6009_v48, %v6005_v45  ;;  %v6015_v17 = vrot.slane %v6013_v32, 5  ;;  %v6450_v42 = vrot.slane %v11458_v59, 5  ;;  %v11484_v32 = vld [vmem:[#allocation3 + $0x50] sm:$0x1] }
 0x240   : > { %6649 = vrot.lane.b32.xlu1 %v8437_v61, %s9070_s21  ;;  %6825 = vrot.lane.b32.xlu0 %v8469_v14, %s9068_s19  ;;  %v6449_v35 = vrot.slane %v6447_v24, 4  ;;  %v5431_v49 = vsel %vm9313_vm14, %v5426_v23, %v5430_v12  ;;  %v4827_v40 = vrot.slane %v4825_v25, 4  ;;  %v4830_v27 = vrot.slane %v4828_v31, 5  ;;  %v11472_v14 = vld [vmem:[#allocation3 + $0x50] sm:$0x1] }
 0x241   : > { %v4836_v46 = vrot.slane %v4834_v36, 5  ;;  %v8483_v13 = vcombine.low %v5421_v22, %v5431_v49  ;;  %v6011_v58 = vrot.slane %v6010_v16, 4  ;;  %v4838_v62 = vshrl.u32 %v11266_v30, 16  ;;  %v6356_v23 = vld [vmem:[#allocation3 + $0x3c] sm:$0xe] }
 0x242   : > { %v6451_v61 = vsel %vm9226_vm9, %v6449_v35, %v6450_v42  ;;  %v6006_v47 = vsel %vm9313_vm14, %v6001_v52, %v6005_v45  ;;  %v6448_v20 = vsel %vm9226_vm9, %v8405_v60, %v6447_v24  ;;  %v4831_v53 = vor.u32 %v4830_v27, %v4827_v40  ;;  %v5141_v27 = vld [vmem:[#allocation3 + $0x3c] sm:$0xe] }
 0x243   : > { %v4844_v19 = vshll.u32 %v11274_v7, 16  ;;  %v6016_v43 = vsel %vm9313_vm14, %v6011_v58, %v6015_v17  ;;  %v8549_v30 = vcombine.low %v6448_v20, %v6451_v61  ;;  %v4840_v55 = vrot.slane %v4838_v62, 4  ;;  %v11487_v7 = vld [vmem:[#allocation3 + $0x44] sm:$0x1]  ;;  %v11495_v17 = vld [vmem:[#allocation3 + $0x40] sm:$0xf] }
 0x244   : > { %7079 = vrot.lane.b32.xlu1 %v8516_v26, %s9069_s20  ;;  %6901 = vrot.lane.b32.xlu0 %v8483_v13, %s9073_s29  ;;  %v5244_v48 = vrot.slane %v11467_v0, 5  ;;  %v8530_v22 = vcombine.low %v6006_v47, %v6016_v43  ;;  %v4832_v54 = vrot.slane %v4831_v53, 4  ;;  %v8375_v52 = vrot.slane %v5142_v15, 9  ;;  %v11505_v62 = vld [vmem:[#allocation3 + $0x44] sm:$0x1] }
 0x245   : > { %v5247_v12 = vrot.slane %v11472_v14, 5  ;;  %v4841_v26 = vor.u32 %v4840_v55, %v4836_v46  ;;  %v4846_v45 = vrot.slane %v4844_v19, 5  ;;  %v5845_v24 = vrot.slane %v11405_v41, 5  ;;  %v4109_v19 = vld [vmem:[#allocation3 + $0x78] sm:$0x1] }
 0x246   : > { %v5246_v60 = vrot.slane %v5244_v48, 4  ;;  %v4837_v25 = vsel %vm9313_vm14, %v4832_v54, %v4836_v46  ;;  %v5245_v31 = vsel %vm9226_vm9, %v8375_v52, %v5244_v48  ;;  %v8390_v36 = vrot.slane %v5749_v5, 9  ;;  %v5748_v54 = vld [vmem:[#allocation3 + $0x3c] sm:$0xe]  ;;  %v11521_v52 = vld [vmem:[%s13197_s2] ss:$0 sm:$0xff] }
 0x247   : > { %v6440_v16 = vrot.slane %v11427_v56, 5  ;;  %v4842_v35 = vrot.slane %v4841_v26, 4  ;;  %v5847_v49 = vrot.slane %v5845_v24, 4  ;;  %v5848_v40 = vrot.slane %v11484_v32, 5  ;;  %v8768_v43 = vpop.f32.mrf.mxu0 }
 0x248   : > { %7155 = vrot.lane.b32.xlu1 %v8530_v22, %s9074_s8  ;;  %7241 = vrot.lane.b32.xlu0 %v8549_v30, %s9072_s23  ;;  %v5248_v42 = vsel %vm9226_vm9, %v5246_v60, %v5247_v12  ;;  %v5846_v46 = vsel %vm9226_vm9, %v8390_v36, %v5845_v24  ;;  %v8404_v13 = vrot.slane %v6356_v23, 9  ;;  %v6443_v61 = vrot.slane %v11487_v7, 5  ;;  %v11516_v22 = vld [vmem:[#allocation3 + $0x44] sm:$0x1] }
 0x249   : > { %v6442_v58 = vrot.slane %v6440_v16, 4  ;;  %v4847_v15 = vsel %vm9313_vm14, %v4842_v35, %v4846_v45  ;;  %v8455_v47 = vcombine.low %v5245_v31, %v5248_v42  ;;  %v5849_v20 = vsel %vm9226_vm9, %v5847_v49, %v5848_v40  ;;  %v3871_v24 = vpop.f32.mrf.mxu0 }
 0x24a   : > { %v5237_v53 = vrot.slane %v11495_v17, 5  ;;  %v8436_v30 = vcombine.low %v4837_v25, %v4847_v15  ;;  %v6441_v55 = vsel %vm9226_vm9, %v8404_v13, %v6440_v16  ;;  %v8374_v5 = vrot.slane %v5141_v27, 9  ;;  %v11535_v16 = vld [vmem:[%s13198_s3] ss:$0 sm:$0xff] }
 0x24b   : > { %v6444_v48 = vsel %vm9226_vm9, %v6442_v58, %v6443_v61  ;;  %v3971_v12 = vmul.f32 %v11521_v52, %v8768_v43  ;;  %v8502_v26 = vcombine.low %v5846_v46, %v5849_v20  ;;  %v5240_v60 = vrot.slane %v11505_v62, 5  ;;  %v8769_v27 = vpop.f32.mrf.mxu0 }
 0x24c   : > { %6733 = vrot.lane.b32.xlu0 %v8455_v47, %s9067_s18  ;;  %v5239_v45 = vrot.slane %v5237_v53, 4  ;;  %6647 = vrot.lane.b32.xlu1 %v8436_v30, %s9070_s21  ;;  %v8548_v23 = vcombine.low %v6441_v55, %v6444_v48  ;;  %v5238_v25 = vsel %vm9226_vm9, %v8374_v5, %v5237_v53  ;;  %v5838_v31 = vrot.slane %v11423_v9, 5 }
 0x24d   : > { %v4110_v36 = vsel %vm9172_vm3, 0, %v4109_v19  ;;  %v4010_v35 = vadd.f32 %v11535_v16, %v3971_v12  ;;  %v3969_v42 = vmul.f32 %v11521_v52, %v3871_v24  ;;  %v8389_v49 = vrot.slane %v5748_v54, 9  ;;  %v3874_v19 = vpop.f32.mrf.mxu0 }
 0x24e   : > { %v5841_v40 = vrot.slane %v11516_v22, 5  ;;  %4111 = vst [vmem:[#allocation3 + $0x78] sm:$0x1] %v4110_v36  ;;  %v5241_v46 = vsel %vm9226_vm9, %v5239_v45, %v5240_v60  ;;  %v5840_v13 = vrot.slane %v5838_v31, 4  ;;  %v11545_v58 = vrot.slane %v5487_v18, 4 }
 0x24f   : > { %v5490_v61 = vshll.u32 %v11405_v41, 16  ;;  %v4042_v15 = vmax.f32 %v4010_v35, 0.0  ;;  %v4008_v47 = vadd.f32 %v11535_v16, %v3969_v42  ;;  %v3972_v20 = vmul.f32 %v11521_v52, %v8769_v27  ;;  %v4641_v35 = vld [vmem:[#allocation3 + $0x60] sm:$0xf] }
 0x250   : > { %7239 = vrot.lane.b32.xlu0 %v8548_v23, %s9072_s23  ;;  %v5496_v53 = vrot.slane %v5494_v38, 4  ;;  %6987 = vrot.lane.b32.xlu1 %v8502_v26, %s9071_s22  ;;  %v5839_v4 = vsel %vm9226_vm9, %v8389_v49, %v5838_v31  ;;  %v5842_v3 = vsel %vm9226_vm9, %v5840_v13, %v5841_v40  ;;  %v5500_v43 = vshll.u32 %v11484_v32, 16 }
 0x251   : > { %v11558_v18 = vrot.slane %v5490_v61, 5  ;;  %v8604_v30 = vpack.c.bf16 %v4042_v15, %v4042_v15  ;;  %v4040_v55 = vmax.f32 %v4008_v47, 0.0  ;;  %v4011_v48 = vadd.f32 %v11535_v16, %v3972_v20  ;;  %v4634_v20 = vld [vmem:[#allocation3 + $0x54] sm:$0xf] }
 0x252   : > { %v3970_v41 = vmul.f32 %v11521_v52, %v3874_v19  ;;  %v8454_v38 = vcombine.low %v5238_v25, %v5241_v46  ;;  %v8501_v5 = vcombine.low %v5839_v4, %v5842_v3  ;;  %v11567_v12 = vrot.slane %v6072_v37, 4  ;;  %v4106_v3 = vld [vmem:[#allocation3 + $0x6c] sm:$0x1] }
 0x253   : > { %v5497_v54 = vor.u32 %v5496_v53, %v11558_v18  ;;  %v4391_v26 = vshrl.u32 %v8604_v30, 16  ;;  %v8602_v45 = vpack.c.bf16 %v4040_v55, %v4040_v55  ;;  %v4043_v60 = vmax.f32 %v4011_v48, 0.0  ;;  %v4716_v55 = vld [vmem:[#allocation3 + $0x48] sm:$0xf] }
 0x254   : > { %v5493_v32 = vsel %vm9313_vm14, %v11545_v58, %v11558_v18  ;;  %v4009_v24 = vadd.f32 %v11535_v16, %v3970_v41  ;;  %6731 = vrot.lane.b32.xlu1 %v8454_v38, %s9067_s18  ;;  %6985 = vrot.lane.b32.xlu0 %v8501_v5, %s9071_s22  ;;  %v11578_v25 = vrot.slane %v5500_v43, 5  ;;  %v6075_v11 = vshll.u32 %v11407_v34, 16  ;;  %v4645_v48 = vld [vmem:[#allocation3 + $0x68] sm:$0x1] }
 0x255   : > { %v11576_v23 = vrot.slane %v5497_v54, 4  ;;  %v4393_v2 = vrot.slane %v4391_v26, 7  ;;  %v4394_v37 = vshll.u32 %v8604_v30, 16  ;;  %v4374_v31 = vshrl.u32 %v8602_v45, 16  ;;  %v4167_v30 = vld [vmem:[#allocation3 + $0x80] sm:$0x1] }
 0x256   : > { %v8605_v36 = vpack.c.bf16 %v4043_v60, %v4043_v60  ;;  %v4041_v42 = vmax.f32 %v4009_v24, 0.0  ;;  %v11581_v49 = vrot.slane %v6075_v11, 5  ;;  %v6081_v40 = vrot.slane %v6079_v21, 4 }
 0x257   : > { %v6085_v27 = vshll.u32 %v11458_v59, 16  ;;  %v4396_v46 = vor.u32 %v4394_v37, %v4393_v2  ;;  %v4376_v13 = vrot.slane %v4374_v31, 7  ;;  %v4377_v61 = vshll.u32 %v8602_v45, 16 }
 0x258   : > { %v4399_v15 = vshrl.u32 %v8605_v36, 16  ;;  %v4397_v47 = vrot.slane %v4393_v2, 4  ;;  %v4402_v53 = vshll.u32 %v8605_v36, 16  ;;  %v8603_v19 = vpack.c.bf16 %v4041_v42, %v4041_v42 }
 0x259   : > { %v5503_v4 = vsel %vm9313_vm14, %v11576_v23, %v11578_v25  ;;  %v4642_v34 = vsel %vm9232_vm10, %v4396_v46, %v4641_v35  ;;  %v4379_v21 = vor.u32 %v4377_v61, %v4376_v13  ;;  %v4380_v43 = vrot.slane %v4376_v13, 4  ;;  %v11597_v23 = vpop.permute.xlu0 %6641  ;;  %v4638_v35 = vld [vmem:[#allocation3 + $0x5c] sm:$0x1] }
 0x25a   : > { %v4401_v59 = vrot.slane %v4399_v15, 7  ;;  %4643 = vst [vmem:[#allocation3 + $0x60] sm:$0xf] %v4642_v34  ;;  %v4382_v41 = vshrl.u32 %v8603_v19, 16  ;;  %v4385_v38 = vshll.u32 %v8603_v19, 16  ;;  %v6082_v5 = vor.u32 %v6081_v40, %v11581_v49 }
 0x25b   : > { %v6087_v54 = vrot.slane %v6085_v27, 5  ;;  %v4635_v26 = vsel %vm9232_vm10, %v4379_v21, %v4634_v20  ;;  %v4107_v24 = vsel %vm9172_vm3, 0, %v4106_v3  ;;  %v4168_v2 = vsel %vm9200_vm5, 0, %v4167_v30  ;;  %v4164_v27 = vld [vmem:[#allocation3 + $0x74] sm:$0x1] }
 0x25c   : > { %v4404_v45 = vor.u32 %v4402_v53, %v4401_v59  ;;  %v4406_v60 = vrot.slane %v4401_v59, 4  ;;  %4636 = vst [vmem:[#allocation3 + $0x54] sm:$0xf] %v4635_v26  ;;  %v4384_v25 = vrot.slane %v4382_v41, 7  ;;  %v6083_v11 = vrot.slane %v6082_v5, 4 }
 0x25d   : > { %4108 = vst [vmem:[#allocation3 + $0x6c] sm:$0x1] %v4107_v24  ;;  %v4897_v37 = vshrl.u32 %v4716_v55, 16  ;;  %4169 = vst [vmem:[#allocation3 + $0x80] sm:$0x1] %v4168_v2  ;;  %v4900_v42 = vshll.u32 %v4716_v55, 16  ;;  %v5463_v24 = vor.u32 %v11431_v28, %v11425_v51 }
 0x25e   : > { %v4405_v31 = vsel %vm9238_vm11, %v4397_v47, %v4404_v45  ;;  %v4646_v36 = vsel %vm9172_vm3, %v4406_v60, %v4645_v48  ;;  %v4906_v40 = vshll.u32 %v11467_v0, 16  ;;  %v4387_v46 = vor.u32 %v4385_v38, %v4384_v25  ;;  %v11627_v48 = vpop.permute.xlu0 %6721  ;;  %v11646_v51 = vld [vmem:[#allocation3 + $0x4] sm:$0xf]  ;;  %v11648_v28 = vld [vmem:[#allocation3] sm:$0xf] }
 0x25f   : > { %4644 = vst.msk [vmem:[#allocation3 + $0x64] sm:$0xf] %vm310_vm0, %v4405_v31  ;;  %4647 = vst [vmem:[#allocation3 + $0x68] sm:$0x1] %v4646_v36  ;;  %v4389_v13 = vrot.slane %v4384_v25, 4  ;;  %v6088_v61 = vsel %vm9313_vm14, %v6083_v11, %v6087_v54  ;;  %v4899_v15 = vrot.slane %v4897_v37, 4  ;;  %v6078_v47 = vsel %vm9313_vm14, %v11567_v12, %v11581_v49 }
 0x260   : > { %v4902_v20 = vrot.slane %v4900_v42, 5  ;;  %v4908_v53 = vrot.slane %v4906_v40, 5  ;;  %v4910_v19 = vshrl.u32 %v11467_v0, 16  ;;  %v4388_v3 = vsel %vm9238_vm11, %v4380_v43, %v4387_v46 }
 0x261   : > { %v4639_v34 = vsel %vm9172_vm3, %v4389_v13, %v4638_v35  ;;  %v4916_v21 = vshll.u32 %v11472_v14, 16  ;;  %v4165_v59 = vsel %vm9200_vm5, 0, %v4164_v27  ;;  %4637 = vst.msk [vmem:[#allocation3 + $0x58] sm:$0xf] %vm310_vm0, %v4388_v3  ;;  %v5326_v30 = vld [vmem:[#allocation3 + $0x60] sm:$0xf]  ;;  %v8486_v0 = vcombine.low %v5493_v32, %v5503_v4 }
 0x262   : > { %4640 = vst [vmem:[#allocation3 + $0x5c] sm:$0x1] %v4639_v34  ;;  %v5933_v12 = vld [vmem:[#allocation3 + $0x60] sm:$0xf]  ;;  %v8533_v49 = vcombine.low %v6078_v47, %v6088_v61  ;;  %v4903_v43 = vor.u32 %v4902_v20, %v4899_v15  ;;  %v4912_v55 = vrot.slane %v4910_v19, 4  ;;  %v5529_v14 = vshrl.u32 %v5326_v30, 16  ;;  %v11665_v34 = vpop.permute.xlu0 %7073 }
 0x263   : > { %4166 = vst [vmem:[#allocation3 + $0x74] sm:$0x1] %v4165_v59  ;;  %v5532_v41 = vshll.u32 %v5326_v30, 16  ;;  %v6114_v38 = vshrl.u32 %v5933_v12, 16  ;;  %v6117_v5 = vshll.u32 %v5933_v12, 16  ;;  %v8772_v54 = vpop.f32.mrf.mxu0  ;;  %v5466_v58 = vshll.u32 %v11423_v9, 16 }
 0x264   : > { %v4904_v26 = vrot.slane %v4903_v43, 4  ;;  %v4913_v45 = vor.u32 %v4912_v55, %v4908_v53  ;;  %v11629_v60 = vld [vmem:[#allocation3 + $0x54] sm:$0xf]  ;;  %v11634_v18 = vrot.slane %v5529_v14, 4  ;;  %v4918_v25 = vrot.slane %v4916_v21, 5 }
 0x265   : > { %v11636_v32 = vrot.slane %v5532_v41, 5  ;;  %v11638_v4 = vrot.slane %v6114_v38, 4  ;;  %v3975_v37 = vmul.f32 %v11521_v52, %v8772_v54  ;;  %v3887_v31 = vpop.f32.mrf.mxu0  ;;  %v5505_v35 = vshrl.u32 %v11629_v60, 16  ;;  %v11658_v61 = vld [vmem:[#allocation3 + $0x54] sm:$0xf] }
 0x266   : > { %v11640_v11 = vld [vmem:[#allocation3 + $0x64] sm:$0xf]  ;;  %v4914_v36 = vrot.slane %v4913_v45, 4  ;;  %v8417_v42 = vcombine.low %v11648_v28, %v11646_v51  ;;  %v11653_v27 = vrot.slane %v6117_v5, 5  ;;  %v4909_v13 = vsel %vm9313_vm14, %v4904_v26, %v4908_v53 }
 0x267   : > { %v11642_v2 = vld [vmem:[#allocation3 + $0x64] sm:$0xf]  ;;  %v8472_v40 = vcombine.low %v5326_v30, %v11640_v11  ;;  %v4014_v47 = vadd.f32 %v11535_v16, %v3975_v37  ;;  %v3973_v20 = vmul.f32 %v11521_v52, %v3887_v31  ;;  %v8773_v19 = vpop.f32.mrf.mxu0  ;;  %v5508_v30 = vshll.u32 %v11629_v60, 16 }
 0x268   : > { %v8519_v46 = vcombine.low %v5933_v12, %v11642_v2  ;;  %v4919_v3 = vsel %vm9313_vm14, %v4914_v36, %v4918_v25  ;;  %v3976_v53 = vmul.f32 %v11521_v52, %v8773_v19  ;;  %v11671_v59 = vld [vmem:[#allocation3 + $0x58] sm:$0xf]  ;;  %v6090_v12 = vshrl.u32 %v11658_v61, 16  ;;  %v11755_v28 = vld [vmem:[#allocation3 + $0x64] sm:$0xf] }
 0x269   : > { %6831 = vrot.lane.b32.xlu1 %v8472_v40, %s9068_s19  ;;  %v4046_v43 = vmax.f32 %v4014_v47, 0.0  ;;  %v4012_v55 = vadd.f32 %v11535_v16, %v3973_v20  ;;  %v8439_v14 = vcombine.low %v4909_v13, %v4919_v3  ;;  %v3890_v41 = vpop.f32.mrf.mxu0  ;;  %v11676_v38 = vrot.slane %v5505_v35, 4  ;;  %v11678_v5 = vld [vmem:[#allocation3 + $0x58] sm:$0xf] }
 0x26a   : > { %7085 = vrot.lane.b32.xlu0 %v8519_v46, %s9069_s20  ;;  %v4015_v54 = vadd.f32 %v11535_v16, %v3976_v53  ;;  %v3974_v26 = vmul.f32 %v11521_v52, %v3890_v41  ;;  %v8471_v25 = vcombine.low %v11629_v60, %v11671_v59  ;;  %v11685_v36 = vrot.slane %v5508_v30, 5  ;;  %v11696_v53 = vpop.permute.xlu0 %6817 }
 0x26b   : > { %v8608_v37 = vpack.c.bf16 %v4046_v43, %v4046_v43  ;;  %v4044_v31 = vmax.f32 %v4012_v55, 0.0  ;;  %v11687_v40 = vrot.slane %v6090_v12, 4  ;;  %v6093_v13 = vshll.u32 %v11658_v61, 16 }
 0x26c   : > { %v4047_v35 = vmax.f32 %v4015_v54, 0.0  ;;  %v4013_v46 = vadd.f32 %v11535_v16, %v3974_v26  ;;  %v8518_v47 = vcombine.low %v11658_v61, %v11678_v5  ;;  %v5464_v3 = vrot.slane %v5463_v24, 4  ;;  %v4655_v26 = vld [vmem:[#allocation3 + $0x78] sm:$0xf]  ;;  %v11747_v61 = vpop.permute.xlu1 %6819 }
 0x26d   : > { %6907 = vrot.lane.b32.xlu1 %v8486_v0, %s9073_s29  ;;  %v4425_v20 = vshrl.u32 %v8608_v37, 16  ;;  %v8606_v60 = vpack.c.bf16 %v4044_v31, %v4044_v31  ;;  %v5468_v0 = vrot.slane %v5466_v58, 5  ;;  %v4428_v55 = vshll.u32 %v8608_v37, 16  ;;  %v8937_v58 = vld [vmem:[%s13199_s4 + $0x20] ss:$0 sps:$4 sm:$0xff]  }
 0x26e   : > { %7161 = vrot.lane.b32.xlu0 %v8533_v49, %s9074_s8  ;;  %v8609_v30 = vpack.c.bf16 %v4047_v35, %v4047_v35  ;;  %v4045_v12 = vmax.f32 %v4013_v46, 0.0  ;;  %v5472_v49 = vrot.slane %v5470_v50, 4  ;;  %v5476_v54 = vshll.u32 %v11516_v22, 16  ;;  %v4648_v37 = vld [vmem:[#allocation3 + $0x6c] sm:$0xf]  ;;  %v11710_v19 = vpop.permute.xlu0 %7233 }
 0x26f   : > { %v4427_v43 = vrot.slane %v4425_v20, 7  ;;  %v4408_v41 = vshrl.u32 %v8606_v60, 16  ;;  %v4411_v45 = vshll.u32 %v8606_v60, 16  ;;  %v5469_v9 = vsel %vm9313_vm14, %v5464_v3, %v5468_v0 }
 0x270   : > { %v4433_v21 = vshrl.u32 %v8609_v30, 16  ;;  %v4436_v31 = vshll.u32 %v8609_v30, 16  ;;  %v8607_v24 = vpack.c.bf16 %v4045_v12, %v4045_v12  ;;  %v5473_v50 = vor.u32 %v5472_v49, %v5468_v0 }
 0x271   : > { %6653 = vrot.lane.b32.xlu1 %v8439_v14, %s9070_s21  ;;  %v4430_v35 = vor.u32 %v4428_v55, %v4427_v43  ;;  %v4410_v46 = vrot.slane %v4408_v41, 7  ;;  %v4431_v22 = vrot.slane %v4427_v43, 4  ;;  %v5478_v41 = vrot.slane %v5476_v54, 5 }
 0x272   : > { %6829 = vrot.lane.b32.xlu0 %v8471_v25, %s9068_s19  ;;  %v4435_v20 = vrot.slane %v4433_v21, 7  ;;  %v4416_v60 = vshrl.u32 %v8607_v24, 16  ;;  %v4419_v30 = vshll.u32 %v8607_v24, 16  ;;  %v4659_v25 = vld [vmem:[#allocation3 + $0x80] sm:$0x1]  ;;  %v5474_v55 = vrot.slane %v5473_v50, 4 }
 0x273   : > { %v4656_v14 = vsel %vm9232_vm10, %v4430_v35, %v4655_v26  ;;  %v4413_v12 = vor.u32 %v4411_v45, %v4410_v46  ;;  %vm13229_vm2 = vcmask 1043456   ;;  %v4414_v3 = vrot.slane %v4410_v46, 4  ;;  %v4652_v24 = vld [vmem:[#allocation3 + $0x74] sm:$0x1]  ;;  %v6359_v50 = vld [vmem:[#allocation3 + $0x60] sm:$0xe] }
 0x274   : > { %8829 = vmatprep.subr.msk.bf16.mxu1 %vm13229_vm2, %v8937_v58  ;;  %4657 = vst [vmem:[#allocation3 + $0x78] sm:$0xf] %v4656_v14  ;;  %v4438_v0 = vor.u32 %v4436_v31, %v4435_v20  ;;  %v4440_v49 = vrot.slane %v4435_v20, 4  ;;  %v4418_v43 = vrot.slane %v4416_v60, 7  ;;  %v5479_v45 = vsel %vm9313_vm14, %v5474_v55, %v5478_v41  ;;  %v4714_v58 = vld [vmem:[#allocation3 + $0x3c] sm:$0xf] }
 0x275   : > { %7083 = vrot.lane.b32.xlu1 %v8518_v47, %s9069_s20  ;;  %v4649_v21 = vsel %vm9232_vm10, %v4413_v12, %v4648_v37  ;;  %v6048_v54 = vor.u32 %v11454_v6, %v11439_v10  ;;  %v6051_v26 = vshll.u32 %v11427_v56, 16  ;;  %v8485_v37 = vcombine.low %v5469_v9, %v5479_v45  ;;  %v11728_v6 = vld [vmem:[#allocation3 + $0x68] sm:$0x1]  ;;  %v5144_v45 = vld [vmem:[#allocation3 + $0x60] sm:$0xe] }
 0x276   : > { %4650 = vst [vmem:[#allocation3 + $0x6c] sm:$0xf] %v4649_v21  ;;  %v4439_v31 = vsel %vm9238_vm11, %v4431_v22, %v4438_v0  ;;  %v4660_v35 = vsel %vm9172_vm3, %v4440_v49, %v4659_v25  ;;  %v4421_v47 = vor.u32 %v4419_v30, %v4418_v43  ;;  %v4423_v46 = vrot.slane %v4418_v43, 4 }
 0x277   : > { %4658 = vst.msk [vmem:[#allocation3 + $0x7c] sm:$0xf] %vm310_vm0, %v4439_v31  ;;  %4661 = vst [vmem:[#allocation3 + $0x80] sm:$0x1] %v4660_v35  ;;  %v6049_v20 = vrot.slane %v6048_v54, 4  ;;  %v6053_v60 = vrot.slane %v6051_v26, 5  ;;  %6905 = vrot.lane.b32.xlu0 %v8485_v37, %s9073_s29  ;;  %v7267_v56 = vsel %vm3436_vm15, %v8417_v42, %v11597_v23 }
 0x278   : > { %v6057_v10 = vrot.slane %v6055_v44, 4  ;;  %v4422_v22 = vsel %vm9238_vm11, %v4414_v3, %v4421_v47  ;;  %v4653_v30 = vsel %vm9172_vm3, %v4423_v46, %v4652_v24  ;;  %v11736_v14 = vrot.slane %v6093_v13, 5  ;;  %v11749_v13 = vpop.permute.xlu0 %6725  ;;  %v11765_v47 = vld [vmem:[#allocation3 + $0x68] sm:$0x1] }
 0x279   : > { %v6061_v12 = vshll.u32 %v11487_v7, 16  ;;  %4651 = vst.msk [vmem:[#allocation3 + $0x70] sm:$0xf] %vm310_vm0, %v4422_v22  ;;  %4654 = vst [vmem:[#allocation3 + $0x74] sm:$0x1] %v4653_v30  ;;  %v8407_v9 = vrot.slane %v6359_v50, 9  ;;  %v6054_v7 = vsel %vm9313_vm14, %v6049_v20, %v6053_v60  ;;  %v7314_v20 = vsel %vm3485_vm1, %v7267_v56, %v11627_v48 }
 0x27a   : > { %v6058_v44 = vor.u32 %v6057_v10, %v6053_v60  ;;  %v6461_v25 = vrot.slane %v11642_v2, 5  ;;  %v6464_v55 = vrot.slane %v11728_v6, 5  ;;  %v4873_v41 = vshrl.u32 %v4714_v58, 16  ;;  %v6358_v30 = vld [vmem:[#allocation3 + $0x54] sm:$0xe] }
 0x27b   : > { %v4876_v3 = vshll.u32 %v4714_v58, 16  ;;  %v6063_v49 = vrot.slane %v6061_v12, 5  ;;  %v4882_v23 = vshll.u32 %v11495_v17, 16  ;;  %v4886_v21 = vshrl.u32 %v11495_v17, 16  ;;  %v11767_v17 = vld [vmem:[#allocation3 + $0x68] sm:$0x1]  ;;  %v11772_v12 = vpop.permute.xlu1 %6979 }
 0x27c   : > { %v6059_v0 = vrot.slane %v6058_v44, 4  ;;  %v6463_v51 = vrot.slane %v6461_v25, 4  ;;  %v4875_v42 = vrot.slane %v4873_v41, 4  ;;  %v4892_v24 = vshll.u32 %v11505_v62, 16  ;;  %v5751_v62 = vld [vmem:[#allocation3 + $0x60] sm:$0xe]  ;;  %v11774_v44 = vpop.permute.xlu0 %6977 }
 0x27d   : > { %v4878_v43 = vrot.slane %v4876_v3, 5  ;;  %v6462_v26 = vsel %vm9226_vm9, %v8407_v9, %v6461_v25  ;;  %v4884_v35 = vrot.slane %v4882_v23, 5  ;;  %v4888_v37 = vrot.slane %v4886_v21, 4  ;;  %v11780_v48 = vld [vmem:[#allocation3 + $0x5c] sm:$0x1] }
 0x27e   : > { %v6064_v54 = vsel %vm9313_vm14, %v6059_v0, %v6063_v49  ;;  %v6465_v31 = vsel %vm9226_vm9, %v6463_v51, %v6464_v55  ;;  %v4894_v60 = vrot.slane %v4892_v24, 5  ;;  %v8377_v10 = vrot.slane %v5144_v45, 9 }
 0x27f   : > { %v8532_v46 = vcombine.low %v6054_v7, %v6064_v54  ;;  %v8551_v50 = vcombine.low %v6462_v26, %v6465_v31  ;;  %v4879_v58 = vor.u32 %v4878_v43, %v4875_v42  ;;  %v5258_v22 = vrot.slane %v11755_v28, 5  ;;  %v11791_v54 = vld [vmem:[#allocation3 + $0x58] sm:$0xf]  ;;  %v5143_v26 = vld [vmem:[#allocation3 + $0x54] sm:$0xe] }
 0x280   : > { %v4889_v25 = vor.u32 %v4888_v37, %v4884_v35  ;;  %v5261_v7 = vrot.slane %v11765_v47, 5  ;;  %v5859_v55 = vrot.slane %v11640_v11, 5  ;;  %v8392_v41 = vrot.slane %v5751_v62, 9  ;;  %v11793_v31 = vpop.permute.xlu0 %7077  ;;  %v5750_v37 = vld [vmem:[#allocation3 + $0x54] sm:$0xe] }
 0x281   : > { %7159 = vrot.lane.b32.xlu1 %v8532_v46, %s9074_s8  ;;  %7245 = vrot.lane.b32.xlu0 %v8551_v50, %s9072_s23  ;;  %v4880_v9 = vrot.slane %v4879_v58, 4  ;;  %v5260_v56 = vrot.slane %v5258_v22, 4  ;;  %v5862_v3 = vrot.slane %v11767_v17, 5  ;;  %v6454_v0 = vrot.slane %v11678_v5, 5  ;;  %13230 = vst [vmem:[#allocation7_spill] sm:$0xff] %v11793_v31 }
 0x282   : > { %v4890_v49 = vrot.slane %v4889_v25, 4  ;;  %v5259_v51 = vsel %vm9226_vm9, %v8377_v10, %v5258_v22  ;;  %v5861_v23 = vrot.slane %v5859_v55, 4  ;;  %v8406_v42 = vrot.slane %v6358_v30, 9  ;;  %v11801_v62 = vld [vmem:[#allocation3 + $0x78] sm:$0xf] }
 0x283   : > { %v4885_v43 = vsel %vm9313_vm14, %v4880_v9, %v4884_v35  ;;  %v5262_v21 = vsel %vm9226_vm9, %v5260_v56, %v5261_v7  ;;  %v6456_v24 = vrot.slane %v6454_v0, 4  ;;  %v6457_v45 = vrot.slane %v11780_v48, 5  ;;  %v11811_v9 = vld [vmem:[#allocation3 + $0x5c] sm:$0x1]  ;;  %v11815_v7 = vpop.permute.xlu1 %6723 }
 0x284   : > { %v4895_v46 = vsel %vm9313_vm14, %v4890_v49, %v4894_v60  ;;  %v8457_v50 = vcombine.low %v5259_v51, %v5262_v21  ;;  %v5860_v58 = vsel %vm9226_vm9, %v8392_v41, %v5859_v55  ;;  %v5863_v35 = vsel %vm9226_vm9, %v5861_v23, %v5862_v3  ;;  %v11813_v25 = vld [vmem:[#allocation3 + $0x5c] sm:$0x1]  ;;  %v11825_v23 = vld [vmem:[#allocation3 + $0x78] sm:$0xf] }
 0x285   : > { %v8438_v10 = vcombine.low %v4885_v43, %v4895_v46  ;;  %v6455_v22 = vsel %vm9226_vm9, %v8406_v42, %v6454_v0  ;;  %v6458_v30 = vsel %vm9226_vm9, %v6456_v24, %v6457_v45  ;;  %v11809_v60 = vsel %vm3518_vm4, %v7314_v20, %v11696_v53  ;;  %v11819_v0 = vld [vmem:[#allocation3 + $0x7c] sm:$0xf] }
 0x286   : > { %6737 = vrot.lane.b32.xlu0 %v8457_v50, %s9067_s18  ;;  %v8504_v55 = vcombine.low %v5860_v58, %v5863_v35  ;;  %v8550_v56 = vcombine.low %v6455_v22, %v6458_v30  ;;  %v8376_v41 = vrot.slane %v5143_v26, 9  ;;  %v5251_v3 = vrot.slane %v11791_v54, 5  ;;  %v11831_v45 = vld [vmem:[#allocation3 + $0x7c] sm:$0xf]  ;;  %v8776_v26 = vpop.f32.mrf.mxu0  ;;  %v11840_v22 = vpop.permute.xlu0 %7153 }
 0x287   : > { %6651 = vrot.lane.b32.xlu1 %v8438_v10, %s9070_s21  ;;  %v8391_v49 = vrot.slane %v5750_v37, 9  ;;  %v5852_v53 = vrot.slane %v11671_v59, 5  ;;  %v5577_v20 = vshrl.u32 %v11801_v62, 16  ;;  %v5580_v51 = vshll.u32 %v11801_v62, 16  ;;  %v4115_v37 = vld [vmem:[#allocation3 + $0x90] sm:$0x1]  ;;  %v11838_v10 = vpop.permute.xlu1 %6823 }
 0x288   : > { %v5252_v42 = vsel %vm9226_vm9, %v8376_v41, %v5251_v3  ;;  %v5253_v43 = vrot.slane %v5251_v3, 4  ;;  %v5254_v21 = vrot.slane %v11811_v9, 5  ;;  %v5855_v24 = vrot.slane %v11813_v25, 5  ;;  %13231 = vst [vmem:[#allocation8_spill] sm:$0xff] %v11838_v10 }
 0x289   : > { %v5853_v46 = vsel %vm9226_vm9, %v8391_v49, %v5852_v53  ;;  %v5854_v50 = vrot.slane %v5852_v53, 4  ;;  %v8474_v58 = vcombine.low %v11801_v62, %v11819_v0  ;;  %v11845_v41 = vrot.slane %v5577_v20, 4 }
 0x28a   : > { %7243 = vrot.lane.b32.xlu0 %v8550_v56, %s9072_s23  ;;  %v5255_v30 = vsel %vm9226_vm9, %v5253_v43, %v5254_v21  ;;  %v11847_v3 = vrot.slane %v5580_v51, 5  ;;  %v3979_v56 = vmul.f32 %v11521_v52, %v8776_v26  ;;  %v8521_v20 = vcombine.low %v11825_v23, %v11831_v45  ;;  %v3903_v43 = vpop.f32.mrf.mxu0 }
 0x28b   : > { %6991 = vrot.lane.b32.xlu1 %v8504_v55, %s9071_s22  ;;  %v5856_v62 = vsel %vm9226_vm9, %v5854_v50, %v5855_v24  ;;  %v8456_v15 = vcombine.low %v5252_v42, %v5255_v30  ;;  %v4116_v51 = vsel %vm9172_vm3, 0, %v4115_v37  ;;  %v5535_v21 = vor.u32 %v11636_v32, %v11634_v18 }
 0x28c   : > { %v8503_v57 = vcombine.low %v5853_v46, %v5856_v62  ;;  %v4018_v55 = vadd.f32 %v11535_v16, %v3979_v56  ;;  %4117 = vst [vmem:[#allocation3 + $0x90] sm:$0x1] %v4116_v51  ;;  %v5538_v24 = vshll.u32 %v11640_v11, 16  ;;  %v13232_v50 = vshrl.u32 %v11640_v11, 16  ;;  %v4112_v51 = vld [vmem:[#allocation3 + $0x84] sm:$0x1]  ;;  %v8777_v53 = vpop.f32.mrf.mxu0 }
 0x28d   : > { %v5548_v42 = vshll.u32 %v11767_v17, 16  ;;  %v6120_v46 = vor.u32 %v11653_v27, %v11638_v4  ;;  %v6123_v37 = vshll.u32 %v11642_v2, 16  ;;  %v13233_v30 = vshrl.u32 %v11642_v2, 16 }
 0x28e   : > { %v5544_v26 = vrot.slane %v13232_v50, 4  ;;  %6989 = vrot.lane.b32.xlu0 %v8503_v57, %s9071_s22  ;;  %v4050_v18 = vmax.f32 %v4018_v55, 0.0  ;;  %v5536_v32 = vrot.slane %v5535_v21, 4  ;;  %v5540_v56 = vrot.slane %v5538_v24, 5  ;;  %v11875_v50 = vpop.permute.xlu1 %6899  ;;  %v11877_v57 = vpop.permute.xlu0 %6821  ;;  %v4173_v24 = vld [vmem:[#allocation3 + $0x98] sm:$0x1] }
 0x28f   : > { %v6129_v62 = vrot.slane %v13233_v30, 4  ;;  %6735 = vrot.lane.b32.xlu1 %v8456_v15, %s9067_s18  ;;  %v6133_v11 = vshll.u32 %v11728_v6, 16  ;;  %v5550_v17 = vrot.slane %v5548_v42, 5  ;;  %v6121_v35 = vrot.slane %v6120_v46, 4  ;;  %v4720_v30 = vld [vmem:[#allocation3 + $0x60] sm:$0xf] }
 0x290   : > { %v6125_v4 = vrot.slane %v6123_v37, 5  ;;  %v3977_v27 = vmul.f32 %v11521_v52, %v3903_v43  ;;  %v8612_v2 = vpack.c.bf16 %v4050_v18, %v4050_v18  ;;  %v5541_v15 = vsel %vm9313_vm14, %v5536_v32, %v5540_v56 }
 0x291   : > { %v5545_v55 = vor.u32 %v5544_v26, %v5540_v56  ;;  %v6135_v21 = vrot.slane %v6133_v11, 5  ;;  %v4113_v43 = vsel %vm9172_vm3, 0, %v4112_v51  ;;  %v3980_v26 = vmul.f32 %v11521_v52, %v8777_v53 }
 0x292   : > { %7089 = vrot.lane.b32.xlu0 %v8521_v20, %s9069_s20  ;;  %v6126_v6 = vsel %vm9313_vm14, %v6121_v35, %v6125_v4  ;;  %v6130_v49 = vor.u32 %v6129_v62, %v6125_v4  ;;  %v4016_v42 = vadd.f32 %v11535_v16, %v3977_v27  ;;  %v4459_v46 = vshrl.u32 %v8612_v2, 16  ;;  %4114 = vst [vmem:[#allocation3 + $0x84] sm:$0x1] %v4113_v43  ;;  %v11897_v4 = vpop.permute.xlu1 %6645  ;;  %v11899_v27 = vpop.permute.xlu0 %6897 }
 0x293   : > { %6835 = vrot.lane.b32.xlu1 %v8474_v58, %s9068_s19  ;;  %v4462_v37 = vshll.u32 %v8612_v2, 16  ;;  %v5546_v18 = vrot.slane %v5545_v55, 4  ;;  %v4174_v20 = vsel %vm9200_vm5, 0, %v4173_v24  ;;  %v4945_v35 = vshrl.u32 %v4720_v30, 16  ;;  %v4669_v53 = vld [vmem:[#allocation3 + $0x90] sm:$0xf] }
 0x294   : > { %v6131_v32 = vrot.slane %v6130_v49, 4  ;;  %v4048_v56 = vmax.f32 %v4016_v42, 0.0  ;;  %v11892_v62 = vrot.slane %v4459_v46, 7  ;;  %v4019_v51 = vadd.f32 %v11535_v16, %v3980_v26  ;;  %4175 = vst [vmem:[#allocation3 + $0x98] sm:$0x1] %v4174_v20 }
 0x295   : > { %v5551_v11 = vsel %vm9313_vm14, %v5546_v18, %v5550_v17  ;;  %v4948_v58 = vshll.u32 %v4720_v30, 16  ;;  %v4947_v24 = vrot.slane %v4945_v35, 4  ;;  %v13234_v42 = vshrl.u32 %v11825_v23, 16  ;;  %v3906_v30 = vpop.f32.mrf.mxu0 }
 0x296   : > { %v8488_v49 = vcombine.low %v5541_v15, %v5551_v11  ;;  %v6136_v2 = vsel %vm9313_vm14, %v6131_v32, %v6135_v21  ;;  %v8610_v55 = vpack.c.bf16 %v4048_v56, %v4048_v56  ;;  %v4464_v17 = vor.u32 %v4462_v37, %v11892_v62 }
 0x297   : > { %v11905_v43 = vrot.slane %v13234_v42, 4  ;;  %v8535_v46 = vcombine.low %v6126_v6, %v6136_v2  ;;  %v4051_v18 = vmax.f32 %v4019_v51, 0.0  ;;  %v4950_v10 = vrot.slane %v4948_v58, 5  ;;  %v4170_v58 = vld [vmem:[#allocation3 + $0x8c] sm:$0x1] }
 0x298   : > { %6911 = vrot.lane.b32.xlu1 %v8488_v49, %s9073_s29  ;;  %v4442_v26 = vshrl.u32 %v8610_v55, 16  ;;  %v4445_v20 = vshll.u32 %v8610_v55, 16  ;;  %v4954_v15 = vshll.u32 %v11755_v28, 16  ;;  %v4670_v21 = vsel %vm9232_vm10, %v4464_v17, %v4669_v53  ;;  %v5328_v49 = vld [vmem:[#allocation3 + $0x6c] sm:$0xf] }
 0x299   : > { %7165 = vrot.lane.b32.xlu0 %v8535_v46, %s9074_s8  ;;  %v8613_v32 = vpack.c.bf16 %v4051_v18, %v4051_v18  ;;  %v4958_v56 = vshrl.u32 %v11755_v28, 16  ;;  %v4964_v37 = vshll.u32 %v11765_v47, 16  ;;  %4671 = vst [vmem:[#allocation3 + $0x90] sm:$0xf] %v4670_v21  ;;  %v4951_v35 = vor.u32 %v4950_v10, %v4947_v24  ;;  %v4662_v42 = vld [vmem:[#allocation3 + $0x84] sm:$0xf]  ;;  %v11923_v46 = vpop.permute.xlu1 %7075  ;;  %v11925_v47 = vpop.permute.xlu0 %7237 }
 0x29a   : > { %v11915_v6 = vrot.slane %v4442_v26, 7  ;;  %v4956_v11 = vrot.slane %v4954_v15, 5  ;;  %v3978_v51 = vmul.f32 %v11521_v52, %v3906_v30  ;;  %v13235_v2 = vshll.u32 %v11825_v23, 16  ;;  %13236 = vst [vmem:[#allocation9_spill] sm:$0xff] %v11923_v46  ;;  %13237 = vst [vmem:[#allocation10_spill] sm:$0xff] %v11925_v47 }
 0x29b   : > { %v4465_v53 = vrot.slane %v11892_v62, 4  ;;  %v4467_v17 = vshrl.u32 %v8613_v32, 16  ;;  %v4960_v28 = vrot.slane %v4958_v56, 4  ;;  %v4470_v24 = vshll.u32 %v8613_v32, 16  ;;  %v11929_v30 = vld [vmem:[#allocation3 + $0x6c] sm:$0xf] }
 0x29c   : > { %v11920_v55 = vrot.slane %v13235_v2, 5  ;;  %v4447_v10 = vor.u32 %v4445_v20, %v11915_v6  ;;  %v4952_v18 = vrot.slane %v4951_v35, 4  ;;  %v4017_v52 = vadd.f32 %v11535_v16, %v3978_v51  ;;  %v11933_v15 = vld [vmem:[#allocation3 + $0x70] sm:$0xf]  ;;  %v4673_v2 = vld [vmem:[#allocation3 + $0x98] sm:$0x1] }
 0x29d   : > { %v4469_v23 = vrot.slane %v4467_v17, 7  ;;  %v4961_v26 = vor.u32 %v4960_v28, %v4956_v11  ;;  %v4171_v62 = vsel %vm9200_vm5, 0, %v4170_v58  ;;  %v5553_v21 = vshrl.u32 %v5328_v49, 16 }
 0x29e   : > { %v4663_v56 = vsel %vm9232_vm10, %v4447_v10, %v4662_v42  ;;  %v4966_v47 = vrot.slane %v4964_v37, 5  ;;  %v4049_v20 = vmax.f32 %v4017_v52, 0.0  ;;  %4172 = vst [vmem:[#allocation3 + $0x8c] sm:$0x1] %v4171_v62  ;;  %v5556_v32 = vshll.u32 %v5328_v49, 16  ;;  %v11952_v52 = vpop.permute.xlu1 %6643 }
 0x29f   : > { %v4448_v16 = vrot.slane %v11915_v6, 4  ;;  %4664 = vst [vmem:[#allocation3 + $0x84] sm:$0xf] %v4663_v56  ;;  %v4472_v35 = vor.u32 %v4470_v24, %v4469_v23  ;;  %v4474_v51 = vrot.slane %v4469_v23, 4  ;;  %v4962_v17 = vrot.slane %v4961_v26, 4 }
 0x2a0   : > { %v4957_v58 = vsel %vm9313_vm14, %v4952_v18, %v4956_v11  ;;  %v8611_v28 = vpack.c.bf16 %v4049_v20, %v4049_v20  ;;  %v11940_v31 = vrot.slane %v5553_v21, 4  ;;  %v8473_v46 = vcombine.low %v5328_v49, %v11933_v15  ;;  %v11949_v10 = vld [vmem:[#allocation3 + $0x70] sm:$0xf]  ;;  %v11954_v11 = vpop.permute.xlu0 %6729  ;;  %v11979_v23 = vld [vmem:[#allocation3 + $0x80] sm:$0x1] }
 0x2a1   : > { %v4473_v37 = vsel %vm9238_vm11, %v4465_v53, %v4472_v35  ;;  %v4674_v42 = vsel %vm9172_vm3, %v4474_v51, %v4673_v2  ;;  %v4967_v6 = vsel %vm9313_vm14, %v4962_v17, %v4966_v47  ;;  %v6138_v24 = vshrl.u32 %v11929_v30, 16 }
 0x2a2   : > { %4672 = vst.msk [vmem:[#allocation3 + $0x94] sm:$0xf] %vm310_vm0, %v4473_v37  ;;  %4675 = vst [vmem:[#allocation3 + $0x98] sm:$0x1] %v4674_v42  ;;  %v8441_v49 = vcombine.low %v4957_v58, %v4967_v6  ;;  %v4450_v18 = vshrl.u32 %v8611_v28, 16  ;;  %v11957_v53 = vrot.slane %v5556_v32, 5  ;;  %6833 = vrot.lane.b32.xlu0 %v8473_v46, %s9068_s19  ;;  %v5511_v21 = vor.u32 %v11685_v36, %v11676_v38 }
 0x2a3   : > { %v4453_v47 = vshll.u32 %v8611_v28, 16  ;;  %v11961_v26 = vrot.slane %v6138_v24, 4  ;;  %v8520_v2 = vcombine.low %v11929_v30, %v11949_v10  ;;  %v5514_v20 = vshll.u32 %v11671_v59, 16  ;;  %v4718_v36 = vld [vmem:[#allocation3 + $0x54] sm:$0xf] }
 0x2a4   : > { %6657 = vrot.lane.b32.xlu1 %v8441_v49, %s9070_s21  ;;  %v4452_v56 = vrot.slane %v4450_v18, 7  ;;  %v13238_v32 = vshrl.u32 %v11671_v59, 16  ;;  %v5512_v51 = vrot.slane %v5511_v21, 4  ;;  %v5524_v17 = vshll.u32 %v11813_v25, 16  ;;  %v6361_v49 = vld [vmem:[#allocation3 + $0x78] sm:$0xe]  ;;  %v11981_v25 = vpop.permute.xlu1 %6983 }
 0x2a5   : > { %v4666_v46 = vld [vmem:[#allocation3 + $0x8c] sm:$0x1]  ;;  %v6096_v58 = vor.u32 %v11736_v14, %v11687_v40  ;;  %v6099_v38 = vshll.u32 %v11678_v5, 16  ;;  %v5516_v42 = vrot.slane %v5514_v20, 5  ;;  %v13239_v6 = vshrl.u32 %v11678_v5, 16  ;;  %13240 = vst [vmem:[#allocation11_spill] sm:$0xff] %v11981_v25  ;;  %v11983_v40 = vpop.permute.xlu0 %7235 }
 0x2a6   : > { %v5520_v35 = vrot.slane %v13238_v32, 4  ;;  %v4455_v28 = vor.u32 %v4453_v47, %v4452_v56  ;;  %v4457_v37 = vrot.slane %v4452_v56, 4  ;;  %v5526_v18 = vrot.slane %v5524_v17, 5  ;;  %13241 = vst [vmem:[#allocation12_spill] sm:$0xff] %v11983_v40  ;;  %v5145_v25 = vld [vmem:[#allocation3 + $0x6c] sm:$0xe] }
 0x2a7   : > { %v6105_v24 = vrot.slane %v13239_v6, 4  ;;  %v6097_v59 = vrot.slane %v6096_v58, 4  ;;  %v6101_v32 = vrot.slane %v6099_v38, 5  ;;  %v6109_v21 = vshll.u32 %v11780_v48, 16  ;;  %v12048_v40 = vld [vmem:[#allocation3 + $0x74] sm:$0x1] }
 0x2a8   : > { %v4456_v14 = vsel %vm9238_vm11, %v4448_v16, %v4455_v28  ;;  %v4667_v47 = vsel %vm9172_vm3, %v4457_v37, %v4666_v46  ;;  %7087 = vrot.lane.b32.xlu1 %v8520_v2, %s9069_s20  ;;  %v5517_v5 = vsel %vm9313_vm14, %v5512_v51, %v5516_v42  ;;  %v5521_v56 = vor.u32 %v5520_v35, %v5516_v42 }
 0x2a9   : > { %4665 = vst.msk [vmem:[#allocation3 + $0x88] sm:$0xf] %vm310_vm0, %v4456_v14  ;;  %4668 = vst [vmem:[#allocation3 + $0x8c] sm:$0x1] %v4667_v47  ;;  %v6102_v48 = vsel %vm9313_vm14, %v6097_v59, %v6101_v32  ;;  %v6106_v20 = vor.u32 %v6105_v24, %v6101_v32  ;;  %v6111_v17 = vrot.slane %v6109_v21, 5  ;;  %v8409_v58 = vrot.slane %v6361_v49, 9 }
 0x2aa   : > { %v5522_v38 = vrot.slane %v5521_v56, 4  ;;  %v6475_v16 = vrot.slane %v11831_v45, 5  ;;  %v6478_v46 = vrot.slane %v11979_v23, 5  ;;  %v4921_v28 = vshrl.u32 %v4718_v36, 16  ;;  %v12003_v59 = vld [vmem:[#allocation3 + $0x7c] sm:$0xf] }
 0x2ab   : > { %v6107_v2 = vrot.slane %v6106_v20, 4  ;;  %v4924_v37 = vshll.u32 %v4718_v36, 16  ;;  %v4930_v51 = vshll.u32 %v11791_v54, 16  ;;  %v4934_v35 = vshrl.u32 %v11791_v54, 16  ;;  %v12007_v47 = vld [vmem:[#allocation3 + $0x80] sm:$0x1]  ;;  %v12009_v54 = vpop.permute.xlu1 %6727  ;;  %v12011_v20 = vpop.permute.xlu0 %6981 }
 0x2ac   : > { %v5527_v42 = vsel %vm9313_vm14, %v5522_v38, %v5526_v18  ;;  %v6476_v6 = vsel %vm9226_vm9, %v8409_v58, %v6475_v16  ;;  %v6477_v24 = vrot.slane %v6475_v16, 4  ;;  %v4923_v49 = vrot.slane %v4921_v28, 4  ;;  %v5146_v56 = vld [vmem:[#allocation3 + $0x78] sm:$0xe]  ;;  %13242 = vst [vmem:[#allocation13_spill] sm:$0xff] %v12009_v54 }
 0x2ad   : > { %v8487_v32 = vcombine.low %v5517_v5, %v5527_v42  ;;  %v6112_v21 = vsel %vm9313_vm14, %v6107_v2, %v6111_v17  ;;  %v4926_v14 = vrot.slane %v4924_v37, 5  ;;  %v4932_v36 = vrot.slane %v4930_v51, 5  ;;  %v5753_v5 = vld [vmem:[#allocation3 + $0x78] sm:$0xe]  ;;  %v12019_v51 = vld [vmem:[#allocation3 + $0x80] sm:$0x1] }
 0x2ae   : > { %v8534_v18 = vcombine.low %v6102_v48, %v6112_v21  ;;  %v6479_v58 = vsel %vm9226_vm9, %v6477_v24, %v6478_v46  ;;  %v4936_v38 = vrot.slane %v4934_v35, 4  ;;  %v4940_v16 = vshll.u32 %v11811_v9, 16  ;;  %v6360_v35 = vld [vmem:[#allocation3 + $0x6c] sm:$0xe] }
 0x2af   : > { %6909 = vrot.lane.b32.xlu0 %v8487_v32, %s9073_s29  ;;  %v8553_v17 = vcombine.low %v6476_v6, %v6479_v58  ;;  %v4927_v2 = vor.u32 %v4926_v14, %v4923_v49  ;;  %v5272_v37 = vrot.slane %v12003_v59, 5  ;;  %v8379_v21 = vrot.slane %v5146_v56, 9  ;;  %v12024_v32 = vpop.permute.xlu1 %6827 }
 0x2b0   : > { %7163 = vrot.lane.b32.xlu1 %v8534_v18, %s9074_s8  ;;  %v4937_v48 = vor.u32 %v4936_v38, %v4932_v36  ;;  %v4942_v42 = vrot.slane %v4940_v16, 5  ;;  %v5275_v46 = vrot.slane %v12007_v47, 5  ;;  %v8394_v62 = vrot.slane %v5753_v5, 9  ;;  %13243 = vst [vmem:[#allocation14_spill] sm:$0xff] %v12024_v32  ;;  %v12029_v18 = vld [vmem:[#allocation3 + $0x74] sm:$0x1] }
 0x2b1   : > { %v4928_v9 = vrot.slane %v4927_v2, 4  ;;  %v5274_v24 = vrot.slane %v5272_v37, 4  ;;  %v5873_v28 = vrot.slane %v11819_v0, 5  ;;  %v5273_v49 = vsel %vm9226_vm9, %v8379_v21, %v5272_v37  ;;  %v12037_v2 = vld [vmem:[#allocation3 + $0x70] sm:$0xf] }
 0x2b2   : > { %v4938_v6 = vrot.slane %v4937_v48, 4  ;;  %v5876_v14 = vrot.slane %v12019_v51, 5  ;;  %v6468_v56 = vrot.slane %v11949_v10, 5  ;;  %v8408_v5 = vrot.slane %v6360_v35, 9  ;;  %v12039_v48 = vpop.permute.xlu0 %7081  ;;  %v8978_v35 = vld [vmem:[#allocation3 + $0x1c] sm:$0xf] }
 0x2b3   : > { %7249 = vrot.lane.b32.xlu0 %v8553_v17, %s9072_s23  ;;  %v4933_v58 = vsel %vm9313_vm14, %v4928_v9, %v4932_v36  ;;  %v5276_v38 = vsel %vm9226_vm9, %v5274_v24, %v5275_v46  ;;  %v5875_v16 = vrot.slane %v5873_v28, 4  ;;  %13244 = vst [vmem:[#allocation15_spill] sm:$0xff] %v12039_v48  ;;  %v5874_v32 = vsel %vm9226_vm9, %v8394_v62, %v5873_v28  ;;  %v8979_v9 = vld [vmem:[#allocation3 + $0x18] sm:$0xf]  ;;  %v5752_v48 = vld [vmem:[#allocation3 + $0x6c] sm:$0xe] }
 0x2b4   : > { %v4943_v37 = vsel %vm9313_vm14, %v4938_v6, %v4942_v42  ;;  %v8459_v21 = vcombine.low %v5273_v49, %v5276_v38  ;;  %v6470_v17 = vrot.slane %v6468_v56, 4  ;;  %v6471_v46 = vrot.slane %v12029_v18, 5 }
 0x2b5   : > { %v8440_v54 = vcombine.low %v4933_v58, %v4943_v37  ;;  %v5877_v36 = vsel %vm9226_vm9, %v5875_v16, %v5876_v14  ;;  %v8419_v24 = vcombine.low %v8979_v9, %v8978_v35  ;;  %v13245_v42 = vshll.u32 %v11929_v30, 16  ;;  %v12057_v58 = vld [vmem:[#allocation3 + $0x74] sm:$0x1]  ;;  %v12066_v16 = vld [vmem:[#allocation3 + $0x90] sm:$0xf] }
 0x2b6   : > { %v8506_v49 = vcombine.low %v5874_v32, %v5877_v36  ;;  %v6469_v62 = vsel %vm9226_vm9, %v8408_v5, %v6468_v56  ;;  %v5265_v28 = vrot.slane %v12037_v2, 5  ;;  %v6472_v14 = vsel %vm9226_vm9, %v6470_v17, %v6471_v46  ;;  %v12068_v56 = vpop.permute.xlu1 %6903  ;;  %v12078_v35 = vpop.permute.xlu0 %7157 }
 0x2b7   : > { %v12052_v6 = vrot.slane %v13245_v42, 5  ;;  %6655 = vrot.lane.b32.xlu1 %v8440_v54, %s9070_s21  ;;  %6741 = vrot.lane.b32.xlu0 %v8459_v21, %s9067_s18  ;;  %v7273_v30 = vsel %vm3436_vm15, %v8419_v24, %v11897_v4  ;;  %v8378_v38 = vrot.slane %v5145_v25, 9  ;;  %v5866_v32 = vrot.slane %v11933_v15, 5  ;;  %v12076_v25 = vld [vmem:[#allocation3 + $0x94] sm:$0xf] }
 0x2b8   : > { %v7318_v5 = vsel %vm3485_vm1, %v7273_v30, %v11749_v13  ;;  %v5267_v37 = vrot.slane %v5265_v28, 4  ;;  %v5268_v54 = vrot.slane %v12048_v40, 5  ;;  %v8393_v21 = vrot.slane %v5752_v48, 9  ;;  %v4121_v30 = vld [vmem:[#allocation3 + $0xa8] sm:$0x1] }
 0x2b9   : > { %v8552_v36 = vcombine.low %v6469_v62, %v6472_v14  ;;  %v5266_v17 = vsel %vm9226_vm9, %v8378_v38, %v5265_v28  ;;  %v5868_v46 = vrot.slane %v5866_v32, 4  ;;  %v5869_v4 = vrot.slane %v12057_v58, 5  ;;  %v8780_v14 = vpop.f32.mrf.mxu0 }
 0x2ba   : > { %v12082_v9 = vsel %vm3518_vm4, %v7318_v5, %v11877_v57  ;;  %v5269_v13 = vsel %vm9226_vm9, %v5267_v37, %v5268_v54  ;;  %v7378_v48 = vsel %vm3551_vm6, %v11809_v60, %v11899_v27  ;;  %v5625_v24 = vshrl.u32 %v12066_v16, 16 }
 0x2bb   : > { %6995 = vrot.lane.b32.xlu1 %v8506_v49, %s9071_s22  ;;  %7247 = vrot.lane.b32.xlu0 %v8552_v36, %s9072_s23  ;;  %v8458_v42 = vcombine.low %v5266_v17, %v5269_v13  ;;  %v5867_v62 = vsel %vm9226_vm9, %v8393_v21, %v5866_v32  ;;  %v5870_v57 = vsel %vm9226_vm9, %v5868_v46, %v5869_v4  ;;  %v5628_v28 = vshll.u32 %v12066_v16, 16  ;;  %v12110_v36 = vpop.permute.xlu1 %6649  ;;  %v8980_v17 = vld [vmem:[#allocation3 + $0x10] sm:$0xf]  ;;  %v8981_v46 = vld [vmem:[#allocation3 + $0xc] sm:$0xf] }
 0x2bc   : > { %v8505_v38 = vcombine.low %v5867_v62, %v5870_v57  ;;  %v12099_v60 = vsel %vm3584_vm7, %v7378_v48, %v11774_v44  ;;  %v12101_v27 = vrot.slane %v5625_v24, 4  ;;  %v6168_v5 = vor.u32 %v11920_v55, %v11905_v43  ;;  %v12115_v4 = vld [vmem:[%s13197_s2] ss:$0 sm:$0xff]  ;;  %v12127_v62 = vld [vmem:[#allocation3 + $0x84] sm:$0xf]  ;;  %v12129_v57 = vpop.permute.xlu0 %6825 }
 0x2bd   : > { %v6171_v32 = vshll.u32 %v11831_v45, 16  ;;  %v13246_v37 = vshrl.u32 %v11831_v45, 16  ;;  %v6181_v21 = vshll.u32 %v11979_v23, 16  ;;  %v8418_v44 = vcombine.low %v8981_v46, %v8980_v17 }
 0x2be   : > { %v3983_v13 = vmul.f32 %v12115_v4, %v8780_v14  ;;  %v4122_v43 = vsel %vm9172_vm3, 0, %v4121_v30  ;;  %v5583_v45 = vor.u32 %v11847_v3, %v11845_v41  ;;  %v8476_v55 = vcombine.low %v12066_v16, %v12076_v25  ;;  %v12136_v41 = vld [vmem:[%s13198_s3] ss:$0 sm:$0xff] }
 0x2bf   : > { %v6177_v54 = vrot.slane %v13246_v37, 4  ;;  %6739 = vrot.lane.b32.xlu1 %v8458_v42, %s9067_s18  ;;  %6993 = vrot.lane.b32.xlu0 %v8505_v38, %s9071_s22  ;;  %v6169_v23 = vrot.slane %v6168_v5, 4  ;;  %v6173_v48 = vrot.slane %v6171_v32, 5  ;;  %4123 = vst [vmem:[#allocation3 + $0xa8] sm:$0x1] %v4122_v43  ;;  %v5586_v24 = vshll.u32 %v11819_v0, 16  ;;  %v3919_v38 = vpop.f32.mrf.mxu0 }
 0x2c0   : > { %v7270_v14 = vsel %vm3436_vm15, %v8418_v44, %v11952_v52  ;;  %v4022_v3 = vadd.f32 %v12136_v41, %v3983_v13  ;;  %v5584_v16 = vrot.slane %v5583_v45, 4  ;;  %v13247_v42 = vshrl.u32 %v11819_v0, 16  ;;  %v12146_v43 = vld [vmem:[#allocation3 + $0x88] sm:$0xf]  ;;  %v12156_v45 = vpop.permute.xlu1 %7079 }
 0x2c1   : > { %v12141_v5 = vrot.slane %v5628_v28, 5  ;;  %v6178_v32 = vor.u32 %v6177_v54, %v6173_v48  ;;  %v7316_v37 = vsel %vm3485_vm1, %v7270_v14, %v11815_v7  ;;  %v5588_v17 = vrot.slane %v5586_v24, 5 }
 0x2c2   : > { %v5592_v30 = vrot.slane %v13247_v42, 4  ;;  %v6183_v52 = vrot.slane %v6181_v21, 5  ;;  %v4054_v46 = vmax.f32 %v4022_v3, 0.0  ;;  %v5596_v44 = vshll.u32 %v12019_v51, 16  ;;  %v4118_v3 = vld [vmem:[#allocation3 + $0x9c] sm:$0x1] }
 0x2c3   : > { %v5601_v13 = vshrl.u32 %v12127_v62, 16  ;;  %6839 = vrot.lane.b32.xlu1 %v8476_v55, %s9068_s19  ;;  %v6174_v0 = vsel %vm9313_vm14, %v6169_v23, %v6173_v48  ;;  %v6179_v28 = vrot.slane %v6178_v32, 4  ;;  %v12154_v54 = vsel %vm3518_vm4, %v7316_v37, %v11747_v61  ;;  %v8781_v55 = vpop.f32.mrf.mxu0 }
 0x2c4   : > { %v5593_v7 = vor.u32 %v5592_v30, %v5588_v17  ;;  %v8616_v21 = vpack.c.bf16 %v4054_v46, %v4054_v46  ;;  %v5589_v51 = vsel %vm9313_vm14, %v5584_v16, %v5588_v17  ;;  %v5598_v24 = vrot.slane %v5596_v44, 5  ;;  %v12166_v30 = vpop.permute.xlu0 %6901  ;;  %v4179_v17 = vld [vmem:[#allocation3 + $0xb0] sm:$0x1]  ;;  %v4724_v44 = vld [vmem:[#allocation3 + $0x78] sm:$0xf] }
 0x2c5   : > { %v6184_v23 = vsel %vm9313_vm14, %v6179_v28, %v6183_v52  ;;  %v12163_v42 = vrot.slane %v5601_v13, 4  ;;  %v3981_v16 = vmul.f32 %v12115_v4, %v3919_v38  ;;  %v4119_v52 = vsel %vm9172_vm3, 0, %v4118_v3 }
 0x2c6   : > { %v5594_v48 = vrot.slane %v5593_v7, 4  ;;  %v8537_v32 = vcombine.low %v6174_v0, %v6184_v23  ;;  %v4493_v37 = vshrl.u32 %v8616_v21, 16  ;;  %v4496_v46 = vshll.u32 %v8616_v21, 16  ;;  %4120 = vst [vmem:[#allocation3 + $0x9c] sm:$0x1] %v4119_v52 }
 0x2c7   : > { %v7442_v13 = vsel %vm3617_vm8, %v12099_v60, %v11665_v34  ;;  %v3984_v28 = vmul.f32 %v12115_v4, %v8781_v55  ;;  %v4020_v38 = vadd.f32 %v12136_v41, %v3981_v16  ;;  %v4180_v34 = vsel %vm9200_vm5, 0, %v4179_v17  ;;  %v12188_v55 = vpop.permute.xlu1 %7155 }
 0x2c8   : > { %v5599_v49 = vsel %vm9313_vm14, %v5594_v48, %v5598_v24  ;;  %7169 = vrot.lane.b32.xlu0 %v8537_v32, %s9074_s8  ;;  %v12178_v0 = vrot.slane %v4493_v37, 7  ;;  %v7474_v21 = vsel %vm3650_vm12, %v7442_v13, %v11840_v22  ;;  %v4683_v24 = vld [vmem:[#allocation3 + $0xa8] sm:$0xf]  ;;  %v4993_v60 = vshrl.u32 %v4724_v44, 16  ;;  %4181 = vst [vmem:[#allocation3 + $0xb0] sm:$0x1] %v4180_v34  ;;  %v3922_v48 = vpop.f32.mrf.mxu0  ;;  %v12197_v52 = vpop.permute.xlu0 %7241 }
 0x2c9   : > { %v8490_v7 = vcombine.low %v5589_v51, %v5599_v49  ;;  %v7506_v3 = vsel %vm3683_vm13, %v7474_v21, %v11710_v19  ;;  %v4023_v23 = vadd.f32 %v12136_v41, %v3984_v28  ;;  %v8475_v51 = vcombine.low %v12127_v62, %v12146_v43  ;;  %13249 = vst [vmem:[#allocation16_spill] sm:$0xff] %v12197_v52 }
 0x2ca   : > { %v4498_v49 = vor.u32 %v4496_v46, %v12178_v0  ;;  %v4052_v22 = vmax.f32 %v4020_v38, 0.0  ;;  %vm13248_vm2 = vcmask 588800   ;;  %v4996_v19 = vshll.u32 %v4724_v44, 16 }
 0x2cb   : > { %6915 = vrot.lane.b32.xlu1 %v8490_v7, %s9073_s29  ;;  %8796 = vmatprep.mubr.msk.bf16.mxu1 %vm13248_vm2, %v7506_v3  ;;  %v4055_v32 = vmax.f32 %v4023_v23, 0.0  ;;  %v4995_v37 = vrot.slane %v4993_v60, 4  ;;  %v5002_v16 = vshll.u32 %v12003_v59, 16  ;;  %v5006_v17 = vshrl.u32 %v12003_v59, 16  ;;  %v4176_v23 = vld [vmem:[#allocation3 + $0xa4] sm:$0x1] }
 0x2cc   : > { %v4684_v46 = vsel %vm9232_vm10, %v4498_v49, %v4683_v24  ;;  %6837 = vrot.lane.b32.xlu0 %v8475_v51, %s9068_s19  ;;  %v8614_v13 = vpack.c.bf16 %v4052_v22, %v4052_v22  ;;  %v4998_v28 = vrot.slane %v4996_v19, 5  ;;  %v5012_v7 = vshll.u32 %v12007_v47, 16  ;;  %v12205_v51 = vpop.permute.xlu1 %6647 }
 0x2cd   : > { %4685 = vst [vmem:[#allocation3 + $0xa8] sm:$0xf] %v4684_v46  ;;  %v8617_v44 = vpack.c.bf16 %v4055_v32, %v4055_v32  ;;  %v5004_v38 = vrot.slane %v5002_v16, 5  ;;  %v5008_v21 = vrot.slane %v5006_v17, 4  ;;  %v3982_v3 = vmul.f32 %v12115_v4, %v3922_v48  ;;  %v4676_v32 = vld [vmem:[#allocation3 + $0x9c] sm:$0xf] }
 0x2ce   : > { %v4476_v34 = vshrl.u32 %v8614_v13, 16  ;;  %v4479_v59 = vshll.u32 %v8614_v13, 16  ;;  %v4999_v60 = vor.u32 %v4998_v28, %v4995_v37  ;;  %v5014_v61 = vrot.slane %v5012_v7, 5  ;;  %v12212_v13 = vpop.permute.xlu0 %6733 }
 0x2cf   : > { %v4501_v14 = vshrl.u32 %v8617_v44, 16  ;;  %v4504_v52 = vshll.u32 %v8617_v44, 16  ;;  %v5009_v24 = vor.u32 %v5008_v21, %v5004_v38  ;;  %v4021_v49 = vadd.f32 %v12136_v41, %v3982_v3  ;;  %v4687_v44 = vld [vmem:[#allocation3 + $0xb0] sm:$0x1] }
 0x2d0   : > { %v4478_v22 = vrot.slane %v4476_v34, 7  ;;  %v5000_v47 = vrot.slane %v4999_v60, 4  ;;  %v4177_v19 = vsel %vm9200_vm5, 0, %v4176_v23  ;;  %v5559_v48 = vor.u32 %v11957_v53, %v11940_v31 }
 0x2d1   : > { %v4503_v16 = vrot.slane %v4501_v14, 7  ;;  %v5010_v17 = vrot.slane %v5009_v24, 4  ;;  %v4053_v37 = vmax.f32 %v4021_v49, 0.0  ;;  %4178 = vst [vmem:[#allocation3 + $0xa4] sm:$0x1] %v4177_v19  ;;  %v5562_v46 = vshll.u32 %v11933_v15, 16 }
 0x2d2   : > { %v4499_v28 = vrot.slane %v12178_v0, 4  ;;  %v4481_v7 = vor.u32 %v4479_v59, %v4478_v22  ;;  %v5005_v21 = vsel %vm9313_vm14, %v5000_v47, %v5004_v38  ;;  %v5560_v3 = vrot.slane %v5559_v48, 4  ;;  %v12219_v14 = vld [vmem:[#allocation3 + $0x84] sm:$0xf]  ;;  %v12233_v48 = vld [vmem:[#allocation3 + $0x88] sm:$0xf] }
 0x2d3   : > { %v4506_v23 = vor.u32 %v4504_v52, %v4503_v16  ;;  %v4508_v34 = vrot.slane %v4503_v16, 4  ;;  %v5015_v31 = vsel %vm9313_vm14, %v5010_v17, %v5014_v61  ;;  %v8615_v53 = vpack.c.bf16 %v4053_v37, %v4053_v37  ;;  %v6362_v37 = vld [vmem:[#allocation3 + $0x84] sm:$0xe] }
 0x2d4   : > { %v4677_v60 = vsel %vm9232_vm10, %v4481_v7, %v4676_v32  ;;  %v8443_v24 = vcombine.low %v5005_v21, %v5015_v31  ;;  %v5564_v49 = vrot.slane %v5562_v46, 5  ;;  %v13250_v0 = vshrl.u32 %v11933_v15, 16  ;;  %v12235_v32 = vpop.permute.xlu1 %6987  ;;  %v12244_v21 = vld [vmem:[#allocation3 + $0x8c] sm:$0x1] }
 0x2d5   : > { %v13251_v19 = vshll.u32 %v12127_v62, 16  ;;  %4678 = vst [vmem:[#allocation3 + $0x9c] sm:$0xf] %v4677_v60  ;;  %v4507_v52 = vsel %vm9238_vm11, %v4499_v28, %v4506_v23  ;;  %v4688_v61 = vsel %vm9172_vm3, %v4508_v34, %v4687_v44  ;;  %v4484_v47 = vshrl.u32 %v8615_v53, 16  ;;  %13252 = vst [vmem:[#allocation17_spill] sm:$0xff] %v12235_v32 }
 0x2d6   : > { %v5568_v59 = vrot.slane %v13250_v0, 4  ;;  %v4482_v16 = vrot.slane %v4478_v22, 4  ;;  %4686 = vst.msk [vmem:[#allocation3 + $0xac] sm:$0xf] %vm310_vm0, %v4507_v52  ;;  %4689 = vst [vmem:[#allocation3 + $0xb0] sm:$0x1] %v4688_v61  ;;  %6661 = vrot.lane.b32.xlu1 %v8443_v24, %s9070_s21  ;;  %v5565_v7 = vsel %vm9313_vm14, %v5560_v3, %v5564_v49  ;;  %v12246_v22 = vpop.permute.xlu0 %7239 }
 0x2d7   : > { %v12227_v38 = vrot.slane %v13251_v19, 5  ;;  %v5572_v62 = vshll.u32 %v12057_v58, 16  ;;  %v6186_v17 = vshrl.u32 %v12219_v14, 16  ;;  %v4486_v46 = vrot.slane %v4484_v47, 7 }
 0x2d8   : > { %v5569_v15 = vor.u32 %v5568_v59, %v5564_v49  ;;  %v4487_v28 = vshll.u32 %v8615_v53, 16  ;;  %v6189_v44 = vshll.u32 %v12219_v14, 16  ;;  %v4680_v23 = vld [vmem:[#allocation3 + $0xa4] sm:$0x1]  ;;  %v8522_v58 = vcombine.low %v12219_v14, %v12233_v48  ;;  %v8941_v14 = vld [vmem:[%s13199_s4 + $0x8] sm:$0xff]  }
 0x2d9   : > { %v5574_v31 = vrot.slane %v5572_v62, 5  ;;  %v4491_v0 = vrot.slane %v4486_v46, 4  ;;  %v12251_v53 = vrot.slane %v6186_v17, 4  ;;  %v6482_v3 = vrot.slane %v12233_v48, 5  ;;  %v12265_v17 = vld [vmem:[#allocation3 + $0x8c] sm:$0x1] }
 0x2da   : > { %v5570_v34 = vrot.slane %v5569_v15, 4  ;;  %v4489_v24 = vor.u32 %v4487_v28, %v4486_v46  ;;  %7091 = vrot.lane.b32.xlu1 %v8522_v58, %s9069_s20  ;;  %v8410_v59 = vrot.slane %v6362_v37, 9  ;;  %v6144_v19 = vor.u32 %v12052_v6, %v11961_v26  ;;  %v12267_v46 = vpop.permute.xlu1 %6731 }
 0x2db   : > { %v6147_v52 = vshll.u32 %v11949_v10, 16  ;;  %v4681_v47 = vsel %vm9172_vm3, %v4491_v0, %v4680_v23  ;;  %v6485_v62 = vrot.slane %v12244_v21, 5  ;;  %v6484_v37 = vrot.slane %v6482_v3, 4  ;;  %v12279_v0 = vpop.permute.xlu0 %6985 }
 0x2dc   : > { %v5575_v49 = vsel %vm9313_vm14, %v5570_v34, %v5574_v31  ;;  %v4490_v61 = vsel %vm9238_vm11, %v4482_v16, %v4489_v24  ;;  %4682 = vst [vmem:[#allocation3 + $0xa4] sm:$0x1] %v4681_v47  ;;  %v6145_v26 = vrot.slane %v6144_v19, 4  ;;  %v13253_v28 = vshrl.u32 %v11949_v10, 16  ;;  %v4722_v24 = vld [vmem:[#allocation3 + $0x6c] sm:$0xf] }
 0x2dd   : > { %v8489_v15 = vcombine.low %v5565_v7, %v5575_v49  ;;  %4679 = vst.msk [vmem:[#allocation3 + $0xa0] sm:$0xf] %vm310_vm0, %v4490_v61  ;;  %v6149_v6 = vrot.slane %v6147_v52, 5  ;;  %v6157_v16 = vshll.u32 %v12029_v18, 16  ;;  %v5607_v7 = vor.u32 %v12227_v38, %v12163_v42  ;;  %v8938_v42 = vld [vmem:[%s13199_s4 + $0x18] sm:$0xff]  }
 0x2de   : > { %v6153_v34 = vrot.slane %v13253_v28, 4  ;;  %v5610_v23 = vshll.u32 %v12146_v43, 16  ;;  %v13254_v31 = vshrl.u32 %v12146_v43, 16  ;;  %v6483_v49 = vsel %vm9226_vm9, %v8410_v59, %v6482_v3  ;;  %v8984_v3 = vld [vmem:[%s13199_s4 + $0x20] ss:$0 sps:$4 sm:$0xff]  }
 0x2df   : > { %6913 = vrot.lane.b32.xlu0 %v8489_v15, %s9073_s29  ;;  %v6486_v10 = vsel %vm9226_vm9, %v6484_v37, %v6485_v62  ;;  %v5620_v18 = vshll.u32 %v12265_v17, 16  ;;  %v6150_v52 = vsel %vm9313_vm14, %v6145_v26, %v6149_v6  ;;  %v6159_v61 = vrot.slane %v6157_v16, 5  ;;  %v12297_v26 = vpop.permute.xlu1 %6831  ;;  %v12308_v60 = vpop.permute.xlu0 %7085 }
 0x2e0   : > { %v5616_v58 = vrot.slane %v13254_v31, 4  ;;  %v6154_v19 = vor.u32 %v6153_v34, %v6149_v6  ;;  %v8554_v38 = vcombine.low %v6483_v49, %v6486_v10  ;;  %v5612_v47 = vrot.slane %v5610_v23, 5  ;;  %13256 = vst [vmem:[#allocation18_spill] sm:$0xff] %v12297_v26  ;;  %v5754_v10 = vld [vmem:[#allocation3 + $0x84] sm:$0xe] }
 0x2e1   : > { %v5608_v28 = vrot.slane %v5607_v7, 4  ;;  %vm13255_vm2 = vcmask 1043456   ;;  %v4969_v62 = vshrl.u32 %v4722_v24, 16  ;;  %v5622_v34 = vrot.slane %v5620_v18, 5  ;;  %v8986_v26 = vld [vmem:[#allocation3 + $0x30] sm:$0xf] }
 0x2e2   : > { %v6155_v15 = vrot.slane %v6154_v19, 4  ;;  %v7606_v59 = vsel %vm13255_vm2, %v8984_v3, 0  ;;  %v5617_v37 = vor.u32 %v5616_v58, %v5612_v47  ;;  %v4972_v31 = vshll.u32 %v4722_v24, 16  ;;  %v12303_v19 = vld [vmem:[#allocation3 + $0x90] sm:$0xf]  ;;  %v8940_v58 = vld [vmem:[%s13199_s4 + $0x10] sm:$0xff]  }
 0x2e3   : > { %7251 = vrot.lane.b32.xlu0 %v8554_v38, %s9072_s23  ;;  %8787 = vmatpush3.bf16.msra.mxu1 %v7606_v59  ;;  %v4978_v49 = vshll.u32 %v12037_v2, 16  ;;  %v4971_v16 = vrot.slane %v4969_v62, 4  ;;  %v4982_v7 = vshrl.u32 %v12037_v2, 16  ;;  %v4988_v23 = vshll.u32 %v12048_v40, 16  ;;  %v5147_v59 = vld [vmem:[#allocation3 + $0x84] sm:$0xe] }
 0x2e4   : > { %v6160_v6 = vsel %vm9313_vm14, %v6155_v15, %v6159_v61  ;;  %8788 = vmatprep.subr.bf16.mxu1 %v8938_v42  ;;  %v5618_v18 = vrot.slane %v5617_v37, 4  ;;  %v4974_v38 = vrot.slane %v4972_v31, 5  ;;  %v12312_v2 = vrot.slane %v6189_v44, 5  ;;  %v12317_v62 = vld [vmem:[#allocation3 + $0x88] sm:$0xf] }
 0x2e5   : > { %v8536_v24 = vcombine.low %v6150_v52, %v6160_v6  ;;  %v4980_v3 = vrot.slane %v4978_v49, 5  ;;  %v5613_v40 = vsel %vm9313_vm14, %v5608_v28, %v5612_v47  ;;  %v4984_v61 = vrot.slane %v4982_v7, 4  ;;  %v12326_v6 = vld [vmem:[#allocation3 + $0x8c] sm:$0x1]  ;;  %v12328_v7 = vld [vmem:[#allocation3 + $0x94] sm:$0xf] }
 0x2e6   : > { %v5880_v15 = vrot.slane %v12146_v43, 5  ;;  %v5623_v52 = vsel %vm9313_vm14, %v5618_v18, %v5622_v34  ;;  %v4975_v37 = vor.u32 %v4974_v38, %v4971_v16  ;;  %v4990_v31 = vrot.slane %v4988_v23, 5  ;;  %v12332_v23 = vpop.permute.xlu1 %6907 }
 0x2e7   : > { %7167 = vrot.lane.b32.xlu1 %v8536_v24, %s9074_s8  ;;  %v8395_v49 = vrot.slane %v5754_v10, 9  ;;  %8789 = vmatpush3.bf16.msra.mxu1 %v8938_v42  ;;  %v8491_v44 = vcombine.low %v5613_v40, %v5623_v52  ;;  %v4985_v47 = vor.u32 %v4984_v61, %v4980_v3  ;;  %v5883_v43 = vrot.slane %v12265_v17, 5  ;;  %13257 = vst [vmem:[#allocation19_spill] sm:$0xff] %v12332_v23 }
 0x2e8   : > { %v5882_v28 = vrot.slane %v5880_v15, 4  ;;  %8790 = vmatprep.subr.bf16.mxu1 %v8940_v58  ;;  %v4976_v24 = vrot.slane %v4975_v37, 4  ;;  %v8380_v34 = vrot.slane %v5147_v59, 9  ;;  %v5279_v16 = vrot.slane %v12317_v62, 5  ;;  %v12344_v37 = vld [vmem:[#allocation3 + $0x98] sm:$0x1] }
 0x2e9   : > { %v6210_v42 = vshrl.u32 %v12303_v19, 16  ;;  %6917 = vrot.lane.b32.xlu0 %v8491_v44, %s9073_s29  ;;  %v4986_v10 = vrot.slane %v4985_v47, 4  ;;  %v5881_v18 = vsel %vm9226_vm9, %v8395_v49, %v5880_v15  ;;  %v6213_v38 = vshll.u32 %v12303_v19, 16  ;;  %v12346_v44 = vpop.permute.xlu0 %7161 }
 0x2ea   : > { %v5884_v17 = vsel %vm9226_vm9, %v5882_v28, %v5883_v43  ;;  %v4981_v59 = vsel %vm9313_vm14, %v4976_v24, %v4980_v3  ;;  %v5281_v40 = vrot.slane %v5279_v16, 4  ;;  %v5282_v61 = vrot.slane %v12326_v6, 5  ;;  %v8942_v3 = vld [vmem:[%s13199_s4] sm:$0xff]  }
 0x2eb   : > { %v6223_v52 = vshrl.u32 %v12328_v7, 16  ;;  %8791 = vmatpush3.bf16.msra.mxu1 %v8940_v58  ;;  %v4991_v15 = vsel %vm9313_vm14, %v4986_v10, %v4990_v31  ;;  %v8507_v49 = vcombine.low %v5881_v18, %v5884_v17  ;;  %v6212_v47 = vrot.slane %v6210_v42, 4  ;;  %v8985_v58 = vld [vmem:[#allocation3 + $0x34] sm:$0xf] }
 0x2ec   : > { %v6215_v28 = vrot.slane %v6213_v38, 5  ;;  %8792 = vmatprep.subr.bf16.mxu1 %v8941_v14  ;;  %v8442_v43 = vcombine.low %v4981_v59, %v4991_v15  ;;  %v5283_v24 = vsel %vm9226_vm9, %v5281_v40, %v5282_v61  ;;  %v8421_v32 = vcombine.low %v8986_v26, %v8985_v58  ;;  %v12364_v38 = vld [vmem:[#allocation3 + $0x98] sm:$0x1] }
 0x2ed   : > { %v5631_v23 = vor.u32 %v12141_v5, %v12101_v27  ;;  %6997 = vrot.lane.b32.xlu0 %v8507_v49, %s9071_s22  ;;  %v5280_v31 = vsel %vm9226_vm9, %v8380_v34, %v5279_v16  ;;  %v5634_v42 = vshll.u32 %v12076_v25, 16  ;;  %v13258_v10 = vshrl.u32 %v12076_v25, 16  ;;  %v8784_v34 = vpop.f32.mrf.mxu0  ;;  %v12370_v16 = vpop.permute.xlu1 %6653 }
 0x2ee   : > { %v5644_v17 = vshll.u32 %v12344_v37, 16  ;;  %6659 = vrot.lane.b32.xlu1 %v8442_v43, %s9070_s21  ;;  %v7279_v26 = vsel %vm3436_vm15, %v8421_v32, %v12110_v36  ;;  %v6216_v5 = vor.u32 %v6215_v28, %v6212_v47  ;;  %v6219_v59 = vshll.u32 %v12328_v7, 16  ;;  %v4127_v47 = vld [vmem:[#allocation3 + $0xc0] sm:$0x1] }
 0x2ef   : > { %v5640_v18 = vrot.slane %v13258_v10, 4  ;;  %v5632_v27 = vrot.slane %v5631_v23, 4  ;;  %8793 = vmatpush3.bf16.msra.mxu1 %v8941_v14  ;;  %v8460_v40 = vcombine.low %v5280_v31, %v5283_v24  ;;  %v8523_v61 = vcombine.low %v12303_v19, %v12328_v7  ;;  %v12379_v14 = vpop.permute.xlu0 %6829  ;;  %v6363_v10 = vld [vmem:[#allocation3 + $0x90] sm:$0xe] }
 0x2f0   : > { %v5636_v15 = vrot.slane %v5634_v42, 5  ;;  %v6225_v49 = vrot.slane %v6223_v52, 4  ;;  %8794 = vmatprep.subr.bf16.mxu1 %v8942_v3  ;;  %v12376_v43 = vsel %vm3485_vm1, %v7279_v26, %v11954_v11  ;;  %v6217_v36 = vrot.slane %v6216_v5, 4 }
 0x2f1   : > { %v6221_v32 = vrot.slane %v6219_v59, 5  ;;  %v6229_v23 = vshll.u32 %v12364_v38, 16  ;;  %7093 = vrot.lane.b32.xlu0 %v8523_v61, %s9069_s20  ;;  %v5646_v24 = vrot.slane %v5644_v17, 5  ;;  %v7382_v19 = vsel %vm3551_vm6, %v12082_v9, %v12166_v30 }
 0x2f2   : > { %v5641_v28 = vor.u32 %v5640_v18, %v5636_v15  ;;  %v3987_v52 = vmul.f32 %v12115_v4, %v8784_v34  ;;  %6743 = vrot.lane.b32.xlu1 %v8460_v40, %s9067_s18  ;;  %v5637_v11 = vsel %vm9313_vm14, %v5632_v27, %v5636_v15  ;;  %v7414_v17 = vsel %vm3584_vm7, %v7382_v19, %v12011_v20  ;;  %v12401_v40 = vpop.permute.xlu1 %7083 }
 0x2f3   : > { %v6222_v58 = vsel %vm9313_vm14, %v6217_v36, %v6221_v32  ;;  %v6226_v31 = vor.u32 %v6225_v49, %v6221_v32  ;;  %v6231_v42 = vrot.slane %v6229_v23, 5  ;;  %8795 = vmatpush3.bf16.msra.mxu1 %v8942_v3  ;;  %v4128_v30 = vsel %vm9172_vm3, 0, %v4127_v47  ;;  %v3935_v3 = vpop.f32.mrf.mxu0  ;;  %v12408_v23 = vpop.permute.xlu0 %6905 }
 0x2f4   : > { %v5642_v18 = vrot.slane %v5641_v28, 4  ;;  %v4026_v9 = vadd.f32 %v12136_v41, %v3987_v52  ;;  %4129 = vst [vmem:[#allocation3 + $0xc0] sm:$0x1] %v4128_v30  ;;  %v6192_v27 = vor.u32 %v12312_v2, %v12251_v53  ;;  %v6195_v5 = vshll.u32 %v12233_v48, 16  ;;  %v4124_v52 = vld [vmem:[#allocation3 + $0xb4] sm:$0x1] }
 0x2f5   : > { %v6227_v26 = vrot.slane %v6226_v31, 4  ;;  %v13259_v59 = vshrl.u32 %v12233_v48, 16  ;;  %v6205_v15 = vshll.u32 %v12244_v21, 16  ;;  %v8411_v49 = vrot.slane %v6363_v10, 9 }
 0x2f6   : > { %v5647_v20 = vsel %vm9313_vm14, %v5642_v18, %v5646_v24  ;;  %v4058_v61 = vmax.f32 %v4026_v9, 0.0  ;;  %v6193_v53 = vrot.slane %v6192_v27, 4  ;;  %v6197_v2 = vrot.slane %v6195_v5, 5  ;;  %v12425_v27 = vpop.permute.xlu1 %7159 }
 0x2f7   : > { %v6201_v34 = vrot.slane %v13259_v59, 4  ;;  %v8492_v36 = vcombine.low %v5637_v11, %v5647_v20  ;;  %v6232_v32 = vsel %vm9313_vm14, %v6227_v26, %v6231_v42  ;;  %v6207_v28 = vrot.slane %v6205_v15, 5  ;;  %v8785_v42 = vpop.f32.mrf.mxu0  ;;  %v4185_v20 = vld [vmem:[#allocation3 + $0xc8] sm:$0x1] }
 0x2f8   : > { %v8539_v48 = vcombine.low %v6222_v58, %v6232_v32  ;;  %v8620_v47 = vpack.c.bf16 %v4058_v61, %v4058_v61  ;;  %v6489_v19 = vrot.slane %v12328_v7, 5  ;;  %v6198_v21 = vsel %vm9313_vm14, %v6193_v53, %v6197_v2  ;;  %v4726_v61 = vld [vmem:[#allocation3 + $0x84] sm:$0xf]  ;;  %v12438_v53 = vpop.permute.xlu0 %7245 }
 0x2f9   : > { %6919 = vrot.lane.b32.xlu1 %v8492_v36, %s9073_s29  ;;  %v6202_v24 = vor.u32 %v6201_v34, %v6197_v2  ;;  %v6492_v11 = vrot.slane %v12364_v38, 5  ;;  %v3985_v31 = vmul.f32 %v12115_v4, %v3935_v3  ;;  %v4125_v26 = vsel %vm9172_vm3, 0, %v4124_v52  ;;  %v13260_v36 = vld [vmem:[#allocation9_spill] sm:$0xff]  ;;  %v13261_v2 = vld [vmem:[#allocation7_spill] sm:$0xff] }
 0x2fa   : > { %7173 = vrot.lane.b32.xlu0 %v8539_v48, %s9074_s8  ;;  %v4527_v10 = vshrl.u32 %v8620_v47, 16  ;;  %v4530_v58 = vshll.u32 %v8620_v47, 16  ;;  %v6490_v18 = vsel %vm9226_vm9, %v8411_v49, %v6489_v19  ;;  %v6491_v7 = vrot.slane %v6489_v19, 4  ;;  %4126 = vst [vmem:[#allocation3 + $0xb4] sm:$0x1] %v4125_v26 }
 0x2fb   : > { %v6203_v9 = vrot.slane %v6202_v24, 4  ;;  %v4024_v30 = vadd.f32 %v12136_v41, %v3985_v31  ;;  %v7380_v38 = vsel %vm3551_vm6, %v12154_v54, %v11875_v50  ;;  %v3988_v3 = vmul.f32 %v12115_v4, %v8785_v42  ;;  %v4697_v15 = vld [vmem:[#allocation3 + $0xc0] sm:$0xf]  ;;  %v3938_v42 = vpop.f32.mrf.mxu0 }
 0x2fc   : > { %v12427_v5 = vrot.slane %v4527_v10, 7  ;;  %v6493_v59 = vsel %vm9226_vm9, %v6491_v7, %v6492_v11  ;;  %v7412_v34 = vsel %vm3584_vm7, %v7380_v38, %v11772_v12  ;;  %v7446_v48 = vsel %vm3617_vm8, %v7414_v17, %v13261_v2  ;;  %v4182_v10 = vld [vmem:[#allocation3 + $0xbc] sm:$0x1] }
 0x2fd   : > { %v6208_v49 = vsel %vm9313_vm14, %v6203_v9, %v6207_v28  ;;  %v8555_v50 = vcombine.low %v6490_v18, %v6493_v59  ;;  %v4056_v54 = vmax.f32 %v4024_v30, 0.0  ;;  %v7444_v32 = vsel %vm3617_vm8, %v7412_v34, %v13260_v36  ;;  %v12454_v30 = vpop.permute.xlu1 %6651 }
 0x2fe   : > { %v4532_v12 = vor.u32 %v4530_v58, %v12427_v5  ;;  %v8538_v47 = vcombine.low %v6198_v21, %v6208_v49  ;;  %v7476_v19 = vsel %vm3650_vm12, %v7444_v32, %v12188_v55  ;;  %v4027_v28 = vadd.f32 %v12136_v41, %v3988_v3  ;;  %v13262_v32 = vld [vmem:[#allocation12_spill] sm:$0xff] }
 0x2ff   : > { %7253 = vrot.lane.b32.xlu0 %v8555_v50, %s9072_s23  ;;  %v8618_v52 = vpack.c.bf16 %v4056_v54, %v4056_v54  ;;  %v4186_v24 = vsel %vm9200_vm5, 0, %v4185_v20  ;;  %v5017_v11 = vshrl.u32 %v4726_v61, 16  ;;  %v5020_v17 = vshll.u32 %v4726_v61, 16 }
 0x300   : > { %v4698_v31 = vsel %vm9232_vm10, %v4532_v12, %v4697_v15  ;;  %7171 = vrot.lane.b32.xlu1 %v8538_v47, %s9074_s8  ;;  %4187 = vst [vmem:[#allocation3 + $0xc8] sm:$0x1] %v4186_v24  ;;  %v5026_v21 = vshll.u32 %v12317_v62, 16  ;;  %v5030_v55 = vshrl.u32 %v12317_v62, 16  ;;  %v4059_v7 = vmax.f32 %v4027_v28, 0.0  ;;  %v12462_v15 = vpop.permute.xlu0 %6737 }
 0x301   : > { %4699 = vst [vmem:[#allocation3 + $0xc0] sm:$0xf] %v4698_v31  ;;  %v4510_v58 = vshrl.u32 %v8618_v52, 16  ;;  %v4513_v18 = vshll.u32 %v8618_v52, 16  ;;  %v5019_v9 = vrot.slane %v5017_v11, 4  ;;  %v5022_v26 = vrot.slane %v5020_v17, 5 }
 0x302   : > { %v5028_v38 = vrot.slane %v5026_v21, 5  ;;  %v5032_v59 = vrot.slane %v5030_v55, 4  ;;  %v5036_v34 = vshll.u32 %v12326_v6, 16  ;;  %v8621_v20 = vpack.c.bf16 %v4059_v7, %v4059_v7  ;;  %v4690_v50 = vld [vmem:[#allocation3 + $0xb4] sm:$0xf] }
 0x303   : > { %v12457_v3 = vrot.slane %v4510_v58, 7  ;;  %v3986_v61 = vmul.f32 %v12115_v4, %v3938_v42  ;;  %v4183_v62 = vsel %vm9200_vm5, 0, %v4182_v10  ;;  %v4533_v49 = vrot.slane %v12427_v5, 4  ;;  %v8987_v5 = vld [vmem:[#allocation3 + $0x28] sm:$0xf] }
 0x304   : > { %v5023_v54 = vor.u32 %v5022_v26, %v5019_v9  ;;  %v5033_v36 = vor.u32 %v5032_v59, %v5028_v38  ;;  %4184 = vst [vmem:[#allocation3 + $0xbc] sm:$0x1] %v4183_v62  ;;  %v7508_v2 = vsel %vm3683_vm13, %v7476_v19, %v13262_v32  ;;  %v4535_v47 = vshrl.u32 %v8621_v20, 16  ;;  %v8988_v11 = vld [vmem:[#allocation3 + $0x24] sm:$0xf] }
 0x305   : > { %v4515_v6 = vor.u32 %v4513_v18, %v12457_v3  ;;  %v4516_v12 = vrot.slane %v12457_v3, 4  ;;  %v5038_v4 = vrot.slane %v5036_v34, 5  ;;  %vm13263_vm2 = vcmask 588800   ;;  %v6364_v17 = vld [vmem:[#allocation3 + $0x9c] sm:$0xe]  ;;  %v12477_v18 = vpop.permute.xlu1 %6991 }
 0x306   : > { %8797 = vmatmul.mubr.msk.bf16.vlgmr.msra.gmra.mxu1 %vm13263_vm2, %v7508_v2  ;;  %v5024_v52 = vrot.slane %v5023_v54, 4  ;;  %v5034_v28 = vrot.slane %v5033_v36, 4  ;;  %v4025_v24 = vadd.f32 %v12136_v41, %v3986_v61  ;;  %v8420_v31 = vcombine.low %v8988_v11, %v8987_v5  ;;  %v12475_v10 = vld [vmem:[#allocation3 + $0xa0] sm:$0xf]  ;;  %v5755_v58 = vld [vmem:[#allocation3 + $0x90] sm:$0xe]  ;;  %v12487_v61 = vpop.permute.xlu0 %7243 }
 0x307   : > { %v4691_v21 = vsel %vm9232_vm10, %v4515_v6, %v4690_v50  ;;  %v4537_v19 = vrot.slane %v4535_v47, 7  ;;  %v4538_v55 = vshll.u32 %v8621_v20, 16  ;;  %v7478_v42 = vsel %vm3650_vm12, %v7446_v48, %v12078_v35  ;;  %v4701_v7 = vld [vmem:[#allocation3 + $0xc8] sm:$0x1]  ;;  %v12485_v59 = vld [vmem:[#allocation3 + $0xa4] sm:$0x1]  ;;  %vm13266_vm10 = vmmov %vm13263_vm2 }
 0x308   : > { %4692 = vst [vmem:[#allocation3 + $0xb4] sm:$0xf] %v4691_v21  ;;  %v5029_v41 = vsel %vm9313_vm14, %v5024_v52, %v5028_v38  ;;  %v5039_v9 = vsel %vm9313_vm14, %v5034_v28, %v5038_v4  ;;  %v4057_v33 = vmax.f32 %v4025_v24, 0.0  ;;  %v7276_v26 = vsel %vm3436_vm15, %v8420_v31, %v12205_v51  ;;  %v13264_v50 = vld [vmem:[#allocation13_spill] sm:$0xff]  ;;  %v13265_v38 = vld [vmem:[#allocation10_spill] sm:$0xff] }
 0x309   : > { %v4540_v35 = vor.u32 %v4538_v55, %v4537_v19  ;;  %v4542_v48 = vrot.slane %v4537_v19, 4  ;;  %v8444_v34 = vcombine.low %v5029_v41, %v5039_v9  ;;  %v8412_v20 = vrot.slane %v6364_v17, 9  ;;  %v12496_v2 = vld [vmem:[#allocation3 + $0x94] sm:$0xf]  ;;  %v5148_v51 = vld [vmem:[#allocation3 + $0x90] sm:$0xe] }
 0x30a   : > { %v8619_v62 = vpack.c.bf16 %v4057_v33, %v4057_v33  ;;  %v12491_v54 = vsel %vm3485_vm1, %v7276_v26, %v13264_v50  ;;  %v7510_v36 = vsel %vm3683_vm13, %v7478_v42, %v13265_v38  ;;  %v6496_v32 = vrot.slane %v12475_v10, 5  ;;  %v12505_v28 = vld [vmem:[#allocation3 + $0x98] sm:$0x1]  ;;  %v12507_v24 = vld [vmem:[#allocation3 + $0x9c] sm:$0xf]  ;;  %v12515_v42 = vpop.permute.xlu1 %6735 }
 0x30b   : > { %v4541_v6 = vsel %vm9238_vm11, %v4533_v49, %v4540_v35  ;;  %v4702_v47 = vsel %vm9172_vm3, %v4542_v48, %v4701_v7  ;;  %6663 = vrot.lane.b32.xlu1 %v8444_v34, %s9070_s21  ;;  %8800 = vmatprep.mubr.msk.bf16.mxu1 %vm13266_vm10, %v7510_v36  ;;  %v6499_v4 = vrot.slane %v12485_v59, 5  ;;  %v8396_v52 = vrot.slane %v5755_v58, 9  ;;  %v5336_v33 = vld [vmem:[#allocation3 + $0x9c] sm:$0xf]  ;;  %v12525_v34 = vpop.permute.xlu0 %6989  ;;  %vm13280_vm10 = vmmov %vm13263_vm2 }
 0x30c   : > { %4700 = vst.msk [vmem:[#allocation3 + $0xc4] sm:$0xf] %vm310_vm0, %v4541_v6  ;;  %4703 = vst [vmem:[#allocation3 + $0xc8] sm:$0x1] %v4702_v47  ;;  %v4518_v5 = vshrl.u32 %v8619_v62, 16  ;;  %v4521_v11 = vshll.u32 %v8619_v62, 16  ;;  %v6497_v49 = vsel %vm9226_vm9, %v8412_v20, %v6496_v32 }
 0x30d   : > { %v6498_v31 = vrot.slane %v6496_v32, 4  ;;  %v5887_v17 = vrot.slane %v12076_v25, 5  ;;  %v5890_v21 = vrot.slane %v12344_v37, 5  ;;  %v8381_v19 = vrot.slane %v5148_v51, 9  ;;  %v4694_v26 = vld [vmem:[#allocation3 + $0xbc] sm:$0x1] }
 0x30e   : > { %v5286_v55 = vrot.slane %v12496_v2, 5  ;;  %v4520_v58 = vrot.slane %v4518_v5, 7  ;;  %v5289_v41 = vrot.slane %v12505_v28, 5  ;;  %v6234_v9 = vshrl.u32 %v12507_v24, 16  ;;  %v12533_v6 = vld [vmem:[#allocation3 + $0xa0] sm:$0xf]  ;;  %v12546_v3 = vpop.permute.xlu1 %6835 }
 0x30f   : > { %v6500_v7 = vsel %vm9226_vm9, %v6498_v31, %v6499_v4  ;;  %v5888_v25 = vsel %vm9226_vm9, %v8396_v52, %v5887_v17  ;;  %v5889_v37 = vrot.slane %v5887_v17, 4  ;;  %v6237_v32 = vshll.u32 %v12507_v24, 16 }
 0x310   : > { %v8556_v35 = vcombine.low %v6497_v49, %v6500_v7  ;;  %v5287_v48 = vsel %vm9226_vm9, %v8381_v19, %v5286_v55  ;;  %v4523_v20 = vor.u32 %v4521_v11, %v4520_v58  ;;  %v4525_v62 = vrot.slane %v4520_v58, 4 }
 0x311   : > { %v5288_v50 = vrot.slane %v5286_v55, 4  ;;  %v6236_v38 = vrot.slane %v6234_v9, 4  ;;  %v5891_v36 = vsel %vm9226_vm9, %v5889_v37, %v5890_v21  ;;  %v8524_v51 = vcombine.low %v12507_v24, %v12475_v10  ;;  %v12544_v21 = vld [vmem:[#allocation3 + $0xa4] sm:$0x1] }
 0x312   : > { %7255 = vrot.lane.b32.xlu0 %v8556_v35, %s9072_s23  ;;  %v5649_v47 = vshrl.u32 %v5336_v33, 16  ;;  %v4524_v4 = vsel %vm9238_vm11, %v4516_v12, %v4523_v20  ;;  %v4695_v52 = vsel %vm9172_vm3, %v4525_v62, %v4694_v26  ;;  %v8508_v5 = vcombine.low %v5888_v25, %v5891_v36  ;;  %v12556_v26 = vld [vmem:[#allocation3 + $0x90] sm:$0xf]  ;;  %v12558_v35 = vpop.permute.xlu0 %7089  ;;  %vm13273_vm11 = vmmov %vm13263_vm2 }
 0x313   : > { %v5290_v11 = vsel %vm9226_vm9, %v5288_v50, %v5289_v41  ;;  %4693 = vst.msk [vmem:[#allocation3 + $0xb8] sm:$0xf] %vm310_vm0, %v4524_v4  ;;  %4696 = vst [vmem:[#allocation3 + $0xbc] sm:$0x1] %v4695_v52  ;;  %v6239_v24 = vrot.slane %v6237_v32, 5  ;;  %v5652_v17 = vshll.u32 %v5336_v33, 16  ;;  %v8477_v12 = vcombine.low %v5336_v33, %v12533_v6 }
 0x314   : > { %v8461_v49 = vcombine.low %v5287_v48, %v5290_v11  ;;  %v5651_v31 = vrot.slane %v5649_v47, 4  ;;  %6999 = vrot.lane.b32.xlu1 %v8508_v5, %s9071_s22  ;;  %v5662_v39 = vshrl.u32 %v12533_v6, 16  ;;  %v6243_v19 = vshll.u32 %v12475_v10, 16  ;;  %13267 = vst [vmem:[#allocation9_spill] sm:$0xff] %v12556_v26  ;;  %v5756_v11 = vld [vmem:[#allocation3 + $0x9c] sm:$0xe] }
 0x315   : > { %v6247_v55 = vshrl.u32 %v12475_v10, 16  ;;  %v5654_v58 = vrot.slane %v5652_v17, 5  ;;  %v6240_v7 = vor.u32 %v6239_v24, %v6236_v38  ;;  %v6253_v41 = vshll.u32 %v12485_v59, 16 }
 0x316   : > { %6745 = vrot.lane.b32.xlu0 %v8461_v49, %s9067_s18  ;;  %v5658_v9 = vshll.u32 %v12533_v6, 16  ;;  %v6245_v25 = vrot.slane %v6243_v19, 5  ;;  %v5664_v48 = vrot.slane %v5662_v39, 4  ;;  %v5668_v33 = vshll.u32 %v12544_v21, 16  ;;  %v12568_v49 = vpop.permute.xlu1 %6911 }
 0x317   : > { %v6249_v37 = vrot.slane %v6247_v55, 4  ;;  %v6241_v20 = vrot.slane %v6240_v7, 4  ;;  %v6255_v62 = vrot.slane %v6253_v41, 5  ;;  %v5655_v10 = vor.u32 %v5654_v58, %v5651_v31  ;;  %v12574_v58 = vpop.permute.xlu0 %7165 }
 0x318   : > { %v5660_v50 = vrot.slane %v5658_v9, 5  ;;  %7095 = vrot.lane.b32.xlu1 %v8524_v51, %s9069_s20  ;;  %v5670_v36 = vrot.slane %v5668_v33, 5  ;;  %v5041_v59 = vshrl.u32 %v12556_v26, 16  ;;  %v5044_v32 = vshll.u32 %v12556_v26, 16  ;;  %v12807_v26 = vld [vmem:[#allocation3 + $0xc4] sm:$0xf] }
 0x319   : > { %v6250_v38 = vor.u32 %v6249_v37, %v6245_v25  ;;  %v6246_v47 = vsel %vm9313_vm14, %v6241_v20, %v6245_v25  ;;  %v5656_v4 = vrot.slane %v5655_v10, 4  ;;  %v5050_v5 = vshll.u32 %v12496_v2, 16  ;;  %v12578_v37 = vld [vmem:[#allocation3 + $0x9c] sm:$0xf]  ;;  %v12583_v10 = vld [vmem:[#allocation3 + $0xa0] sm:$0xf] }
 0x31a   : > { %6841 = vrot.lane.b32.xlu0 %v8477_v12, %s9068_s19  ;;  %v5665_v52 = vor.u32 %v5664_v48, %v5660_v50  ;;  %v5043_v51 = vrot.slane %v5041_v59, 4  ;;  %v5046_v31 = vrot.slane %v5044_v32, 5  ;;  %v5054_v17 = vshrl.u32 %v12496_v2, 16  ;;  %13268 = vst [vmem:[#allocation7_spill] sm:$0xff] %v12578_v37  ;;  %13269 = vst [vmem:[#allocation12_spill] sm:$0xff] %v12583_v10 }
 0x31b   : > { %v6251_v24 = vrot.slane %v6250_v38, 4  ;;  %v5661_v39 = vsel %vm9313_vm14, %v5656_v4, %v5660_v50  ;;  %v5052_v12 = vrot.slane %v5050_v5, 5  ;;  %v5060_v55 = vshll.u32 %v12505_v28, 16 }
 0x31c   : > { %v5666_v19 = vrot.slane %v5665_v52, 4  ;;  %v5047_v41 = vor.u32 %v5046_v31, %v5043_v51  ;;  %v5056_v9 = vrot.slane %v5054_v17, 4  ;;  %v8397_v25 = vrot.slane %v5756_v11, 9 }
 0x31d   : > { %v6256_v7 = vsel %vm9313_vm14, %v6251_v24, %v6255_v62  ;;  %v5062_v33 = vrot.slane %v5060_v55, 5  ;;  %v5894_v20 = vrot.slane %v12533_v6, 5  ;;  %v5897_v59 = vrot.slane %v12544_v21, 5  ;;  %v12586_v62 = vld [vmem:[#allocation3 + $0xa4] sm:$0x1]  ;;  %v12593_v6 = vpop.permute.xlu1 %6657 }
 0x31e   : > { %v8540_v48 = vcombine.low %v6246_v47, %v6256_v7  ;;  %v5671_v2 = vsel %vm9313_vm14, %v5666_v19, %v5670_v36  ;;  %v5048_v50 = vrot.slane %v5047_v41, 4  ;;  %v5057_v38 = vor.u32 %v5056_v9, %v5052_v12  ;;  %v12603_v19 = vpop.permute.xlu0 %6833  ;;  %v12607_v9 = vld [vmem:[#allocation3 + $0xac] sm:$0xf] }
 0x31f   : > { %v8493_v28 = vcombine.low %v5661_v39, %v5671_v2  ;;  %v5895_v32 = vsel %vm9226_vm9, %v8397_v25, %v5894_v20  ;;  %v5896_v47 = vrot.slane %v5894_v20, 4  ;;  %v5065_v36 = vshrl.u32 %v12578_v37, 16  ;;  %v5945_v39 = vld [vmem:[#allocation3 + $0xa8] sm:$0xf]  ;;  %v8989_v20 = vld [vmem:[#allocation3 + $0x4c] sm:$0xf] }
 0x320   : > { %7175 = vrot.lane.b32.xlu1 %v8540_v48, %s9074_s8  ;;  %v5068_v4 = vshll.u32 %v12578_v37, 16  ;;  %v5053_v52 = vsel %vm9313_vm14, %v5048_v50, %v5052_v12  ;;  %v5058_v21 = vrot.slane %v5057_v38, 4  ;;  %v5074_v5 = vshll.u32 %v12583_v10, 16  ;;  %v13270_v38 = vld [vmem:[#allocation8_spill] sm:$0xff] }
 0x321   : > { %6921 = vrot.lane.b32.xlu0 %v8493_v28, %s9073_s29  ;;  %v5078_v11 = vshrl.u32 %v12583_v10, 16  ;;  %v5898_v24 = vsel %vm9226_vm9, %v5896_v47, %v5897_v59  ;;  %v5067_v51 = vrot.slane %v5065_v36, 4  ;;  %v5084_v17 = vshll.u32 %v12586_v62, 16  ;;  %v8990_v28 = vld [vmem:[#allocation3 + $0x48] sm:$0xf] }
 0x322   : > { %v5070_v31 = vrot.slane %v5068_v4, 5  ;;  %v5063_v55 = vsel %vm9313_vm14, %v5058_v21, %v5062_v33  ;;  %v8509_v7 = vcombine.low %v5895_v32, %v5898_v24  ;;  %v5076_v12 = vrot.slane %v5074_v5, 5  ;;  %v5149_v36 = vld [vmem:[#allocation3 + $0x9c] sm:$0xe] }
 0x323   : > { %v5080_v41 = vrot.slane %v5078_v11, 4  ;;  %v7354_v25 = vsel %vm3518_vm4, %v12376_v43, %v12129_v57  ;;  %v8445_v48 = vcombine.low %v5053_v52, %v5063_v55  ;;  %v8423_v50 = vcombine.low %v8990_v28, %v8989_v20  ;;  %v12622_v52 = vpop.permute.xlu1 %7087 }
 0x324   : > { %v5071_v2 = vor.u32 %v5070_v31, %v5067_v51  ;;  %v7352_v59 = vsel %vm3518_vm4, %v12491_v54, %v13270_v38  ;;  %v6258_v32 = vshrl.u32 %v5945_v39, 16  ;;  %v6261_v47 = vshll.u32 %v5945_v39, 16  ;;  %v12641_v38 = vld [vmem:[#allocation3 + $0xac] sm:$0xf] }
 0x325   : > { %7001 = vrot.lane.b32.xlu0 %v8509_v7, %s9071_s22  ;;  %v5081_v33 = vor.u32 %v5080_v41, %v5076_v12  ;;  %6665 = vrot.lane.b32.xlu1 %v8445_v48, %s9070_s21  ;;  %v5086_v21 = vrot.slane %v5084_v17, 5  ;;  %v12619_v57 = vsel %vm3436_vm15, %v8423_v50, %v12370_v16  ;;  %v6271_v43 = vshrl.u32 %v12607_v9, 16  ;;  %v12629_v7 = vpop.permute.xlu0 %6909  ;;  %v5965_v48 = vld [vmem:[#allocation3 + $0xb0] sm:$0x1] }
 0x326   : > { %v5072_v4 = vrot.slane %v5071_v2, 4  ;;  %v6260_v54 = vrot.slane %v6258_v32, 4  ;;  %v6263_v11 = vrot.slane %v6261_v47, 5  ;;  %v8525_v24 = vcombine.low %v5945_v39, %v12607_v9 }
 0x327   : > { %v5082_v5 = vrot.slane %v5081_v33, 4  ;;  %v8382_v31 = vrot.slane %v5149_v36, 9  ;;  %v5293_v55 = vrot.slane %v12583_v10, 5  ;;  %v5296_v17 = vrot.slane %v12586_v62, 5  ;;  %v13271_v33 = vld [vmem:[#allocation15_spill] sm:$0xff] }
 0x328   : > { %v5077_v51 = vsel %vm9313_vm14, %v5072_v4, %v5076_v12  ;;  %v7386_v41 = vsel %vm3551_vm6, %v7354_v25, %v12408_v23  ;;  %v6264_v39 = vor.u32 %v6263_v11, %v6260_v54  ;;  %v6267_v2 = vshll.u32 %v12607_v9, 16  ;;  %v5338_v12 = vld [vmem:[#allocation3 + $0xa8] sm:$0xf]  ;;  %v12648_v11 = vpop.permute.xlu1 %7163 }
 0x329   : > { %v5087_v16 = vsel %vm9313_vm14, %v5082_v5, %v5086_v21  ;;  %7097 = vrot.lane.b32.xlu0 %v8525_v24, %s9069_s20  ;;  %v5294_v28 = vsel %vm9226_vm9, %v8382_v31, %v5293_v55  ;;  %v5295_v62 = vrot.slane %v5293_v55, 4  ;;  %v7418_v50 = vsel %vm3584_vm7, %v7386_v41, %v12279_v0  ;;  %v6365_v54 = vld [vmem:[#allocation3 + $0xa8] sm:$0xe] }
 0x32a   : > { %v8446_v20 = vcombine.low %v5077_v51, %v5087_v16  ;;  %v7450_v32 = vsel %vm3617_vm8, %v7418_v50, %v13271_v33  ;;  %v6265_v47 = vrot.slane %v6264_v39, 4  ;;  %v6269_v23 = vrot.slane %v6267_v2, 5  ;;  %v12654_v39 = vpop.permute.xlu0 %7249 }
 0x32b   : > { %v6273_v25 = vrot.slane %v6271_v43, 4  ;;  %v5297_v36 = vsel %vm9226_vm9, %v5295_v62, %v5296_v17  ;;  %v6277_v4 = vshll.u32 %v5965_v48, 16  ;;  %v5673_v21 = vshrl.u32 %v5338_v12, 16  ;;  %v13272_v62 = vld [vmem:[#allocation11_spill] sm:$0xff] }
 0x32c   : > { %6667 = vrot.lane.b32.xlu1 %v8446_v20, %s9070_s21  ;;  %v5676_v5 = vshll.u32 %v5338_v12, 16  ;;  %v8462_v0 = vcombine.low %v5294_v28, %v5297_v36  ;;  %v6270_v24 = vsel %vm9313_vm14, %v6265_v47, %v6269_v23  ;;  %v5686_v31 = vshrl.u32 %v12641_v38, 16  ;;  %v12662_v47 = vld [vmem:[#allocation3 + $0xb0] sm:$0x1] }
 0x32d   : > { %v6274_v51 = vor.u32 %v6273_v25, %v6269_v23  ;;  %v6279_v55 = vrot.slane %v6277_v4, 5  ;;  %v5675_v43 = vrot.slane %v5673_v21, 4  ;;  %v8478_v41 = vcombine.low %v5338_v12, %v12641_v38 }
 0x32e   : > { %v5678_v16 = vrot.slane %v5676_v5, 5  ;;  %v7384_v2 = vsel %vm3551_vm6, %v7352_v59, %v12068_v56  ;;  %v8413_v20 = vrot.slane %v6365_v54, 9  ;;  %v6503_v28 = vrot.slane %v12607_v9, 5  ;;  %v12673_v5 = vld [vmem:[#allocation3 + $0xb8] sm:$0xf]  ;;  %v12675_v54 = vpop.permute.xlu1 %6655 }
 0x32f   : > { %v6275_v17 = vrot.slane %v6274_v51, 4  ;;  %v7416_v50 = vsel %vm3584_vm7, %v7384_v2, %v13272_v62  ;;  %v6506_v33 = vrot.slane %v5965_v48, 5  ;;  %v5682_v12 = vshll.u32 %v12641_v38, 16  ;;  %v8991_v2 = vld [vmem:[#allocation3 + $0x40] sm:$0xf] }
 0x330   : > { %6747 = vrot.lane.b32.xlu1 %v8462_v0, %s9067_s18  ;;  %v5679_v23 = vor.u32 %v5678_v16, %v5675_v43  ;;  %v7448_v56 = vsel %vm3617_vm8, %v7416_v50, %v12156_v45  ;;  %v6504_v9 = vsel %vm9226_vm9, %v8413_v20, %v6503_v28  ;;  %v6505_v59 = vrot.slane %v6503_v28, 4  ;;  %v6366_v43 = vld [vmem:[#allocation3 + $0xb4] sm:$0xe]  ;;  %v12689_v16 = vld [vmem:[#allocation3 + $0xbc] sm:$0x1]  ;;  %v13274_v50 = vld [vmem:[#allocation16_spill] sm:$0xff] }
 0x331   : > { %v6280_v25 = vsel %vm9313_vm14, %v6275_v17, %v6279_v55  ;;  %v7480_v4 = vsel %vm3650_vm12, %v7448_v56, %v12425_v27  ;;  %v5684_v21 = vrot.slane %v5682_v12, 5  ;;  %v5688_v51 = vrot.slane %v5686_v31, 4  ;;  %v12691_v17 = vpop.permute.xlu0 %6741  ;;  %v12701_v12 = vld [vmem:[#allocation3 + $0xac] sm:$0xf] }
 0x332   : > { %v8541_v36 = vcombine.low %v6270_v24, %v6280_v25  ;;  %v5680_v48 = vrot.slane %v5679_v23, 4  ;;  %v6507_v0 = vsel %vm9226_vm9, %v6505_v59, %v6506_v33  ;;  %v5692_v45 = vshll.u32 %v12662_v47, 16  ;;  %v5150_v25 = vld [vmem:[#allocation3 + $0xa8] sm:$0xe]  ;;  %v12709_v59 = vld [vmem:[#allocation3 + $0xb0] sm:$0x1] }
 0x333   : > { %v7512_v55 = vsel %vm3683_vm13, %v7480_v4, %v12246_v22  ;;  %v12685_v27 = vsel %vm3485_vm1, %v12619_v57, %v12212_v13  ;;  %v8557_v24 = vcombine.low %v6504_v9, %v6507_v0  ;;  %v5689_v31 = vor.u32 %v5688_v51, %v5684_v21  ;;  %v8992_v22 = vld [vmem:[#allocation3 + $0x3c] sm:$0xf]  ;;  %v5757_v57 = vld [vmem:[#allocation3 + $0xa8] sm:$0xe]  ;;  %v5947_v0 = vld [vmem:[#allocation3 + $0xb4] sm:$0xf] }
 0x334   : > { %7177 = vrot.lane.b32.xlu0 %v8541_v36, %s9074_s8  ;;  %6843 = vrot.lane.b32.xlu1 %v8478_v41, %s9068_s19  ;;  %v8422_v20 = vcombine.low %v8992_v22, %v8991_v2  ;;  %v7482_v28 = vsel %vm3650_vm12, %v7450_v32, %v12346_v44  ;;  %v6510_v13 = vrot.slane %v12673_v5, 5  ;;  %v5685_v41 = vsel %vm9313_vm14, %v5680_v48, %v5684_v21 }
 0x335   : > { %8801 = vmatmul.mubr.msk.bf16.gmra.mxu1 %vm13273_vm11, %v7512_v55  ;;  %v5694_v62 = vrot.slane %v5692_v45, 5  ;;  %v7514_v33 = vsel %vm3683_vm13, %v7482_v28, %v13274_v50  ;;  %v8414_v23 = vrot.slane %v6366_v43, 9  ;;  %v5690_v56 = vrot.slane %v5689_v31, 4  ;;  %vm13281_vm11 = vmmov %vm13263_vm2 }
 0x336   : > { %v12705_v9 = vsel %vm3436_vm15, %v8422_v20, %v12454_v30  ;;  %8804 = vmatprep.mubr.msk.bf16.mxu1 %vm13263_vm2, %v7514_v33  ;;  %v6512_v44 = vrot.slane %v6510_v13, 4  ;;  %v6513_v32 = vrot.slane %v12689_v16, 5  ;;  %v8398_v4 = vrot.slane %v5757_v57, 9  ;;  %v12716_v30 = vpop.permute.xlu1 %6995  ;;  %v12724_v20 = vpop.permute.xlu0 %7247 }
 0x337   : > { %v6511_v36 = vsel %vm9226_vm9, %v8414_v23, %v6510_v13  ;;  %v5901_v48 = vrot.slane %v12641_v38, 5  ;;  %v5904_v21 = vrot.slane %v12662_v47, 5  ;;  %13275 = vst [vmem:[#allocation13_spill] sm:$0xff] %v12716_v30  ;;  %v5695_v51 = vsel %vm9313_vm14, %v5690_v56, %v5694_v62  ;;  %v12728_v62 = vld [vmem:[#allocation3 + $0xb8] sm:$0xf] }
 0x338   : > { %7257 = vrot.lane.b32.xlu0 %v8557_v24, %s9072_s23  ;;  %v6514_v45 = vsel %vm9226_vm9, %v6512_v44, %v6513_v32  ;;  %v8383_v55 = vrot.slane %v5150_v25, 9  ;;  %v5300_v43 = vrot.slane %v12701_v12, 5  ;;  %v5340_v24 = vld [vmem:[#allocation3 + $0xb4] sm:$0xf]  ;;  %v8494_v31 = vcombine.low %v5685_v41, %v5695_v51 }
 0x339   : > { %v8558_v2 = vcombine.low %v6511_v36, %v6514_v45  ;;  %v5903_v22 = vrot.slane %v5901_v48, 4  ;;  %v5303_v38 = vrot.slane %v12709_v59, 5  ;;  %v5902_v47 = vsel %vm9226_vm9, %v8398_v4, %v5901_v48  ;;  %v12739_v45 = vld [vmem:[#allocation3 + $0xbc] sm:$0x1] }
 0x33a   : > { %v5302_v28 = vrot.slane %v5300_v43, 4  ;;  %v6282_v13 = vshrl.u32 %v5947_v0, 16  ;;  %v6285_v57 = vshll.u32 %v5947_v0, 16  ;;  %6923 = vrot.lane.b32.xlu1 %v8494_v31, %s9073_s29  ;;  %v5301_v50 = vsel %vm9226_vm9, %v8383_v55, %v5300_v43  ;;  %v12741_v31 = vpop.permute.xlu1 %6739 }
 0x33b   : > { %v5905_v41 = vsel %vm9226_vm9, %v5903_v22, %v5904_v21  ;;  %v5697_v33 = vshrl.u32 %v5340_v24, 16  ;;  %v5700_v23 = vshll.u32 %v5340_v24, 16  ;;  %v5710_v51 = vshrl.u32 %v12728_v62, 16  ;;  %v12746_v22 = vld [vmem:[#allocation3 + $0xa8] sm:$0xf] }
 0x33c   : > { %7259 = vrot.lane.b32.xlu0 %v8558_v2, %s9072_s23  ;;  %v8510_v25 = vcombine.low %v5902_v47, %v5905_v41  ;;  %v5304_v56 = vsel %vm9226_vm9, %v5302_v28, %v5303_v38  ;;  %v6284_v44 = vrot.slane %v6282_v13, 4  ;;  %v6287_v32 = vrot.slane %v6285_v57, 5  ;;  %v12752_v57 = vpop.permute.xlu0 %6993 }
 0x33d   : > { %v8463_v36 = vcombine.low %v5301_v50, %v5304_v56  ;;  %v5699_v4 = vrot.slane %v5697_v33, 4  ;;  %v5702_v48 = vrot.slane %v5700_v23, 5  ;;  %v8526_v21 = vcombine.low %v5947_v0, %v12673_v5 }
 0x33e   : > { %v6288_v55 = vor.u32 %v6287_v32, %v6284_v44  ;;  %v6291_v43 = vshll.u32 %v12673_v5, 16  ;;  %v6295_v2 = vshrl.u32 %v12673_v5, 16  ;;  %7003 = vrot.lane.b32.xlu1 %v8510_v25, %s9071_s22  ;;  %v6301_v38 = vshll.u32 %v12689_v16, 16 }
 0x33f   : > { %v5703_v47 = vor.u32 %v5702_v48, %v5699_v4  ;;  %v5706_v28 = vshll.u32 %v12728_v62, 16  ;;  %v5712_v13 = vrot.slane %v5710_v51, 4  ;;  %v5716_v33 = vshll.u32 %v12739_v45, 16 }
 0x340   : > { %6749 = vrot.lane.b32.xlu0 %v8463_v36, %s9067_s18  ;;  %v6289_v0 = vrot.slane %v6288_v55, 4  ;;  %v6293_v41 = vrot.slane %v6291_v43, 5  ;;  %v6297_v50 = vrot.slane %v6295_v2, 4  ;;  %v8479_v5 = vcombine.low %v5340_v24, %v12728_v62  ;;  %v12768_v55 = vpop.permute.xlu1 %6839 }
 0x341   : > { %v5704_v23 = vrot.slane %v5703_v47, 4  ;;  %v5708_v56 = vrot.slane %v5706_v28, 5  ;;  %v5089_v25 = vshrl.u32 %v12746_v22, 16  ;;  %v12760_v16 = vsel %vm3485_vm1, %v12705_v9, %v12267_v46  ;;  %13276 = vst [vmem:[#allocation10_spill] sm:$0xff] %v12768_v55 }
 0x342   : > { %v6298_v44 = vor.u32 %v6297_v50, %v6293_v41  ;;  %v6303_v32 = vrot.slane %v6301_v38, 5  ;;  %v5092_v36 = vshll.u32 %v12746_v22, 16  ;;  %7099 = vrot.lane.b32.xlu1 %v8526_v21, %s9069_s20  ;;  %v6294_v24 = vsel %vm9313_vm14, %v6289_v0, %v6293_v41  ;;  %v5758_v38 = vld [vmem:[#allocation3 + $0xb4] sm:$0xe]  ;;  %v12774_v0 = vpop.permute.xlu0 %7169 }
 0x343   : > { %v5713_v4 = vor.u32 %v5712_v13, %v5708_v56  ;;  %v5091_v48 = vrot.slane %v5089_v25, 4  ;;  %v5098_v51 = vshll.u32 %v12701_v12, 16  ;;  %v5718_v46 = vrot.slane %v5716_v33, 5  ;;  %v12779_v25 = vld [vmem:[#allocation3 + $0xb4] sm:$0xf] }
 0x344   : > { %6845 = vrot.lane.b32.xlu0 %v8479_v5, %s9068_s19  ;;  %v6299_v43 = vrot.slane %v6298_v44, 4  ;;  %v5094_v9 = vrot.slane %v5092_v36, 5  ;;  %v5102_v2 = vshrl.u32 %v12701_v12, 16  ;;  %v5709_v21 = vsel %vm9313_vm14, %v5704_v23, %v5708_v56  ;;  %v12781_v44 = vld [vmem:[#allocation3 + $0xb8] sm:$0xf] }
 0x345   : > { %v5714_v47 = vrot.slane %v5713_v4, 4  ;;  %v5100_v28 = vrot.slane %v5098_v51, 5  ;;  %v5908_v50 = vrot.slane %v12728_v62, 5  ;;  %v5108_v33 = vshll.u32 %v12709_v59, 16  ;;  %v12785_v62 = vld [vmem:[#allocation3 + $0xbc] sm:$0x1] }
 0x346   : > { %v6304_v13 = vsel %vm9313_vm14, %v6299_v43, %v6303_v32  ;;  %v5095_v41 = vor.u32 %v5094_v9, %v5091_v48  ;;  %v5104_v5 = vrot.slane %v5102_v2, 4  ;;  %v8399_v56 = vrot.slane %v5758_v38, 9 }
 0x347   : > { %v8542_v36 = vcombine.low %v6294_v24, %v6304_v13  ;;  %v5719_v23 = vsel %vm9313_vm14, %v5714_v47, %v5718_v46  ;;  %v5910_v4 = vrot.slane %v5908_v50, 4  ;;  %v5911_v32 = vrot.slane %v12739_v45, 5  ;;  %v12793_v46 = vpop.permute.xlu1 %6915 }
 0x348   : > { %v8495_v51 = vcombine.low %v5709_v21, %v5719_v23  ;;  %v5096_v37 = vrot.slane %v5095_v41, 4  ;;  %v5105_v10 = vor.u32 %v5104_v5, %v5100_v28  ;;  %v5113_v59 = vshrl.u32 %v12779_v25, 16  ;;  %v5949_v21 = vld [vmem:[#allocation3 + $0xc0] sm:$0xf] }
 0x349   : > { %7179 = vrot.lane.b32.xlu1 %v8542_v36, %s9074_s8  ;;  %v5116_v48 = vshll.u32 %v12779_v25, 16  ;;  %v5122_v24 = vshll.u32 %v12781_v44, 16  ;;  %v5126_v43 = vshrl.u32 %v12781_v44, 16  ;;  %v5110_v2 = vrot.slane %v5108_v33, 5  ;;  %v12801_v36 = vpop.permute.xlu0 %6837 }
 0x34a   : > { %6925 = vrot.lane.b32.xlu0 %v8495_v51, %s9073_s29  ;;  %v5106_v9 = vrot.slane %v5105_v10, 4  ;;  %v5912_v38 = vsel %vm9226_vm9, %v5910_v4, %v5911_v32  ;;  %v5132_v45 = vshll.u32 %v12785_v62, 16  ;;  %v5909_v47 = vsel %vm9226_vm9, %v8399_v56, %v5908_v50  ;;  %v13277_v56 = vld [vmem:[#allocation14_spill] sm:$0xff] }
 0x34b   : > { %v5115_v13 = vrot.slane %v5113_v59, 4  ;;  %v5118_v41 = vrot.slane %v5116_v48, 5  ;;  %v5124_v5 = vrot.slane %v5122_v24, 5  ;;  %v5101_v23 = vsel %vm9313_vm14, %v5096_v37, %v5100_v28  ;;  %v8993_v24 = vld [vmem:[#allocation3 + $0x64] sm:$0xf] }
 0x34c   : > { %v5111_v10 = vsel %vm9313_vm14, %v5106_v9, %v5110_v2  ;;  %v8511_v33 = vcombine.low %v5909_v47, %v5912_v38  ;;  %v5128_v51 = vrot.slane %v5126_v43, 4  ;;  %v6306_v55 = vshrl.u32 %v5949_v21, 16  ;;  %v8994_v43 = vld [vmem:[#allocation3 + $0x60] sm:$0xf]  ;;  %v12817_v47 = vpop.permute.xlu1 %6661 }
 0x34d   : > { %v8447_v4 = vcombine.low %v5101_v23, %v5111_v10  ;;  %v5119_v32 = vor.u32 %v5118_v41, %v5115_v13  ;;  %v6309_v30 = vshll.u32 %v5949_v21, 16  ;;  %v7358_v50 = vsel %vm3518_vm4, %v12685_v27, %v12379_v14 }
 0x34e   : > { %v7356_v59 = vsel %vm3518_vm4, %v12760_v16, %v13277_v56  ;;  %7005 = vrot.lane.b32.xlu0 %v8511_v33, %s9071_s22  ;;  %v5129_v37 = vor.u32 %v5128_v51, %v5124_v5  ;;  %v5134_v28 = vrot.slane %v5132_v45, 5  ;;  %v8425_v9 = vcombine.low %v8994_v43, %v8993_v24  ;;  %v5151_v16 = vld [vmem:[#allocation3 + $0xb4] sm:$0xe]  ;;  %v5342_v33 = vld [vmem:[#allocation3 + $0xc0] sm:$0xf] }
 0x34f   : > { %6669 = vrot.lane.b32.xlu1 %v8447_v4, %s9070_s21  ;;  %v5120_v48 = vrot.slane %v5119_v32, 4  ;;  %v6308_v2 = vrot.slane %v6306_v55, 4  ;;  %v6311_v38 = vrot.slane %v6309_v30, 5  ;;  %v6319_v14 = vshrl.u32 %v12807_v26, 16  ;;  %v5967_v55 = vld [vmem:[#allocation3 + $0xc8] sm:$0x1] }
 0x350   : > { %v5130_v13 = vrot.slane %v5129_v37, 4  ;;  %v8527_v27 = vcombine.low %v5949_v21, %v12807_v26  ;;  %v5307_v41 = vrot.slane %v12781_v44, 5  ;;  %v12826_v23 = vsel %vm3436_vm15, %v8425_v9, %v12593_v6 }
 0x351   : > { %v5125_v45 = vsel %vm9313_vm14, %v5120_v48, %v5124_v5  ;;  %v7390_v30 = vsel %vm3551_vm6, %v7358_v50, %v12629_v7  ;;  %v6312_v10 = vor.u32 %v6311_v38, %v6308_v2  ;;  %v12830_v51 = vpop.permute.xlu0 %6913  ;;  %v5310_v5 = vrot.slane %v12785_v62, 5  ;;  %v12839_v50 = vld [vmem:[#allocation3 + $0xc4] sm:$0xf]  ;;  %v12848_v38 = vpop.permute.xlu1 %7091 }
 0x352   : > { %v5135_v21 = vsel %vm9313_vm14, %v5130_v13, %v5134_v28  ;;  %7101 = vrot.lane.b32.xlu0 %v8527_v27, %s9069_s20  ;;  %v5309_v4 = vrot.slane %v5307_v41, 4  ;;  %v7422_v6 = vsel %vm3584_vm7, %v7390_v30, %v12525_v34  ;;  %v8384_v56 = vrot.slane %v5151_v16, 9 }
 0x353   : > { %v8448_v32 = vcombine.low %v5125_v45, %v5135_v21  ;;  %v6313_v37 = vrot.slane %v6312_v10, 4  ;;  %v6315_v7 = vshll.u32 %v12807_v26, 16  ;;  %v6321_v24 = vrot.slane %v6319_v14, 4  ;;  %v13278_v45 = vld [vmem:[#allocation19_spill] sm:$0xff] }
 0x354   : > { %v5311_v48 = vsel %vm9226_vm9, %v5309_v4, %v5310_v5  ;;  %v6325_v28 = vshll.u32 %v5967_v55, 16  ;;  %v5721_v43 = vshrl.u32 %v5342_v33, 16  ;;  %v5308_v62 = vsel %vm9226_vm9, %v8384_v56, %v5307_v41  ;;  %v13279_v41 = vld [vmem:[#allocation17_spill] sm:$0xff] }
 0x355   : > { %6671 = vrot.lane.b32.xlu1 %v8448_v32, %s9070_s21  ;;  %v7454_v34 = vsel %vm3617_vm8, %v7422_v6, %v12308_v60  ;;  %v6317_v9 = vrot.slane %v6315_v7, 5  ;;  %v5724_v2 = vshll.u32 %v5342_v33, 16  ;;  %v8464_v13 = vcombine.low %v5308_v62, %v5311_v48  ;;  %v12853_v30 = vpop.permute.xlu0 %7251  ;;  %v12857_v60 = vld [vmem:[#allocation3 + $0xc8] sm:$0x1]  ;;  %v6367_v7 = vld [vmem:[#allocation3 + $0xc0] sm:$0xe] }
 0x356   : > { %v5723_v27 = vrot.slane %v5721_v43, 4  ;;  %v5734_v16 = vshrl.u32 %v12839_v50, 16  ;;  %v7388_v14 = vsel %vm3551_vm6, %v7356_v59, %v13278_v45  ;;  %v6327_v21 = vrot.slane %v6325_v28, 5 }
 0x357   : > { %v6322_v10 = vor.u32 %v6321_v24, %v6317_v9  ;;  %v5726_v4 = vrot.slane %v5724_v2, 5  ;;  %v7420_v5 = vsel %vm3584_vm7, %v7388_v14, %v13279_v41  ;;  %v6318_v6 = vsel %vm9313_vm14, %v6313_v37, %v6317_v9 }
 0x358   : > { %v8480_v32 = vcombine.low %v5342_v33, %v12839_v50  ;;  %v7452_v56 = vsel %vm3617_vm8, %v7420_v5, %v12401_v40  ;;  %v6517_v59 = vrot.slane %v12807_v26, 5  ;;  %v5730_v43 = vshll.u32 %v12839_v50, 16 }
 0x359   : > { %6751 = vrot.lane.b32.xlu1 %v8464_v13, %s9067_s18  ;;  %v6323_v48 = vrot.slane %v6322_v10, 4  ;;  %v7484_v24 = vsel %vm3650_vm12, %v7452_v56, %v12648_v11  ;;  %v5727_v28 = vor.u32 %v5726_v4, %v5723_v27  ;;  %v6520_v2 = vrot.slane %v5967_v55, 5  ;;  %v12874_v13 = vpop.permute.xlu1 %7167  ;;  %v8995_v55 = vld [vmem:[#allocation3 + $0x58] sm:$0xf]  ;;  %v4130_v4 = vld [vmem:[#allocation3 + $0xcc] sm:$0x1] }
 0x35a   : > { %v6519_v62 = vrot.slane %v6517_v59, 4  ;;  %v5736_v37 = vrot.slane %v5734_v16, 4  ;;  %v5740_v33 = vshll.u32 %v12857_v60, 16  ;;  %v8415_v9 = vrot.slane %v6367_v7, 9  ;;  %v8996_v16 = vld [vmem:[#allocation3 + $0x54] sm:$0xf] }
 0x35b   : > { %v6328_v40 = vsel %vm9313_vm14, %v6323_v48, %v6327_v21  ;;  %v5732_v45 = vrot.slane %v5730_v43, 5  ;;  %v7516_v26 = vsel %vm3683_vm13, %v7484_v24, %v12487_v61  ;;  %v5728_v27 = vrot.slane %v5727_v28, 4  ;;  %v12879_v41 = vpop.permute.xlu0 %6917  ;;  %v12889_v56 = vld [vmem:[#allocation3 + $0xd0] sm:$0xf]  ;;  %s9075_s18 = smov [#allocation4]  }
 0x35c   : > { %v8543_v14 = vcombine.low %v6318_v6, %v6328_v40  ;;  %v6521_v11 = vsel %vm9226_vm9, %v6519_v62, %v6520_v2  ;;  %8805 = vmatmul.mubr.msk.bf16.gmra.mxu1 %vm13280_vm10, %v7516_v26  ;;  %v8424_v10 = vcombine.low %v8996_v16, %v8995_v55  ;;  %v7330_v21 = vsel %vm3485_vm1, %v12826_v23, %v12462_v15  ;;  %v13282_v2 = vld [vmem:[#allocation18_spill] sm:$0xff] }
 0x35d   : > { %6847 = vrot.lane.b32.xlu1 %v8480_v32, %s9068_s19  ;;  %v6518_v61 = vsel %vm9226_vm9, %v8415_v9, %v6517_v59  ;;  %v5737_v5 = vor.u32 %v5736_v37, %v5732_v45  ;;  %v7486_v6 = vsel %vm3650_vm12, %v7454_v34, %v12574_v58  ;;  %v5742_v7 = vrot.slane %v5740_v33, 5  ;;  %v4188_v32 = vld [vmem:[#allocation3 + $0xd4] sm:$0x1]  ;;  %v5759_v58 = vld [vmem:[#allocation3 + $0xc0] sm:$0xe] }
 0x35e   : > { %7181 = vrot.lane.b32.xlu0 %v8543_v14, %s9074_s8  ;;  %v7288_v48 = vsel %vm3436_vm15, %v8424_v10, %v12675_v54  ;;  %v7518_v15 = vsel %vm3683_vm13, %v7486_v6, %v12438_v53  ;;  %v5915_v23 = vrot.slane %v12839_v50, 5  ;;  %v8559_v24 = vcombine.low %v6518_v61, %v6521_v11  ;;  %v8997_v16 = vld [vmem:[#allocation3 + $0x70] sm:$0xf]  ;;  %v8998_v10 = vld [vmem:[#allocation3 + $0x6c] sm:$0xf] }
 0x35f   : > { %v5738_v59 = vrot.slane %v5737_v5, 4  ;;  %v7328_v28 = vsel %vm3485_vm1, %v7288_v48, %v12515_v42  ;;  %8808 = vmatprep.mubr.msk.bf16.mxu1 %vm13281_vm11, %v7518_v15  ;;  %v4131_v34 = vsel %vm9172_vm3, 0, %v4130_v4  ;;  %v5733_v54 = vsel %vm9313_vm14, %v5728_v27, %v5732_v45  ;;  %v12906_v62 = vpop.permute.xlu0 %6997 }
 0x360   : > { %v5917_v43 = vrot.slane %v5915_v23, 4  ;;  %v5918_v53 = vrot.slane %v12857_v60, 5  ;;  %4132 = vst [vmem:[#allocation3 + $0xcc] sm:$0x1] %v4131_v34  ;;  %v6343_v50 = vshrl.u32 %v12889_v56, 16  ;;  %v7360_v37 = vsel %vm3518_vm4, %v7328_v28, %v13282_v2  ;;  %v6660_v60 = vpop.permute.xlu1 %6659 }
 0x361   : > { %v5743_v42 = vsel %vm9313_vm14, %v5738_v59, %v5742_v7  ;;  %v13283_v33 = vmov 0   ;;  %v4189_v1 = vsel %vm9200_vm5, 0, %v4188_v32  ;;  %v6339_v40 = vshll.u32 %v12889_v56, 16  ;;  %v8999_v32 = vld [vmem:[#allocation3 + $0x7c] sm:$0xf] }
 0x362   : > { %4134 = vst.msk [vmem:[#allocation3 + $0xcc] sm:$0xf] %vm310_vm0, %v13283_v33  ;;  %v7362_v9 = vsel %vm3518_vm4, %v7330_v21, %v12603_v19  ;;  %7261 = vrot.lane.b32.xlu0 %v8559_v24, %s9072_s23  ;;  %v8496_v45 = vcombine.low %v5733_v54, %v5743_v42  ;;  %v8400_v26 = vrot.slane %v5759_v58, 9  ;;  %4190 = vst [vmem:[#allocation3 + $0xd4] sm:$0x1] %v4189_v1  ;;  %v6345_v27 = vrot.slane %v6343_v50, 4 }
 0x363   : > { %v5919_v14 = vsel %vm9226_vm9, %v5917_v43, %v5918_v53  ;;  %v12922_v11 = vrot.slane %v6339_v40, 5  ;;  %v7394_v8 = vsel %vm3551_vm6, %v7362_v9, %v12830_v51  ;;  %v7392_v19 = vsel %vm3551_vm6, %v7360_v37, %v12568_v49  ;;  %v7094_v48 = vpop.permute.xlu0 %7093  ;;  %v9000_v24 = vld [vmem:[#allocation3 + $0x78] sm:$0xf]  ;;  %vm13284_vm0 = vmmov %vm13263_vm2 }
 0x364   : > { %6927 = vrot.lane.b32.xlu1 %v8496_v45, %s9073_s29  ;;  %v7426_v55 = vsel %vm3584_vm7, %v7394_v8, %v12752_v57  ;;  %v8426_v4 = vcombine.low %v8998_v10, %v8997_v16  ;;  %v5916_v21 = vsel %vm9226_vm9, %v8400_v26, %v5915_v23  ;;  %v7424_v51 = vsel %vm3584_vm7, %v7392_v19, %v12477_v18  ;;  %v12942_v7 = vpop.permute.xlu1 %6743  ;;  %vm13285_vm3 = vmmov %vm13284_vm0 }
 0x365   : > { %v7458_v61 = vsel %vm3617_vm8, %v7426_v55, %v12558_v35  ;;  %v8512_v5 = vcombine.low %v5916_v21, %v5919_v14  ;;  %v7456_v6 = vsel %vm3617_vm8, %v7424_v51, %v12622_v52  ;;  %v6346_v15 = vor.u32 %v6345_v27, %v12922_v11  ;;  %v13286_v27 = vld [vmem:[#allocation13_spill] sm:$0xff]  ;;  %vm13287_vm5 = vmmov %vm13284_vm0 }
 0x366   : > { %v7294_v57 = vsel %vm3436_vm15, %v8426_v4, %v6660_v60  ;;  %v7490_v49 = vsel %vm3650_vm12, %v7458_v61, %v12774_v0  ;;  %v7488_v35 = vsel %vm3650_vm12, %v7456_v6, %v12874_v13  ;;  %v6524_v52 = vrot.slane %v12889_v56, 5  ;;  %v9002_v6 = vld [vmem:[#allocation3 + $0x84] sm:$0xf]  ;;  %vm13292_vm2 = vmmov %vm13284_vm0 }
 0x367   : > { %v7332_v18 = vsel %vm3485_vm1, %v7294_v57, %v12741_v31  ;;  %v8427_v59 = vcombine.low %v9000_v24, %v8999_v32  ;;  %v7520_v0 = vsel %vm3683_vm13, %v7488_v35, %v12724_v20  ;;  %v7522_v31 = vsel %vm3683_vm13, %v7490_v49, %v12654_v39  ;;  %vm13295_vm10 = vmmov %vm13284_vm0 }
 0x368   : > { %7007 = vrot.lane.b32.xlu1 %v8512_v5, %s9071_s22  ;;  %v7364_v28 = vsel %vm3518_vm4, %v7332_v18, %v12546_v3  ;;  %8809 = vmatmul.mubr.msk.bf16.gmra.mxu1 %vm13284_vm0, %v7520_v0  ;;  %v6347_v3 = vrot.slane %v6346_v15, 4  ;;  %v8431_v9 = vcombine.low %v12746_v22, %v12701_v12  ;;  %v8432_v45 = vcombine.low %v12779_v25, %v12781_v44  ;;  %v13289_v18 = vld [vmem:[#allocation10_spill] sm:$0xff]  ;;  %vm13296_vm11 = vmmov %vm13284_vm0  ;;  %v8688_v44 = vld [vmem:[%s9207_s17 + $0x10] sm:$0xff]   ;;  %s269_s22 = sand.u32 1, %s9056_s25  }
 0x369   : > { %v5951_v23 = vld [vmem:[#allocation3 + $0xcc] sm:$0xf]  ;;  %v5968_v54 = vld [vmem:[#allocation3 + $0xd4] sm:$0x1]  ;;  %v7297_v50 = vsel %vm3436_vm15, %v8427_v59, %v12817_v47  ;;  %8812 = vmatprep.mubr.msk.bf16.mxu1 %vm13285_vm3, %v7522_v31  ;;  %v7396_v1 = vsel %vm3551_vm6, %v7364_v28, %v12793_v46  ;;  %s8042_s14 = scalar_lea.sflag [#allocation5], %s269_s22 }
 0x36a   : > { %v6330_v58 = vshrl.u32 %v5951_v23, 16  ;;  %v6333_v34 = vshll.u32 %v5951_v23, 16  ;;  %v8528_v13 = vcombine.low %v5951_v23, %v12889_v56  ;;  %v6349_v43 = vshll.u32 %v5968_v54, 16  ;;  %v6368_v53 = vld [vmem:[#allocation3 + $0xcc] sm:$0xe] }
 0x36b   : > { %v6526_v56 = vrot.slane %v6524_v52, 4  ;;  %v6920_v37 = vpop.permute.xlu1 %6919  ;;  %v8416_v40 = vrot.slane %v6368_v53, 9  ;;  %v6527_v60 = vrot.slane %v5968_v54, 5  ;;  %v7334_v47 = vsel %vm3485_vm1, %v7297_v50, %v12691_v17  ;;  %v9003_v54 = vld [vmem:[#allocation3 + $0x94] sm:$0xf]  ;;  %v13291_v31 = vld [vmem:[#allocation9_spill] sm:$0xff] }
 0x36c   : > { %v6332_v20 = vrot.slane %v6330_v58, 4  ;;  %v6335_v42 = vrot.slane %v6333_v34, 5  ;;  %7103 = vrot.lane.b32.xlu1 %v8528_v13, %s9069_s20  ;;  %v6351_v2 = vrot.slane %v6349_v43, 5  ;;  %v7174_v33 = vpop.permute.xlu0 %7173  ;;  %v7428_v8 = vsel %vm3584_vm7, %v7396_v1, %v13286_v27 }
 0x36d   : > { %v7366_v46 = vsel %vm3518_vm4, %v7334_v47, %v12801_v36  ;;  %v6525_v55 = vsel %vm9226_vm9, %v8416_v40, %v6524_v52  ;;  %v6528_v19 = vsel %vm9226_vm9, %v6526_v56, %v6527_v60  ;;  %v7460_v36 = vsel %vm3617_vm8, %v7428_v8, %v12848_v38  ;;  %vm13288_vm9 = vmmov %vm13284_vm0 }
 0x36e   : > { %v6336_v39 = vor.u32 %v6335_v42, %v6332_v20  ;;  %v6352_v14 = vsel %vm9313_vm14, %v6347_v3, %v6351_v2  ;;  %v7398_v16 = vsel %vm3551_vm6, %v7366_v46, %v12879_v41  ;;  %v8560_v29 = vcombine.low %v6525_v55, %v6528_v19  ;;  %v13294_v55 = vld [vmem:[#allocation7_spill] sm:$0xff] }
 0x36f   : > { %v7430_v4 = vsel %vm3584_vm7, %v7398_v16, %v12906_v62  ;;  %v9001_v62 = vld [vmem:[#allocation3 + $0x88] sm:$0xf]  ;;  %v8429_v43 = vcombine.low %v13291_v31, %v9003_v54 }
 0x370   : > { %v6337_v26 = vrot.slane %v6336_v39, 4  ;;  %v7462_v63 = vsel %vm3617_vm8, %v7430_v4, %v7094_v48  ;;  %v8428_v57 = vcombine.low %v9002_v6, %v9001_v62 }
 0x371   : > { %v7254_v61 = vpop.permute.xlu0 %7253  ;;  %v7494_v51 = vsel %vm3650_vm12, %v7462_v63, %v7174_v33 }
 0x372   : > { %v6342_v17 = vsel %vm9313_vm14, %v6337_v26, %v12922_v11  ;;  %v7172_v21 = vpop.permute.xlu1 %7171  ;;  %v7526_v5 = vsel %vm3683_vm13, %v7494_v51, %v7254_v61  ;;  %vm13290_vm14 = vmmov %vm13284_vm0 }
 0x373   : > { %v8544_v10 = vcombine.low %v6342_v17, %v6352_v14  ;;  %v7492_v11 = vsel %vm3650_vm12, %v7460_v36, %v7172_v21  ;;  %v13293_v17 = vld [vmem:[#allocation12_spill] sm:$0xff] }
 0x374   : > { %v7524_v41 = vsel %vm3683_vm13, %v7492_v11, %v12853_v30  ;;  %v8430_v19 = vcombine.low %v13294_v55, %v13293_v17 }
 0x375   : > { %7183 = vrot.lane.b32.xlu1 %v8544_v10, %s9074_s8  ;;  %8813 = vmatmul.mubr.msk.bf16.gmra.mxu1 %vm13287_vm5, %v7524_v41  ;;  %s8622_s8 = sshll.u32 %s9137_s28, 8  ;;  %s9008_s28 = sshll.u32 %s9075_s18, 4  ;;  %s9009_s28 = int_to_ptr.vmem [resolvable:$false] %s9008_s28 }
 0x376   : > { %8816 = vmatprep.mubr.msk.bf16.mxu1 %vm13288_vm9, %v7526_v5  ;;  %s8054_s13 = scalar_lea.hbm %s13202_s7, %s8622_s8  ;;  %s9010_s19 = scalar_lea.vmem %s9009_s28, 512 }
 0x379   : > { %7263 = vrot.lane.b32.xlu1 %v8560_v29, %s9072_s23  ;;  %s8119_s23 = sshll.u32 %s269_s22, 4 }
 0x37a   : > { %s13135_s29 = scalar_lea.vmem [#allocation4], %s8119_s23 }
 0x37d   : > { %v6664_v38 = vpop.permute.xlu1 %6663 }
 0x37e   : > { %v7300_v48 = vsel %vm3436_vm15, %v8428_v57, %v6664_v38  ;;  %v8624_v57 = vld [vmem:[%s9207_s17] sm:$0xff]  }
 0x37f   : > { %v7336_v35 = vsel %vm3485_vm1, %v7300_v48, %v12942_v7 }
 0x380   : > { %v7368_v23 = vsel %vm3518_vm4, %v7336_v35, %v13289_v18  ;;  %v8625_v18 = vunpack.c.l.bf16 %v8624_v57 }
 0x381   : > { %v7400_v32 = vsel %vm3551_vm6, %v7368_v23, %v6920_v37 }
 0x384   : > { %v7256_v49 = vpop.permute.xlu0 %7255 }
 0x386   : > { %v7000_v15 = vpop.permute.xlu1 %6999 }
 0x387   : > { %v7432_v59 = vsel %vm3584_vm7, %v7400_v32, %v7000_v15  ;;  %v13040_v15 = vld [vmem:[%s13200_s5] ss:$0 sm:$0xff] }
 0x388   : > { %v6746_v30 = vpop.permute.xlu0 %6745 }
 0x38a   : > { %v7096_v52 = vpop.permute.xlu1 %7095 }
 0x38b   : > { %v7464_v0 = vsel %vm3617_vm8, %v7432_v59, %v7096_v52  ;;  %v13047_v52 = vld [vmem:[%s13201_s6] ss:$0 sm:$0xff] }
 0x38c   : > { %v6842_v24 = vpop.permute.xlu0 %6841 }
 0x392   : > { %v7176_v28 = vpop.permute.xlu1 %7175 }
 0x393   : > { %v7496_v58 = vsel %vm3650_vm12, %v7464_v0, %v7176_v28  ;;  %v6922_v13 = vpop.permute.xlu0 %6921 }
 0x394   : > { %v7528_v34 = vsel %vm3683_vm13, %v7496_v58, %v7256_v49 }
 0x395   : > { %8817 = vmatmul.mubr.msk.bf16.gmra.mxu1 %vm13290_vm14, %v7528_v34 }
 0x397   : > { %v6666_v7 = vpop.permute.xlu1 %6665  ;;  %v7002_v53 = vpop.permute.xlu0 %7001 }
 0x398   : > { %v7303_v50 = vsel %vm3436_vm15, %v8429_v43, %v6666_v7 }
 0x399   : > { %v7338_v42 = vsel %vm3485_vm1, %v7303_v50, %v6746_v30 }
 0x39a   : > { %v7370_v2 = vsel %vm3518_vm4, %v7338_v42, %v6842_v24  ;;  %v8687_v24 = vld [vmem:[%s9207_s17 + $0x8] sm:$0xff]  }
 0x39b   : > { %v7098_v3 = vpop.permute.xlu0 %7097  ;;  %v7402_v37 = vsel %vm3551_vm6, %v7370_v2, %v6922_v13  ;;  %v8626_v13 = vunpack.c.h.bf16 %v8624_v57  ;;  %v8629_v7 = vunpack.c.l.bf16 %v8687_v24  ;;  %v8630_v2 = vunpack.c.h.bf16 %v8687_v24 }
 0x39c   : > { %v7434_v1 = vsel %vm3584_vm7, %v7402_v37, %v7002_v53 }
 0x39d   : > { %v7466_v40 = vsel %vm3617_vm8, %v7434_v1, %v7098_v3 }
 0x39e   : > { %v6668_v20 = vpop.permute.xlu1 %6667 }
 0x39f   : > { %v7306_v10 = vsel %vm3436_vm15, %v8430_v19, %v6668_v20 }
 0x3a2   : > { %v6748_v56 = vpop.permute.xlu1 %6747 }
 0x3a3   : > { %v7340_v4 = vsel %vm3485_vm1, %v7306_v10, %v6748_v56 }
 0x3a6   : > { %v7178_v33 = vpop.permute.xlu0 %7177  ;;  %v6844_v39 = vpop.permute.xlu1 %6843 }
 0x3a7   : > { %v7498_v60 = vsel %vm3650_vm12, %v7466_v40, %v7178_v33  ;;  %v7372_v36 = vsel %vm3518_vm4, %v7340_v4, %v6844_v39 }
 0x3aa   : > { %v7258_v47 = vpop.permute.xlu0 %7257 }
 0x3ab   : > { %v7530_v26 = vsel %vm3683_vm13, %v7498_v60, %v7258_v47 }
 0x3ac   : > { %8820 = vmatprep.mubr.msk.bf16.mxu1 %vm13292_vm2, %v7530_v26  ;;  %v6924_v14 = vpop.permute.xlu1 %6923 }
 0x3ad   : > { %v7404_v61 = vsel %vm3551_vm6, %v7372_v36, %v6924_v14 }
 0x3ae   : > { %v7260_v27 = vpop.permute.xlu0 %7259 }
 0x3b0   : > { %v7004_v8 = vpop.permute.xlu1 %7003 }
 0x3b1   : > { %v7436_v63 = vsel %vm3584_vm7, %v7404_v61, %v7004_v8 }
 0x3b2   : > { %v6750_v46 = vpop.permute.xlu0 %6749 }
 0x3b4   : > { %v7100_v16 = vpop.permute.xlu1 %7099 }
 0x3b5   : > { %v7468_v11 = vsel %vm3617_vm8, %v7436_v63, %v7100_v16 }
 0x3b6   : > { %v6846_v21 = vpop.permute.xlu0 %6845 }
 0x3bb   : > { %v7180_v29 = vpop.permute.xlu1 %7179 }
 0x3bc   : > { %v7500_v51 = vsel %vm3650_vm12, %v7468_v11, %v7180_v29  ;;  %v6926_v5 = vpop.permute.xlu0 %6925 }
 0x3bd   : > { %v7532_v41 = vsel %vm3683_vm13, %v7500_v51, %v7260_v27  ;;  %v8633_v51 = vunpack.c.l.bf16 %v8688_v44 }
 0x3be   : > { %8821 = vmatmul.mubr.msk.bf16.gmra.mxu1 %vm13295_vm10, %v7532_v41 }
 0x3c0   : > { %v7006_v62 = vpop.permute.xlu0 %7005 }
 0x3c1   : > { %v6670_v38 = vpop.permute.xlu1 %6669 }
 0x3c2   : > { %v7309_v49 = vsel %vm3436_vm15, %v8431_v9, %v6670_v38 }
 0x3c3   : > { %v7342_v23 = vsel %vm3485_vm1, %v7309_v49, %v6750_v46 }
 0x3c4   : > { %v7102_v22 = vpop.permute.xlu0 %7101  ;;  %v7374_v28 = vsel %vm3518_vm4, %v7342_v23, %v6846_v21 }
 0x3c5   : > { %v7406_v50 = vsel %vm3551_vm6, %v7374_v28, %v6926_v5 }
 0x3c6   : > { %v8798_v6 = vpop.f32.mrf.mxu1  ;;  %v7438_v56 = vsel %vm3584_vm7, %v7406_v50, %v7006_v62  ;;  %v8689_v62 = vld [vmem:[%s9207_s17 + $0x18] sm:$0xff]  }
 0x3c7   : > { %v6672_v48 = vpop.permute.xlu1 %6671  ;;  %v7778_v9 = vmul.f32 %v8798_v6, %v13040_v15  ;;  %v7470_v39 = vsel %vm3617_vm8, %v7438_v56, %v7102_v22 }
 0x3c8   : > { %v7642_v35 = vpop.f32.mrf.mxu1  ;;  %v7312_v55 = vsel %vm3436_vm15, %v8432_v45, %v6672_v48  ;;  %v8634_v48 = vunpack.c.h.bf16 %v8688_v44 }
 0x3c9   : > { %v7776_v30 = vmul.f32 %v13040_v15, %v7642_v35  ;;  %v7817_v54 = vadd.f32 %v13047_v52, %v7778_v9  ;;  %v8637_v35 = vunpack.c.l.bf16 %v8689_v62 }
 0x3ca   : > { %v8799_v12 = vpop.f32.mrf.mxu1 }
 0x3cb   : > { %v7815_v32 = vadd.f32 %v13047_v52, %v7776_v30  ;;  %v6752_v59 = vpop.permute.xlu1 %6751  ;;  %v7779_v31 = vmul.f32 %v8799_v12, %v13040_v15  ;;  %v7913_v1 = vadd.f32 %v8629_v7, %v7817_v54 }
 0x3cc   : > { %v7645_v0 = vpop.f32.mrf.mxu1  ;;  %v7344_v19 = vsel %vm3485_vm1, %v7312_v55, %v6752_v59  ;;  %v8638_v59 = vunpack.c.h.bf16 %v8689_v62 }
 0x3cd   : > { %v7777_v58 = vmul.f32 %v13040_v15, %v7645_v0  ;;  %v7911_v34 = vadd.f32 %v8625_v18, %v7815_v32  ;;  %v7818_v37 = vadd.f32 %v13047_v52, %v7779_v31  ;;  %v7945_v14 = vmax.f32 %v7913_v1, 0.0 }
 0x3cf   : > { %v7816_v43 = vadd.f32 %v13047_v52, %v7777_v58  ;;  %v7943_v53 = vmax.f32 %v7911_v34, 0.0  ;;  %v6848_v42 = vpop.permute.xlu1 %6847  ;;  %v7914_v27 = vadd.f32 %v8630_v2, %v7818_v37 }
 0x3d0   : > { %v7182_v20 = vpop.permute.xlu0 %7181  ;;  %v7376_v16 = vsel %vm3518_vm4, %v7344_v19, %v6848_v42 }
 0x3d1   : > { %7975 = vxpose.xlu0.b32.start [1/16] (narrow) %v7943_v53, 8  ;;  %v7912_v3 = vadd.f32 %v8626_v13, %v7816_v43  ;;  %v7502_v40 = vsel %vm3650_vm12, %v7470_v39, %v7182_v20  ;;  %v7946_v46 = vmax.f32 %v7914_v27, 0.0  ;;  %v8690_v13 = vld [vmem:[%s9207_s17 + $0x20] sm:$0xff]   ;;  %v8691_v20 = vld [vmem:[%s9207_s17 + $0x28] sm:$0xff]  }
 0x3d2   : > { %v8641_v31 = vunpack.c.l.bf16 %v8690_v13  ;;  %v8642_v56 = vunpack.c.h.bf16 %v8690_v13  ;;  %v8645_v37 = vunpack.c.l.bf16 %v8691_v20  ;;  %v8646_v27 = vunpack.c.h.bf16 %v8691_v20 }
 0x3d3   : > { %v7944_v33 = vmax.f32 %v7912_v3, 0.0 }
 0x3d4   : > { %v7262_v60 = vpop.permute.xlu0 %7261 }
 0x3d5   : > { %7976 = vxpose.xlu0.b32.cont [2/16] (narrow) %v7944_v33, 8  ;;  %v7534_v47 = vsel %vm3683_vm13, %v7502_v40, %v7262_v60 }
 0x3d6   : > { %v6928_v26 = vpop.permute.xlu1 %6927  ;;  %8824 = vmatprep.mubr.msk.bf16.mxu1 %vm13296_vm11, %v7534_v47 }
 0x3d7   : > { %v7408_v4 = vsel %vm3551_vm6, %v7376_v16, %v6928_v26 }
 0x3d9   : > { %7977 = vxpose.xlu0.b32.cont [3/16] (narrow) %v7945_v14, 8 }
 0x3da   : > { %v7008_v8 = vpop.permute.xlu1 %7007 }
 0x3db   : > { %v7440_v36 = vsel %vm3584_vm7, %v7408_v4, %v7008_v8 }
 0x3dd   : > { %7978 = vxpose.xlu0.b32.cont [4/16] (narrow) %v7946_v46, 8  ;;  %v8692_v46 = vld [vmem:[%s9207_s17 + $0x30] sm:$0xff]  }
 0x3de   : > { %v7104_v17 = vpop.permute.xlu1 %7103  ;;  %v8649_v19 = vunpack.c.l.bf16 %v8692_v46 }
 0x3df   : > { %v7472_v21 = vsel %vm3617_vm8, %v7440_v36, %v7104_v17 }
 0x3e7   : > { %v7184_v10 = vpop.permute.xlu1 %7183 }
 0x3e8   : > { %v7504_v61 = vsel %vm3650_vm12, %v7472_v21, %v7184_v10 }
 0x3eb   : > { %v7264_v63 = vpop.permute.xlu1 %7263 }
 0x3ec   : > { %v7536_v11 = vsel %vm3683_vm13, %v7504_v61, %v7264_v63 }
 0x3ed   : > { %8825 = vmatmul.mubr.msk.bf16.gmra.mxu1 %vm13284_vm0, %v7536_v11  ;;  %v8650_v11 = vunpack.c.h.bf16 %v8692_v46  ;;  %v8697_v46 = vld [vmem:[%s9207_s17 + $0x58] sm:$0xff]  }
 0x3f5   : > { %v8802_v25 = vpop.f32.mrf.mxu1 }
 0x3f6   : > { %v7782_v5 = vmul.f32 %v8802_v25, %v13040_v15 }
 0x3f7   : > { %v7658_v45 = vpop.f32.mrf.mxu1 }
 0x3f8   : > { %v7780_v29 = vmul.f32 %v13040_v15, %v7658_v45  ;;  %v7821_v30 = vadd.f32 %v13047_v52, %v7782_v5 }
 0x3f9   : > { %v8803_v41 = vpop.f32.mrf.mxu1 }
 0x3fa   : > { %v7819_v38 = vadd.f32 %v13047_v52, %v7780_v29  ;;  %v7783_v18 = vmul.f32 %v8803_v41, %v13040_v15  ;;  %v7917_v24 = vadd.f32 %v8637_v35, %v7821_v30  ;;  %v8693_v29 = vld [vmem:[%s9207_s17 + $0x38] sm:$0xff]  }
 0x3fb   : > { %v7661_v6 = vpop.f32.mrf.mxu1 }
 0x3fc   : > { %v7781_v57 = vmul.f32 %v13040_v15, %v7661_v6  ;;  %v7915_v49 = vadd.f32 %v8633_v51, %v7819_v38  ;;  %v7822_v9 = vadd.f32 %v13047_v52, %v7783_v18  ;;  %v7949_v0 = vmax.f32 %v7917_v24, 0.0  ;;  %v8695_v24 = vld [vmem:[%s9207_s17 + $0x48] sm:$0xff]  }
 0x3fd   : > { %v8653_v6 = vunpack.c.l.bf16 %v8693_v29 }
 0x3fe   : > { %v7820_v23 = vadd.f32 %v13047_v52, %v7781_v57  ;;  %v7947_v12 = vmax.f32 %v7915_v49, 0.0  ;;  %v7918_v28 = vadd.f32 %v8638_v59, %v7822_v9  ;;  %v8694_v57 = vld [vmem:[%s9207_s17 + $0x40] sm:$0xff]  }
 0x3ff   : > { %v8657_v30 = vunpack.c.l.bf16 %v8694_v57 }
 0x400   : > { %7979 = vxpose.xlu0.b32.cont [5/16] (narrow) %v7947_v12, 8  ;;  %v7916_v22 = vadd.f32 %v8634_v48, %v7820_v23  ;;  %v7950_v58 = vmax.f32 %v7918_v28, 0.0 }
 0x402   : > { %v7948_v32 = vmax.f32 %v7916_v22, 0.0  ;;  %v8654_v22 = vunpack.c.h.bf16 %v8693_v29 }
 0x404   : > { %7980 = vxpose.xlu0.b32.cont [6/16] (narrow) %v7948_v32, 8 }
 0x408   : > { %7981 = vxpose.xlu0.b32.cont [7/16] (narrow) %v7949_v0, 8 }
 0x40c   : > { %7982 = vxpose.xlu0.b32.cont [8/16] (narrow) %v7950_v58, 8  ;;  %v8658_v58 = vunpack.c.h.bf16 %v8694_v57 }
 0x41c   : > { %v8806_v34 = vpop.f32.mrf.mxu1 }
 0x41d   : > { %v7786_v53 = vmul.f32 %v8806_v34, %v13040_v15 }
 0x41e   : > { %v7674_v7 = vpop.f32.mrf.mxu1 }
 0x41f   : > { %v7784_v54 = vmul.f32 %v13040_v15, %v7674_v7  ;;  %v7825_v33 = vadd.f32 %v13047_v52, %v7786_v53  ;;  %v8661_v7 = vunpack.c.l.bf16 %v8695_v24 }
 0x420   : > { %v8807_v43 = vpop.f32.mrf.mxu1 }
 0x421   : > { %v7823_v50 = vadd.f32 %v13047_v52, %v7784_v54  ;;  %v7787_v1 = vmul.f32 %v8807_v43, %v13040_v15  ;;  %v7921_v14 = vadd.f32 %v8645_v37, %v7825_v33 }
 0x422   : > { %v7677_v42 = vpop.f32.mrf.mxu1 }
 0x423   : > { %v7785_v3 = vmul.f32 %v13040_v15, %v7677_v42  ;;  %v7919_v2 = vadd.f32 %v8641_v31, %v7823_v50  ;;  %v7826_v47 = vadd.f32 %v13047_v52, %v7787_v1  ;;  %v7953_v16 = vmax.f32 %v7921_v14, 0.0 }
 0x425   : > { %v7824_v39 = vadd.f32 %v13047_v52, %v7785_v3  ;;  %v7951_v40 = vmax.f32 %v7919_v2, 0.0  ;;  %v7922_v10 = vadd.f32 %v8646_v27, %v7826_v47 }
 0x427   : > { %7983 = vxpose.xlu0.b32.cont [9/16] (narrow) %v7951_v40, 8  ;;  %v7920_v60 = vadd.f32 %v8642_v56, %v7824_v39  ;;  %v7954_v25 = vmax.f32 %v7922_v10, 0.0  ;;  %v8662_v56 = vunpack.c.h.bf16 %v8695_v24  ;;  %v8696_v40 = vld [vmem:[%s9207_s17 + $0x50] sm:$0xff]   ;;  %v8669_v10 = vunpack.c.l.bf16 %v8697_v46 }
 0x428   : > { %v8810_v8 = vpop.f32.mrf.mxu1 }
 0x429   : > { %v7952_v26 = vmax.f32 %v7920_v60, 0.0  ;;  %v7790_v44 = vmul.f32 %v8810_v8, %v13040_v15 }
 0x42a   : > { %v7690_v17 = vpop.f32.mrf.mxu1 }
 0x42b   : > { %7984 = vxpose.xlu0.b32.cont [10/16] (narrow) %v7952_v26, 8  ;;  %v7788_v55 = vmul.f32 %v13040_v15, %v7690_v17  ;;  %v7829_v5 = vadd.f32 %v13047_v52, %v7790_v44  ;;  %v8665_v26 = vunpack.c.l.bf16 %v8696_v40 }
 0x42c   : > { %v8811_v4 = vpop.f32.mrf.mxu1 }
 0x42d   : > { %v7827_v36 = vadd.f32 %v13047_v52, %v7788_v55  ;;  %v7791_v38 = vmul.f32 %v8811_v4, %v13040_v15  ;;  %v7925_v23 = vadd.f32 %v8653_v6, %v7829_v5 }
 0x42e   : > { %v7693_v21 = vpop.f32.mrf.mxu1 }
 0x42f   : > { %7985 = vxpose.xlu0.b32.cont [11/16] (narrow) %v7953_v16, 8  ;;  %v7789_v61 = vmul.f32 %v13040_v15, %v7693_v21  ;;  %v7923_v63 = vadd.f32 %v8649_v19, %v7827_v36  ;;  %v7830_v18 = vadd.f32 %v13047_v52, %v7791_v38  ;;  %v7957_v34 = vmax.f32 %v7925_v23, 0.0  ;;  %v8698_v38 = vld [vmem:[%s9207_s17 + $0x60] sm:$0xff]  }
 0x430   : > { %v8666_v16 = vunpack.c.h.bf16 %v8696_v40  ;;  %v8673_v57 = vunpack.c.l.bf16 %v8698_v38 }
 0x431   : > { %v7828_v45 = vadd.f32 %v13047_v52, %v7789_v61  ;;  %v7955_v51 = vmax.f32 %v7923_v63, 0.0  ;;  %v7926_v13 = vadd.f32 %v8654_v22, %v7830_v18 }
 0x433   : > { %7986 = vxpose.xlu0.b32.cont [12/16] (narrow) %v7954_v25, 8  ;;  %v7924_v41 = vadd.f32 %v8650_v11, %v7828_v45  ;;  %v7958_v20 = vmax.f32 %v7926_v13, 0.0  ;;  %v8670_v45 = vunpack.c.h.bf16 %v8697_v46 }
 0x435   : > { %v8814_v62 = vpop.f32.mrf.mxu1  ;;  %v7956_v49 = vmax.f32 %v7924_v41, 0.0 }
 0x436   : > { %v7794_v9 = vmul.f32 %v8814_v62, %v13040_v15 }
 0x437   : > { %7987 = vxpose.xlu0.b32.cont [13/16] (narrow) %v7955_v51, 8  ;;  %v7706_v48 = vpop.f32.mrf.mxu1 }
 0x438   : > { %v7792_v35 = vmul.f32 %v13040_v15, %v7706_v48  ;;  %v7833_v54 = vadd.f32 %v13047_v52, %v7794_v9  ;;  %v8674_v9 = vunpack.c.h.bf16 %v8698_v38 }
 0x439   : > { %v8815_v12 = vpop.f32.mrf.mxu1 }
 0x43a   : > { %v7831_v32 = vadd.f32 %v13047_v52, %v7792_v35  ;;  %v7795_v31 = vmul.f32 %v8815_v12, %v13040_v15  ;;  %v7929_v2 = vadd.f32 %v8661_v7, %v7833_v54 }
 0x43b   : > { %7988 = vxpose.xlu0.b32.cont [14/16] (narrow) %v7956_v49, 8  ;;  %v7709_v59 = vpop.f32.mrf.mxu1 }
 0x43c   : > { %v7793_v0 = vmul.f32 %v13040_v15, %v7709_v59  ;;  %v7927_v28 = vadd.f32 %v8657_v30, %v7831_v32  ;;  %v7834_v42 = vadd.f32 %v13047_v52, %v7795_v31  ;;  %v7961_v37 = vmax.f32 %v7929_v2, 0.0  ;;  %v8699_v30 = vld [vmem:[%s9207_s17 + $0x68] sm:$0xff]  }
 0x43d   : > { %v8677_v32 = vunpack.c.l.bf16 %v8699_v30  ;;  %v8678_v54 = vunpack.c.h.bf16 %v8699_v30 }
 0x43e   : > { %v7832_v43 = vadd.f32 %v13047_v52, %v7793_v0  ;;  %v7959_v53 = vmax.f32 %v7927_v28, 0.0  ;;  %v7930_v33 = vadd.f32 %v8662_v56, %v7834_v42 }
 0x43f   : > { %7989 = vxpose.xlu0.b32.cont [15/16] (narrow) %v7957_v34, 8 }
 0x440   : > { %8007 = vxpose.xlu1.b32.start [1/16] (narrow) %v7959_v53, 8  ;;  %v7928_v50 = vadd.f32 %v8658_v58, %v7832_v43  ;;  %v7962_v1 = vmax.f32 %v7930_v33, 0.0 }
 0x442   : > { %v7960_v3 = vmax.f32 %v7928_v50, 0.0 }
 0x443   : > { %7990 = vxpose.xlu0.b32.end [16/16] (narrow) %v7958_v20, 8  ;;  %v8700_v20 = vld [vmem:[%s9207_s17 + $0x70] sm:$0xff]  }
 0x444   : > { %8008 = vxpose.xlu1.b32.cont [2/16] (narrow) %v7960_v3, 8  ;;  %v8681_v2 = vunpack.c.l.bf16 %v8700_v20 }
 0x448   : > { %8009 = vxpose.xlu1.b32.cont [3/16] (narrow) %v7961_v37, 8 }
 0x44c   : > { %8010 = vxpose.xlu1.b32.cont [4/16] (narrow) %v7962_v1, 8  ;;  %v8701_v1 = vld [vmem:[%s9207_s17 + $0x78] sm:$0xff]   ;;  %s8056_s17 = sshll.u32 %s13135_s29, 4  ;;  %s13154_s17 = int_to_ptr.vmem [resolvable:$true] %s8056_s17 }
 0x44d   : > { %s9004_s15 = scalar_lea.vmem %s13154_s17, 256  ;;  %p9011_p0 = scmp.lt.s32.totalorder %s13154_s17, %s9009_s28 }
 0x44e   : > { %p9005_p11 = scmp.ne.s32.totalorder %s13154_s17, %s9004_s15  ;;  %p9012_p1 = scmp.lt.s32.totalorder %s9010_s19, %s9004_s15 }
 0x450   : > { %p9006_p12 = pnand %p9005_p11, %p9154_p5  ;;  %p9013_p2 = por %p9012_p1, %p9011_p0 }
 0x452   : > { %p9007_p13 = pneg %p9006_p12 }
 0x454   : > { %p9014_p3 = pnand %p9013_p2, %p9007_p13 }
 0x455   : > { %v8818_v39 = vpop.f32.mrf.mxu1 }
 0x456   : > { %v7798_v27 = vmul.f32 %v8818_v39, %v13040_v15 }
 0x457   : > { %v7722_v60 = vpop.f32.mrf.mxu1 }
 0x458   : > { %v7796_v47 = vmul.f32 %v13040_v15, %v7722_v60  ;;  %v7837_v4 = vadd.f32 %v13047_v52, %v7798_v27 }
 0x459   : > { %v8819_v14 = vpop.f32.mrf.mxu1 }
 0x45a   : > { %v7835_v8 = vadd.f32 %v13047_v52, %v7796_v47  ;;  %v7799_v36 = vmul.f32 %v8819_v14, %v13040_v15  ;;  %v7933_v44 = vadd.f32 %v8669_v10, %v7837_v4  ;;  %v8682_v47 = vunpack.c.h.bf16 %v8700_v20 }
 0x45b   : > { %v7725_v17 = vpop.f32.mrf.mxu1  ;;  %v8686_v10 = vunpack.c.h.bf16 %v8701_v1 }
 0x45c   : > { %v7797_v55 = vmul.f32 %v13040_v15, %v7725_v17  ;;  %v7931_v19 = vadd.f32 %v8665_v26, %v7835_v8  ;;  %v7838_v11 = vadd.f32 %v13047_v52, %v7799_v36  ;;  %v7965_v29 = vmax.f32 %v7933_v44, 0.0 }
 0x45d   : > { %v8685_v26 = vunpack.c.l.bf16 %v8701_v1 }
 0x45e   : > { %v7836_v21 = vadd.f32 %v13047_v52, %v7797_v55  ;;  %v7963_v61 = vmax.f32 %v7931_v19, 0.0  ;;  %v7934_v51 = vadd.f32 %v8670_v45, %v7838_v11 }
 0x460   : > { %8011 = vxpose.xlu1.b32.cont [5/16] (narrow) %v7963_v61, 8  ;;  %v7932_v63 = vadd.f32 %v8666_v16, %v7836_v21  ;;  %v7966_v41 = vmax.f32 %v7934_v51, 0.0 }
 0x462   : > { %v7964_v25 = vmax.f32 %v7932_v63, 0.0 }
 0x464   : > { %8012 = vxpose.xlu1.b32.cont [6/16] (narrow) %v7964_v25, 8 }
 0x468   : > { %8013 = vxpose.xlu1.b32.cont [7/16] (narrow) %v7965_v29, 8 }
 0x46c   : > { %8014 = vxpose.xlu1.b32.cont [8/16] (narrow) %v7966_v41, 8 }
 0x47e   : > { %v8822_v5 = vpop.f32.mrf.mxu1 }
 0x47f   : > { %v7802_v48 = vmul.f32 %v8822_v5, %v13040_v15 }
 0x480   : > { %v7738_v62 = vpop.f32.mrf.mxu1 }
 0x481   : > { %v7800_v6 = vmul.f32 %v13040_v15, %v7738_v62  ;;  %v7841_v24 = vadd.f32 %v13047_v52, %v7802_v48 }
 0x482   : > { %v8823_v49 = vpop.f32.mrf.mxu1 }
 0x483   : > { %v7839_v35 = vadd.f32 %v13047_v52, %v7800_v6  ;;  %v7991_v23 = vpop.trf.xlu0  ;;  %v7803_v59 = vmul.f32 %v8823_v49, %v13040_v15  ;;  %v7937_v7 = vadd.f32 %v8677_v32, %v7841_v24 }
 0x484   : > { %v7741_v18 = vpop.f32.mrf.mxu1  ;;  %8039 = vst [vmem:[%s13135_s29] sm:$0xff] %v7991_v23 }
 0x485   : > { %v7801_v12 = vmul.f32 %v13040_v15, %v7741_v18  ;;  %v7935_v22 = vadd.f32 %v8673_v57, %v7839_v35  ;;  %v7842_v34 = vadd.f32 %v13047_v52, %v7803_v59  ;;  %v7969_v31 = vmax.f32 %v7937_v7, 0.0 }
 0x487   : > { %v7840_v0 = vadd.f32 %v13047_v52, %v7801_v12  ;;  %v7967_v28 = vmax.f32 %v7935_v22, 0.0  ;;  %v7938_v43 = vadd.f32 %v8678_v54, %v7842_v34 }
 0x489   : > { %8015 = vxpose.xlu1.b32.cont [9/16] (narrow) %v7967_v28, 8  ;;  %v7936_v58 = vadd.f32 %v8674_v9, %v7840_v0  ;;  %v7970_v53 = vmax.f32 %v7938_v43, 0.0 }
 0x48b   : > { %v7968_v13 = vmax.f32 %v7936_v58, 0.0 }
 0x48d   : > { %8016 = vxpose.xlu1.b32.cont [10/16] (narrow) %v7968_v13, 8 }
 0x491   : > { %8017 = vxpose.xlu1.b32.cont [11/16] (narrow) %v7969_v31, 8 }
 0x495   : > { %8018 = vxpose.xlu1.b32.cont [12/16] (narrow) %v7970_v53, 8 }
 0x4ad   : > { %v8826_v50 = vpop.f32.mrf.mxu1 }
 0x4ae   : > { %v7806_v37 = vmul.f32 %v8826_v50, %v13040_v15 }
 0x4af   : > { %v7754_v42 = vpop.f32.mrf.mxu1 }
 0x4b0   : > { %v7804_v3 = vmul.f32 %v13040_v15, %v7754_v42  ;;  %v7845_v14 = vadd.f32 %v13047_v52, %v7806_v37 }
 0x4b1   : > { %v8827_v56 = vpop.f32.mrf.mxu1 }
 0x4b2   : > { %v7843_v33 = vadd.f32 %v13047_v52, %v7804_v3  ;;  %v7807_v27 = vmul.f32 %v8827_v56, %v13040_v15  ;;  %v7941_v16 = vadd.f32 %v8685_v26, %v7845_v14 }
 0x4b3   : > { %v7757_v39 = vpop.f32.mrf.mxu1 }
 0x4b4   : > { %v7805_v40 = vmul.f32 %v13040_v15, %v7757_v39  ;;  %v7939_v60 = vadd.f32 %v8681_v2, %v7843_v33  ;;  %v7846_v55 = vadd.f32 %v13047_v52, %v7807_v27  ;;  %v7973_v4 = vmax.f32 %v7941_v16, 0.0 }
 0x4b6   : > { %v7844_v8 = vadd.f32 %v13047_v52, %v7805_v40  ;;  %v7971_v46 = vmax.f32 %v7939_v60, 0.0  ;;  %v7942_v36 = vadd.f32 %v8686_v10, %v7846_v55 }
 0x4b8   : > { %8019 = vxpose.xlu1.b32.cont [13/16] (narrow) %v7971_v46, 8  ;;  %v7940_v17 = vadd.f32 %v8682_v47, %v7844_v8  ;;  %v7974_v21 = vmax.f32 %v7942_v36, 0.0 }
 0x4ba   : > { %v7972_v19 = vmax.f32 %v7940_v17, 0.0 }
 0x4bc   : > { %8020 = vxpose.xlu1.b32.cont [14/16] (narrow) %v7972_v19, 8 }
 0x4c0   : > { %8021 = vxpose.xlu1.b32.cont [15/16] (narrow) %v7973_v4, 8 }
 0x4c4   : > { %8022 = vxpose.xlu1.b32.end [16/16] (narrow) %v7974_v21, 8 }
 0x504   : > { %v8023_v15 = vpop.trf.xlu1 }
 0x505   : > { %8040 = vst [vmem:[%s13135_s29 + $0x8] sm:$0xff] %v8023_v15 }
 0x506   : > { %9017 = shalt.err (!%p9014_p3)
}
 0x507   : > { %s9018_s20 = scalar_lea.hbm %s8054_s13, 256  ;;  %s9022_s23 = scalar_lea.hbm %s13202_s7, 512 }
 0x508   : > { %p9019_p4 = scmp.ne.s32.totalorder %s8054_s13, %s9018_s20  ;;  %p9023_p9 = scmp.lt.s32.totalorder %s8054_s13, %s13202_s7 }
 0x509   : > { %p9024_p10 = scmp.lt.s32.totalorder %s9022_s23, %s9018_s20 }
 0x50a   : > { %p9020_p7 = pnand %p9019_p4, %p9154_p5 }
 0x50b   : > { %p9025_p11 = por %p9024_p10, %p9023_p9 }
 0x50c   : > { %p9021_p8 = pneg %p9020_p7 }
 0x50e   : > { %p9026_p12 = pnand %p9025_p11, %p9021_p8 }
 0x510   : > { %9029 = shalt.err (!%p9026_p12)
}
 0x511   : > { %8830 = dma.vmem_to_hbm [thread:$0]  (%p9154_p5), %s13154_s17, 256, %s8054_s13, %s8042_s14  }
 0x512 PF: > { %p8836_p13 = scmp.ge.s32.totalorder %s9064_s27, 2  ;;  %s8068_s16 = sand.u32 1, %s9052_s24  }
 0x513   : > { %s8069_s9 = scalar_lea.sflag [#allocation5], %s8068_s16 }
 0x514   : > { %p8833_p0 = pnand %p8836_p13, %p9158_p6 }
 0x516   : > { %p8834_p1 = pneg %p8833_p0 }
 0x518   : > { %9047 = dma.done.wait (%p8834_p1), %s8069_s9, 256  }
 0x519   : > { %9049 = vsyncadd (%p8834_p1), %s8069_s9, 4294967040  ;;  %p17_p2 = scmp.ge.s32.totalorder %s9141_s30, 4   ;;  %s13297_s24 = smov %s9056_s25 }
 0x51a   : > { %s13298_s25 = smov %s9060_s26  ;;  %s13299_s26 = smov %s9152_s10 }
 0x51b   : > { %s13300_s27 = smov %s9141_s30  ;;  %19 = sbr.rel (!%p17_p2) target bundleno = 3 (0x3), region = 89 }
 0x520   :  { %8074 = vsyncpa [#allocation5], 1 }
 0x521   :  { %8076 = vsyncpa [#allocation5 + $0x1], 1 }

</bundles_post_ra>
